<compile_context>
chip_gen: v5e
topology: v5e:2x2
jax: 0.10.0
libtpu: 0.0.40
codegen_flags: <defaults>
</compile_context>

<pallas_src>
import functools

import jax
import jax.numpy as jnp
from jax import lax
from jax.experimental import pallas as pl
from jax.experimental.pallas import tpu as pltpu

DTYPE = jnp.float32


# ------------------------------------------------------------------ math utils
def _atan_poly(x):
    """Cephes-style atanf for x >= 0, elementwise VPU/EUP ops only."""
    tan3pi8 = 2.414213562373095
    tanpi8 = 0.4142135623730951
    big = x > tan3pi8
    mid = jnp.logical_and(x > tanpi8, jnp.logical_not(big))
    inv_x = pl.reciprocal(x, approx=True)          # only used where big (x > 2.41)
    inv_xp1 = pl.reciprocal(x + 1.0, approx=True)  # x + 1 >= 1, safe
    xr = jnp.where(big, -inv_x, jnp.where(mid, (x - 1.0) * inv_xp1, x))
    y0 = jnp.where(big, jnp.pi / 2, jnp.where(mid, jnp.pi / 4, 0.0))
    z = xr * xr
    p = ((((8.05374449538e-2 * z - 1.38776856032e-1) * z + 1.99777106478e-1) * z
          - 3.33329491539e-1) * z * xr + xr)
    return y0 + p


def _atan2_ypos(y, x):
    """atan2(y, x) for strictly positive y (true for the RDT argument when k1 > 0)."""
    t = x * pl.reciprocal(y, approx=True)   # y > 0 strictly
    at = _atan_poly(jnp.abs(t))
    at = jnp.where(t < 0.0, -at, at)
    return jnp.pi / 2 - at


# ------------------------------------------------------------------ the kernel
def _ops_kernel(params_ref, k1_ref, k1inv_ref, k2_ref, k3_ref, w_ref, o_ref, *, tk1):
    # params (SMEM): [c_beta = |G||T|^(-2/3),  c_E = |S||T|^4,  th2 = |T|^2]
    c_beta = params_ref[0]
    c_E = params_ref[1]
    th2 = params_ref[2]
    base = pl.program_id(0) * tk1

    k2 = k2_ref[...]            # (R, 128) lane-dense, padded with 0
    k3 = k3_ref[...]            # (R, 128)
    w = w_ref[...]              # (R, 128) trapezoid weights (0 in the padding)

    # k1-independent invariants (hoisted out of the per-k1 loop)
    k2sq = k2 * k2
    k23sq = k2sq + k3 * k3

    lane = lax.broadcasted_iota(jnp.int32, (1, 8), 1)

    for j in range(tk1):                         # static unroll over the k1 chunk
        k1 = k1_ref[base + j]                    # scalar (SMEM)
        inv_k1 = k1inv_ref[base + j]             # 1/k1 precomputed host-side
        k1sq = k1 * k1

        kk = k1sq + k23sq
        s = k1sq + k2sq

        # EddyLifetime 'TwoThird':  beta = |G| (|T| |k|)^(-2/3) = c_beta * kk^(-1/3)
        beta = c_beta * jnp.exp(jnp.log(kk) * (-1.0 / 3.0))
        bk1 = beta * k1
        k30 = k3 + bk1
        kk0 = s + k30 * k30

        # EnergySpectrum:  E0 = c_E * kk0^2 * (1 + th2*kk0)^(-17/6)   (no sqrt, no pow)
        E0 = c_E * (kk0 * kk0) * jnp.exp(jnp.log(1.0 + th2 * kk0) * (-17.0 / 6.0))

        # consolidated reciprocals (exact where they set the Phi magnitude)
        inv_kk = pl.reciprocal(kk)
        inv_kk0 = pl.reciprocal(kk0)
        rs = lax.rsqrt(s)
        sqrt_s = s * rs
        inv_s = rs * rs
        inv_s32 = rs * inv_s                    # 1 / sqrt(s^3)

        # PowerSpectraRDT
        C1 = (beta * k1sq) * (kk0 - 2.0 * k30 * k30 + bk1 * k30) * (inv_kk * inv_s)
        C2 = k2 * kk0 * inv_s32 * _atan2_ypos(bk1 * sqrt_s, kk0 - k30 * bk1)
        r = k2 * inv_k1
        zeta1 = C1 - r * C2
        zeta2 = C1 * r + C2

        # weights + shared denominators folded into 3 prefactors
        Ew = E0 * w
        A = Ew * (inv_kk0 * inv_kk0)
        B = Ew * (inv_kk * inv_kk0)
        C = Ew * (inv_kk * inv_kk)

        p11 = A * (kk0 - k1sq - 2.0 * k1 * (k30 * zeta1) + s * (zeta1 * zeta1))
        p22 = A * (kk0 - k2sq - 2.0 * (k2 * k30) * zeta2 + s * (zeta2 * zeta2))
        p33 = C * s
        p13 = B * (s * zeta1 - k1 * k30)
        p12 = A * (s * (zeta1 * zeta2) - k1 * k2 - (k1 * k30) * zeta2 - (k2 * k30) * zeta1)
        p23 = B * (s * zeta2 - k2 * k30)

        def quad(pw):
            # trapz over k3 then k2 == weighted full reduction (weights already in pw)
            t = jnp.sum(pw, axis=1, keepdims=True)          # (R, 1)
            return k1 * jnp.sum(t, axis=0, keepdims=True)   # (1, 1)

        vals = (quad(p11), quad(p22), quad(p33), quad(p13), quad(p12), quad(p23))
        row = jnp.zeros((1, 8), DTYPE)
        for c_idx, v in enumerate(vals):
            row = jnp.where(lane == c_idx, v, row)
        o_ref[pl.ds(j, 1), :] = row
    # TODO(synk): torch also stores self.div (divergence diagnostic); it is not part
    # of the returned kF, so it is not computed here.


# ------------------------------------------------------------------ glue (JAX)
def _trapz_weights(x):
    dx = jnp.diff(x)
    w = jnp.zeros_like(x)
    w = w.at[:-1].add(0.5 * dx)
    w = w.at[1:].add(0.5 * dx)
    return w


def _pack_fields(grid_k2, grid_k3):
    """Flatten the (N2, N3) quadrature plane into a lane-dense (R, 128) layout."""
    n2, n3 = grid_k2.shape[0], grid_k3.shape[0]
    K2 = jnp.broadcast_to(grid_k2[:, None], (n2, n3)).astype(DTYPE).reshape(-1)
    K3 = jnp.broadcast_to(grid_k3[None, :], (n2, n3)).astype(DTYPE).reshape(-1)
    W = (_trapz_weights(grid_k2)[:, None]
         * _trapz_weights(grid_k3)[None, :]).astype(DTYPE).reshape(-1)
    total = n2 * n3
    lanes = 128
    rows = -(-total // lanes)
    rows = -(-rows // 8) * 8                      # multiple of 8 sublanes
    pad = rows * lanes - total
    K2f = jnp.pad(K2, (0, pad)).reshape(rows, lanes)
    K3f = jnp.pad(K3, (0, pad)).reshape(rows, lanes)
    Wf = jnp.pad(W, (0, pad)).reshape(rows, lanes)   # W=0 in the padding
    return K2f, K3f, Wf


def make_grid(n_half=16):
    # mirrors NET_OnePointSpectra.init_grids (torch uses n_half=100 -> 201 points)
    grid_plus = jnp.logspace(-8.0, 0.0, n_half, dtype=DTYPE) * 1.0e4
    grid_minus = -grid_plus[::-1]
    grid_zero = jnp.zeros((1,), dtype=DTYPE)
    return jnp.concatenate([grid_minus, grid_zero, grid_plus])


def net_one_point_spectra(k1_input, grid_k2, grid_k3, theta, scale, gamma, tk1=8):
    k1_input = jnp.asarray(k1_input, DTYPE)
    n1 = k1_input.shape[0]
    n1p = -(-n1 // tk1) * tk1
    if n1p > n1:
        # pad with a harmless positive value; rows are discarded below
        k1_pad = jnp.concatenate([k1_input, jnp.full((n1p - n1,), 1.0, DTYPE)])
    else:
        k1_pad = k1_input
    k1inv_pad = 1.0 / k1_pad

    K2f, K3f, Wf = _pack_fields(jnp.asarray(grid_k2, DTYPE), jnp.asarray(grid_k3, DTYPE))
    R, L = K2f.shape

    # hoisted scalar constants (|Theta|, |Scale|, |Gamma| as in init_nets/EddyLifetime)
    theta_a = jnp.abs(jnp.asarray(theta, DTYPE))
    scale_a = jnp.abs(jnp.asarray(scale, DTYPE))
    gamma_a = jnp.abs(jnp.asarray(gamma, DTYPE))
    c_beta = gamma_a * theta_a ** (-2.0 / 3.0)
    c_E = scale_a * theta_a ** 4
    th2 = theta_a * theta_a
    params = jnp.stack([c_beta, c_E, th2]).astype(DTYPE)

    field_spec = pl.BlockSpec((R, L), lambda c: (0, 0))        # resident in VMEM
    out_spec = pl.BlockSpec((tk1, 8), lambda c: (c, 0))        # one block per chunk

    out = pl.pallas_call(
        functools.partial(_ops_kernel, tk1=tk1),
        grid=(n1p // tk1,),
        in_specs=[
            pl.BlockSpec(memory_space=pltpu.MemorySpace.SMEM),  # params
            pl.BlockSpec(memory_space=pltpu.MemorySpace.SMEM),  # k1 values
            pl.BlockSpec(memory_space=pltpu.MemorySpace.SMEM),  # 1/k1 values
            field_spec, field_spec, field_spec,                 # K2, K3, W (flattened)
        ],
        out_specs=out_spec,
        out_shape=jax.ShapeDtypeStruct((n1p, 8), DTYPE),
        compiler_params=pltpu.CompilerParams(dimension_semantics=("parallel",)),
    )(params, k1_pad, k1inv_pad, K2f, K3f, Wf)

    # columns: [Phi11, Phi22, Phi33, Phi13, Phi12, Phi23] -> (6, N1)
    kF = out[:n1, :6].T
    return kF


# ------------------------------------------------------------------ pure-JAX ref
def reference_kF(k1_input, grid_k2, grid_k3, theta, scale, gamma):
    theta, scale, gamma = abs(theta), abs(scale), abs(gamma)
    k1_input = k1_input.astype(DTYPE)
    grid_k2 = grid_k2.astype(DTYPE)
    grid_k3 = grid_k3.astype(DTYPE)
    k1 = k1_input[:, None, None]
    k2 = grid_k2[None, :, None]
    k3 = grid_k3[None, None, :]
    kk = k1 ** 2 + k2 ** 2 + k3 ** 2
    kL = theta * jnp.sqrt(kk)
    beta = gamma * kL ** (-2.0 / 3.0)
    k30 = k3 + beta * k1
    kk0 = k1 ** 2 + k2 ** 2 + k30 ** 2
    k0L = theta * jnp.sqrt(kk0)
    E0 = scale * k0L ** 4 / (1.0 + k0L ** 2) ** (17.0 / 6.0)
    s = k1 ** 2 + k2 ** 2
    C1 = beta * k1 ** 2 * (kk0 - 2.0 * k30 ** 2 + beta * k1 * k30) / (kk * s)
    C2 = k2 * kk0 / jnp.sqrt(s ** 3) * jnp.arctan2(beta * k1 * jnp.sqrt(s),
                                                   kk0 - k30 * k1 * beta)
    zeta1 = C1 - k2 / k1 * C2
    zeta2 = C1 * k2 / k1 + C2
    Phi11 = E0 / kk0 ** 2 * (kk0 - k1 ** 2 - 2 * k1 * k30 * zeta1 + s * zeta1 ** 2)
    Phi22 = E0 / kk0 ** 2 * (kk0 - k2 ** 2 - 2 * k2 * k30 * zeta2 + s * zeta2 ** 2)
    Phi33 = E0 / kk ** 2 * s
    Phi13 = E0 / (kk * kk0) * (-k1 * k30 + s * zeta1)
    Phi12 = E0 / kk0 ** 2 * (-k1 * k2 - k1 * k30 * zeta2 - k2 * k30 * zeta1 + s * zeta1 * zeta2)
    Phi23 = E0 / (kk * kk0) * (-k2 * k30 + s * zeta2)

    def trapz_last(y, x):
        dx = x[1:] - x[:-1]
        return jnp.sum(0.5 * dx * (y[..., 1:] + y[..., :-1]), axis=-1)

    kF = []
    for Phi in (Phi11, Phi22, Phi33, Phi13, Phi12, Phi23):
        i3 = trapz_last(Phi, grid_k3)     # (N1, N2)
        i2 = trapz_last(i3, grid_k2)      # (N1,)
        kF.append(k1_input * i2)
    return jnp.stack(kF)


# ------------------------------------------------------------------ main
if __name__ == "__main__":
    key = jax.random.PRNGKey(0)
    n1 = 8
    k1_input = jnp.sort(jax.random.uniform(key, (n1,), minval=0.1, maxval=10.0,
                                           dtype=jnp.float32))
    grid_k2 = make_grid(16)   # 33 points (small version of torch's 201)
    grid_k3 = make_grid(16)
    # nn.Parameter inits in init_nets(): Theta = Scale = Gamma = 1.0
    theta, scale, gamma = 1.0, 1.0, 1.0

    kF = net_one_point_spectra(k1_input, grid_k2, grid_k3, theta, scale, gamma)
    kF = jax.block_until_ready(kF)

    ref = reference_kF(k1_input, grid_k2, grid_k3, theta, scale, gamma)
    assert kF.shape == (6, n1)
    assert bool(jnp.isfinite(kF).all()), "non-finite kernel output"
    err = float(jnp.max(jnp.abs(kF - ref)))
    # slightly loosened vs 1e-3: the atan2 path now uses hardware approx reciprocals
    tol = float(2e-3 * (jnp.max(jnp.abs(ref)) + 1e-8))
    assert err <= tol, f"kernel/ref mismatch: err={err} tol={tol}"
    print("KERNEL_OK")
</pallas_src>

<mosaic_0001>
module attributes {stable_mosaic.version = 11 : i64} {
  func.func @_ops_kernel(%arg0: i32, %arg1: memref<3xf32, #tpu.memory_space<smem>>, %arg2: memref<8xf32, #tpu.memory_space<smem>>, %arg3: memref<8xf32, #tpu.memory_space<smem>>, %arg4: memref<16x128xf32, #tpu.memory_space<vmem>>, %arg5: memref<16x128xf32, #tpu.memory_space<vmem>>, %arg6: memref<16x128xf32, #tpu.memory_space<vmem>>, %arg7: memref<8x8xf32, #tpu.memory_space<vmem>>) attributes {dimension_semantics = [#tpu.dimension_semantics<parallel>], iteration_bounds = array<i64: 1>, scalar_prefetch = 0 : i64, scratch_operands = 0 : i64, tpu.core_type = #tpu.core_type<tc>, window_params = [{transform_indices = @transform_0, window_bounds = array<i64: 3>}, {transform_indices = @transform_1, window_bounds = array<i64: 8>}, {transform_indices = @transform_2, window_bounds = array<i64: 8>}, {pipeline_mode = #tpu.pipeline_mode<synchronous>, transform_indices = @transform_3, window_bounds = array<i64: 16, 128>}, {pipeline_mode = #tpu.pipeline_mode<synchronous>, transform_indices = @transform_4, window_bounds = array<i64: 16, 128>}, {pipeline_mode = #tpu.pipeline_mode<synchronous>, transform_indices = @transform_5, window_bounds = array<i64: 16, 128>}, {transform_indices = @transform_6, window_bounds = array<i64: 8, 8>}]} {
    %c0 = arith.constant 0 : index
    %0 = memref.load %arg1[%c0] : memref<3xf32, #tpu.memory_space<smem>>
    %c1 = arith.constant 1 : index
    %1 = memref.load %arg1[%c1] : memref<3xf32, #tpu.memory_space<smem>>
    %c2 = arith.constant 2 : index
    %2 = memref.load %arg1[%c2] : memref<3xf32, #tpu.memory_space<smem>>
    %c8_i32 = arith.constant 8 : i32
    %3 = arith.muli %arg0, %c8_i32 : i32
    %c0_0 = arith.constant 0 : index
    %c0_1 = arith.constant 0 : index
    %4 = vector.load %arg4[%c0_0, %c0_1] : memref<16x128xf32, #tpu.memory_space<vmem>>, vector<16x128xf32>
    %c0_2 = arith.constant 0 : index
    %c0_3 = arith.constant 0 : index
    %5 = vector.load %arg5[%c0_2, %c0_3] : memref<16x128xf32, #tpu.memory_space<vmem>>, vector<16x128xf32>
    %c0_4 = arith.constant 0 : index
    %c0_5 = arith.constant 0 : index
    %6 = vector.load %arg6[%c0_4, %c0_5] : memref<16x128xf32, #tpu.memory_space<vmem>>, vector<16x128xf32>
    %7 = arith.mulf %4, %4 : vector<16x128xf32>
    %8 = arith.mulf %5, %5 : vector<16x128xf32>
    %9 = arith.addf %7, %8 : vector<16x128xf32>
    %10 = tpu.iota {dimensions = array<i32: 1>} : vector<1x8xi32>
    %c0_i32 = arith.constant 0 : i32
    %11 = arith.addi %3, %c0_i32 : i32
    %12 = arith.index_cast %11 : i32 to index
    %13 = memref.load %arg2[%12] : memref<8xf32, #tpu.memory_space<smem>>
    %c0_i32_6 = arith.constant 0 : i32
    %14 = arith.addi %3, %c0_i32_6 : i32
    %15 = arith.index_cast %14 : i32 to index
    %16 = memref.load %arg3[%15] : memref<8xf32, #tpu.memory_space<smem>>
    %17 = arith.mulf %13, %13 : f32
    %18 = vector.broadcast %17 : f32 to vector<16x128xf32>
    %19 = arith.addf %18, %9 : vector<16x128xf32>
    %20 = vector.broadcast %17 : f32 to vector<16x128xf32>
    %21 = arith.addf %20, %7 : vector<16x128xf32>
    %22 = math.log %19 : vector<16x128xf32>
    %cst = arith.constant -0.333333343 : f32
    %23 = vector.broadcast %cst : f32 to vector<16x128xf32>
    %24 = arith.mulf %22, %23 : vector<16x128xf32>
    %25 = math.exp %24 : vector<16x128xf32>
    %26 = vector.broadcast %0 : f32 to vector<16x128xf32>
    %27 = arith.mulf %26, %25 : vector<16x128xf32>
    %28 = vector.broadcast %13 : f32 to vector<16x128xf32>
    %29 = arith.mulf %27, %28 : vector<16x128xf32>
    %30 = arith.addf %5, %29 : vector<16x128xf32>
    %31 = arith.mulf %30, %30 : vector<16x128xf32>
    %32 = arith.addf %21, %31 : vector<16x128xf32>
    %33 = arith.mulf %32, %32 : vector<16x128xf32>
    %34 = vector.broadcast %1 : f32 to vector<16x128xf32>
    %35 = arith.mulf %34, %33 : vector<16x128xf32>
    %36 = vector.broadcast %2 : f32 to vector<16x128xf32>
    %37 = arith.mulf %36, %32 : vector<16x128xf32>
    %cst_7 = arith.constant 1.000000e+00 : f32
    %38 = vector.broadcast %cst_7 : f32 to vector<16x128xf32>
    %39 = arith.addf %38, %37 : vector<16x128xf32>
    %40 = math.log %39 : vector<16x128xf32>
    %cst_8 = arith.constant -2.83333325 : f32
    %41 = vector.broadcast %cst_8 : f32 to vector<16x128xf32>
    %42 = arith.mulf %40, %41 : vector<16x128xf32>
    %43 = math.exp %42 : vector<16x128xf32>
    %44 = arith.mulf %35, %43 : vector<16x128xf32>
    %45 = tpu.reciprocal %19 : vector<16x128xf32> -> vector<16x128xf32>
    %46 = tpu.reciprocal %32 : vector<16x128xf32> -> vector<16x128xf32>
    %47 = math.rsqrt %21 : vector<16x128xf32>
    %48 = arith.mulf %21, %47 : vector<16x128xf32>
    %49 = arith.mulf %47, %47 : vector<16x128xf32>
    %50 = arith.mulf %47, %49 : vector<16x128xf32>
    %51 = vector.broadcast %17 : f32 to vector<16x128xf32>
    %52 = arith.mulf %27, %51 : vector<16x128xf32>
    %cst_9 = arith.constant 2.000000e+00 : f32
    %53 = vector.broadcast %cst_9 : f32 to vector<16x128xf32>
    %54 = arith.mulf %53, %30 : vector<16x128xf32>
    %55 = arith.mulf %54, %30 : vector<16x128xf32>
    %56 = arith.subf %32, %55 : vector<16x128xf32>
    %57 = arith.mulf %29, %30 : vector<16x128xf32>
    %58 = arith.addf %56, %57 : vector<16x128xf32>
    %59 = arith.mulf %52, %58 : vector<16x128xf32>
    %60 = arith.mulf %45, %49 : vector<16x128xf32>
    %61 = arith.mulf %59, %60 : vector<16x128xf32>
    %62 = arith.mulf %4, %32 : vector<16x128xf32>
    %63 = arith.mulf %62, %50 : vector<16x128xf32>
    %64 = arith.mulf %29, %48 : vector<16x128xf32>
    %65 = arith.mulf %30, %29 : vector<16x128xf32>
    %66 = arith.subf %32, %65 : vector<16x128xf32>
    %67 = tpu.reciprocal %64 {approx = true} : vector<16x128xf32> -> vector<16x128xf32>
    %68 = arith.mulf %66, %67 : vector<16x128xf32>
    %69 = math.absf %68 : vector<16x128xf32>
    %cst_10 = arith.constant 2.41421366 : f32
    %70 = vector.broadcast %cst_10 : f32 to vector<16x128xf32>
    %71 = arith.cmpf ogt, %69, %70 : vector<16x128xf32>
    %cst_11 = arith.constant 0.414213568 : f32
    %72 = vector.broadcast %cst_11 : f32 to vector<16x128xf32>
    %73 = arith.cmpf ogt, %69, %72 : vector<16x128xf32>
    %cst_12 = arith.constant dense<true> : vector<16x128xi1>
    %74 = arith.xori %71, %cst_12 : vector<16x128xi1>
    %75 = arith.andi %73, %74 : vector<16x128xi1>
    %76 = tpu.reciprocal %69 {approx = true} : vector<16x128xf32> -> vector<16x128xf32>
    %cst_13 = arith.constant 1.000000e+00 : f32
    %77 = vector.broadcast %cst_13 : f32 to vector<16x128xf32>
    %78 = arith.addf %69, %77 : vector<16x128xf32>
    %79 = tpu.reciprocal %78 {approx = true} : vector<16x128xf32> -> vector<16x128xf32>
    %cst_14 = arith.constant 0.000000e+00 : f32
    %80 = vector.broadcast %cst_14 : f32 to vector<16x128xf32>
    %81 = arith.subf %80, %76 : vector<16x128xf32>
    %cst_15 = arith.constant 1.000000e+00 : f32
    %82 = vector.broadcast %cst_15 : f32 to vector<16x128xf32>
    %83 = arith.subf %69, %82 : vector<16x128xf32>
    %84 = arith.mulf %83, %79 : vector<16x128xf32>
    %85 = arith.select %75, %84, %69 : vector<16x128xi1>, vector<16x128xf32>
    %86 = arith.select %71, %81, %85 : vector<16x128xi1>, vector<16x128xf32>
    %cst_16 = arith.constant 0.785398185 : f32
    %cst_17 = arith.constant 0.000000e+00 : f32
    %87 = vector.broadcast %cst_16 : f32 to vector<16x128xf32>
    %88 = vector.broadcast %cst_17 : f32 to vector<16x128xf32>
    %89 = arith.select %75, %87, %88 : vector<16x128xi1>, vector<16x128xf32>
    %cst_18 = arith.constant 1.57079637 : f32
    %90 = vector.broadcast %cst_18 : f32 to vector<16x128xf32>
    %91 = arith.select %71, %90, %89 : vector<16x128xi1>, vector<16x128xf32>
    %92 = arith.mulf %86, %86 : vector<16x128xf32>
    %cst_19 = arith.constant 0.0805374458 : f32
    %93 = vector.broadcast %cst_19 : f32 to vector<16x128xf32>
    %94 = arith.mulf %93, %92 : vector<16x128xf32>
    %cst_20 = arith.constant 0.138776854 : f32
    %95 = vector.broadcast %cst_20 : f32 to vector<16x128xf32>
    %96 = arith.subf %94, %95 : vector<16x128xf32>
    %97 = arith.mulf %96, %92 : vector<16x128xf32>
    %cst_21 = arith.constant 0.199777111 : f32
    %98 = vector.broadcast %cst_21 : f32 to vector<16x128xf32>
    %99 = arith.addf %97, %98 : vector<16x128xf32>
    %100 = arith.mulf %99, %92 : vector<16x128xf32>
    %cst_22 = arith.constant 0.333329499 : f32
    %101 = vector.broadcast %cst_22 : f32 to vector<16x128xf32>
    %102 = arith.subf %100, %101 : vector<16x128xf32>
    %103 = arith.mulf %102, %92 : vector<16x128xf32>
    %104 = arith.mulf %103, %86 : vector<16x128xf32>
    %105 = arith.addf %104, %86 : vector<16x128xf32>
    %106 = arith.addf %91, %105 : vector<16x128xf32>
    %cst_23 = arith.constant 0.000000e+00 : f32
    %107 = vector.broadcast %cst_23 : f32 to vector<16x128xf32>
    %108 = arith.cmpf olt, %68, %107 : vector<16x128xf32>
    %cst_24 = arith.constant 0.000000e+00 : f32
    %109 = vector.broadcast %cst_24 : f32 to vector<16x128xf32>
    %110 = arith.subf %109, %106 : vector<16x128xf32>
    %111 = arith.select %108, %110, %106 : vector<16x128xi1>, vector<16x128xf32>
    %cst_25 = arith.constant 1.57079637 : f32
    %112 = vector.broadcast %cst_25 : f32 to vector<16x128xf32>
    %113 = arith.subf %112, %111 : vector<16x128xf32>
    %114 = arith.mulf %63, %113 : vector<16x128xf32>
    %115 = vector.broadcast %16 : f32 to vector<16x128xf32>
    %116 = arith.mulf %4, %115 : vector<16x128xf32>
    %117 = arith.mulf %116, %114 : vector<16x128xf32>
    %118 = arith.subf %61, %117 : vector<16x128xf32>
    %119 = arith.mulf %61, %116 : vector<16x128xf32>
    %120 = arith.addf %119, %114 : vector<16x128xf32>
    %121 = arith.mulf %44, %6 : vector<16x128xf32>
    %122 = arith.mulf %46, %46 : vector<16x128xf32>
    %123 = arith.mulf %121, %122 : vector<16x128xf32>
    %124 = arith.mulf %45, %46 : vector<16x128xf32>
    %125 = arith.mulf %121, %124 : vector<16x128xf32>
    %126 = arith.mulf %45, %45 : vector<16x128xf32>
    %127 = arith.mulf %121, %126 : vector<16x128xf32>
    %128 = vector.broadcast %17 : f32 to vector<16x128xf32>
    %129 = arith.subf %32, %128 : vector<16x128xf32>
    %cst_26 = arith.constant 2.000000e+00 : f32
    %130 = arith.mulf %cst_26, %13 : f32
    %131 = arith.mulf %30, %118 : vector<16x128xf32>
    %132 = vector.broadcast %130 : f32 to vector<16x128xf32>
    %133 = arith.mulf %132, %131 : vector<16x128xf32>
    %134 = arith.subf %129, %133 : vector<16x128xf32>
    %135 = arith.mulf %118, %118 : vector<16x128xf32>
    %136 = arith.mulf %21, %135 : vector<16x128xf32>
    %137 = arith.addf %134, %136 : vector<16x128xf32>
    %138 = arith.mulf %123, %137 : vector<16x128xf32>
    %139 = arith.subf %32, %7 : vector<16x128xf32>
    %140 = arith.mulf %4, %30 : vector<16x128xf32>
    %cst_27 = arith.constant 2.000000e+00 : f32
    %141 = vector.broadcast %cst_27 : f32 to vector<16x128xf32>
    %142 = arith.mulf %141, %140 : vector<16x128xf32>
    %143 = arith.mulf %142, %120 : vector<16x128xf32>
    %144 = arith.subf %139, %143 : vector<16x128xf32>
    %145 = arith.mulf %120, %120 : vector<16x128xf32>
    %146 = arith.mulf %21, %145 : vector<16x128xf32>
    %147 = arith.addf %144, %146 : vector<16x128xf32>
    %148 = arith.mulf %123, %147 : vector<16x128xf32>
    %149 = arith.mulf %127, %21 : vector<16x128xf32>
    %150 = arith.mulf %21, %118 : vector<16x128xf32>
    %151 = vector.broadcast %13 : f32 to vector<16x128xf32>
    %152 = arith.mulf %151, %30 : vector<16x128xf32>
    %153 = arith.subf %150, %152 : vector<16x128xf32>
    %154 = arith.mulf %125, %153 : vector<16x128xf32>
    %155 = arith.mulf %118, %120 : vector<16x128xf32>
    %156 = arith.mulf %21, %155 : vector<16x128xf32>
    %157 = vector.broadcast %13 : f32 to vector<16x128xf32>
    %158 = arith.mulf %157, %4 : vector<16x128xf32>
    %159 = arith.subf %156, %158 : vector<16x128xf32>
    %160 = vector.broadcast %13 : f32 to vector<16x128xf32>
    %161 = arith.mulf %160, %30 : vector<16x128xf32>
    %162 = arith.mulf %161, %120 : vector<16x128xf32>
    %163 = arith.subf %159, %162 : vector<16x128xf32>
    %164 = arith.mulf %4, %30 : vector<16x128xf32>
    %165 = arith.mulf %164, %118 : vector<16x128xf32>
    %166 = arith.subf %163, %165 : vector<16x128xf32>
    %167 = arith.mulf %123, %166 : vector<16x128xf32>
    %168 = arith.mulf %21, %120 : vector<16x128xf32>
    %169 = arith.mulf %4, %30 : vector<16x128xf32>
    %170 = arith.subf %168, %169 : vector<16x128xf32>
    %171 = arith.mulf %125, %170 : vector<16x128xf32>
    %cst_28 = arith.constant dense<0.000000e+00> : vector<16xf32>
    %172 = vector.multi_reduction <add>, %138, %cst_28 [1] : vector<16x128xf32> to vector<16xf32>
    %173 = vector.shape_cast %172 : vector<16xf32> to vector<16x1xf32>
    %cst_29 = arith.constant dense<0.000000e+00> : vector<1xf32>
    %174 = vector.multi_reduction <add>, %173, %cst_29 [0] : vector<16x1xf32> to vector<1xf32>
    %175 = vector.shape_cast %174 : vector<1xf32> to vector<1x1xf32>
    %176 = vector.broadcast %13 : f32 to vector<1x1xf32>
    %177 = arith.mulf %176, %175 : vector<1x1xf32>
    %cst_30 = arith.constant dense<0.000000e+00> : vector<16xf32>
    %178 = vector.multi_reduction <add>, %148, %cst_30 [1] : vector<16x128xf32> to vector<16xf32>
    %179 = vector.shape_cast %178 : vector<16xf32> to vector<16x1xf32>
    %cst_31 = arith.constant dense<0.000000e+00> : vector<1xf32>
    %180 = vector.multi_reduction <add>, %179, %cst_31 [0] : vector<16x1xf32> to vector<1xf32>
    %181 = vector.shape_cast %180 : vector<1xf32> to vector<1x1xf32>
    %182 = vector.broadcast %13 : f32 to vector<1x1xf32>
    %183 = arith.mulf %182, %181 : vector<1x1xf32>
    %cst_32 = arith.constant dense<0.000000e+00> : vector<16xf32>
    %184 = vector.multi_reduction <add>, %149, %cst_32 [1] : vector<16x128xf32> to vector<16xf32>
    %185 = vector.shape_cast %184 : vector<16xf32> to vector<16x1xf32>
    %cst_33 = arith.constant dense<0.000000e+00> : vector<1xf32>
    %186 = vector.multi_reduction <add>, %185, %cst_33 [0] : vector<16x1xf32> to vector<1xf32>
    %187 = vector.shape_cast %186 : vector<1xf32> to vector<1x1xf32>
    %188 = vector.broadcast %13 : f32 to vector<1x1xf32>
    %189 = arith.mulf %188, %187 : vector<1x1xf32>
    %cst_34 = arith.constant dense<0.000000e+00> : vector<16xf32>
    %190 = vector.multi_reduction <add>, %154, %cst_34 [1] : vector<16x128xf32> to vector<16xf32>
    %191 = vector.shape_cast %190 : vector<16xf32> to vector<16x1xf32>
    %cst_35 = arith.constant dense<0.000000e+00> : vector<1xf32>
    %192 = vector.multi_reduction <add>, %191, %cst_35 [0] : vector<16x1xf32> to vector<1xf32>
    %193 = vector.shape_cast %192 : vector<1xf32> to vector<1x1xf32>
    %194 = vector.broadcast %13 : f32 to vector<1x1xf32>
    %195 = arith.mulf %194, %193 : vector<1x1xf32>
    %cst_36 = arith.constant dense<0.000000e+00> : vector<16xf32>
    %196 = vector.multi_reduction <add>, %167, %cst_36 [1] : vector<16x128xf32> to vector<16xf32>
    %197 = vector.shape_cast %196 : vector<16xf32> to vector<16x1xf32>
    %cst_37 = arith.constant dense<0.000000e+00> : vector<1xf32>
    %198 = vector.multi_reduction <add>, %197, %cst_37 [0] : vector<16x1xf32> to vector<1xf32>
    %199 = vector.shape_cast %198 : vector<1xf32> to vector<1x1xf32>
    %200 = vector.broadcast %13 : f32 to vector<1x1xf32>
    %201 = arith.mulf %200, %199 : vector<1x1xf32>
    %cst_38 = arith.constant dense<0.000000e+00> : vector<16xf32>
    %202 = vector.multi_reduction <add>, %171, %cst_38 [1] : vector<16x128xf32> to vector<16xf32>
    %203 = vector.shape_cast %202 : vector<16xf32> to vector<16x1xf32>
    %cst_39 = arith.constant dense<0.000000e+00> : vector<1xf32>
    %204 = vector.multi_reduction <add>, %203, %cst_39 [0] : vector<16x1xf32> to vector<1xf32>
    %205 = vector.shape_cast %204 : vector<1xf32> to vector<1x1xf32>
    %206 = vector.broadcast %13 : f32 to vector<1x1xf32>
    %207 = arith.mulf %206, %205 : vector<1x1xf32>
    %cst_40 = arith.constant 0.000000e+00 : f32
    %208 = vector.broadcast %cst_40 : f32 to vector<1x8xf32>
    %c0_i32_41 = arith.constant 0 : i32
    %209 = vector.broadcast %c0_i32_41 : i32 to vector<1x8xi32>
    %210 = arith.cmpi eq, %10, %209 : vector<1x8xi32>
    %211 = vector.shape_cast %177 : vector<1x1xf32> to vector<1x1xf32>
    %212 = vector.broadcast %211 : vector<1x1xf32> to vector<1x8xf32>
    %213 = arith.select %210, %212, %208 : vector<1x8xi1>, vector<1x8xf32>
    %c1_i32 = arith.constant 1 : i32
    %214 = vector.broadcast %c1_i32 : i32 to vector<1x8xi32>
    %215 = arith.cmpi eq, %10, %214 : vector<1x8xi32>
    %216 = vector.shape_cast %183 : vector<1x1xf32> to vector<1x1xf32>
    %217 = vector.broadcast %216 : vector<1x1xf32> to vector<1x8xf32>
    %218 = arith.select %215, %217, %213 : vector<1x8xi1>, vector<1x8xf32>
    %c2_i32 = arith.constant 2 : i32
    %219 = vector.broadcast %c2_i32 : i32 to vector<1x8xi32>
    %220 = arith.cmpi eq, %10, %219 : vector<1x8xi32>
    %221 = vector.shape_cast %189 : vector<1x1xf32> to vector<1x1xf32>
    %222 = vector.broadcast %221 : vector<1x1xf32> to vector<1x8xf32>
    %223 = arith.select %220, %222, %218 : vector<1x8xi1>, vector<1x8xf32>
    %c3_i32 = arith.constant 3 : i32
    %224 = vector.broadcast %c3_i32 : i32 to vector<1x8xi32>
    %225 = arith.cmpi eq, %10, %224 : vector<1x8xi32>
    %226 = vector.shape_cast %195 : vector<1x1xf32> to vector<1x1xf32>
    %227 = vector.broadcast %226 : vector<1x1xf32> to vector<1x8xf32>
    %228 = arith.select %225, %227, %223 : vector<1x8xi1>, vector<1x8xf32>
    %c4_i32 = arith.constant 4 : i32
    %229 = vector.broadcast %c4_i32 : i32 to vector<1x8xi32>
    %230 = arith.cmpi eq, %10, %229 : vector<1x8xi32>
    %231 = vector.shape_cast %201 : vector<1x1xf32> to vector<1x1xf32>
    %232 = vector.broadcast %231 : vector<1x1xf32> to vector<1x8xf32>
    %233 = arith.select %230, %232, %228 : vector<1x8xi1>, vector<1x8xf32>
    %c5_i32 = arith.constant 5 : i32
    %234 = vector.broadcast %c5_i32 : i32 to vector<1x8xi32>
    %235 = arith.cmpi eq, %10, %234 : vector<1x8xi32>
    %236 = vector.shape_cast %207 : vector<1x1xf32> to vector<1x1xf32>
    %237 = vector.broadcast %236 : vector<1x1xf32> to vector<1x8xf32>
    %238 = arith.select %235, %237, %233 : vector<1x8xi1>, vector<1x8xf32>
    %c0_42 = arith.constant 0 : index
    %c0_43 = arith.constant 0 : index
    %239 = vector.load %arg7[%c0_42, %c0_43] : memref<8x8xf32, #tpu.memory_space<vmem>>, vector<1x8xf32>
    tpu.vector_store %arg7[%c0_42, %c0_43], %238 {strides = array<i32>} : memref<8x8xf32, #tpu.memory_space<vmem>>, vector<1x8xf32>,
    %c1_i32_44 = arith.constant 1 : i32
    %240 = arith.addi %3, %c1_i32_44 : i32
    %241 = arith.index_cast %240 : i32 to index
    %242 = memref.load %arg2[%241] : memref<8xf32, #tpu.memory_space<smem>>
    %c1_i32_45 = arith.constant 1 : i32
    %243 = arith.addi %3, %c1_i32_45 : i32
    %244 = arith.index_cast %243 : i32 to index
    %245 = memref.load %arg3[%244] : memref<8xf32, #tpu.memory_space<smem>>
    %246 = arith.mulf %242, %242 : f32
    %247 = vector.broadcast %246 : f32 to vector<16x128xf32>
    %248 = arith.addf %247, %9 : vector<16x128xf32>
    %249 = vector.broadcast %246 : f32 to vector<16x128xf32>
    %250 = arith.addf %249, %7 : vector<16x128xf32>
    %251 = math.log %248 : vector<16x128xf32>
    %cst_46 = arith.constant -0.333333343 : f32
    %252 = vector.broadcast %cst_46 : f32 to vector<16x128xf32>
    %253 = arith.mulf %251, %252 : vector<16x128xf32>
    %254 = math.exp %253 : vector<16x128xf32>
    %255 = vector.broadcast %0 : f32 to vector<16x128xf32>
    %256 = arith.mulf %255, %254 : vector<16x128xf32>
    %257 = vector.broadcast %242 : f32 to vector<16x128xf32>
    %258 = arith.mulf %256, %257 : vector<16x128xf32>
    %259 = arith.addf %5, %258 : vector<16x128xf32>
    %260 = arith.mulf %259, %259 : vector<16x128xf32>
    %261 = arith.addf %250, %260 : vector<16x128xf32>
    %262 = arith.mulf %261, %261 : vector<16x128xf32>
    %263 = vector.broadcast %1 : f32 to vector<16x128xf32>
    %264 = arith.mulf %263, %262 : vector<16x128xf32>
    %265 = vector.broadcast %2 : f32 to vector<16x128xf32>
    %266 = arith.mulf %265, %261 : vector<16x128xf32>
    %cst_47 = arith.constant 1.000000e+00 : f32
    %267 = vector.broadcast %cst_47 : f32 to vector<16x128xf32>
    %268 = arith.addf %267, %266 : vector<16x128xf32>
    %269 = math.log %268 : vector<16x128xf32>
    %cst_48 = arith.constant -2.83333325 : f32
    %270 = vector.broadcast %cst_48 : f32 to vector<16x128xf32>
    %271 = arith.mulf %269, %270 : vector<16x128xf32>
    %272 = math.exp %271 : vector<16x128xf32>
    %273 = arith.mulf %264, %272 : vector<16x128xf32>
    %274 = tpu.reciprocal %248 : vector<16x128xf32> -> vector<16x128xf32>
    %275 = tpu.reciprocal %261 : vector<16x128xf32> -> vector<16x128xf32>
    %276 = math.rsqrt %250 : vector<16x128xf32>
    %277 = arith.mulf %250, %276 : vector<16x128xf32>
    %278 = arith.mulf %276, %276 : vector<16x128xf32>
    %279 = arith.mulf %276, %278 : vector<16x128xf32>
    %280 = vector.broadcast %246 : f32 to vector<16x128xf32>
    %281 = arith.mulf %256, %280 : vector<16x128xf32>
    %cst_49 = arith.constant 2.000000e+00 : f32
    %282 = vector.broadcast %cst_49 : f32 to vector<16x128xf32>
    %283 = arith.mulf %282, %259 : vector<16x128xf32>
    %284 = arith.mulf %283, %259 : vector<16x128xf32>
    %285 = arith.subf %261, %284 : vector<16x128xf32>
    %286 = arith.mulf %258, %259 : vector<16x128xf32>
    %287 = arith.addf %285, %286 : vector<16x128xf32>
    %288 = arith.mulf %281, %287 : vector<16x128xf32>
    %289 = arith.mulf %274, %278 : vector<16x128xf32>
    %290 = arith.mulf %288, %289 : vector<16x128xf32>
    %291 = arith.mulf %4, %261 : vector<16x128xf32>
    %292 = arith.mulf %291, %279 : vector<16x128xf32>
    %293 = arith.mulf %258, %277 : vector<16x128xf32>
    %294 = arith.mulf %259, %258 : vector<16x128xf32>
    %295 = arith.subf %261, %294 : vector<16x128xf32>
    %296 = tpu.reciprocal %293 {approx = true} : vector<16x128xf32> -> vector<16x128xf32>
    %297 = arith.mulf %295, %296 : vector<16x128xf32>
    %298 = math.absf %297 : vector<16x128xf32>
    %cst_50 = arith.constant 2.41421366 : f32
    %299 = vector.broadcast %cst_50 : f32 to vector<16x128xf32>
    %300 = arith.cmpf ogt, %298, %299 : vector<16x128xf32>
    %cst_51 = arith.constant 0.414213568 : f32
    %301 = vector.broadcast %cst_51 : f32 to vector<16x128xf32>
    %302 = arith.cmpf ogt, %298, %301 : vector<16x128xf32>
    %cst_52 = arith.constant dense<true> : vector<16x128xi1>
    %303 = arith.xori %300, %cst_52 : vector<16x128xi1>
    %304 = arith.andi %302, %303 : vector<16x128xi1>
    %305 = tpu.reciprocal %298 {approx = true} : vector<16x128xf32> -> vector<16x128xf32>
    %cst_53 = arith.constant 1.000000e+00 : f32
    %306 = vector.broadcast %cst_53 : f32 to vector<16x128xf32>
    %307 = arith.addf %298, %306 : vector<16x128xf32>
    %308 = tpu.reciprocal %307 {approx = true} : vector<16x128xf32> -> vector<16x128xf32>
    %cst_54 = arith.constant 0.000000e+00 : f32
    %309 = vector.broadcast %cst_54 : f32 to vector<16x128xf32>
    %310 = arith.subf %309, %305 : vector<16x128xf32>
    %cst_55 = arith.constant 1.000000e+00 : f32
    %311 = vector.broadcast %cst_55 : f32 to vector<16x128xf32>
    %312 = arith.subf %298, %311 : vector<16x128xf32>
    %313 = arith.mulf %312, %308 : vector<16x128xf32>
    %314 = arith.select %304, %313, %298 : vector<16x128xi1>, vector<16x128xf32>
    %315 = arith.select %300, %310, %314 : vector<16x128xi1>, vector<16x128xf32>
    %cst_56 = arith.constant 0.785398185 : f32
    %cst_57 = arith.constant 0.000000e+00 : f32
    %316 = vector.broadcast %cst_56 : f32 to vector<16x128xf32>
    %317 = vector.broadcast %cst_57 : f32 to vector<16x128xf32>
    %318 = arith.select %304, %316, %317 : vector<16x128xi1>, vector<16x128xf32>
    %cst_58 = arith.constant 1.57079637 : f32
    %319 = vector.broadcast %cst_58 : f32 to vector<16x128xf32>
    %320 = arith.select %300, %319, %318 : vector<16x128xi1>, vector<16x128xf32>
    %321 = arith.mulf %315, %315 : vector<16x128xf32>
    %cst_59 = arith.constant 0.0805374458 : f32
    %322 = vector.broadcast %cst_59 : f32 to vector<16x128xf32>
    %323 = arith.mulf %322, %321 : vector<16x128xf32>
    %cst_60 = arith.constant 0.138776854 : f32
    %324 = vector.broadcast %cst_60 : f32 to vector<16x128xf32>
    %325 = arith.subf %323, %324 : vector<16x128xf32>
    %326 = arith.mulf %325, %321 : vector<16x128xf32>
    %cst_61 = arith.constant 0.199777111 : f32
    %327 = vector.broadcast %cst_61 : f32 to vector<16x128xf32>
    %328 = arith.addf %326, %327 : vector<16x128xf32>
    %329 = arith.mulf %328, %321 : vector<16x128xf32>
    %cst_62 = arith.constant 0.333329499 : f32
    %330 = vector.broadcast %cst_62 : f32 to vector<16x128xf32>
    %331 = arith.subf %329, %330 : vector<16x128xf32>
    %332 = arith.mulf %331, %321 : vector<16x128xf32>
    %333 = arith.mulf %332, %315 : vector<16x128xf32>
    %334 = arith.addf %333, %315 : vector<16x128xf32>
    %335 = arith.addf %320, %334 : vector<16x128xf32>
    %cst_63 = arith.constant 0.000000e+00 : f32
    %336 = vector.broadcast %cst_63 : f32 to vector<16x128xf32>
    %337 = arith.cmpf olt, %297, %336 : vector<16x128xf32>
    %cst_64 = arith.constant 0.000000e+00 : f32
    %338 = vector.broadcast %cst_64 : f32 to vector<16x128xf32>
    %339 = arith.subf %338, %335 : vector<16x128xf32>
    %340 = arith.select %337, %339, %335 : vector<16x128xi1>, vector<16x128xf32>
    %cst_65 = arith.constant 1.57079637 : f32
    %341 = vector.broadcast %cst_65 : f32 to vector<16x128xf32>
    %342 = arith.subf %341, %340 : vector<16x128xf32>
    %343 = arith.mulf %292, %342 : vector<16x128xf32>
    %344 = vector.broadcast %245 : f32 to vector<16x128xf32>
    %345 = arith.mulf %4, %344 : vector<16x128xf32>
    %346 = arith.mulf %345, %343 : vector<16x128xf32>
    %347 = arith.subf %290, %346 : vector<16x128xf32>
    %348 = arith.mulf %290, %345 : vector<16x128xf32>
    %349 = arith.addf %348, %343 : vector<16x128xf32>
    %350 = arith.mulf %273, %6 : vector<16x128xf32>
    %351 = arith.mulf %275, %275 : vector<16x128xf32>
    %352 = arith.mulf %350, %351 : vector<16x128xf32>
    %353 = arith.mulf %274, %275 : vector<16x128xf32>
    %354 = arith.mulf %350, %353 : vector<16x128xf32>
    %355 = arith.mulf %274, %274 : vector<16x128xf32>
    %356 = arith.mulf %350, %355 : vector<16x128xf32>
    %357 = vector.broadcast %246 : f32 to vector<16x128xf32>
    %358 = arith.subf %261, %357 : vector<16x128xf32>
    %cst_66 = arith.constant 2.000000e+00 : f32
    %359 = arith.mulf %cst_66, %242 : f32
    %360 = arith.mulf %259, %347 : vector<16x128xf32>
    %361 = vector.broadcast %359 : f32 to vector<16x128xf32>
    %362 = arith.mulf %361, %360 : vector<16x128xf32>
    %363 = arith.subf %358, %362 : vector<16x128xf32>
    %364 = arith.mulf %347, %347 : vector<16x128xf32>
    %365 = arith.mulf %250, %364 : vector<16x128xf32>
    %366 = arith.addf %363, %365 : vector<16x128xf32>
    %367 = arith.mulf %352, %366 : vector<16x128xf32>
    %368 = arith.subf %261, %7 : vector<16x128xf32>
    %369 = arith.mulf %4, %259 : vector<16x128xf32>
    %cst_67 = arith.constant 2.000000e+00 : f32
    %370 = vector.broadcast %cst_67 : f32 to vector<16x128xf32>
    %371 = arith.mulf %370, %369 : vector<16x128xf32>
    %372 = arith.mulf %371, %349 : vector<16x128xf32>
    %373 = arith.subf %368, %372 : vector<16x128xf32>
    %374 = arith.mulf %349, %349 : vector<16x128xf32>
    %375 = arith.mulf %250, %374 : vector<16x128xf32>
    %376 = arith.addf %373, %375 : vector<16x128xf32>
    %377 = arith.mulf %352, %376 : vector<16x128xf32>
    %378 = arith.mulf %356, %250 : vector<16x128xf32>
    %379 = arith.mulf %250, %347 : vector<16x128xf32>
    %380 = vector.broadcast %242 : f32 to vector<16x128xf32>
    %381 = arith.mulf %380, %259 : vector<16x128xf32>
    %382 = arith.subf %379, %381 : vector<16x128xf32>
    %383 = arith.mulf %354, %382 : vector<16x128xf32>
    %384 = arith.mulf %347, %349 : vector<16x128xf32>
    %385 = arith.mulf %250, %384 : vector<16x128xf32>
    %386 = vector.broadcast %242 : f32 to vector<16x128xf32>
    %387 = arith.mulf %386, %4 : vector<16x128xf32>
    %388 = arith.subf %385, %387 : vector<16x128xf32>
    %389 = vector.broadcast %242 : f32 to vector<16x128xf32>
    %390 = arith.mulf %389, %259 : vector<16x128xf32>
    %391 = arith.mulf %390, %349 : vector<16x128xf32>
    %392 = arith.subf %388, %391 : vector<16x128xf32>
    %393 = arith.mulf %4, %259 : vector<16x128xf32>
    %394 = arith.mulf %393, %347 : vector<16x128xf32>
    %395 = arith.subf %392, %394 : vector<16x128xf32>
    %396 = arith.mulf %352, %395 : vector<16x128xf32>
    %397 = arith.mulf %250, %349 : vector<16x128xf32>
    %398 = arith.mulf %4, %259 : vector<16x128xf32>
    %399 = arith.subf %397, %398 : vector<16x128xf32>
    %400 = arith.mulf %354, %399 : vector<16x128xf32>
    %cst_68 = arith.constant dense<0.000000e+00> : vector<16xf32>
    %401 = vector.multi_reduction <add>, %367, %cst_68 [1] : vector<16x128xf32> to vector<16xf32>
    %402 = vector.shape_cast %401 : vector<16xf32> to vector<16x1xf32>
    %cst_69 = arith.constant dense<0.000000e+00> : vector<1xf32>
    %403 = vector.multi_reduction <add>, %402, %cst_69 [0] : vector<16x1xf32> to vector<1xf32>
    %404 = vector.shape_cast %403 : vector<1xf32> to vector<1x1xf32>
    %405 = vector.broadcast %242 : f32 to vector<1x1xf32>
    %406 = arith.mulf %405, %404 : vector<1x1xf32>
    %cst_70 = arith.constant dense<0.000000e+00> : vector<16xf32>
    %407 = vector.multi_reduction <add>, %377, %cst_70 [1] : vector<16x128xf32> to vector<16xf32>
    %408 = vector.shape_cast %407 : vector<16xf32> to vector<16x1xf32>
    %cst_71 = arith.constant dense<0.000000e+00> : vector<1xf32>
    %409 = vector.multi_reduction <add>, %408, %cst_71 [0] : vector<16x1xf32> to vector<1xf32>
    %410 = vector.shape_cast %409 : vector<1xf32> to vector<1x1xf32>
    %411 = vector.broadcast %242 : f32 to vector<1x1xf32>
    %412 = arith.mulf %411, %410 : vector<1x1xf32>
    %cst_72 = arith.constant dense<0.000000e+00> : vector<16xf32>
    %413 = vector.multi_reduction <add>, %378, %cst_72 [1] : vector<16x128xf32> to vector<16xf32>
    %414 = vector.shape_cast %413 : vector<16xf32> to vector<16x1xf32>
    %cst_73 = arith.constant dense<0.000000e+00> : vector<1xf32>
    %415 = vector.multi_reduction <add>, %414, %cst_73 [0] : vector<16x1xf32> to vector<1xf32>
    %416 = vector.shape_cast %415 : vector<1xf32> to vector<1x1xf32>
    %417 = vector.broadcast %242 : f32 to vector<1x1xf32>
    %418 = arith.mulf %417, %416 : vector<1x1xf32>
    %cst_74 = arith.constant dense<0.000000e+00> : vector<16xf32>
    %419 = vector.multi_reduction <add>, %383, %cst_74 [1] : vector<16x128xf32> to vector<16xf32>
    %420 = vector.shape_cast %419 : vector<16xf32> to vector<16x1xf32>
    %cst_75 = arith.constant dense<0.000000e+00> : vector<1xf32>
    %421 = vector.multi_reduction <add>, %420, %cst_75 [0] : vector<16x1xf32> to vector<1xf32>
    %422 = vector.shape_cast %421 : vector<1xf32> to vector<1x1xf32>
    %423 = vector.broadcast %242 : f32 to vector<1x1xf32>
    %424 = arith.mulf %423, %422 : vector<1x1xf32>
    %cst_76 = arith.constant dense<0.000000e+00> : vector<16xf32>
    %425 = vector.multi_reduction <add>, %396, %cst_76 [1] : vector<16x128xf32> to vector<16xf32>
    %426 = vector.shape_cast %425 : vector<16xf32> to vector<16x1xf32>
    %cst_77 = arith.constant dense<0.000000e+00> : vector<1xf32>
    %427 = vector.multi_reduction <add>, %426, %cst_77 [0] : vector<16x1xf32> to vector<1xf32>
    %428 = vector.shape_cast %427 : vector<1xf32> to vector<1x1xf32>
    %429 = vector.broadcast %242 : f32 to vector<1x1xf32>
    %430 = arith.mulf %429, %428 : vector<1x1xf32>
    %cst_78 = arith.constant dense<0.000000e+00> : vector<16xf32>
    %431 = vector.multi_reduction <add>, %400, %cst_78 [1] : vector<16x128xf32> to vector<16xf32>
    %432 = vector.shape_cast %431 : vector<16xf32> to vector<16x1xf32>
    %cst_79 = arith.constant dense<0.000000e+00> : vector<1xf32>
    %433 = vector.multi_reduction <add>, %432, %cst_79 [0] : vector<16x1xf32> to vector<1xf32>
    %434 = vector.shape_cast %433 : vector<1xf32> to vector<1x1xf32>
    %435 = vector.broadcast %242 : f32 to vector<1x1xf32>
    %436 = arith.mulf %435, %434 : vector<1x1xf32>
    %cst_80 = arith.constant 0.000000e+00 : f32
    %437 = vector.broadcast %cst_80 : f32 to vector<1x8xf32>
    %c0_i32_81 = arith.constant 0 : i32
    %438 = vector.broadcast %c0_i32_81 : i32 to vector<1x8xi32>
    %439 = arith.cmpi eq, %10, %438 : vector<1x8xi32>
    %440 = vector.shape_cast %406 : vector<1x1xf32> to vector<1x1xf32>
    %441 = vector.broadcast %440 : vector<1x1xf32> to vector<1x8xf32>
    %442 = arith.select %439, %441, %437 : vector<1x8xi1>, vector<1x8xf32>
    %c1_i32_82 = arith.constant 1 : i32
    %443 = vector.broadcast %c1_i32_82 : i32 to vector<1x8xi32>
    %444 = arith.cmpi eq, %10, %443 : vector<1x8xi32>
    %445 = vector.shape_cast %412 : vector<1x1xf32> to vector<1x1xf32>
    %446 = vector.broadcast %445 : vector<1x1xf32> to vector<1x8xf32>
    %447 = arith.select %444, %446, %442 : vector<1x8xi1>, vector<1x8xf32>
    %c2_i32_83 = arith.constant 2 : i32
    %448 = vector.broadcast %c2_i32_83 : i32 to vector<1x8xi32>
    %449 = arith.cmpi eq, %10, %448 : vector<1x8xi32>
    %450 = vector.shape_cast %418 : vector<1x1xf32> to vector<1x1xf32>
    %451 = vector.broadcast %450 : vector<1x1xf32> to vector<1x8xf32>
    %452 = arith.select %449, %451, %447 : vector<1x8xi1>, vector<1x8xf32>
    %c3_i32_84 = arith.constant 3 : i32
    %453 = vector.broadcast %c3_i32_84 : i32 to vector<1x8xi32>
    %454 = arith.cmpi eq, %10, %453 : vector<1x8xi32>
    %455 = vector.shape_cast %424 : vector<1x1xf32> to vector<1x1xf32>
    %456 = vector.broadcast %455 : vector<1x1xf32> to vector<1x8xf32>
    %457 = arith.select %454, %456, %452 : vector<1x8xi1>, vector<1x8xf32>
    %c4_i32_85 = arith.constant 4 : i32
    %458 = vector.broadcast %c4_i32_85 : i32 to vector<1x8xi32>
    %459 = arith.cmpi eq, %10, %458 : vector<1x8xi32>
    %460 = vector.shape_cast %430 : vector<1x1xf32> to vector<1x1xf32>
    %461 = vector.broadcast %460 : vector<1x1xf32> to vector<1x8xf32>
    %462 = arith.select %459, %461, %457 : vector<1x8xi1>, vector<1x8xf32>
    %c5_i32_86 = arith.constant 5 : i32
    %463 = vector.broadcast %c5_i32_86 : i32 to vector<1x8xi32>
    %464 = arith.cmpi eq, %10, %463 : vector<1x8xi32>
    %465 = vector.shape_cast %436 : vector<1x1xf32> to vector<1x1xf32>
    %466 = vector.broadcast %465 : vector<1x1xf32> to vector<1x8xf32>
    %467 = arith.select %464, %466, %462 : vector<1x8xi1>, vector<1x8xf32>
    %c1_87 = arith.constant 1 : index
    %c0_88 = arith.constant 0 : index
    %468 = vector.load %arg7[%c1_87, %c0_88] : memref<8x8xf32, #tpu.memory_space<vmem>>, vector<1x8xf32>
    tpu.vector_store %arg7[%c1_87, %c0_88], %467 {strides = array<i32>} : memref<8x8xf32, #tpu.memory_space<vmem>>, vector<1x8xf32>,
    %c2_i32_89 = arith.constant 2 : i32
    %469 = arith.addi %3, %c2_i32_89 : i32
    %470 = arith.index_cast %469 : i32 to index
    %471 = memref.load %arg2[%470] : memref<8xf32, #tpu.memory_space<smem>>
    %c2_i32_90 = arith.constant 2 : i32
    %472 = arith.addi %3, %c2_i32_90 : i32
    %473 = arith.index_cast %472 : i32 to index
    %474 = memref.load %arg3[%473] : memref<8xf32, #tpu.memory_space<smem>>
    %475 = arith.mulf %471, %471 : f32
    %476 = vector.broadcast %475 : f32 to vector<16x128xf32>
    %477 = arith.addf %476, %9 : vector<16x128xf32>
    %478 = vector.broadcast %475 : f32 to vector<16x128xf32>
    %479 = arith.addf %478, %7 : vector<16x128xf32>
    %480 = math.log %477 : vector<16x128xf32>
    %cst_91 = arith.constant -0.333333343 : f32
    %481 = vector.broadcast %cst_91 : f32 to vector<16x128xf32>
    %482 = arith.mulf %480, %481 : vector<16x128xf32>
    %483 = math.exp %482 : vector<16x128xf32>
    %484 = vector.broadcast %0 : f32 to vector<16x128xf32>
    %485 = arith.mulf %484, %483 : vector<16x128xf32>
    %486 = vector.broadcast %471 : f32 to vector<16x128xf32>
    %487 = arith.mulf %485, %486 : vector<16x128xf32>
    %488 = arith.addf %5, %487 : vector<16x128xf32>
    %489 = arith.mulf %488, %488 : vector<16x128xf32>
    %490 = arith.addf %479, %489 : vector<16x128xf32>
    %491 = arith.mulf %490, %490 : vector<16x128xf32>
    %492 = vector.broadcast %1 : f32 to vector<16x128xf32>
    %493 = arith.mulf %492, %491 : vector<16x128xf32>
    %494 = vector.broadcast %2 : f32 to vector<16x128xf32>
    %495 = arith.mulf %494, %490 : vector<16x128xf32>
    %cst_92 = arith.constant 1.000000e+00 : f32
    %496 = vector.broadcast %cst_92 : f32 to vector<16x128xf32>
    %497 = arith.addf %496, %495 : vector<16x128xf32>
    %498 = math.log %497 : vector<16x128xf32>
    %cst_93 = arith.constant -2.83333325 : f32
    %499 = vector.broadcast %cst_93 : f32 to vector<16x128xf32>
    %500 = arith.mulf %498, %499 : vector<16x128xf32>
    %501 = math.exp %500 : vector<16x128xf32>
    %502 = arith.mulf %493, %501 : vector<16x128xf32>
    %503 = tpu.reciprocal %477 : vector<16x128xf32> -> vector<16x128xf32>
    %504 = tpu.reciprocal %490 : vector<16x128xf32> -> vector<16x128xf32>
    %505 = math.rsqrt %479 : vector<16x128xf32>
    %506 = arith.mulf %479, %505 : vector<16x128xf32>
    %507 = arith.mulf %505, %505 : vector<16x128xf32>
    %508 = arith.mulf %505, %507 : vector<16x128xf32>
    %509 = vector.broadcast %475 : f32 to vector<16x128xf32>
    %510 = arith.mulf %485, %509 : vector<16x128xf32>
    %cst_94 = arith.constant 2.000000e+00 : f32
    %511 = vector.broadcast %cst_94 : f32 to vector<16x128xf32>
    %512 = arith.mulf %511, %488 : vector<16x128xf32>
    %513 = arith.mulf %512, %488 : vector<16x128xf32>
    %514 = arith.subf %490, %513 : vector<16x128xf32>
    %515 = arith.mulf %487, %488 : vector<16x128xf32>
    %516 = arith.addf %514, %515 : vector<16x128xf32>
    %517 = arith.mulf %510, %516 : vector<16x128xf32>
    %518 = arith.mulf %503, %507 : vector<16x128xf32>
    %519 = arith.mulf %517, %518 : vector<16x128xf32>
    %520 = arith.mulf %4, %490 : vector<16x128xf32>
    %521 = arith.mulf %520, %508 : vector<16x128xf32>
    %522 = arith.mulf %487, %506 : vector<16x128xf32>
    %523 = arith.mulf %488, %487 : vector<16x128xf32>
    %524 = arith.subf %490, %523 : vector<16x128xf32>
    %525 = tpu.reciprocal %522 {approx = true} : vector<16x128xf32> -> vector<16x128xf32>
    %526 = arith.mulf %524, %525 : vector<16x128xf32>
    %527 = math.absf %526 : vector<16x128xf32>
    %cst_95 = arith.constant 2.41421366 : f32
    %528 = vector.broadcast %cst_95 : f32 to vector<16x128xf32>
    %529 = arith.cmpf ogt, %527, %528 : vector<16x128xf32>
    %cst_96 = arith.constant 0.414213568 : f32
    %530 = vector.broadcast %cst_96 : f32 to vector<16x128xf32>
    %531 = arith.cmpf ogt, %527, %530 : vector<16x128xf32>
    %cst_97 = arith.constant dense<true> : vector<16x128xi1>
    %532 = arith.xori %529, %cst_97 : vector<16x128xi1>
    %533 = arith.andi %531, %532 : vector<16x128xi1>
    %534 = tpu.reciprocal %527 {approx = true} : vector<16x128xf32> -> vector<16x128xf32>
    %cst_98 = arith.constant 1.000000e+00 : f32
    %535 = vector.broadcast %cst_98 : f32 to vector<16x128xf32>
    %536 = arith.addf %527, %535 : vector<16x128xf32>
    %537 = tpu.reciprocal %536 {approx = true} : vector<16x128xf32> -> vector<16x128xf32>
    %cst_99 = arith.constant 0.000000e+00 : f32
    %538 = vector.broadcast %cst_99 : f32 to vector<16x128xf32>
    %539 = arith.subf %538, %534 : vector<16x128xf32>
    %cst_100 = arith.constant 1.000000e+00 : f32
    %540 = vector.broadcast %cst_100 : f32 to vector<16x128xf32>
    %541 = arith.subf %527, %540 : vector<16x128xf32>
    %542 = arith.mulf %541, %537 : vector<16x128xf32>
    %543 = arith.select %533, %542, %527 : vector<16x128xi1>, vector<16x128xf32>
    %544 = arith.select %529, %539, %543 : vector<16x128xi1>, vector<16x128xf32>
    %cst_101 = arith.constant 0.785398185 : f32
    %cst_102 = arith.constant 0.000000e+00 : f32
    %545 = vector.broadcast %cst_101 : f32 to vector<16x128xf32>
    %546 = vector.broadcast %cst_102 : f32 to vector<16x128xf32>
    %547 = arith.select %533, %545, %546 : vector<16x128xi1>, vector<16x128xf32>
    %cst_103 = arith.constant 1.57079637 : f32
    %548 = vector.broadcast %cst_103 : f32 to vector<16x128xf32>
    %549 = arith.select %529, %548, %547 : vector<16x128xi1>, vector<16x128xf32>
    %550 = arith.mulf %544, %544 : vector<16x128xf32>
    %cst_104 = arith.constant 0.0805374458 : f32
    %551 = vector.broadcast %cst_104 : f32 to vector<16x128xf32>
    %552 = arith.mulf %551, %550 : vector<16x128xf32>
    %cst_105 = arith.constant 0.138776854 : f32
    %553 = vector.broadcast %cst_105 : f32 to vector<16x128xf32>
    %554 = arith.subf %552, %553 : vector<16x128xf32>
    %555 = arith.mulf %554, %550 : vector<16x128xf32>
    %cst_106 = arith.constant 0.199777111 : f32
    %556 = vector.broadcast %cst_106 : f32 to vector<16x128xf32>
    %557 = arith.addf %555, %556 : vector<16x128xf32>
    %558 = arith.mulf %557, %550 : vector<16x128xf32>
    %cst_107 = arith.constant 0.333329499 : f32
    %559 = vector.broadcast %cst_107 : f32 to vector<16x128xf32>
    %560 = arith.subf %558, %559 : vector<16x128xf32>
    %561 = arith.mulf %560, %550 : vector<16x128xf32>
    %562 = arith.mulf %561, %544 : vector<16x128xf32>
    %563 = arith.addf %562, %544 : vector<16x128xf32>
    %564 = arith.addf %549, %563 : vector<16x128xf32>
    %cst_108 = arith.constant 0.000000e+00 : f32
    %565 = vector.broadcast %cst_108 : f32 to vector<16x128xf32>
    %566 = arith.cmpf olt, %526, %565 : vector<16x128xf32>
    %cst_109 = arith.constant 0.000000e+00 : f32
    %567 = vector.broadcast %cst_109 : f32 to vector<16x128xf32>
    %568 = arith.subf %567, %564 : vector<16x128xf32>
    %569 = arith.select %566, %568, %564 : vector<16x128xi1>, vector<16x128xf32>
    %cst_110 = arith.constant 1.57079637 : f32
    %570 = vector.broadcast %cst_110 : f32 to vector<16x128xf32>
    %571 = arith.subf %570, %569 : vector<16x128xf32>
    %572 = arith.mulf %521, %571 : vector<16x128xf32>
    %573 = vector.broadcast %474 : f32 to vector<16x128xf32>
    %574 = arith.mulf %4, %573 : vector<16x128xf32>
    %575 = arith.mulf %574, %572 : vector<16x128xf32>
    %576 = arith.subf %519, %575 : vector<16x128xf32>
    %577 = arith.mulf %519, %574 : vector<16x128xf32>
    %578 = arith.addf %577, %572 : vector<16x128xf32>
    %579 = arith.mulf %502, %6 : vector<16x128xf32>
    %580 = arith.mulf %504, %504 : vector<16x128xf32>
    %581 = arith.mulf %579, %580 : vector<16x128xf32>
    %582 = arith.mulf %503, %504 : vector<16x128xf32>
    %583 = arith.mulf %579, %582 : vector<16x128xf32>
    %584 = arith.mulf %503, %503 : vector<16x128xf32>
    %585 = arith.mulf %579, %584 : vector<16x128xf32>
    %586 = vector.broadcast %475 : f32 to vector<16x128xf32>
    %587 = arith.subf %490, %586 : vector<16x128xf32>
    %cst_111 = arith.constant 2.000000e+00 : f32
    %588 = arith.mulf %cst_111, %471 : f32
    %589 = arith.mulf %488, %576 : vector<16x128xf32>
    %590 = vector.broadcast %588 : f32 to vector<16x128xf32>
    %591 = arith.mulf %590, %589 : vector<16x128xf32>
    %592 = arith.subf %587, %591 : vector<16x128xf32>
    %593 = arith.mulf %576, %576 : vector<16x128xf32>
    %594 = arith.mulf %479, %593 : vector<16x128xf32>
    %595 = arith.addf %592, %594 : vector<16x128xf32>
    %596 = arith.mulf %581, %595 : vector<16x128xf32>
    %597 = arith.subf %490, %7 : vector<16x128xf32>
    %598 = arith.mulf %4, %488 : vector<16x128xf32>
    %cst_112 = arith.constant 2.000000e+00 : f32
    %599 = vector.broadcast %cst_112 : f32 to vector<16x128xf32>
    %600 = arith.mulf %599, %598 : vector<16x128xf32>
    %601 = arith.mulf %600, %578 : vector<16x128xf32>
    %602 = arith.subf %597, %601 : vector<16x128xf32>
    %603 = arith.mulf %578, %578 : vector<16x128xf32>
    %604 = arith.mulf %479, %603 : vector<16x128xf32>
    %605 = arith.addf %602, %604 : vector<16x128xf32>
    %606 = arith.mulf %581, %605 : vector<16x128xf32>
    %607 = arith.mulf %585, %479 : vector<16x128xf32>
    %608 = arith.mulf %479, %576 : vector<16x128xf32>
    %609 = vector.broadcast %471 : f32 to vector<16x128xf32>
    %610 = arith.mulf %609, %488 : vector<16x128xf32>
    %611 = arith.subf %608, %610 : vector<16x128xf32>
    %612 = arith.mulf %583, %611 : vector<16x128xf32>
    %613 = arith.mulf %576, %578 : vector<16x128xf32>
    %614 = arith.mulf %479, %613 : vector<16x128xf32>
    %615 = vector.broadcast %471 : f32 to vector<16x128xf32>
    %616 = arith.mulf %615, %4 : vector<16x128xf32>
    %617 = arith.subf %614, %616 : vector<16x128xf32>
    %618 = vector.broadcast %471 : f32 to vector<16x128xf32>
    %619 = arith.mulf %618, %488 : vector<16x128xf32>
    %620 = arith.mulf %619, %578 : vector<16x128xf32>
    %621 = arith.subf %617, %620 : vector<16x128xf32>
    %622 = arith.mulf %4, %488 : vector<16x128xf32>
    %623 = arith.mulf %622, %576 : vector<16x128xf32>
    %624 = arith.subf %621, %623 : vector<16x128xf32>
    %625 = arith.mulf %581, %624 : vector<16x128xf32>
    %626 = arith.mulf %479, %578 : vector<16x128xf32>
    %627 = arith.mulf %4, %488 : vector<16x128xf32>
    %628 = arith.subf %626, %627 : vector<16x128xf32>
    %629 = arith.mulf %583, %628 : vector<16x128xf32>
    %cst_113 = arith.constant dense<0.000000e+00> : vector<16xf32>
    %630 = vector.multi_reduction <add>, %596, %cst_113 [1] : vector<16x128xf32> to vector<16xf32>
    %631 = vector.shape_cast %630 : vector<16xf32> to vector<16x1xf32>
    %cst_114 = arith.constant dense<0.000000e+00> : vector<1xf32>
    %632 = vector.multi_reduction <add>, %631, %cst_114 [0] : vector<16x1xf32> to vector<1xf32>
    %633 = vector.shape_cast %632 : vector<1xf32> to vector<1x1xf32>
    %634 = vector.broadcast %471 : f32 to vector<1x1xf32>
    %635 = arith.mulf %634, %633 : vector<1x1xf32>
    %cst_115 = arith.constant dense<0.000000e+00> : vector<16xf32>
    %636 = vector.multi_reduction <add>, %606, %cst_115 [1] : vector<16x128xf32> to vector<16xf32>
    %637 = vector.shape_cast %636 : vector<16xf32> to vector<16x1xf32>
    %cst_116 = arith.constant dense<0.000000e+00> : vector<1xf32>
    %638 = vector.multi_reduction <add>, %637, %cst_116 [0] : vector<16x1xf32> to vector<1xf32>
    %639 = vector.shape_cast %638 : vector<1xf32> to vector<1x1xf32>
    %640 = vector.broadcast %471 : f32 to vector<1x1xf32>
    %641 = arith.mulf %640, %639 : vector<1x1xf32>
    %cst_117 = arith.constant dense<0.000000e+00> : vector<16xf32>
    %642 = vector.multi_reduction <add>, %607, %cst_117 [1] : vector<16x128xf32> to vector<16xf32>
    %643 = vector.shape_cast %642 : vector<16xf32> to vector<16x1xf32>
    %cst_118 = arith.constant dense<0.000000e+00> : vector<1xf32>
    %644 = vector.multi_reduction <add>, %643, %cst_118 [0] : vector<16x1xf32> to vector<1xf32>
    %645 = vector.shape_cast %644 : vector<1xf32> to vector<1x1xf32>
    %646 = vector.broadcast %471 : f32 to vector<1x1xf32>
    %647 = arith.mulf %646, %645 : vector<1x1xf32>
    %cst_119 = arith.constant dense<0.000000e+00> : vector<16xf32>
    %648 = vector.multi_reduction <add>, %612, %cst_119 [1] : vector<16x128xf32> to vector<16xf32>
    %649 = vector.shape_cast %648 : vector<16xf32> to vector<16x1xf32>
    %cst_120 = arith.constant dense<0.000000e+00> : vector<1xf32>
    %650 = vector.multi_reduction <add>, %649, %cst_120 [0] : vector<16x1xf32> to vector<1xf32>
    %651 = vector.shape_cast %650 : vector<1xf32> to vector<1x1xf32>
    %652 = vector.broadcast %471 : f32 to vector<1x1xf32>
    %653 = arith.mulf %652, %651 : vector<1x1xf32>
    %cst_121 = arith.constant dense<0.000000e+00> : vector<16xf32>
    %654 = vector.multi_reduction <add>, %625, %cst_121 [1] : vector<16x128xf32> to vector<16xf32>
    %655 = vector.shape_cast %654 : vector<16xf32> to vector<16x1xf32>
    %cst_122 = arith.constant dense<0.000000e+00> : vector<1xf32>
    %656 = vector.multi_reduction <add>, %655, %cst_122 [0] : vector<16x1xf32> to vector<1xf32>
    %657 = vector.shape_cast %656 : vector<1xf32> to vector<1x1xf32>
    %658 = vector.broadcast %471 : f32 to vector<1x1xf32>
    %659 = arith.mulf %658, %657 : vector<1x1xf32>
    %cst_123 = arith.constant dense<0.000000e+00> : vector<16xf32>
    %660 = vector.multi_reduction <add>, %629, %cst_123 [1] : vector<16x128xf32> to vector<16xf32>
    %661 = vector.shape_cast %660 : vector<16xf32> to vector<16x1xf32>
    %cst_124 = arith.constant dense<0.000000e+00> : vector<1xf32>
    %662 = vector.multi_reduction <add>, %661, %cst_124 [0] : vector<16x1xf32> to vector<1xf32>
    %663 = vector.shape_cast %662 : vector<1xf32> to vector<1x1xf32>
    %664 = vector.broadcast %471 : f32 to vector<1x1xf32>
    %665 = arith.mulf %664, %663 : vector<1x1xf32>
    %cst_125 = arith.constant 0.000000e+00 : f32
    %666 = vector.broadcast %cst_125 : f32 to vector<1x8xf32>
    %c0_i32_126 = arith.constant 0 : i32
    %667 = vector.broadcast %c0_i32_126 : i32 to vector<1x8xi32>
    %668 = arith.cmpi eq, %10, %667 : vector<1x8xi32>
    %669 = vector.shape_cast %635 : vector<1x1xf32> to vector<1x1xf32>
    %670 = vector.broadcast %669 : vector<1x1xf32> to vector<1x8xf32>
    %671 = arith.select %668, %670, %666 : vector<1x8xi1>, vector<1x8xf32>
    %c1_i32_127 = arith.constant 1 : i32
    %672 = vector.broadcast %c1_i32_127 : i32 to vector<1x8xi32>
    %673 = arith.cmpi eq, %10, %672 : vector<1x8xi32>
    %674 = vector.shape_cast %641 : vector<1x1xf32> to vector<1x1xf32>
    %675 = vector.broadcast %674 : vector<1x1xf32> to vector<1x8xf32>
    %676 = arith.select %673, %675, %671 : vector<1x8xi1>, vector<1x8xf32>
    %c2_i32_128 = arith.constant 2 : i32
    %677 = vector.broadcast %c2_i32_128 : i32 to vector<1x8xi32>
    %678 = arith.cmpi eq, %10, %677 : vector<1x8xi32>
    %679 = vector.shape_cast %647 : vector<1x1xf32> to vector<1x1xf32>
    %680 = vector.broadcast %679 : vector<1x1xf32> to vector<1x8xf32>
    %681 = arith.select %678, %680, %676 : vector<1x8xi1>, vector<1x8xf32>
    %c3_i32_129 = arith.constant 3 : i32
    %682 = vector.broadcast %c3_i32_129 : i32 to vector<1x8xi32>
    %683 = arith.cmpi eq, %10, %682 : vector<1x8xi32>
    %684 = vector.shape_cast %653 : vector<1x1xf32> to vector<1x1xf32>
    %685 = vector.broadcast %684 : vector<1x1xf32> to vector<1x8xf32>
    %686 = arith.select %683, %685, %681 : vector<1x8xi1>, vector<1x8xf32>
    %c4_i32_130 = arith.constant 4 : i32
    %687 = vector.broadcast %c4_i32_130 : i32 to vector<1x8xi32>
    %688 = arith.cmpi eq, %10, %687 : vector<1x8xi32>
    %689 = vector.shape_cast %659 : vector<1x1xf32> to vector<1x1xf32>
    %690 = vector.broadcast %689 : vector<1x1xf32> to vector<1x8xf32>
    %691 = arith.select %688, %690, %686 : vector<1x8xi1>, vector<1x8xf32>
    %c5_i32_131 = arith.constant 5 : i32
    %692 = vector.broadcast %c5_i32_131 : i32 to vector<1x8xi32>
    %693 = arith.cmpi eq, %10, %692 : vector<1x8xi32>
    %694 = vector.shape_cast %665 : vector<1x1xf32> to vector<1x1xf32>
    %695 = vector.broadcast %694 : vector<1x1xf32> to vector<1x8xf32>
    %696 = arith.select %693, %695, %691 : vector<1x8xi1>, vector<1x8xf32>
    %c2_132 = arith.constant 2 : index
    %c0_133 = arith.constant 0 : index
    %697 = vector.load %arg7[%c2_132, %c0_133] : memref<8x8xf32, #tpu.memory_space<vmem>>, vector<1x8xf32>
    tpu.vector_store %arg7[%c2_132, %c0_133], %696 {strides = array<i32>} : memref<8x8xf32, #tpu.memory_space<vmem>>, vector<1x8xf32>,
    %c3_i32_134 = arith.constant 3 : i32
    %698 = arith.addi %3, %c3_i32_134 : i32
    %699 = arith.index_cast %698 : i32 to index
    %700 = memref.load %arg2[%699] : memref<8xf32, #tpu.memory_space<smem>>
    %c3_i32_135 = arith.constant 3 : i32
    %701 = arith.addi %3, %c3_i32_135 : i32
    %702 = arith.index_cast %701 : i32 to index
    %703 = memref.load %arg3[%702] : memref<8xf32, #tpu.memory_space<smem>>
    %704 = arith.mulf %700, %700 : f32
    %705 = vector.broadcast %704 : f32 to vector<16x128xf32>
    %706 = arith.addf %705, %9 : vector<16x128xf32>
    %707 = vector.broadcast %704 : f32 to vector<16x128xf32>
    %708 = arith.addf %707, %7 : vector<16x128xf32>
    %709 = math.log %706 : vector<16x128xf32>
    %cst_136 = arith.constant -0.333333343 : f32
    %710 = vector.broadcast %cst_136 : f32 to vector<16x128xf32>
    %711 = arith.mulf %709, %710 : vector<16x128xf32>
    %712 = math.exp %711 : vector<16x128xf32>
    %713 = vector.broadcast %0 : f32 to vector<16x128xf32>
    %714 = arith.mulf %713, %712 : vector<16x128xf32>
    %715 = vector.broadcast %700 : f32 to vector<16x128xf32>
    %716 = arith.mulf %714, %715 : vector<16x128xf32>
    %717 = arith.addf %5, %716 : vector<16x128xf32>
    %718 = arith.mulf %717, %717 : vector<16x128xf32>
    %719 = arith.addf %708, %718 : vector<16x128xf32>
    %720 = arith.mulf %719, %719 : vector<16x128xf32>
    %721 = vector.broadcast %1 : f32 to vector<16x128xf32>
    %722 = arith.mulf %721, %720 : vector<16x128xf32>
    %723 = vector.broadcast %2 : f32 to vector<16x128xf32>
    %724 = arith.mulf %723, %719 : vector<16x128xf32>
    %cst_137 = arith.constant 1.000000e+00 : f32
    %725 = vector.broadcast %cst_137 : f32 to vector<16x128xf32>
    %726 = arith.addf %725, %724 : vector<16x128xf32>
    %727 = math.log %726 : vector<16x128xf32>
    %cst_138 = arith.constant -2.83333325 : f32
    %728 = vector.broadcast %cst_138 : f32 to vector<16x128xf32>
    %729 = arith.mulf %727, %728 : vector<16x128xf32>
    %730 = math.exp %729 : vector<16x128xf32>
    %731 = arith.mulf %722, %730 : vector<16x128xf32>
    %732 = tpu.reciprocal %706 : vector<16x128xf32> -> vector<16x128xf32>
    %733 = tpu.reciprocal %719 : vector<16x128xf32> -> vector<16x128xf32>
    %734 = math.rsqrt %708 : vector<16x128xf32>
    %735 = arith.mulf %708, %734 : vector<16x128xf32>
    %736 = arith.mulf %734, %734 : vector<16x128xf32>
    %737 = arith.mulf %734, %736 : vector<16x128xf32>
    %738 = vector.broadcast %704 : f32 to vector<16x128xf32>
    %739 = arith.mulf %714, %738 : vector<16x128xf32>
    %cst_139 = arith.constant 2.000000e+00 : f32
    %740 = vector.broadcast %cst_139 : f32 to vector<16x128xf32>
    %741 = arith.mulf %740, %717 : vector<16x128xf32>
    %742 = arith.mulf %741, %717 : vector<16x128xf32>
    %743 = arith.subf %719, %742 : vector<16x128xf32>
    %744 = arith.mulf %716, %717 : vector<16x128xf32>
    %745 = arith.addf %743, %744 : vector<16x128xf32>
    %746 = arith.mulf %739, %745 : vector<16x128xf32>
    %747 = arith.mulf %732, %736 : vector<16x128xf32>
    %748 = arith.mulf %746, %747 : vector<16x128xf32>
    %749 = arith.mulf %4, %719 : vector<16x128xf32>
    %750 = arith.mulf %749, %737 : vector<16x128xf32>
    %751 = arith.mulf %716, %735 : vector<16x128xf32>
    %752 = arith.mulf %717, %716 : vector<16x128xf32>
    %753 = arith.subf %719, %752 : vector<16x128xf32>
    %754 = tpu.reciprocal %751 {approx = true} : vector<16x128xf32> -> vector<16x128xf32>
    %755 = arith.mulf %753, %754 : vector<16x128xf32>
    %756 = math.absf %755 : vector<16x128xf32>
    %cst_140 = arith.constant 2.41421366 : f32
    %757 = vector.broadcast %cst_140 : f32 to vector<16x128xf32>
    %758 = arith.cmpf ogt, %756, %757 : vector<16x128xf32>
    %cst_141 = arith.constant 0.414213568 : f32
    %759 = vector.broadcast %cst_141 : f32 to vector<16x128xf32>
    %760 = arith.cmpf ogt, %756, %759 : vector<16x128xf32>
    %cst_142 = arith.constant dense<true> : vector<16x128xi1>
    %761 = arith.xori %758, %cst_142 : vector<16x128xi1>
    %762 = arith.andi %760, %761 : vector<16x128xi1>
    %763 = tpu.reciprocal %756 {approx = true} : vector<16x128xf32> -> vector<16x128xf32>
    %cst_143 = arith.constant 1.000000e+00 : f32
    %764 = vector.broadcast %cst_143 : f32 to vector<16x128xf32>
    %765 = arith.addf %756, %764 : vector<16x128xf32>
    %766 = tpu.reciprocal %765 {approx = true} : vector<16x128xf32> -> vector<16x128xf32>
    %cst_144 = arith.constant 0.000000e+00 : f32
    %767 = vector.broadcast %cst_144 : f32 to vector<16x128xf32>
    %768 = arith.subf %767, %763 : vector<16x128xf32>
    %cst_145 = arith.constant 1.000000e+00 : f32
    %769 = vector.broadcast %cst_145 : f32 to vector<16x128xf32>
    %770 = arith.subf %756, %769 : vector<16x128xf32>
    %771 = arith.mulf %770, %766 : vector<16x128xf32>
    %772 = arith.select %762, %771, %756 : vector<16x128xi1>, vector<16x128xf32>
    %773 = arith.select %758, %768, %772 : vector<16x128xi1>, vector<16x128xf32>
    %cst_146 = arith.constant 0.785398185 : f32
    %cst_147 = arith.constant 0.000000e+00 : f32
    %774 = vector.broadcast %cst_146 : f32 to vector<16x128xf32>
    %775 = vector.broadcast %cst_147 : f32 to vector<16x128xf32>
    %776 = arith.select %762, %774, %775 : vector<16x128xi1>, vector<16x128xf32>
    %cst_148 = arith.constant 1.57079637 : f32
    %777 = vector.broadcast %cst_148 : f32 to vector<16x128xf32>
    %778 = arith.select %758, %777, %776 : vector<16x128xi1>, vector<16x128xf32>
    %779 = arith.mulf %773, %773 : vector<16x128xf32>
    %cst_149 = arith.constant 0.0805374458 : f32
    %780 = vector.broadcast %cst_149 : f32 to vector<16x128xf32>
    %781 = arith.mulf %780, %779 : vector<16x128xf32>
    %cst_150 = arith.constant 0.138776854 : f32
    %782 = vector.broadcast %cst_150 : f32 to vector<16x128xf32>
    %783 = arith.subf %781, %782 : vector<16x128xf32>
    %784 = arith.mulf %783, %779 : vector<16x128xf32>
    %cst_151 = arith.constant 0.199777111 : f32
    %785 = vector.broadcast %cst_151 : f32 to vector<16x128xf32>
    %786 = arith.addf %784, %785 : vector<16x128xf32>
    %787 = arith.mulf %786, %779 : vector<16x128xf32>
    %cst_152 = arith.constant 0.333329499 : f32
    %788 = vector.broadcast %cst_152 : f32 to vector<16x128xf32>
    %789 = arith.subf %787, %788 : vector<16x128xf32>
    %790 = arith.mulf %789, %779 : vector<16x128xf32>
    %791 = arith.mulf %790, %773 : vector<16x128xf32>
    %792 = arith.addf %791, %773 : vector<16x128xf32>
    %793 = arith.addf %778, %792 : vector<16x128xf32>
    %cst_153 = arith.constant 0.000000e+00 : f32
    %794 = vector.broadcast %cst_153 : f32 to vector<16x128xf32>
    %795 = arith.cmpf olt, %755, %794 : vector<16x128xf32>
    %cst_154 = arith.constant 0.000000e+00 : f32
    %796 = vector.broadcast %cst_154 : f32 to vector<16x128xf32>
    %797 = arith.subf %796, %793 : vector<16x128xf32>
    %798 = arith.select %795, %797, %793 : vector<16x128xi1>, vector<16x128xf32>
    %cst_155 = arith.constant 1.57079637 : f32
    %799 = vector.broadcast %cst_155 : f32 to vector<16x128xf32>
    %800 = arith.subf %799, %798 : vector<16x128xf32>
    %801 = arith.mulf %750, %800 : vector<16x128xf32>
    %802 = vector.broadcast %703 : f32 to vector<16x128xf32>
    %803 = arith.mulf %4, %802 : vector<16x128xf32>
    %804 = arith.mulf %803, %801 : vector<16x128xf32>
    %805 = arith.subf %748, %804 : vector<16x128xf32>
    %806 = arith.mulf %748, %803 : vector<16x128xf32>
    %807 = arith.addf %806, %801 : vector<16x128xf32>
    %808 = arith.mulf %731, %6 : vector<16x128xf32>
    %809 = arith.mulf %733, %733 : vector<16x128xf32>
    %810 = arith.mulf %808, %809 : vector<16x128xf32>
    %811 = arith.mulf %732, %733 : vector<16x128xf32>
    %812 = arith.mulf %808, %811 : vector<16x128xf32>
    %813 = arith.mulf %732, %732 : vector<16x128xf32>
    %814 = arith.mulf %808, %813 : vector<16x128xf32>
    %815 = vector.broadcast %704 : f32 to vector<16x128xf32>
    %816 = arith.subf %719, %815 : vector<16x128xf32>
    %cst_156 = arith.constant 2.000000e+00 : f32
    %817 = arith.mulf %cst_156, %700 : f32
    %818 = arith.mulf %717, %805 : vector<16x128xf32>
    %819 = vector.broadcast %817 : f32 to vector<16x128xf32>
    %820 = arith.mulf %819, %818 : vector<16x128xf32>
    %821 = arith.subf %816, %820 : vector<16x128xf32>
    %822 = arith.mulf %805, %805 : vector<16x128xf32>
    %823 = arith.mulf %708, %822 : vector<16x128xf32>
    %824 = arith.addf %821, %823 : vector<16x128xf32>
    %825 = arith.mulf %810, %824 : vector<16x128xf32>
    %826 = arith.subf %719, %7 : vector<16x128xf32>
    %827 = arith.mulf %4, %717 : vector<16x128xf32>
    %cst_157 = arith.constant 2.000000e+00 : f32
    %828 = vector.broadcast %cst_157 : f32 to vector<16x128xf32>
    %829 = arith.mulf %828, %827 : vector<16x128xf32>
    %830 = arith.mulf %829, %807 : vector<16x128xf32>
    %831 = arith.subf %826, %830 : vector<16x128xf32>
    %832 = arith.mulf %807, %807 : vector<16x128xf32>
    %833 = arith.mulf %708, %832 : vector<16x128xf32>
    %834 = arith.addf %831, %833 : vector<16x128xf32>
    %835 = arith.mulf %810, %834 : vector<16x128xf32>
    %836 = arith.mulf %814, %708 : vector<16x128xf32>
    %837 = arith.mulf %708, %805 : vector<16x128xf32>
    %838 = vector.broadcast %700 : f32 to vector<16x128xf32>
    %839 = arith.mulf %838, %717 : vector<16x128xf32>
    %840 = arith.subf %837, %839 : vector<16x128xf32>
    %841 = arith.mulf %812, %840 : vector<16x128xf32>
    %842 = arith.mulf %805, %807 : vector<16x128xf32>
    %843 = arith.mulf %708, %842 : vector<16x128xf32>
    %844 = vector.broadcast %700 : f32 to vector<16x128xf32>
    %845 = arith.mulf %844, %4 : vector<16x128xf32>
    %846 = arith.subf %843, %845 : vector<16x128xf32>
    %847 = vector.broadcast %700 : f32 to vector<16x128xf32>
    %848 = arith.mulf %847, %717 : vector<16x128xf32>
    %849 = arith.mulf %848, %807 : vector<16x128xf32>
    %850 = arith.subf %846, %849 : vector<16x128xf32>
    %851 = arith.mulf %4, %717 : vector<16x128xf32>
    %852 = arith.mulf %851, %805 : vector<16x128xf32>
    %853 = arith.subf %850, %852 : vector<16x128xf32>
    %854 = arith.mulf %810, %853 : vector<16x128xf32>
    %855 = arith.mulf %708, %807 : vector<16x128xf32>
    %856 = arith.mulf %4, %717 : vector<16x128xf32>
    %857 = arith.subf %855, %856 : vector<16x128xf32>
    %858 = arith.mulf %812, %857 : vector<16x128xf32>
    %cst_158 = arith.constant dense<0.000000e+00> : vector<16xf32>
    %859 = vector.multi_reduction <add>, %825, %cst_158 [1] : vector<16x128xf32> to vector<16xf32>
    %860 = vector.shape_cast %859 : vector<16xf32> to vector<16x1xf32>
    %cst_159 = arith.constant dense<0.000000e+00> : vector<1xf32>
    %861 = vector.multi_reduction <add>, %860, %cst_159 [0] : vector<16x1xf32> to vector<1xf32>
    %862 = vector.shape_cast %861 : vector<1xf32> to vector<1x1xf32>
    %863 = vector.broadcast %700 : f32 to vector<1x1xf32>
    %864 = arith.mulf %863, %862 : vector<1x1xf32>
    %cst_160 = arith.constant dense<0.000000e+00> : vector<16xf32>
    %865 = vector.multi_reduction <add>, %835, %cst_160 [1] : vector<16x128xf32> to vector<16xf32>
    %866 = vector.shape_cast %865 : vector<16xf32> to vector<16x1xf32>
    %cst_161 = arith.constant dense<0.000000e+00> : vector<1xf32>
    %867 = vector.multi_reduction <add>, %866, %cst_161 [0] : vector<16x1xf32> to vector<1xf32>
    %868 = vector.shape_cast %867 : vector<1xf32> to vector<1x1xf32>
    %869 = vector.broadcast %700 : f32 to vector<1x1xf32>
    %870 = arith.mulf %869, %868 : vector<1x1xf32>
    %cst_162 = arith.constant dense<0.000000e+00> : vector<16xf32>
    %871 = vector.multi_reduction <add>, %836, %cst_162 [1] : vector<16x128xf32> to vector<16xf32>
    %872 = vector.shape_cast %871 : vector<16xf32> to vector<16x1xf32>
    %cst_163 = arith.constant dense<0.000000e+00> : vector<1xf32>
    %873 = vector.multi_reduction <add>, %872, %cst_163 [0] : vector<16x1xf32> to vector<1xf32>
    %874 = vector.shape_cast %873 : vector<1xf32> to vector<1x1xf32>
    %875 = vector.broadcast %700 : f32 to vector<1x1xf32>
    %876 = arith.mulf %875, %874 : vector<1x1xf32>
    %cst_164 = arith.constant dense<0.000000e+00> : vector<16xf32>
    %877 = vector.multi_reduction <add>, %841, %cst_164 [1] : vector<16x128xf32> to vector<16xf32>
    %878 = vector.shape_cast %877 : vector<16xf32> to vector<16x1xf32>
    %cst_165 = arith.constant dense<0.000000e+00> : vector<1xf32>
    %879 = vector.multi_reduction <add>, %878, %cst_165 [0] : vector<16x1xf32> to vector<1xf32>
    %880 = vector.shape_cast %879 : vector<1xf32> to vector<1x1xf32>
    %881 = vector.broadcast %700 : f32 to vector<1x1xf32>
    %882 = arith.mulf %881, %880 : vector<1x1xf32>
    %cst_166 = arith.constant dense<0.000000e+00> : vector<16xf32>
    %883 = vector.multi_reduction <add>, %854, %cst_166 [1] : vector<16x128xf32> to vector<16xf32>
    %884 = vector.shape_cast %883 : vector<16xf32> to vector<16x1xf32>
    %cst_167 = arith.constant dense<0.000000e+00> : vector<1xf32>
    %885 = vector.multi_reduction <add>, %884, %cst_167 [0] : vector<16x1xf32> to vector<1xf32>
    %886 = vector.shape_cast %885 : vector<1xf32> to vector<1x1xf32>
    %887 = vector.broadcast %700 : f32 to vector<1x1xf32>
    %888 = arith.mulf %887, %886 : vector<1x1xf32>
    %cst_168 = arith.constant dense<0.000000e+00> : vector<16xf32>
    %889 = vector.multi_reduction <add>, %858, %cst_168 [1] : vector<16x128xf32> to vector<16xf32>
    %890 = vector.shape_cast %889 : vector<16xf32> to vector<16x1xf32>
    %cst_169 = arith.constant dense<0.000000e+00> : vector<1xf32>
    %891 = vector.multi_reduction <add>, %890, %cst_169 [0] : vector<16x1xf32> to vector<1xf32>
    %892 = vector.shape_cast %891 : vector<1xf32> to vector<1x1xf32>
    %893 = vector.broadcast %700 : f32 to vector<1x1xf32>
    %894 = arith.mulf %893, %892 : vector<1x1xf32>
    %cst_170 = arith.constant 0.000000e+00 : f32
    %895 = vector.broadcast %cst_170 : f32 to vector<1x8xf32>
    %c0_i32_171 = arith.constant 0 : i32
    %896 = vector.broadcast %c0_i32_171 : i32 to vector<1x8xi32>
    %897 = arith.cmpi eq, %10, %896 : vector<1x8xi32>
    %898 = vector.shape_cast %864 : vector<1x1xf32> to vector<1x1xf32>
    %899 = vector.broadcast %898 : vector<1x1xf32> to vector<1x8xf32>
    %900 = arith.select %897, %899, %895 : vector<1x8xi1>, vector<1x8xf32>
    %c1_i32_172 = arith.constant 1 : i32
    %901 = vector.broadcast %c1_i32_172 : i32 to vector<1x8xi32>
    %902 = arith.cmpi eq, %10, %901 : vector<1x8xi32>
    %903 = vector.shape_cast %870 : vector<1x1xf32> to vector<1x1xf32>
    %904 = vector.broadcast %903 : vector<1x1xf32> to vector<1x8xf32>
    %905 = arith.select %902, %904, %900 : vector<1x8xi1>, vector<1x8xf32>
    %c2_i32_173 = arith.constant 2 : i32
    %906 = vector.broadcast %c2_i32_173 : i32 to vector<1x8xi32>
    %907 = arith.cmpi eq, %10, %906 : vector<1x8xi32>
    %908 = vector.shape_cast %876 : vector<1x1xf32> to vector<1x1xf32>
    %909 = vector.broadcast %908 : vector<1x1xf32> to vector<1x8xf32>
    %910 = arith.select %907, %909, %905 : vector<1x8xi1>, vector<1x8xf32>
    %c3_i32_174 = arith.constant 3 : i32
    %911 = vector.broadcast %c3_i32_174 : i32 to vector<1x8xi32>
    %912 = arith.cmpi eq, %10, %911 : vector<1x8xi32>
    %913 = vector.shape_cast %882 : vector<1x1xf32> to vector<1x1xf32>
    %914 = vector.broadcast %913 : vector<1x1xf32> to vector<1x8xf32>
    %915 = arith.select %912, %914, %910 : vector<1x8xi1>, vector<1x8xf32>
    %c4_i32_175 = arith.constant 4 : i32
    %916 = vector.broadcast %c4_i32_175 : i32 to vector<1x8xi32>
    %917 = arith.cmpi eq, %10, %916 : vector<1x8xi32>
    %918 = vector.shape_cast %888 : vector<1x1xf32> to vector<1x1xf32>
    %919 = vector.broadcast %918 : vector<1x1xf32> to vector<1x8xf32>
    %920 = arith.select %917, %919, %915 : vector<1x8xi1>, vector<1x8xf32>
    %c5_i32_176 = arith.constant 5 : i32
    %921 = vector.broadcast %c5_i32_176 : i32 to vector<1x8xi32>
    %922 = arith.cmpi eq, %10, %921 : vector<1x8xi32>
    %923 = vector.shape_cast %894 : vector<1x1xf32> to vector<1x1xf32>
    %924 = vector.broadcast %923 : vector<1x1xf32> to vector<1x8xf32>
    %925 = arith.select %922, %924, %920 : vector<1x8xi1>, vector<1x8xf32>
    %c3 = arith.constant 3 : index
    %c0_177 = arith.constant 0 : index
    %926 = vector.load %arg7[%c3, %c0_177] : memref<8x8xf32, #tpu.memory_space<vmem>>, vector<1x8xf32>
    tpu.vector_store %arg7[%c3, %c0_177], %925 {strides = array<i32>} : memref<8x8xf32, #tpu.memory_space<vmem>>, vector<1x8xf32>,
    %c4_i32_178 = arith.constant 4 : i32
    %927 = arith.addi %3, %c4_i32_178 : i32
    %928 = arith.index_cast %927 : i32 to index
    %929 = memref.load %arg2[%928] : memref<8xf32, #tpu.memory_space<smem>>
    %c4_i32_179 = arith.constant 4 : i32
    %930 = arith.addi %3, %c4_i32_179 : i32
    %931 = arith.index_cast %930 : i32 to index
    %932 = memref.load %arg3[%931] : memref<8xf32, #tpu.memory_space<smem>>
    %933 = arith.mulf %929, %929 : f32
    %934 = vector.broadcast %933 : f32 to vector<16x128xf32>
    %935 = arith.addf %934, %9 : vector<16x128xf32>
    %936 = vector.broadcast %933 : f32 to vector<16x128xf32>
    %937 = arith.addf %936, %7 : vector<16x128xf32>
    %938 = math.log %935 : vector<16x128xf32>
    %cst_180 = arith.constant -0.333333343 : f32
    %939 = vector.broadcast %cst_180 : f32 to vector<16x128xf32>
    %940 = arith.mulf %938, %939 : vector<16x128xf32>
    %941 = math.exp %940 : vector<16x128xf32>
    %942 = vector.broadcast %0 : f32 to vector<16x128xf32>
    %943 = arith.mulf %942, %941 : vector<16x128xf32>
    %944 = vector.broadcast %929 : f32 to vector<16x128xf32>
    %945 = arith.mulf %943, %944 : vector<16x128xf32>
    %946 = arith.addf %5, %945 : vector<16x128xf32>
    %947 = arith.mulf %946, %946 : vector<16x128xf32>
    %948 = arith.addf %937, %947 : vector<16x128xf32>
    %949 = arith.mulf %948, %948 : vector<16x128xf32>
    %950 = vector.broadcast %1 : f32 to vector<16x128xf32>
    %951 = arith.mulf %950, %949 : vector<16x128xf32>
    %952 = vector.broadcast %2 : f32 to vector<16x128xf32>
    %953 = arith.mulf %952, %948 : vector<16x128xf32>
    %cst_181 = arith.constant 1.000000e+00 : f32
    %954 = vector.broadcast %cst_181 : f32 to vector<16x128xf32>
    %955 = arith.addf %954, %953 : vector<16x128xf32>
    %956 = math.log %955 : vector<16x128xf32>
    %cst_182 = arith.constant -2.83333325 : f32
    %957 = vector.broadcast %cst_182 : f32 to vector<16x128xf32>
    %958 = arith.mulf %956, %957 : vector<16x128xf32>
    %959 = math.exp %958 : vector<16x128xf32>
    %960 = arith.mulf %951, %959 : vector<16x128xf32>
    %961 = tpu.reciprocal %935 : vector<16x128xf32> -> vector<16x128xf32>
    %962 = tpu.reciprocal %948 : vector<16x128xf32> -> vector<16x128xf32>
    %963 = math.rsqrt %937 : vector<16x128xf32>
    %964 = arith.mulf %937, %963 : vector<16x128xf32>
    %965 = arith.mulf %963, %963 : vector<16x128xf32>
    %966 = arith.mulf %963, %965 : vector<16x128xf32>
    %967 = vector.broadcast %933 : f32 to vector<16x128xf32>
    %968 = arith.mulf %943, %967 : vector<16x128xf32>
    %cst_183 = arith.constant 2.000000e+00 : f32
    %969 = vector.broadcast %cst_183 : f32 to vector<16x128xf32>
    %970 = arith.mulf %969, %946 : vector<16x128xf32>
    %971 = arith.mulf %970, %946 : vector<16x128xf32>
    %972 = arith.subf %948, %971 : vector<16x128xf32>
    %973 = arith.mulf %945, %946 : vector<16x128xf32>
    %974 = arith.addf %972, %973 : vector<16x128xf32>
    %975 = arith.mulf %968, %974 : vector<16x128xf32>
    %976 = arith.mulf %961, %965 : vector<16x128xf32>
    %977 = arith.mulf %975, %976 : vector<16x128xf32>
    %978 = arith.mulf %4, %948 : vector<16x128xf32>
    %979 = arith.mulf %978, %966 : vector<16x128xf32>
    %980 = arith.mulf %945, %964 : vector<16x128xf32>
    %981 = arith.mulf %946, %945 : vector<16x128xf32>
    %982 = arith.subf %948, %981 : vector<16x128xf32>
    %983 = tpu.reciprocal %980 {approx = true} : vector<16x128xf32> -> vector<16x128xf32>
    %984 = arith.mulf %982, %983 : vector<16x128xf32>
    %985 = math.absf %984 : vector<16x128xf32>
    %cst_184 = arith.constant 2.41421366 : f32
    %986 = vector.broadcast %cst_184 : f32 to vector<16x128xf32>
    %987 = arith.cmpf ogt, %985, %986 : vector<16x128xf32>
    %cst_185 = arith.constant 0.414213568 : f32
    %988 = vector.broadcast %cst_185 : f32 to vector<16x128xf32>
    %989 = arith.cmpf ogt, %985, %988 : vector<16x128xf32>
    %cst_186 = arith.constant dense<true> : vector<16x128xi1>
    %990 = arith.xori %987, %cst_186 : vector<16x128xi1>
    %991 = arith.andi %989, %990 : vector<16x128xi1>
    %992 = tpu.reciprocal %985 {approx = true} : vector<16x128xf32> -> vector<16x128xf32>
    %cst_187 = arith.constant 1.000000e+00 : f32
    %993 = vector.broadcast %cst_187 : f32 to vector<16x128xf32>
    %994 = arith.addf %985, %993 : vector<16x128xf32>
    %995 = tpu.reciprocal %994 {approx = true} : vector<16x128xf32> -> vector<16x128xf32>
    %cst_188 = arith.constant 0.000000e+00 : f32
    %996 = vector.broadcast %cst_188 : f32 to vector<16x128xf32>
    %997 = arith.subf %996, %992 : vector<16x128xf32>
    %cst_189 = arith.constant 1.000000e+00 : f32
    %998 = vector.broadcast %cst_189 : f32 to vector<16x128xf32>
    %999 = arith.subf %985, %998 : vector<16x128xf32>
    %1000 = arith.mulf %999, %995 : vector<16x128xf32>
    %1001 = arith.select %991, %1000, %985 : vector<16x128xi1>, vector<16x128xf32>
    %1002 = arith.select %987, %997, %1001 : vector<16x128xi1>, vector<16x128xf32>
    %cst_190 = arith.constant 0.785398185 : f32
    %cst_191 = arith.constant 0.000000e+00 : f32
    %1003 = vector.broadcast %cst_190 : f32 to vector<16x128xf32>
    %1004 = vector.broadcast %cst_191 : f32 to vector<16x128xf32>
    %1005 = arith.select %991, %1003, %1004 : vector<16x128xi1>, vector<16x128xf32>
    %cst_192 = arith.constant 1.57079637 : f32
    %1006 = vector.broadcast %cst_192 : f32 to vector<16x128xf32>
    %1007 = arith.select %987, %1006, %1005 : vector<16x128xi1>, vector<16x128xf32>
    %1008 = arith.mulf %1002, %1002 : vector<16x128xf32>
    %cst_193 = arith.constant 0.0805374458 : f32
    %1009 = vector.broadcast %cst_193 : f32 to vector<16x128xf32>
    %1010 = arith.mulf %1009, %1008 : vector<16x128xf32>
    %cst_194 = arith.constant 0.138776854 : f32
    %1011 = vector.broadcast %cst_194 : f32 to vector<16x128xf32>
    %1012 = arith.subf %1010, %1011 : vector<16x128xf32>
    %1013 = arith.mulf %1012, %1008 : vector<16x128xf32>
    %cst_195 = arith.constant 0.199777111 : f32
    %1014 = vector.broadcast %cst_195 : f32 to vector<16x128xf32>
    %1015 = arith.addf %1013, %1014 : vector<16x128xf32>
    %1016 = arith.mulf %1015, %1008 : vector<16x128xf32>
    %cst_196 = arith.constant 0.333329499 : f32
    %1017 = vector.broadcast %cst_196 : f32 to vector<16x128xf32>
    %1018 = arith.subf %1016, %1017 : vector<16x128xf32>
    %1019 = arith.mulf %1018, %1008 : vector<16x128xf32>
    %1020 = arith.mulf %1019, %1002 : vector<16x128xf32>
    %1021 = arith.addf %1020, %1002 : vector<16x128xf32>
    %1022 = arith.addf %1007, %1021 : vector<16x128xf32>
    %cst_197 = arith.constant 0.000000e+00 : f32
    %1023 = vector.broadcast %cst_197 : f32 to vector<16x128xf32>
    %1024 = arith.cmpf olt, %984, %1023 : vector<16x128xf32>
    %cst_198 = arith.constant 0.000000e+00 : f32
    %1025 = vector.broadcast %cst_198 : f32 to vector<16x128xf32>
    %1026 = arith.subf %1025, %1022 : vector<16x128xf32>
    %1027 = arith.select %1024, %1026, %1022 : vector<16x128xi1>, vector<16x128xf32>
    %cst_199 = arith.constant 1.57079637 : f32
    %1028 = vector.broadcast %cst_199 : f32 to vector<16x128xf32>
    %1029 = arith.subf %1028, %1027 : vector<16x128xf32>
    %1030 = arith.mulf %979, %1029 : vector<16x128xf32>
    %1031 = vector.broadcast %932 : f32 to vector<16x128xf32>
    %1032 = arith.mulf %4, %1031 : vector<16x128xf32>
    %1033 = arith.mulf %1032, %1030 : vector<16x128xf32>
    %1034 = arith.subf %977, %1033 : vector<16x128xf32>
    %1035 = arith.mulf %977, %1032 : vector<16x128xf32>
    %1036 = arith.addf %1035, %1030 : vector<16x128xf32>
    %1037 = arith.mulf %960, %6 : vector<16x128xf32>
    %1038 = arith.mulf %962, %962 : vector<16x128xf32>
    %1039 = arith.mulf %1037, %1038 : vector<16x128xf32>
    %1040 = arith.mulf %961, %962 : vector<16x128xf32>
    %1041 = arith.mulf %1037, %1040 : vector<16x128xf32>
    %1042 = arith.mulf %961, %961 : vector<16x128xf32>
    %1043 = arith.mulf %1037, %1042 : vector<16x128xf32>
    %1044 = vector.broadcast %933 : f32 to vector<16x128xf32>
    %1045 = arith.subf %948, %1044 : vector<16x128xf32>
    %cst_200 = arith.constant 2.000000e+00 : f32
    %1046 = arith.mulf %cst_200, %929 : f32
    %1047 = arith.mulf %946, %1034 : vector<16x128xf32>
    %1048 = vector.broadcast %1046 : f32 to vector<16x128xf32>
    %1049 = arith.mulf %1048, %1047 : vector<16x128xf32>
    %1050 = arith.subf %1045, %1049 : vector<16x128xf32>
    %1051 = arith.mulf %1034, %1034 : vector<16x128xf32>
    %1052 = arith.mulf %937, %1051 : vector<16x128xf32>
    %1053 = arith.addf %1050, %1052 : vector<16x128xf32>
    %1054 = arith.mulf %1039, %1053 : vector<16x128xf32>
    %1055 = arith.subf %948, %7 : vector<16x128xf32>
    %1056 = arith.mulf %4, %946 : vector<16x128xf32>
    %cst_201 = arith.constant 2.000000e+00 : f32
    %1057 = vector.broadcast %cst_201 : f32 to vector<16x128xf32>
    %1058 = arith.mulf %1057, %1056 : vector<16x128xf32>
    %1059 = arith.mulf %1058, %1036 : vector<16x128xf32>
    %1060 = arith.subf %1055, %1059 : vector<16x128xf32>
    %1061 = arith.mulf %1036, %1036 : vector<16x128xf32>
    %1062 = arith.mulf %937, %1061 : vector<16x128xf32>
    %1063 = arith.addf %1060, %1062 : vector<16x128xf32>
    %1064 = arith.mulf %1039, %1063 : vector<16x128xf32>
    %1065 = arith.mulf %1043, %937 : vector<16x128xf32>
    %1066 = arith.mulf %937, %1034 : vector<16x128xf32>
    %1067 = vector.broadcast %929 : f32 to vector<16x128xf32>
    %1068 = arith.mulf %1067, %946 : vector<16x128xf32>
    %1069 = arith.subf %1066, %1068 : vector<16x128xf32>
    %1070 = arith.mulf %1041, %1069 : vector<16x128xf32>
    %1071 = arith.mulf %1034, %1036 : vector<16x128xf32>
    %1072 = arith.mulf %937, %1071 : vector<16x128xf32>
    %1073 = vector.broadcast %929 : f32 to vector<16x128xf32>
    %1074 = arith.mulf %1073, %4 : vector<16x128xf32>
    %1075 = arith.subf %1072, %1074 : vector<16x128xf32>
    %1076 = vector.broadcast %929 : f32 to vector<16x128xf32>
    %1077 = arith.mulf %1076, %946 : vector<16x128xf32>
    %1078 = arith.mulf %1077, %1036 : vector<16x128xf32>
    %1079 = arith.subf %1075, %1078 : vector<16x128xf32>
    %1080 = arith.mulf %4, %946 : vector<16x128xf32>
    %1081 = arith.mulf %1080, %1034 : vector<16x128xf32>
    %1082 = arith.subf %1079, %1081 : vector<16x128xf32>
    %1083 = arith.mulf %1039, %1082 : vector<16x128xf32>
    %1084 = arith.mulf %937, %1036 : vector<16x128xf32>
    %1085 = arith.mulf %4, %946 : vector<16x128xf32>
    %1086 = arith.subf %1084, %1085 : vector<16x128xf32>
    %1087 = arith.mulf %1041, %1086 : vector<16x128xf32>
    %cst_202 = arith.constant dense<0.000000e+00> : vector<16xf32>
    %1088 = vector.multi_reduction <add>, %1054, %cst_202 [1] : vector<16x128xf32> to vector<16xf32>
    %1089 = vector.shape_cast %1088 : vector<16xf32> to vector<16x1xf32>
    %cst_203 = arith.constant dense<0.000000e+00> : vector<1xf32>
    %1090 = vector.multi_reduction <add>, %1089, %cst_203 [0] : vector<16x1xf32> to vector<1xf32>
    %1091 = vector.shape_cast %1090 : vector<1xf32> to vector<1x1xf32>
    %1092 = vector.broadcast %929 : f32 to vector<1x1xf32>
    %1093 = arith.mulf %1092, %1091 : vector<1x1xf32>
    %cst_204 = arith.constant dense<0.000000e+00> : vector<16xf32>
    %1094 = vector.multi_reduction <add>, %1064, %cst_204 [1] : vector<16x128xf32> to vector<16xf32>
    %1095 = vector.shape_cast %1094 : vector<16xf32> to vector<16x1xf32>
    %cst_205 = arith.constant dense<0.000000e+00> : vector<1xf32>
    %1096 = vector.multi_reduction <add>, %1095, %cst_205 [0] : vector<16x1xf32> to vector<1xf32>
    %1097 = vector.shape_cast %1096 : vector<1xf32> to vector<1x1xf32>
    %1098 = vector.broadcast %929 : f32 to vector<1x1xf32>
    %1099 = arith.mulf %1098, %1097 : vector<1x1xf32>
    %cst_206 = arith.constant dense<0.000000e+00> : vector<16xf32>
    %1100 = vector.multi_reduction <add>, %1065, %cst_206 [1] : vector<16x128xf32> to vector<16xf32>
    %1101 = vector.shape_cast %1100 : vector<16xf32> to vector<16x1xf32>
    %cst_207 = arith.constant dense<0.000000e+00> : vector<1xf32>
    %1102 = vector.multi_reduction <add>, %1101, %cst_207 [0] : vector<16x1xf32> to vector<1xf32>
    %1103 = vector.shape_cast %1102 : vector<1xf32> to vector<1x1xf32>
    %1104 = vector.broadcast %929 : f32 to vector<1x1xf32>
    %1105 = arith.mulf %1104, %1103 : vector<1x1xf32>
    %cst_208 = arith.constant dense<0.000000e+00> : vector<16xf32>
    %1106 = vector.multi_reduction <add>, %1070, %cst_208 [1] : vector<16x128xf32> to vector<16xf32>
    %1107 = vector.shape_cast %1106 : vector<16xf32> to vector<16x1xf32>
    %cst_209 = arith.constant dense<0.000000e+00> : vector<1xf32>
    %1108 = vector.multi_reduction <add>, %1107, %cst_209 [0] : vector<16x1xf32> to vector<1xf32>
    %1109 = vector.shape_cast %1108 : vector<1xf32> to vector<1x1xf32>
    %1110 = vector.broadcast %929 : f32 to vector<1x1xf32>
    %1111 = arith.mulf %1110, %1109 : vector<1x1xf32>
    %cst_210 = arith.constant dense<0.000000e+00> : vector<16xf32>
    %1112 = vector.multi_reduction <add>, %1083, %cst_210 [1] : vector<16x128xf32> to vector<16xf32>
    %1113 = vector.shape_cast %1112 : vector<16xf32> to vector<16x1xf32>
    %cst_211 = arith.constant dense<0.000000e+00> : vector<1xf32>
    %1114 = vector.multi_reduction <add>, %1113, %cst_211 [0] : vector<16x1xf32> to vector<1xf32>
    %1115 = vector.shape_cast %1114 : vector<1xf32> to vector<1x1xf32>
    %1116 = vector.broadcast %929 : f32 to vector<1x1xf32>
    %1117 = arith.mulf %1116, %1115 : vector<1x1xf32>
    %cst_212 = arith.constant dense<0.000000e+00> : vector<16xf32>
    %1118 = vector.multi_reduction <add>, %1087, %cst_212 [1] : vector<16x128xf32> to vector<16xf32>
    %1119 = vector.shape_cast %1118 : vector<16xf32> to vector<16x1xf32>
    %cst_213 = arith.constant dense<0.000000e+00> : vector<1xf32>
    %1120 = vector.multi_reduction <add>, %1119, %cst_213 [0] : vector<16x1xf32> to vector<1xf32>
    %1121 = vector.shape_cast %1120 : vector<1xf32> to vector<1x1xf32>
    %1122 = vector.broadcast %929 : f32 to vector<1x1xf32>
    %1123 = arith.mulf %1122, %1121 : vector<1x1xf32>
    %cst_214 = arith.constant 0.000000e+00 : f32
    %1124 = vector.broadcast %cst_214 : f32 to vector<1x8xf32>
    %c0_i32_215 = arith.constant 0 : i32
    %1125 = vector.broadcast %c0_i32_215 : i32 to vector<1x8xi32>
    %1126 = arith.cmpi eq, %10, %1125 : vector<1x8xi32>
    %1127 = vector.shape_cast %1093 : vector<1x1xf32> to vector<1x1xf32>
    %1128 = vector.broadcast %1127 : vector<1x1xf32> to vector<1x8xf32>
    %1129 = arith.select %1126, %1128, %1124 : vector<1x8xi1>, vector<1x8xf32>
    %c1_i32_216 = arith.constant 1 : i32
    %1130 = vector.broadcast %c1_i32_216 : i32 to vector<1x8xi32>
    %1131 = arith.cmpi eq, %10, %1130 : vector<1x8xi32>
    %1132 = vector.shape_cast %1099 : vector<1x1xf32> to vector<1x1xf32>
    %1133 = vector.broadcast %1132 : vector<1x1xf32> to vector<1x8xf32>
    %1134 = arith.select %1131, %1133, %1129 : vector<1x8xi1>, vector<1x8xf32>
    %c2_i32_217 = arith.constant 2 : i32
    %1135 = vector.broadcast %c2_i32_217 : i32 to vector<1x8xi32>
    %1136 = arith.cmpi eq, %10, %1135 : vector<1x8xi32>
    %1137 = vector.shape_cast %1105 : vector<1x1xf32> to vector<1x1xf32>
    %1138 = vector.broadcast %1137 : vector<1x1xf32> to vector<1x8xf32>
    %1139 = arith.select %1136, %1138, %1134 : vector<1x8xi1>, vector<1x8xf32>
    %c3_i32_218 = arith.constant 3 : i32
    %1140 = vector.broadcast %c3_i32_218 : i32 to vector<1x8xi32>
    %1141 = arith.cmpi eq, %10, %1140 : vector<1x8xi32>
    %1142 = vector.shape_cast %1111 : vector<1x1xf32> to vector<1x1xf32>
    %1143 = vector.broadcast %1142 : vector<1x1xf32> to vector<1x8xf32>
    %1144 = arith.select %1141, %1143, %1139 : vector<1x8xi1>, vector<1x8xf32>
    %c4_i32_219 = arith.constant 4 : i32
    %1145 = vector.broadcast %c4_i32_219 : i32 to vector<1x8xi32>
    %1146 = arith.cmpi eq, %10, %1145 : vector<1x8xi32>
    %1147 = vector.shape_cast %1117 : vector<1x1xf32> to vector<1x1xf32>
    %1148 = vector.broadcast %1147 : vector<1x1xf32> to vector<1x8xf32>
    %1149 = arith.select %1146, %1148, %1144 : vector<1x8xi1>, vector<1x8xf32>
    %c5_i32_220 = arith.constant 5 : i32
    %1150 = vector.broadcast %c5_i32_220 : i32 to vector<1x8xi32>
    %1151 = arith.cmpi eq, %10, %1150 : vector<1x8xi32>
    %1152 = vector.shape_cast %1123 : vector<1x1xf32> to vector<1x1xf32>
    %1153 = vector.broadcast %1152 : vector<1x1xf32> to vector<1x8xf32>
    %1154 = arith.select %1151, %1153, %1149 : vector<1x8xi1>, vector<1x8xf32>
    %c4 = arith.constant 4 : index
    %c0_221 = arith.constant 0 : index
    %1155 = vector.load %arg7[%c4, %c0_221] : memref<8x8xf32, #tpu.memory_space<vmem>>, vector<1x8xf32>
    tpu.vector_store %arg7[%c4, %c0_221], %1154 {strides = array<i32>} : memref<8x8xf32, #tpu.memory_space<vmem>>, vector<1x8xf32>,
    %c5_i32_222 = arith.constant 5 : i32
    %1156 = arith.addi %3, %c5_i32_222 : i32
    %1157 = arith.index_cast %1156 : i32 to index
    %1158 = memref.load %arg2[%1157] : memref<8xf32, #tpu.memory_space<smem>>
    %c5_i32_223 = arith.constant 5 : i32
    %1159 = arith.addi %3, %c5_i32_223 : i32
    %1160 = arith.index_cast %1159 : i32 to index
    %1161 = memref.load %arg3[%1160] : memref<8xf32, #tpu.memory_space<smem>>
    %1162 = arith.mulf %1158, %1158 : f32
    %1163 = vector.broadcast %1162 : f32 to vector<16x128xf32>
    %1164 = arith.addf %1163, %9 : vector<16x128xf32>
    %1165 = vector.broadcast %1162 : f32 to vector<16x128xf32>
    %1166 = arith.addf %1165, %7 : vector<16x128xf32>
    %1167 = math.log %1164 : vector<16x128xf32>
    %cst_224 = arith.constant -0.333333343 : f32
    %1168 = vector.broadcast %cst_224 : f32 to vector<16x128xf32>
    %1169 = arith.mulf %1167, %1168 : vector<16x128xf32>
    %1170 = math.exp %1169 : vector<16x128xf32>
    %1171 = vector.broadcast %0 : f32 to vector<16x128xf32>
    %1172 = arith.mulf %1171, %1170 : vector<16x128xf32>
    %1173 = vector.broadcast %1158 : f32 to vector<16x128xf32>
    %1174 = arith.mulf %1172, %1173 : vector<16x128xf32>
    %1175 = arith.addf %5, %1174 : vector<16x128xf32>
    %1176 = arith.mulf %1175, %1175 : vector<16x128xf32>
    %1177 = arith.addf %1166, %1176 : vector<16x128xf32>
    %1178 = arith.mulf %1177, %1177 : vector<16x128xf32>
    %1179 = vector.broadcast %1 : f32 to vector<16x128xf32>
    %1180 = arith.mulf %1179, %1178 : vector<16x128xf32>
    %1181 = vector.broadcast %2 : f32 to vector<16x128xf32>
    %1182 = arith.mulf %1181, %1177 : vector<16x128xf32>
    %cst_225 = arith.constant 1.000000e+00 : f32
    %1183 = vector.broadcast %cst_225 : f32 to vector<16x128xf32>
    %1184 = arith.addf %1183, %1182 : vector<16x128xf32>
    %1185 = math.log %1184 : vector<16x128xf32>
    %cst_226 = arith.constant -2.83333325 : f32
    %1186 = vector.broadcast %cst_226 : f32 to vector<16x128xf32>
    %1187 = arith.mulf %1185, %1186 : vector<16x128xf32>
    %1188 = math.exp %1187 : vector<16x128xf32>
    %1189 = arith.mulf %1180, %1188 : vector<16x128xf32>
    %1190 = tpu.reciprocal %1164 : vector<16x128xf32> -> vector<16x128xf32>
    %1191 = tpu.reciprocal %1177 : vector<16x128xf32> -> vector<16x128xf32>
    %1192 = math.rsqrt %1166 : vector<16x128xf32>
    %1193 = arith.mulf %1166, %1192 : vector<16x128xf32>
    %1194 = arith.mulf %1192, %1192 : vector<16x128xf32>
    %1195 = arith.mulf %1192, %1194 : vector<16x128xf32>
    %1196 = vector.broadcast %1162 : f32 to vector<16x128xf32>
    %1197 = arith.mulf %1172, %1196 : vector<16x128xf32>
    %cst_227 = arith.constant 2.000000e+00 : f32
    %1198 = vector.broadcast %cst_227 : f32 to vector<16x128xf32>
    %1199 = arith.mulf %1198, %1175 : vector<16x128xf32>
    %1200 = arith.mulf %1199, %1175 : vector<16x128xf32>
    %1201 = arith.subf %1177, %1200 : vector<16x128xf32>
    %1202 = arith.mulf %1174, %1175 : vector<16x128xf32>
    %1203 = arith.addf %1201, %1202 : vector<16x128xf32>
    %1204 = arith.mulf %1197, %1203 : vector<16x128xf32>
    %1205 = arith.mulf %1190, %1194 : vector<16x128xf32>
    %1206 = arith.mulf %1204, %1205 : vector<16x128xf32>
    %1207 = arith.mulf %4, %1177 : vector<16x128xf32>
    %1208 = arith.mulf %1207, %1195 : vector<16x128xf32>
    %1209 = arith.mulf %1174, %1193 : vector<16x128xf32>
    %1210 = arith.mulf %1175, %1174 : vector<16x128xf32>
    %1211 = arith.subf %1177, %1210 : vector<16x128xf32>
    %1212 = tpu.reciprocal %1209 {approx = true} : vector<16x128xf32> -> vector<16x128xf32>
    %1213 = arith.mulf %1211, %1212 : vector<16x128xf32>
    %1214 = math.absf %1213 : vector<16x128xf32>
    %cst_228 = arith.constant 2.41421366 : f32
    %1215 = vector.broadcast %cst_228 : f32 to vector<16x128xf32>
    %1216 = arith.cmpf ogt, %1214, %1215 : vector<16x128xf32>
    %cst_229 = arith.constant 0.414213568 : f32
    %1217 = vector.broadcast %cst_229 : f32 to vector<16x128xf32>
    %1218 = arith.cmpf ogt, %1214, %1217 : vector<16x128xf32>
    %cst_230 = arith.constant dense<true> : vector<16x128xi1>
    %1219 = arith.xori %1216, %cst_230 : vector<16x128xi1>
    %1220 = arith.andi %1218, %1219 : vector<16x128xi1>
    %1221 = tpu.reciprocal %1214 {approx = true} : vector<16x128xf32> -> vector<16x128xf32>
    %cst_231 = arith.constant 1.000000e+00 : f32
    %1222 = vector.broadcast %cst_231 : f32 to vector<16x128xf32>
    %1223 = arith.addf %1214, %1222 : vector<16x128xf32>
    %1224 = tpu.reciprocal %1223 {approx = true} : vector<16x128xf32> -> vector<16x128xf32>
    %cst_232 = arith.constant 0.000000e+00 : f32
    %1225 = vector.broadcast %cst_232 : f32 to vector<16x128xf32>
    %1226 = arith.subf %1225, %1221 : vector<16x128xf32>
    %cst_233 = arith.constant 1.000000e+00 : f32
    %1227 = vector.broadcast %cst_233 : f32 to vector<16x128xf32>
    %1228 = arith.subf %1214, %1227 : vector<16x128xf32>
    %1229 = arith.mulf %1228, %1224 : vector<16x128xf32>
    %1230 = arith.select %1220, %1229, %1214 : vector<16x128xi1>, vector<16x128xf32>
    %1231 = arith.select %1216, %1226, %1230 : vector<16x128xi1>, vector<16x128xf32>
    %cst_234 = arith.constant 0.785398185 : f32
    %cst_235 = arith.constant 0.000000e+00 : f32
    %1232 = vector.broadcast %cst_234 : f32 to vector<16x128xf32>
    %1233 = vector.broadcast %cst_235 : f32 to vector<16x128xf32>
    %1234 = arith.select %1220, %1232, %1233 : vector<16x128xi1>, vector<16x128xf32>
    %cst_236 = arith.constant 1.57079637 : f32
    %1235 = vector.broadcast %cst_236 : f32 to vector<16x128xf32>
    %1236 = arith.select %1216, %1235, %1234 : vector<16x128xi1>, vector<16x128xf32>
    %1237 = arith.mulf %1231, %1231 : vector<16x128xf32>
    %cst_237 = arith.constant 0.0805374458 : f32
    %1238 = vector.broadcast %cst_237 : f32 to vector<16x128xf32>
    %1239 = arith.mulf %1238, %1237 : vector<16x128xf32>
    %cst_238 = arith.constant 0.138776854 : f32
    %1240 = vector.broadcast %cst_238 : f32 to vector<16x128xf32>
    %1241 = arith.subf %1239, %1240 : vector<16x128xf32>
    %1242 = arith.mulf %1241, %1237 : vector<16x128xf32>
    %cst_239 = arith.constant 0.199777111 : f32
    %1243 = vector.broadcast %cst_239 : f32 to vector<16x128xf32>
    %1244 = arith.addf %1242, %1243 : vector<16x128xf32>
    %1245 = arith.mulf %1244, %1237 : vector<16x128xf32>
    %cst_240 = arith.constant 0.333329499 : f32
    %1246 = vector.broadcast %cst_240 : f32 to vector<16x128xf32>
    %1247 = arith.subf %1245, %1246 : vector<16x128xf32>
    %1248 = arith.mulf %1247, %1237 : vector<16x128xf32>
    %1249 = arith.mulf %1248, %1231 : vector<16x128xf32>
    %1250 = arith.addf %1249, %1231 : vector<16x128xf32>
    %1251 = arith.addf %1236, %1250 : vector<16x128xf32>
    %cst_241 = arith.constant 0.000000e+00 : f32
    %1252 = vector.broadcast %cst_241 : f32 to vector<16x128xf32>
    %1253 = arith.cmpf olt, %1213, %1252 : vector<16x128xf32>
    %cst_242 = arith.constant 0.000000e+00 : f32
    %1254 = vector.broadcast %cst_242 : f32 to vector<16x128xf32>
    %1255 = arith.subf %1254, %1251 : vector<16x128xf32>
    %1256 = arith.select %1253, %1255, %1251 : vector<16x128xi1>, vector<16x128xf32>
    %cst_243 = arith.constant 1.57079637 : f32
    %1257 = vector.broadcast %cst_243 : f32 to vector<16x128xf32>
    %1258 = arith.subf %1257, %1256 : vector<16x128xf32>
    %1259 = arith.mulf %1208, %1258 : vector<16x128xf32>
    %1260 = vector.broadcast %1161 : f32 to vector<16x128xf32>
    %1261 = arith.mulf %4, %1260 : vector<16x128xf32>
    %1262 = arith.mulf %1261, %1259 : vector<16x128xf32>
    %1263 = arith.subf %1206, %1262 : vector<16x128xf32>
    %1264 = arith.mulf %1206, %1261 : vector<16x128xf32>
    %1265 = arith.addf %1264, %1259 : vector<16x128xf32>
    %1266 = arith.mulf %1189, %6 : vector<16x128xf32>
    %1267 = arith.mulf %1191, %1191 : vector<16x128xf32>
    %1268 = arith.mulf %1266, %1267 : vector<16x128xf32>
    %1269 = arith.mulf %1190, %1191 : vector<16x128xf32>
    %1270 = arith.mulf %1266, %1269 : vector<16x128xf32>
    %1271 = arith.mulf %1190, %1190 : vector<16x128xf32>
    %1272 = arith.mulf %1266, %1271 : vector<16x128xf32>
    %1273 = vector.broadcast %1162 : f32 to vector<16x128xf32>
    %1274 = arith.subf %1177, %1273 : vector<16x128xf32>
    %cst_244 = arith.constant 2.000000e+00 : f32
    %1275 = arith.mulf %cst_244, %1158 : f32
    %1276 = arith.mulf %1175, %1263 : vector<16x128xf32>
    %1277 = vector.broadcast %1275 : f32 to vector<16x128xf32>
    %1278 = arith.mulf %1277, %1276 : vector<16x128xf32>
    %1279 = arith.subf %1274, %1278 : vector<16x128xf32>
    %1280 = arith.mulf %1263, %1263 : vector<16x128xf32>
    %1281 = arith.mulf %1166, %1280 : vector<16x128xf32>
    %1282 = arith.addf %1279, %1281 : vector<16x128xf32>
    %1283 = arith.mulf %1268, %1282 : vector<16x128xf32>
    %1284 = arith.subf %1177, %7 : vector<16x128xf32>
    %1285 = arith.mulf %4, %1175 : vector<16x128xf32>
    %cst_245 = arith.constant 2.000000e+00 : f32
    %1286 = vector.broadcast %cst_245 : f32 to vector<16x128xf32>
    %1287 = arith.mulf %1286, %1285 : vector<16x128xf32>
    %1288 = arith.mulf %1287, %1265 : vector<16x128xf32>
    %1289 = arith.subf %1284, %1288 : vector<16x128xf32>
    %1290 = arith.mulf %1265, %1265 : vector<16x128xf32>
    %1291 = arith.mulf %1166, %1290 : vector<16x128xf32>
    %1292 = arith.addf %1289, %1291 : vector<16x128xf32>
    %1293 = arith.mulf %1268, %1292 : vector<16x128xf32>
    %1294 = arith.mulf %1272, %1166 : vector<16x128xf32>
    %1295 = arith.mulf %1166, %1263 : vector<16x128xf32>
    %1296 = vector.broadcast %1158 : f32 to vector<16x128xf32>
    %1297 = arith.mulf %1296, %1175 : vector<16x128xf32>
    %1298 = arith.subf %1295, %1297 : vector<16x128xf32>
    %1299 = arith.mulf %1270, %1298 : vector<16x128xf32>
    %1300 = arith.mulf %1263, %1265 : vector<16x128xf32>
    %1301 = arith.mulf %1166, %1300 : vector<16x128xf32>
    %1302 = vector.broadcast %1158 : f32 to vector<16x128xf32>
    %1303 = arith.mulf %1302, %4 : vector<16x128xf32>
    %1304 = arith.subf %1301, %1303 : vector<16x128xf32>
    %1305 = vector.broadcast %1158 : f32 to vector<16x128xf32>
    %1306 = arith.mulf %1305, %1175 : vector<16x128xf32>
    %1307 = arith.mulf %1306, %1265 : vector<16x128xf32>
    %1308 = arith.subf %1304, %1307 : vector<16x128xf32>
    %1309 = arith.mulf %4, %1175 : vector<16x128xf32>
    %1310 = arith.mulf %1309, %1263 : vector<16x128xf32>
    %1311 = arith.subf %1308, %1310 : vector<16x128xf32>
    %1312 = arith.mulf %1268, %1311 : vector<16x128xf32>
    %1313 = arith.mulf %1166, %1265 : vector<16x128xf32>
    %1314 = arith.mulf %4, %1175 : vector<16x128xf32>
    %1315 = arith.subf %1313, %1314 : vector<16x128xf32>
    %1316 = arith.mulf %1270, %1315 : vector<16x128xf32>
    %cst_246 = arith.constant dense<0.000000e+00> : vector<16xf32>
    %1317 = vector.multi_reduction <add>, %1283, %cst_246 [1] : vector<16x128xf32> to vector<16xf32>
    %1318 = vector.shape_cast %1317 : vector<16xf32> to vector<16x1xf32>
    %cst_247 = arith.constant dense<0.000000e+00> : vector<1xf32>
    %1319 = vector.multi_reduction <add>, %1318, %cst_247 [0] : vector<16x1xf32> to vector<1xf32>
    %1320 = vector.shape_cast %1319 : vector<1xf32> to vector<1x1xf32>
    %1321 = vector.broadcast %1158 : f32 to vector<1x1xf32>
    %1322 = arith.mulf %1321, %1320 : vector<1x1xf32>
    %cst_248 = arith.constant dense<0.000000e+00> : vector<16xf32>
    %1323 = vector.multi_reduction <add>, %1293, %cst_248 [1] : vector<16x128xf32> to vector<16xf32>
    %1324 = vector.shape_cast %1323 : vector<16xf32> to vector<16x1xf32>
    %cst_249 = arith.constant dense<0.000000e+00> : vector<1xf32>
    %1325 = vector.multi_reduction <add>, %1324, %cst_249 [0] : vector<16x1xf32> to vector<1xf32>
    %1326 = vector.shape_cast %1325 : vector<1xf32> to vector<1x1xf32>
    %1327 = vector.broadcast %1158 : f32 to vector<1x1xf32>
    %1328 = arith.mulf %1327, %1326 : vector<1x1xf32>
    %cst_250 = arith.constant dense<0.000000e+00> : vector<16xf32>
    %1329 = vector.multi_reduction <add>, %1294, %cst_250 [1] : vector<16x128xf32> to vector<16xf32>
    %1330 = vector.shape_cast %1329 : vector<16xf32> to vector<16x1xf32>
    %cst_251 = arith.constant dense<0.000000e+00> : vector<1xf32>
    %1331 = vector.multi_reduction <add>, %1330, %cst_251 [0] : vector<16x1xf32> to vector<1xf32>
    %1332 = vector.shape_cast %1331 : vector<1xf32> to vector<1x1xf32>
    %1333 = vector.broadcast %1158 : f32 to vector<1x1xf32>
    %1334 = arith.mulf %1333, %1332 : vector<1x1xf32>
    %cst_252 = arith.constant dense<0.000000e+00> : vector<16xf32>
    %1335 = vector.multi_reduction <add>, %1299, %cst_252 [1] : vector<16x128xf32> to vector<16xf32>
    %1336 = vector.shape_cast %1335 : vector<16xf32> to vector<16x1xf32>
    %cst_253 = arith.constant dense<0.000000e+00> : vector<1xf32>
    %1337 = vector.multi_reduction <add>, %1336, %cst_253 [0] : vector<16x1xf32> to vector<1xf32>
    %1338 = vector.shape_cast %1337 : vector<1xf32> to vector<1x1xf32>
    %1339 = vector.broadcast %1158 : f32 to vector<1x1xf32>
    %1340 = arith.mulf %1339, %1338 : vector<1x1xf32>
    %cst_254 = arith.constant dense<0.000000e+00> : vector<16xf32>
    %1341 = vector.multi_reduction <add>, %1312, %cst_254 [1] : vector<16x128xf32> to vector<16xf32>
    %1342 = vector.shape_cast %1341 : vector<16xf32> to vector<16x1xf32>
    %cst_255 = arith.constant dense<0.000000e+00> : vector<1xf32>
    %1343 = vector.multi_reduction <add>, %1342, %cst_255 [0] : vector<16x1xf32> to vector<1xf32>
    %1344 = vector.shape_cast %1343 : vector<1xf32> to vector<1x1xf32>
    %1345 = vector.broadcast %1158 : f32 to vector<1x1xf32>
    %1346 = arith.mulf %1345, %1344 : vector<1x1xf32>
    %cst_256 = arith.constant dense<0.000000e+00> : vector<16xf32>
    %1347 = vector.multi_reduction <add>, %1316, %cst_256 [1] : vector<16x128xf32> to vector<16xf32>
    %1348 = vector.shape_cast %1347 : vector<16xf32> to vector<16x1xf32>
    %cst_257 = arith.constant dense<0.000000e+00> : vector<1xf32>
    %1349 = vector.multi_reduction <add>, %1348, %cst_257 [0] : vector<16x1xf32> to vector<1xf32>
    %1350 = vector.shape_cast %1349 : vector<1xf32> to vector<1x1xf32>
    %1351 = vector.broadcast %1158 : f32 to vector<1x1xf32>
    %1352 = arith.mulf %1351, %1350 : vector<1x1xf32>
    %cst_258 = arith.constant 0.000000e+00 : f32
    %1353 = vector.broadcast %cst_258 : f32 to vector<1x8xf32>
    %c0_i32_259 = arith.constant 0 : i32
    %1354 = vector.broadcast %c0_i32_259 : i32 to vector<1x8xi32>
    %1355 = arith.cmpi eq, %10, %1354 : vector<1x8xi32>
    %1356 = vector.shape_cast %1322 : vector<1x1xf32> to vector<1x1xf32>
    %1357 = vector.broadcast %1356 : vector<1x1xf32> to vector<1x8xf32>
    %1358 = arith.select %1355, %1357, %1353 : vector<1x8xi1>, vector<1x8xf32>
    %c1_i32_260 = arith.constant 1 : i32
    %1359 = vector.broadcast %c1_i32_260 : i32 to vector<1x8xi32>
    %1360 = arith.cmpi eq, %10, %1359 : vector<1x8xi32>
    %1361 = vector.shape_cast %1328 : vector<1x1xf32> to vector<1x1xf32>
    %1362 = vector.broadcast %1361 : vector<1x1xf32> to vector<1x8xf32>
    %1363 = arith.select %1360, %1362, %1358 : vector<1x8xi1>, vector<1x8xf32>
    %c2_i32_261 = arith.constant 2 : i32
    %1364 = vector.broadcast %c2_i32_261 : i32 to vector<1x8xi32>
    %1365 = arith.cmpi eq, %10, %1364 : vector<1x8xi32>
    %1366 = vector.shape_cast %1334 : vector<1x1xf32> to vector<1x1xf32>
    %1367 = vector.broadcast %1366 : vector<1x1xf32> to vector<1x8xf32>
    %1368 = arith.select %1365, %1367, %1363 : vector<1x8xi1>, vector<1x8xf32>
    %c3_i32_262 = arith.constant 3 : i32
    %1369 = vector.broadcast %c3_i32_262 : i32 to vector<1x8xi32>
    %1370 = arith.cmpi eq, %10, %1369 : vector<1x8xi32>
    %1371 = vector.shape_cast %1340 : vector<1x1xf32> to vector<1x1xf32>
    %1372 = vector.broadcast %1371 : vector<1x1xf32> to vector<1x8xf32>
    %1373 = arith.select %1370, %1372, %1368 : vector<1x8xi1>, vector<1x8xf32>
    %c4_i32_263 = arith.constant 4 : i32
    %1374 = vector.broadcast %c4_i32_263 : i32 to vector<1x8xi32>
    %1375 = arith.cmpi eq, %10, %1374 : vector<1x8xi32>
    %1376 = vector.shape_cast %1346 : vector<1x1xf32> to vector<1x1xf32>
    %1377 = vector.broadcast %1376 : vector<1x1xf32> to vector<1x8xf32>
    %1378 = arith.select %1375, %1377, %1373 : vector<1x8xi1>, vector<1x8xf32>
    %c5_i32_264 = arith.constant 5 : i32
    %1379 = vector.broadcast %c5_i32_264 : i32 to vector<1x8xi32>
    %1380 = arith.cmpi eq, %10, %1379 : vector<1x8xi32>
    %1381 = vector.shape_cast %1352 : vector<1x1xf32> to vector<1x1xf32>
    %1382 = vector.broadcast %1381 : vector<1x1xf32> to vector<1x8xf32>
    %1383 = arith.select %1380, %1382, %1378 : vector<1x8xi1>, vector<1x8xf32>
    %c5 = arith.constant 5 : index
    %c0_265 = arith.constant 0 : index
    %1384 = vector.load %arg7[%c5, %c0_265] : memref<8x8xf32, #tpu.memory_space<vmem>>, vector<1x8xf32>
    tpu.vector_store %arg7[%c5, %c0_265], %1383 {strides = array<i32>} : memref<8x8xf32, #tpu.memory_space<vmem>>, vector<1x8xf32>,
    %c6_i32 = arith.constant 6 : i32
    %1385 = arith.addi %3, %c6_i32 : i32
    %1386 = arith.index_cast %1385 : i32 to index
    %1387 = memref.load %arg2[%1386] : memref<8xf32, #tpu.memory_space<smem>>
    %c6_i32_266 = arith.constant 6 : i32
    %1388 = arith.addi %3, %c6_i32_266 : i32
    %1389 = arith.index_cast %1388 : i32 to index
    %1390 = memref.load %arg3[%1389] : memref<8xf32, #tpu.memory_space<smem>>
    %1391 = arith.mulf %1387, %1387 : f32
    %1392 = vector.broadcast %1391 : f32 to vector<16x128xf32>
    %1393 = arith.addf %1392, %9 : vector<16x128xf32>
    %1394 = vector.broadcast %1391 : f32 to vector<16x128xf32>
    %1395 = arith.addf %1394, %7 : vector<16x128xf32>
    %1396 = math.log %1393 : vector<16x128xf32>
    %cst_267 = arith.constant -0.333333343 : f32
    %1397 = vector.broadcast %cst_267 : f32 to vector<16x128xf32>
    %1398 = arith.mulf %1396, %1397 : vector<16x128xf32>
    %1399 = math.exp %1398 : vector<16x128xf32>
    %1400 = vector.broadcast %0 : f32 to vector<16x128xf32>
    %1401 = arith.mulf %1400, %1399 : vector<16x128xf32>
    %1402 = vector.broadcast %1387 : f32 to vector<16x128xf32>
    %1403 = arith.mulf %1401, %1402 : vector<16x128xf32>
    %1404 = arith.addf %5, %1403 : vector<16x128xf32>
    %1405 = arith.mulf %1404, %1404 : vector<16x128xf32>
    %1406 = arith.addf %1395, %1405 : vector<16x128xf32>
    %1407 = arith.mulf %1406, %1406 : vector<16x128xf32>
    %1408 = vector.broadcast %1 : f32 to vector<16x128xf32>
    %1409 = arith.mulf %1408, %1407 : vector<16x128xf32>
    %1410 = vector.broadcast %2 : f32 to vector<16x128xf32>
    %1411 = arith.mulf %1410, %1406 : vector<16x128xf32>
    %cst_268 = arith.constant 1.000000e+00 : f32
    %1412 = vector.broadcast %cst_268 : f32 to vector<16x128xf32>
    %1413 = arith.addf %1412, %1411 : vector<16x128xf32>
    %1414 = math.log %1413 : vector<16x128xf32>
    %cst_269 = arith.constant -2.83333325 : f32
    %1415 = vector.broadcast %cst_269 : f32 to vector<16x128xf32>
    %1416 = arith.mulf %1414, %1415 : vector<16x128xf32>
    %1417 = math.exp %1416 : vector<16x128xf32>
    %1418 = arith.mulf %1409, %1417 : vector<16x128xf32>
    %1419 = tpu.reciprocal %1393 : vector<16x128xf32> -> vector<16x128xf32>
    %1420 = tpu.reciprocal %1406 : vector<16x128xf32> -> vector<16x128xf32>
    %1421 = math.rsqrt %1395 : vector<16x128xf32>
    %1422 = arith.mulf %1395, %1421 : vector<16x128xf32>
    %1423 = arith.mulf %1421, %1421 : vector<16x128xf32>
    %1424 = arith.mulf %1421, %1423 : vector<16x128xf32>
    %1425 = vector.broadcast %1391 : f32 to vector<16x128xf32>
    %1426 = arith.mulf %1401, %1425 : vector<16x128xf32>
    %cst_270 = arith.constant 2.000000e+00 : f32
    %1427 = vector.broadcast %cst_270 : f32 to vector<16x128xf32>
    %1428 = arith.mulf %1427, %1404 : vector<16x128xf32>
    %1429 = arith.mulf %1428, %1404 : vector<16x128xf32>
    %1430 = arith.subf %1406, %1429 : vector<16x128xf32>
    %1431 = arith.mulf %1403, %1404 : vector<16x128xf32>
    %1432 = arith.addf %1430, %1431 : vector<16x128xf32>
    %1433 = arith.mulf %1426, %1432 : vector<16x128xf32>
    %1434 = arith.mulf %1419, %1423 : vector<16x128xf32>
    %1435 = arith.mulf %1433, %1434 : vector<16x128xf32>
    %1436 = arith.mulf %4, %1406 : vector<16x128xf32>
    %1437 = arith.mulf %1436, %1424 : vector<16x128xf32>
    %1438 = arith.mulf %1403, %1422 : vector<16x128xf32>
    %1439 = arith.mulf %1404, %1403 : vector<16x128xf32>
    %1440 = arith.subf %1406, %1439 : vector<16x128xf32>
    %1441 = tpu.reciprocal %1438 {approx = true} : vector<16x128xf32> -> vector<16x128xf32>
    %1442 = arith.mulf %1440, %1441 : vector<16x128xf32>
    %1443 = math.absf %1442 : vector<16x128xf32>
    %cst_271 = arith.constant 2.41421366 : f32
    %1444 = vector.broadcast %cst_271 : f32 to vector<16x128xf32>
    %1445 = arith.cmpf ogt, %1443, %1444 : vector<16x128xf32>
    %cst_272 = arith.constant 0.414213568 : f32
    %1446 = vector.broadcast %cst_272 : f32 to vector<16x128xf32>
    %1447 = arith.cmpf ogt, %1443, %1446 : vector<16x128xf32>
    %cst_273 = arith.constant dense<true> : vector<16x128xi1>
    %1448 = arith.xori %1445, %cst_273 : vector<16x128xi1>
    %1449 = arith.andi %1447, %1448 : vector<16x128xi1>
    %1450 = tpu.reciprocal %1443 {approx = true} : vector<16x128xf32> -> vector<16x128xf32>
    %cst_274 = arith.constant 1.000000e+00 : f32
    %1451 = vector.broadcast %cst_274 : f32 to vector<16x128xf32>
    %1452 = arith.addf %1443, %1451 : vector<16x128xf32>
    %1453 = tpu.reciprocal %1452 {approx = true} : vector<16x128xf32> -> vector<16x128xf32>
    %cst_275 = arith.constant 0.000000e+00 : f32
    %1454 = vector.broadcast %cst_275 : f32 to vector<16x128xf32>
    %1455 = arith.subf %1454, %1450 : vector<16x128xf32>
    %cst_276 = arith.constant 1.000000e+00 : f32
    %1456 = vector.broadcast %cst_276 : f32 to vector<16x128xf32>
    %1457 = arith.subf %1443, %1456 : vector<16x128xf32>
    %1458 = arith.mulf %1457, %1453 : vector<16x128xf32>
    %1459 = arith.select %1449, %1458, %1443 : vector<16x128xi1>, vector<16x128xf32>
    %1460 = arith.select %1445, %1455, %1459 : vector<16x128xi1>, vector<16x128xf32>
    %cst_277 = arith.constant 0.785398185 : f32
    %cst_278 = arith.constant 0.000000e+00 : f32
    %1461 = vector.broadcast %cst_277 : f32 to vector<16x128xf32>
    %1462 = vector.broadcast %cst_278 : f32 to vector<16x128xf32>
    %1463 = arith.select %1449, %1461, %1462 : vector<16x128xi1>, vector<16x128xf32>
    %cst_279 = arith.constant 1.57079637 : f32
    %1464 = vector.broadcast %cst_279 : f32 to vector<16x128xf32>
    %1465 = arith.select %1445, %1464, %1463 : vector<16x128xi1>, vector<16x128xf32>
    %1466 = arith.mulf %1460, %1460 : vector<16x128xf32>
    %cst_280 = arith.constant 0.0805374458 : f32
    %1467 = vector.broadcast %cst_280 : f32 to vector<16x128xf32>
    %1468 = arith.mulf %1467, %1466 : vector<16x128xf32>
    %cst_281 = arith.constant 0.138776854 : f32
    %1469 = vector.broadcast %cst_281 : f32 to vector<16x128xf32>
    %1470 = arith.subf %1468, %1469 : vector<16x128xf32>
    %1471 = arith.mulf %1470, %1466 : vector<16x128xf32>
    %cst_282 = arith.constant 0.199777111 : f32
    %1472 = vector.broadcast %cst_282 : f32 to vector<16x128xf32>
    %1473 = arith.addf %1471, %1472 : vector<16x128xf32>
    %1474 = arith.mulf %1473, %1466 : vector<16x128xf32>
    %cst_283 = arith.constant 0.333329499 : f32
    %1475 = vector.broadcast %cst_283 : f32 to vector<16x128xf32>
    %1476 = arith.subf %1474, %1475 : vector<16x128xf32>
    %1477 = arith.mulf %1476, %1466 : vector<16x128xf32>
    %1478 = arith.mulf %1477, %1460 : vector<16x128xf32>
    %1479 = arith.addf %1478, %1460 : vector<16x128xf32>
    %1480 = arith.addf %1465, %1479 : vector<16x128xf32>
    %cst_284 = arith.constant 0.000000e+00 : f32
    %1481 = vector.broadcast %cst_284 : f32 to vector<16x128xf32>
    %1482 = arith.cmpf olt, %1442, %1481 : vector<16x128xf32>
    %cst_285 = arith.constant 0.000000e+00 : f32
    %1483 = vector.broadcast %cst_285 : f32 to vector<16x128xf32>
    %1484 = arith.subf %1483, %1480 : vector<16x128xf32>
    %1485 = arith.select %1482, %1484, %1480 : vector<16x128xi1>, vector<16x128xf32>
    %cst_286 = arith.constant 1.57079637 : f32
    %1486 = vector.broadcast %cst_286 : f32 to vector<16x128xf32>
    %1487 = arith.subf %1486, %1485 : vector<16x128xf32>
    %1488 = arith.mulf %1437, %1487 : vector<16x128xf32>
    %1489 = vector.broadcast %1390 : f32 to vector<16x128xf32>
    %1490 = arith.mulf %4, %1489 : vector<16x128xf32>
    %1491 = arith.mulf %1490, %1488 : vector<16x128xf32>
    %1492 = arith.subf %1435, %1491 : vector<16x128xf32>
    %1493 = arith.mulf %1435, %1490 : vector<16x128xf32>
    %1494 = arith.addf %1493, %1488 : vector<16x128xf32>
    %1495 = arith.mulf %1418, %6 : vector<16x128xf32>
    %1496 = arith.mulf %1420, %1420 : vector<16x128xf32>
    %1497 = arith.mulf %1495, %1496 : vector<16x128xf32>
    %1498 = arith.mulf %1419, %1420 : vector<16x128xf32>
    %1499 = arith.mulf %1495, %1498 : vector<16x128xf32>
    %1500 = arith.mulf %1419, %1419 : vector<16x128xf32>
    %1501 = arith.mulf %1495, %1500 : vector<16x128xf32>
    %1502 = vector.broadcast %1391 : f32 to vector<16x128xf32>
    %1503 = arith.subf %1406, %1502 : vector<16x128xf32>
    %cst_287 = arith.constant 2.000000e+00 : f32
    %1504 = arith.mulf %cst_287, %1387 : f32
    %1505 = arith.mulf %1404, %1492 : vector<16x128xf32>
    %1506 = vector.broadcast %1504 : f32 to vector<16x128xf32>
    %1507 = arith.mulf %1506, %1505 : vector<16x128xf32>
    %1508 = arith.subf %1503, %1507 : vector<16x128xf32>
    %1509 = arith.mulf %1492, %1492 : vector<16x128xf32>
    %1510 = arith.mulf %1395, %1509 : vector<16x128xf32>
    %1511 = arith.addf %1508, %1510 : vector<16x128xf32>
    %1512 = arith.mulf %1497, %1511 : vector<16x128xf32>
    %1513 = arith.subf %1406, %7 : vector<16x128xf32>
    %1514 = arith.mulf %4, %1404 : vector<16x128xf32>
    %cst_288 = arith.constant 2.000000e+00 : f32
    %1515 = vector.broadcast %cst_288 : f32 to vector<16x128xf32>
    %1516 = arith.mulf %1515, %1514 : vector<16x128xf32>
    %1517 = arith.mulf %1516, %1494 : vector<16x128xf32>
    %1518 = arith.subf %1513, %1517 : vector<16x128xf32>
    %1519 = arith.mulf %1494, %1494 : vector<16x128xf32>
    %1520 = arith.mulf %1395, %1519 : vector<16x128xf32>
    %1521 = arith.addf %1518, %1520 : vector<16x128xf32>
    %1522 = arith.mulf %1497, %1521 : vector<16x128xf32>
    %1523 = arith.mulf %1501, %1395 : vector<16x128xf32>
    %1524 = arith.mulf %1395, %1492 : vector<16x128xf32>
    %1525 = vector.broadcast %1387 : f32 to vector<16x128xf32>
    %1526 = arith.mulf %1525, %1404 : vector<16x128xf32>
    %1527 = arith.subf %1524, %1526 : vector<16x128xf32>
    %1528 = arith.mulf %1499, %1527 : vector<16x128xf32>
    %1529 = arith.mulf %1492, %1494 : vector<16x128xf32>
    %1530 = arith.mulf %1395, %1529 : vector<16x128xf32>
    %1531 = vector.broadcast %1387 : f32 to vector<16x128xf32>
    %1532 = arith.mulf %1531, %4 : vector<16x128xf32>
    %1533 = arith.subf %1530, %1532 : vector<16x128xf32>
    %1534 = vector.broadcast %1387 : f32 to vector<16x128xf32>
    %1535 = arith.mulf %1534, %1404 : vector<16x128xf32>
    %1536 = arith.mulf %1535, %1494 : vector<16x128xf32>
    %1537 = arith.subf %1533, %1536 : vector<16x128xf32>
    %1538 = arith.mulf %4, %1404 : vector<16x128xf32>
    %1539 = arith.mulf %1538, %1492 : vector<16x128xf32>
    %1540 = arith.subf %1537, %1539 : vector<16x128xf32>
    %1541 = arith.mulf %1497, %1540 : vector<16x128xf32>
    %1542 = arith.mulf %1395, %1494 : vector<16x128xf32>
    %1543 = arith.mulf %4, %1404 : vector<16x128xf32>
    %1544 = arith.subf %1542, %1543 : vector<16x128xf32>
    %1545 = arith.mulf %1499, %1544 : vector<16x128xf32>
    %cst_289 = arith.constant dense<0.000000e+00> : vector<16xf32>
    %1546 = vector.multi_reduction <add>, %1512, %cst_289 [1] : vector<16x128xf32> to vector<16xf32>
    %1547 = vector.shape_cast %1546 : vector<16xf32> to vector<16x1xf32>
    %cst_290 = arith.constant dense<0.000000e+00> : vector<1xf32>
    %1548 = vector.multi_reduction <add>, %1547, %cst_290 [0] : vector<16x1xf32> to vector<1xf32>
    %1549 = vector.shape_cast %1548 : vector<1xf32> to vector<1x1xf32>
    %1550 = vector.broadcast %1387 : f32 to vector<1x1xf32>
    %1551 = arith.mulf %1550, %1549 : vector<1x1xf32>
    %cst_291 = arith.constant dense<0.000000e+00> : vector<16xf32>
    %1552 = vector.multi_reduction <add>, %1522, %cst_291 [1] : vector<16x128xf32> to vector<16xf32>
    %1553 = vector.shape_cast %1552 : vector<16xf32> to vector<16x1xf32>
    %cst_292 = arith.constant dense<0.000000e+00> : vector<1xf32>
    %1554 = vector.multi_reduction <add>, %1553, %cst_292 [0] : vector<16x1xf32> to vector<1xf32>
    %1555 = vector.shape_cast %1554 : vector<1xf32> to vector<1x1xf32>
    %1556 = vector.broadcast %1387 : f32 to vector<1x1xf32>
    %1557 = arith.mulf %1556, %1555 : vector<1x1xf32>
    %cst_293 = arith.constant dense<0.000000e+00> : vector<16xf32>
    %1558 = vector.multi_reduction <add>, %1523, %cst_293 [1] : vector<16x128xf32> to vector<16xf32>
    %1559 = vector.shape_cast %1558 : vector<16xf32> to vector<16x1xf32>
    %cst_294 = arith.constant dense<0.000000e+00> : vector<1xf32>
    %1560 = vector.multi_reduction <add>, %1559, %cst_294 [0] : vector<16x1xf32> to vector<1xf32>
    %1561 = vector.shape_cast %1560 : vector<1xf32> to vector<1x1xf32>
    %1562 = vector.broadcast %1387 : f32 to vector<1x1xf32>
    %1563 = arith.mulf %1562, %1561 : vector<1x1xf32>
    %cst_295 = arith.constant dense<0.000000e+00> : vector<16xf32>
    %1564 = vector.multi_reduction <add>, %1528, %cst_295 [1] : vector<16x128xf32> to vector<16xf32>
    %1565 = vector.shape_cast %1564 : vector<16xf32> to vector<16x1xf32>
    %cst_296 = arith.constant dense<0.000000e+00> : vector<1xf32>
    %1566 = vector.multi_reduction <add>, %1565, %cst_296 [0] : vector<16x1xf32> to vector<1xf32>
    %1567 = vector.shape_cast %1566 : vector<1xf32> to vector<1x1xf32>
    %1568 = vector.broadcast %1387 : f32 to vector<1x1xf32>
    %1569 = arith.mulf %1568, %1567 : vector<1x1xf32>
    %cst_297 = arith.constant dense<0.000000e+00> : vector<16xf32>
    %1570 = vector.multi_reduction <add>, %1541, %cst_297 [1] : vector<16x128xf32> to vector<16xf32>
    %1571 = vector.shape_cast %1570 : vector<16xf32> to vector<16x1xf32>
    %cst_298 = arith.constant dense<0.000000e+00> : vector<1xf32>
    %1572 = vector.multi_reduction <add>, %1571, %cst_298 [0] : vector<16x1xf32> to vector<1xf32>
    %1573 = vector.shape_cast %1572 : vector<1xf32> to vector<1x1xf32>
    %1574 = vector.broadcast %1387 : f32 to vector<1x1xf32>
    %1575 = arith.mulf %1574, %1573 : vector<1x1xf32>
    %cst_299 = arith.constant dense<0.000000e+00> : vector<16xf32>
    %1576 = vector.multi_reduction <add>, %1545, %cst_299 [1] : vector<16x128xf32> to vector<16xf32>
    %1577 = vector.shape_cast %1576 : vector<16xf32> to vector<16x1xf32>
    %cst_300 = arith.constant dense<0.000000e+00> : vector<1xf32>
    %1578 = vector.multi_reduction <add>, %1577, %cst_300 [0] : vector<16x1xf32> to vector<1xf32>
    %1579 = vector.shape_cast %1578 : vector<1xf32> to vector<1x1xf32>
    %1580 = vector.broadcast %1387 : f32 to vector<1x1xf32>
    %1581 = arith.mulf %1580, %1579 : vector<1x1xf32>
    %cst_301 = arith.constant 0.000000e+00 : f32
    %1582 = vector.broadcast %cst_301 : f32 to vector<1x8xf32>
    %c0_i32_302 = arith.constant 0 : i32
    %1583 = vector.broadcast %c0_i32_302 : i32 to vector<1x8xi32>
    %1584 = arith.cmpi eq, %10, %1583 : vector<1x8xi32>
    %1585 = vector.shape_cast %1551 : vector<1x1xf32> to vector<1x1xf32>
    %1586 = vector.broadcast %1585 : vector<1x1xf32> to vector<1x8xf32>
    %1587 = arith.select %1584, %1586, %1582 : vector<1x8xi1>, vector<1x8xf32>
    %c1_i32_303 = arith.constant 1 : i32
    %1588 = vector.broadcast %c1_i32_303 : i32 to vector<1x8xi32>
    %1589 = arith.cmpi eq, %10, %1588 : vector<1x8xi32>
    %1590 = vector.shape_cast %1557 : vector<1x1xf32> to vector<1x1xf32>
    %1591 = vector.broadcast %1590 : vector<1x1xf32> to vector<1x8xf32>
    %1592 = arith.select %1589, %1591, %1587 : vector<1x8xi1>, vector<1x8xf32>
    %c2_i32_304 = arith.constant 2 : i32
    %1593 = vector.broadcast %c2_i32_304 : i32 to vector<1x8xi32>
    %1594 = arith.cmpi eq, %10, %1593 : vector<1x8xi32>
    %1595 = vector.shape_cast %1563 : vector<1x1xf32> to vector<1x1xf32>
    %1596 = vector.broadcast %1595 : vector<1x1xf32> to vector<1x8xf32>
    %1597 = arith.select %1594, %1596, %1592 : vector<1x8xi1>, vector<1x8xf32>
    %c3_i32_305 = arith.constant 3 : i32
    %1598 = vector.broadcast %c3_i32_305 : i32 to vector<1x8xi32>
    %1599 = arith.cmpi eq, %10, %1598 : vector<1x8xi32>
    %1600 = vector.shape_cast %1569 : vector<1x1xf32> to vector<1x1xf32>
    %1601 = vector.broadcast %1600 : vector<1x1xf32> to vector<1x8xf32>
    %1602 = arith.select %1599, %1601, %1597 : vector<1x8xi1>, vector<1x8xf32>
    %c4_i32_306 = arith.constant 4 : i32
    %1603 = vector.broadcast %c4_i32_306 : i32 to vector<1x8xi32>
    %1604 = arith.cmpi eq, %10, %1603 : vector<1x8xi32>
    %1605 = vector.shape_cast %1575 : vector<1x1xf32> to vector<1x1xf32>
    %1606 = vector.broadcast %1605 : vector<1x1xf32> to vector<1x8xf32>
    %1607 = arith.select %1604, %1606, %1602 : vector<1x8xi1>, vector<1x8xf32>
    %c5_i32_307 = arith.constant 5 : i32
    %1608 = vector.broadcast %c5_i32_307 : i32 to vector<1x8xi32>
    %1609 = arith.cmpi eq, %10, %1608 : vector<1x8xi32>
    %1610 = vector.shape_cast %1581 : vector<1x1xf32> to vector<1x1xf32>
    %1611 = vector.broadcast %1610 : vector<1x1xf32> to vector<1x8xf32>
    %1612 = arith.select %1609, %1611, %1607 : vector<1x8xi1>, vector<1x8xf32>
    %c6 = arith.constant 6 : index
    %c0_308 = arith.constant 0 : index
    %1613 = vector.load %arg7[%c6, %c0_308] : memref<8x8xf32, #tpu.memory_space<vmem>>, vector<1x8xf32>
    tpu.vector_store %arg7[%c6, %c0_308], %1612 {strides = array<i32>} : memref<8x8xf32, #tpu.memory_space<vmem>>, vector<1x8xf32>,
    %c7_i32 = arith.constant 7 : i32
    %1614 = arith.addi %3, %c7_i32 : i32
    %1615 = arith.index_cast %1614 : i32 to index
    %1616 = memref.load %arg2[%1615] : memref<8xf32, #tpu.memory_space<smem>>
    %c7_i32_309 = arith.constant 7 : i32
    %1617 = arith.addi %3, %c7_i32_309 : i32
    %1618 = arith.index_cast %1617 : i32 to index
    %1619 = memref.load %arg3[%1618] : memref<8xf32, #tpu.memory_space<smem>>
    %1620 = arith.mulf %1616, %1616 : f32
    %1621 = vector.broadcast %1620 : f32 to vector<16x128xf32>
    %1622 = arith.addf %1621, %9 : vector<16x128xf32>
    %1623 = vector.broadcast %1620 : f32 to vector<16x128xf32>
    %1624 = arith.addf %1623, %7 : vector<16x128xf32>
    %1625 = math.log %1622 : vector<16x128xf32>
    %cst_310 = arith.constant -0.333333343 : f32
    %1626 = vector.broadcast %cst_310 : f32 to vector<16x128xf32>
    %1627 = arith.mulf %1625, %1626 : vector<16x128xf32>
    %1628 = math.exp %1627 : vector<16x128xf32>
    %1629 = vector.broadcast %0 : f32 to vector<16x128xf32>
    %1630 = arith.mulf %1629, %1628 : vector<16x128xf32>
    %1631 = vector.broadcast %1616 : f32 to vector<16x128xf32>
    %1632 = arith.mulf %1630, %1631 : vector<16x128xf32>
    %1633 = arith.addf %5, %1632 : vector<16x128xf32>
    %1634 = arith.mulf %1633, %1633 : vector<16x128xf32>
    %1635 = arith.addf %1624, %1634 : vector<16x128xf32>
    %1636 = arith.mulf %1635, %1635 : vector<16x128xf32>
    %1637 = vector.broadcast %1 : f32 to vector<16x128xf32>
    %1638 = arith.mulf %1637, %1636 : vector<16x128xf32>
    %1639 = vector.broadcast %2 : f32 to vector<16x128xf32>
    %1640 = arith.mulf %1639, %1635 : vector<16x128xf32>
    %cst_311 = arith.constant 1.000000e+00 : f32
    %1641 = vector.broadcast %cst_311 : f32 to vector<16x128xf32>
    %1642 = arith.addf %1641, %1640 : vector<16x128xf32>
    %1643 = math.log %1642 : vector<16x128xf32>
    %cst_312 = arith.constant -2.83333325 : f32
    %1644 = vector.broadcast %cst_312 : f32 to vector<16x128xf32>
    %1645 = arith.mulf %1643, %1644 : vector<16x128xf32>
    %1646 = math.exp %1645 : vector<16x128xf32>
    %1647 = arith.mulf %1638, %1646 : vector<16x128xf32>
    %1648 = tpu.reciprocal %1622 : vector<16x128xf32> -> vector<16x128xf32>
    %1649 = tpu.reciprocal %1635 : vector<16x128xf32> -> vector<16x128xf32>
    %1650 = math.rsqrt %1624 : vector<16x128xf32>
    %1651 = arith.mulf %1624, %1650 : vector<16x128xf32>
    %1652 = arith.mulf %1650, %1650 : vector<16x128xf32>
    %1653 = arith.mulf %1650, %1652 : vector<16x128xf32>
    %1654 = vector.broadcast %1620 : f32 to vector<16x128xf32>
    %1655 = arith.mulf %1630, %1654 : vector<16x128xf32>
    %cst_313 = arith.constant 2.000000e+00 : f32
    %1656 = vector.broadcast %cst_313 : f32 to vector<16x128xf32>
    %1657 = arith.mulf %1656, %1633 : vector<16x128xf32>
    %1658 = arith.mulf %1657, %1633 : vector<16x128xf32>
    %1659 = arith.subf %1635, %1658 : vector<16x128xf32>
    %1660 = arith.mulf %1632, %1633 : vector<16x128xf32>
    %1661 = arith.addf %1659, %1660 : vector<16x128xf32>
    %1662 = arith.mulf %1655, %1661 : vector<16x128xf32>
    %1663 = arith.mulf %1648, %1652 : vector<16x128xf32>
    %1664 = arith.mulf %1662, %1663 : vector<16x128xf32>
    %1665 = arith.mulf %4, %1635 : vector<16x128xf32>
    %1666 = arith.mulf %1665, %1653 : vector<16x128xf32>
    %1667 = arith.mulf %1632, %1651 : vector<16x128xf32>
    %1668 = arith.mulf %1633, %1632 : vector<16x128xf32>
    %1669 = arith.subf %1635, %1668 : vector<16x128xf32>
    %1670 = tpu.reciprocal %1667 {approx = true} : vector<16x128xf32> -> vector<16x128xf32>
    %1671 = arith.mulf %1669, %1670 : vector<16x128xf32>
    %1672 = math.absf %1671 : vector<16x128xf32>
    %cst_314 = arith.constant 2.41421366 : f32
    %1673 = vector.broadcast %cst_314 : f32 to vector<16x128xf32>
    %1674 = arith.cmpf ogt, %1672, %1673 : vector<16x128xf32>
    %cst_315 = arith.constant 0.414213568 : f32
    %1675 = vector.broadcast %cst_315 : f32 to vector<16x128xf32>
    %1676 = arith.cmpf ogt, %1672, %1675 : vector<16x128xf32>
    %cst_316 = arith.constant dense<true> : vector<16x128xi1>
    %1677 = arith.xori %1674, %cst_316 : vector<16x128xi1>
    %1678 = arith.andi %1676, %1677 : vector<16x128xi1>
    %1679 = tpu.reciprocal %1672 {approx = true} : vector<16x128xf32> -> vector<16x128xf32>
    %cst_317 = arith.constant 1.000000e+00 : f32
    %1680 = vector.broadcast %cst_317 : f32 to vector<16x128xf32>
    %1681 = arith.addf %1672, %1680 : vector<16x128xf32>
    %1682 = tpu.reciprocal %1681 {approx = true} : vector<16x128xf32> -> vector<16x128xf32>
    %cst_318 = arith.constant 0.000000e+00 : f32
    %1683 = vector.broadcast %cst_318 : f32 to vector<16x128xf32>
    %1684 = arith.subf %1683, %1679 : vector<16x128xf32>
    %cst_319 = arith.constant 1.000000e+00 : f32
    %1685 = vector.broadcast %cst_319 : f32 to vector<16x128xf32>
    %1686 = arith.subf %1672, %1685 : vector<16x128xf32>
    %1687 = arith.mulf %1686, %1682 : vector<16x128xf32>
    %1688 = arith.select %1678, %1687, %1672 : vector<16x128xi1>, vector<16x128xf32>
    %1689 = arith.select %1674, %1684, %1688 : vector<16x128xi1>, vector<16x128xf32>
    %cst_320 = arith.constant 0.785398185 : f32
    %cst_321 = arith.constant 0.000000e+00 : f32
    %1690 = vector.broadcast %cst_320 : f32 to vector<16x128xf32>
    %1691 = vector.broadcast %cst_321 : f32 to vector<16x128xf32>
    %1692 = arith.select %1678, %1690, %1691 : vector<16x128xi1>, vector<16x128xf32>
    %cst_322 = arith.constant 1.57079637 : f32
    %1693 = vector.broadcast %cst_322 : f32 to vector<16x128xf32>
    %1694 = arith.select %1674, %1693, %1692 : vector<16x128xi1>, vector<16x128xf32>
    %1695 = arith.mulf %1689, %1689 : vector<16x128xf32>
    %cst_323 = arith.constant 0.0805374458 : f32
    %1696 = vector.broadcast %cst_323 : f32 to vector<16x128xf32>
    %1697 = arith.mulf %1696, %1695 : vector<16x128xf32>
    %cst_324 = arith.constant 0.138776854 : f32
    %1698 = vector.broadcast %cst_324 : f32 to vector<16x128xf32>
    %1699 = arith.subf %1697, %1698 : vector<16x128xf32>
    %1700 = arith.mulf %1699, %1695 : vector<16x128xf32>
    %cst_325 = arith.constant 0.199777111 : f32
    %1701 = vector.broadcast %cst_325 : f32 to vector<16x128xf32>
    %1702 = arith.addf %1700, %1701 : vector<16x128xf32>
    %1703 = arith.mulf %1702, %1695 : vector<16x128xf32>
    %cst_326 = arith.constant 0.333329499 : f32
    %1704 = vector.broadcast %cst_326 : f32 to vector<16x128xf32>
    %1705 = arith.subf %1703, %1704 : vector<16x128xf32>
    %1706 = arith.mulf %1705, %1695 : vector<16x128xf32>
    %1707 = arith.mulf %1706, %1689 : vector<16x128xf32>
    %1708 = arith.addf %1707, %1689 : vector<16x128xf32>
    %1709 = arith.addf %1694, %1708 : vector<16x128xf32>
    %cst_327 = arith.constant 0.000000e+00 : f32
    %1710 = vector.broadcast %cst_327 : f32 to vector<16x128xf32>
    %1711 = arith.cmpf olt, %1671, %1710 : vector<16x128xf32>
    %cst_328 = arith.constant 0.000000e+00 : f32
    %1712 = vector.broadcast %cst_328 : f32 to vector<16x128xf32>
    %1713 = arith.subf %1712, %1709 : vector<16x128xf32>
    %1714 = arith.select %1711, %1713, %1709 : vector<16x128xi1>, vector<16x128xf32>
    %cst_329 = arith.constant 1.57079637 : f32
    %1715 = vector.broadcast %cst_329 : f32 to vector<16x128xf32>
    %1716 = arith.subf %1715, %1714 : vector<16x128xf32>
    %1717 = arith.mulf %1666, %1716 : vector<16x128xf32>
    %1718 = vector.broadcast %1619 : f32 to vector<16x128xf32>
    %1719 = arith.mulf %4, %1718 : vector<16x128xf32>
    %1720 = arith.mulf %1719, %1717 : vector<16x128xf32>
    %1721 = arith.subf %1664, %1720 : vector<16x128xf32>
    %1722 = arith.mulf %1664, %1719 : vector<16x128xf32>
    %1723 = arith.addf %1722, %1717 : vector<16x128xf32>
    %1724 = arith.mulf %1647, %6 : vector<16x128xf32>
    %1725 = arith.mulf %1649, %1649 : vector<16x128xf32>
    %1726 = arith.mulf %1724, %1725 : vector<16x128xf32>
    %1727 = arith.mulf %1648, %1649 : vector<16x128xf32>
    %1728 = arith.mulf %1724, %1727 : vector<16x128xf32>
    %1729 = arith.mulf %1648, %1648 : vector<16x128xf32>
    %1730 = arith.mulf %1724, %1729 : vector<16x128xf32>
    %1731 = vector.broadcast %1620 : f32 to vector<16x128xf32>
    %1732 = arith.subf %1635, %1731 : vector<16x128xf32>
    %cst_330 = arith.constant 2.000000e+00 : f32
    %1733 = arith.mulf %cst_330, %1616 : f32
    %1734 = arith.mulf %1633, %1721 : vector<16x128xf32>
    %1735 = vector.broadcast %1733 : f32 to vector<16x128xf32>
    %1736 = arith.mulf %1735, %1734 : vector<16x128xf32>
    %1737 = arith.subf %1732, %1736 : vector<16x128xf32>
    %1738 = arith.mulf %1721, %1721 : vector<16x128xf32>
    %1739 = arith.mulf %1624, %1738 : vector<16x128xf32>
    %1740 = arith.addf %1737, %1739 : vector<16x128xf32>
    %1741 = arith.mulf %1726, %1740 : vector<16x128xf32>
    %1742 = arith.subf %1635, %7 : vector<16x128xf32>
    %1743 = arith.mulf %4, %1633 : vector<16x128xf32>
    %cst_331 = arith.constant 2.000000e+00 : f32
    %1744 = vector.broadcast %cst_331 : f32 to vector<16x128xf32>
    %1745 = arith.mulf %1744, %1743 : vector<16x128xf32>
    %1746 = arith.mulf %1745, %1723 : vector<16x128xf32>
    %1747 = arith.subf %1742, %1746 : vector<16x128xf32>
    %1748 = arith.mulf %1723, %1723 : vector<16x128xf32>
    %1749 = arith.mulf %1624, %1748 : vector<16x128xf32>
    %1750 = arith.addf %1747, %1749 : vector<16x128xf32>
    %1751 = arith.mulf %1726, %1750 : vector<16x128xf32>
    %1752 = arith.mulf %1730, %1624 : vector<16x128xf32>
    %1753 = arith.mulf %1624, %1721 : vector<16x128xf32>
    %1754 = vector.broadcast %1616 : f32 to vector<16x128xf32>
    %1755 = arith.mulf %1754, %1633 : vector<16x128xf32>
    %1756 = arith.subf %1753, %1755 : vector<16x128xf32>
    %1757 = arith.mulf %1728, %1756 : vector<16x128xf32>
    %1758 = arith.mulf %1721, %1723 : vector<16x128xf32>
    %1759 = arith.mulf %1624, %1758 : vector<16x128xf32>
    %1760 = vector.broadcast %1616 : f32 to vector<16x128xf32>
    %1761 = arith.mulf %1760, %4 : vector<16x128xf32>
    %1762 = arith.subf %1759, %1761 : vector<16x128xf32>
    %1763 = vector.broadcast %1616 : f32 to vector<16x128xf32>
    %1764 = arith.mulf %1763, %1633 : vector<16x128xf32>
    %1765 = arith.mulf %1764, %1723 : vector<16x128xf32>
    %1766 = arith.subf %1762, %1765 : vector<16x128xf32>
    %1767 = arith.mulf %4, %1633 : vector<16x128xf32>
    %1768 = arith.mulf %1767, %1721 : vector<16x128xf32>
    %1769 = arith.subf %1766, %1768 : vector<16x128xf32>
    %1770 = arith.mulf %1726, %1769 : vector<16x128xf32>
    %1771 = arith.mulf %1624, %1723 : vector<16x128xf32>
    %1772 = arith.mulf %4, %1633 : vector<16x128xf32>
    %1773 = arith.subf %1771, %1772 : vector<16x128xf32>
    %1774 = arith.mulf %1728, %1773 : vector<16x128xf32>
    %cst_332 = arith.constant dense<0.000000e+00> : vector<16xf32>
    %1775 = vector.multi_reduction <add>, %1741, %cst_332 [1] : vector<16x128xf32> to vector<16xf32>
    %1776 = vector.shape_cast %1775 : vector<16xf32> to vector<16x1xf32>
    %cst_333 = arith.constant dense<0.000000e+00> : vector<1xf32>
    %1777 = vector.multi_reduction <add>, %1776, %cst_333 [0] : vector<16x1xf32> to vector<1xf32>
    %1778 = vector.shape_cast %1777 : vector<1xf32> to vector<1x1xf32>
    %1779 = vector.broadcast %1616 : f32 to vector<1x1xf32>
    %1780 = arith.mulf %1779, %1778 : vector<1x1xf32>
    %cst_334 = arith.constant dense<0.000000e+00> : vector<16xf32>
    %1781 = vector.multi_reduction <add>, %1751, %cst_334 [1] : vector<16x128xf32> to vector<16xf32>
    %1782 = vector.shape_cast %1781 : vector<16xf32> to vector<16x1xf32>
    %cst_335 = arith.constant dense<0.000000e+00> : vector<1xf32>
    %1783 = vector.multi_reduction <add>, %1782, %cst_335 [0] : vector<16x1xf32> to vector<1xf32>
    %1784 = vector.shape_cast %1783 : vector<1xf32> to vector<1x1xf32>
    %1785 = vector.broadcast %1616 : f32 to vector<1x1xf32>
    %1786 = arith.mulf %1785, %1784 : vector<1x1xf32>
    %cst_336 = arith.constant dense<0.000000e+00> : vector<16xf32>
    %1787 = vector.multi_reduction <add>, %1752, %cst_336 [1] : vector<16x128xf32> to vector<16xf32>
    %1788 = vector.shape_cast %1787 : vector<16xf32> to vector<16x1xf32>
    %cst_337 = arith.constant dense<0.000000e+00> : vector<1xf32>
    %1789 = vector.multi_reduction <add>, %1788, %cst_337 [0] : vector<16x1xf32> to vector<1xf32>
    %1790 = vector.shape_cast %1789 : vector<1xf32> to vector<1x1xf32>
    %1791 = vector.broadcast %1616 : f32 to vector<1x1xf32>
    %1792 = arith.mulf %1791, %1790 : vector<1x1xf32>
    %cst_338 = arith.constant dense<0.000000e+00> : vector<16xf32>
    %1793 = vector.multi_reduction <add>, %1757, %cst_338 [1] : vector<16x128xf32> to vector<16xf32>
    %1794 = vector.shape_cast %1793 : vector<16xf32> to vector<16x1xf32>
    %cst_339 = arith.constant dense<0.000000e+00> : vector<1xf32>
    %1795 = vector.multi_reduction <add>, %1794, %cst_339 [0] : vector<16x1xf32> to vector<1xf32>
    %1796 = vector.shape_cast %1795 : vector<1xf32> to vector<1x1xf32>
    %1797 = vector.broadcast %1616 : f32 to vector<1x1xf32>
    %1798 = arith.mulf %1797, %1796 : vector<1x1xf32>
    %cst_340 = arith.constant dense<0.000000e+00> : vector<16xf32>
    %1799 = vector.multi_reduction <add>, %1770, %cst_340 [1] : vector<16x128xf32> to vector<16xf32>
    %1800 = vector.shape_cast %1799 : vector<16xf32> to vector<16x1xf32>
    %cst_341 = arith.constant dense<0.000000e+00> : vector<1xf32>
    %1801 = vector.multi_reduction <add>, %1800, %cst_341 [0] : vector<16x1xf32> to vector<1xf32>
    %1802 = vector.shape_cast %1801 : vector<1xf32> to vector<1x1xf32>
    %1803 = vector.broadcast %1616 : f32 to vector<1x1xf32>
    %1804 = arith.mulf %1803, %1802 : vector<1x1xf32>
    %cst_342 = arith.constant dense<0.000000e+00> : vector<16xf32>
    %1805 = vector.multi_reduction <add>, %1774, %cst_342 [1] : vector<16x128xf32> to vector<16xf32>
    %1806 = vector.shape_cast %1805 : vector<16xf32> to vector<16x1xf32>
    %cst_343 = arith.constant dense<0.000000e+00> : vector<1xf32>
    %1807 = vector.multi_reduction <add>, %1806, %cst_343 [0] : vector<16x1xf32> to vector<1xf32>
    %1808 = vector.shape_cast %1807 : vector<1xf32> to vector<1x1xf32>
    %1809 = vector.broadcast %1616 : f32 to vector<1x1xf32>
    %1810 = arith.mulf %1809, %1808 : vector<1x1xf32>
    %cst_344 = arith.constant 0.000000e+00 : f32
    %1811 = vector.broadcast %cst_344 : f32 to vector<1x8xf32>
    %c0_i32_345 = arith.constant 0 : i32
    %1812 = vector.broadcast %c0_i32_345 : i32 to vector<1x8xi32>
    %1813 = arith.cmpi eq, %10, %1812 : vector<1x8xi32>
    %1814 = vector.shape_cast %1780 : vector<1x1xf32> to vector<1x1xf32>
    %1815 = vector.broadcast %1814 : vector<1x1xf32> to vector<1x8xf32>
    %1816 = arith.select %1813, %1815, %1811 : vector<1x8xi1>, vector<1x8xf32>
    %c1_i32_346 = arith.constant 1 : i32
    %1817 = vector.broadcast %c1_i32_346 : i32 to vector<1x8xi32>
    %1818 = arith.cmpi eq, %10, %1817 : vector<1x8xi32>
    %1819 = vector.shape_cast %1786 : vector<1x1xf32> to vector<1x1xf32>
    %1820 = vector.broadcast %1819 : vector<1x1xf32> to vector<1x8xf32>
    %1821 = arith.select %1818, %1820, %1816 : vector<1x8xi1>, vector<1x8xf32>
    %c2_i32_347 = arith.constant 2 : i32
    %1822 = vector.broadcast %c2_i32_347 : i32 to vector<1x8xi32>
    %1823 = arith.cmpi eq, %10, %1822 : vector<1x8xi32>
    %1824 = vector.shape_cast %1792 : vector<1x1xf32> to vector<1x1xf32>
    %1825 = vector.broadcast %1824 : vector<1x1xf32> to vector<1x8xf32>
    %1826 = arith.select %1823, %1825, %1821 : vector<1x8xi1>, vector<1x8xf32>
    %c3_i32_348 = arith.constant 3 : i32
    %1827 = vector.broadcast %c3_i32_348 : i32 to vector<1x8xi32>
    %1828 = arith.cmpi eq, %10, %1827 : vector<1x8xi32>
    %1829 = vector.shape_cast %1798 : vector<1x1xf32> to vector<1x1xf32>
    %1830 = vector.broadcast %1829 : vector<1x1xf32> to vector<1x8xf32>
    %1831 = arith.select %1828, %1830, %1826 : vector<1x8xi1>, vector<1x8xf32>
    %c4_i32_349 = arith.constant 4 : i32
    %1832 = vector.broadcast %c4_i32_349 : i32 to vector<1x8xi32>
    %1833 = arith.cmpi eq, %10, %1832 : vector<1x8xi32>
    %1834 = vector.shape_cast %1804 : vector<1x1xf32> to vector<1x1xf32>
    %1835 = vector.broadcast %1834 : vector<1x1xf32> to vector<1x8xf32>
    %1836 = arith.select %1833, %1835, %1831 : vector<1x8xi1>, vector<1x8xf32>
    %c5_i32_350 = arith.constant 5 : i32
    %1837 = vector.broadcast %c5_i32_350 : i32 to vector<1x8xi32>
    %1838 = arith.cmpi eq, %10, %1837 : vector<1x8xi32>
    %1839 = vector.shape_cast %1810 : vector<1x1xf32> to vector<1x1xf32>
    %1840 = vector.broadcast %1839 : vector<1x1xf32> to vector<1x8xf32>
    %1841 = arith.select %1838, %1840, %1836 : vector<1x8xi1>, vector<1x8xf32>
    %c7 = arith.constant 7 : index
    %c0_351 = arith.constant 0 : index
    %1842 = vector.load %arg7[%c7, %c0_351] : memref<8x8xf32, #tpu.memory_space<vmem>>, vector<1x8xf32>
    tpu.vector_store %arg7[%c7, %c0_351], %1841 {strides = array<i32>} : memref<8x8xf32, #tpu.memory_space<vmem>>, vector<1x8xf32>,
    return
  }
  func.func @transform_0(%arg0: i32) -> i32 {
    %c0_i32 = arith.constant 0 : i32
    %c0_i32_0 = arith.constant 0 : i32
    return %c0_i32 : i32
  }
  func.func @transform_1(%arg0: i32) -> i32 {
    %c0_i32 = arith.constant 0 : i32
    %c0_i32_0 = arith.constant 0 : i32
    return %c0_i32 : i32
  }
  func.func @transform_2(%arg0: i32) -> i32 {
    %c0_i32 = arith.constant 0 : i32
    %c0_i32_0 = arith.constant 0 : i32
    return %c0_i32 : i32
  }
  func.func @transform_3(%arg0: i32) -> (i32, i32) {
    %c0_i32 = arith.constant 0 : i32
    %c0_i32_0 = arith.constant 0 : i32
    %c0_i32_1 = arith.constant 0 : i32
    return %c0_i32, %c0_i32_0 : i32, i32
  }
  func.func @transform_4(%arg0: i32) -> (i32, i32) {
    %c0_i32 = arith.constant 0 : i32
    %c0_i32_0 = arith.constant 0 : i32
    %c0_i32_1 = arith.constant 0 : i32
    return %c0_i32, %c0_i32_0 : i32, i32
  }
  func.func @transform_5(%arg0: i32) -> (i32, i32) {
    %c0_i32 = arith.constant 0 : i32
    %c0_i32_0 = arith.constant 0 : i32
    %c0_i32_1 = arith.constant 0 : i32
    return %c0_i32, %c0_i32_0 : i32, i32
  }
  func.func @transform_6(%arg0: i32) -> (i32, i32) {
    %c0_i32 = arith.constant 0 : i32
    %c0_i32_0 = arith.constant 0 : i32
    return %arg0, %c0_i32 : i32, i32
  }
}

</mosaic_0001>

<bundles_post_ra>
// kernel: tpu_custom_call.1
= control target key start
LH: loop header
LB: loop body
LE: loop exit
PB: predicated region body
PF: predicated region fallthrough
CT: control target
= control target key end

     0   :  { %11 = vsyncpa [#allocation5], 0  ;;  %s8172_s0 = inlined_call_operand.hbm [shape: f32[3], index: 0, kind: input, shape index: {}]   ;;  %s8173_s1 = inlined_call_operand.hbm [shape: f32[8], index: 1, kind: input, shape index: {}]   ;;  %s8174_s2 = inlined_call_operand.vmem [shape: f32[8], index: 2, kind: input, shape index: {}]   ;;  %s8175_s3 = inlined_call_operand.hbm [shape: f32[16,128], index: 3, kind: input, shape index: {}]   ;;  %s8176_s4 = inlined_call_operand.hbm [shape: f32[16,128], index: 4, kind: input, shape index: {}]   ;;  %s8177_s5 = inlined_call_operand.hbm [shape: f32[16,128], index: 5, kind: input, shape index: {}]   ;;  %s8178_s6 = inlined_call_operand.hbm [shape: f32[8,8], index: 6, kind: output, shape index: {}]  }
   0x1   :  { %12 = vsyncpa [#allocation8], 0 }
   0x2   :  { %13 = vsyncpa [#allocation6], 0 }
   0x3   :  { %14 = vsyncpa [#allocation3], 0 }
   0x4   :  { %15 = vsyncpa [#allocation12], 0 }
   0x5   :  { %16 = vsyncpa [#allocation4], 0  ;;  %s61_s23 = sshll.u32 %s8176_s4, 4  ;;  %s3900_s24 = smov [#allocation11]   ;;  %s62_s23 = int_to_ptr.hbm [resolvable:$true] %s61_s23 }
   0x6   :  { %s63_s25 = sshll.u32 %s3900_s24, 4  ;;  %s22_s28 = sshll.u32 %s8172_s0, 4  ;;  %s64_s25 = int_to_ptr.vmem [resolvable:$true] %s63_s25  ;;  %s23_s28 = int_to_ptr.hbm [resolvable:$true] %s22_s28 }
   0x7   :  { %s3901_s29 = smov 128   ;;  %s3902_s30 = smov 8  }
   0x8   :  { %69 = dma.hbm_to_vmem [thread:$0]  %s62_s23, 256, %s64_s25, [#allocation12], %s3901_s29, %s3901_s29, %s3902_s30  }
   0x9   :  { %s3903_s7 = smov [#allocation2]   ;;  %s31_s10 = sshll.u32 %s8173_s1, 4  ;;  %s32_s10 = int_to_ptr.hbm [resolvable:$true] %s31_s10 }
   0xa   :  { %25 = dma.hbm_to_smem %s23_s28, 16, %s3903_s7, [#allocation5]  }
   0xb   :  { %s40_s12 = sshll.u32 %s8174_s2, 4  ;;  %s3904_s13 = smov [#allocation7]   ;;  %s41_s12 = int_to_ptr.vmem [resolvable:$true] %s40_s12 }
   0xc   :  { %34 = dma.hbm_to_smem %s32_s10, 16, %s3904_s13, [#allocation8]  }
   0xd   :  { %s3905_s14 = smov [#allocation9]   ;;  %s48_s16 = sshll.u32 %s8175_s3, 4  ;;  %s49_s16 = int_to_ptr.hbm [resolvable:$true] %s48_s16 }
   0xe   :  { %43 = dma.vmem_to_smem %s41_s12, 16, %s3905_s14, [#allocation6]  }
   0xf   :  { %s3906_s17 = smov [#allocation10]   ;;  %s74_s20 = sshll.u32 %s8177_s5, 4  ;;  %s75_s20 = int_to_ptr.hbm [resolvable:$true] %s74_s20 }
  0x10   :  { %s50_s18 = sshll.u32 %s3906_s17, 4  ;;  %s3907_s2 = smov [#allocation13]   ;;  %s51_s18 = int_to_ptr.vmem [resolvable:$true] %s50_s18 }
  0x11   :  { %56 = dma.hbm_to_vmem [thread:$0]  %s49_s16, 256, %s51_s18, [#allocation3], %s3901_s29, %s3901_s29, %s3902_s30  }
  0x12   :  { %s76_s21 = sshll.u32 %s3907_s2, 4  ;;  %s77_s21 = int_to_ptr.vmem [resolvable:$true] %s76_s21 }
  0x13   :  { %82 = dma.hbm_to_vmem [thread:$0]  %s75_s20, 256, %s77_s21, [#allocation12], %s3901_s29, %s3901_s29, %s3902_s30  }
  0x14   :  { %3888 = dma.done.wait [#allocation5], 16  }
  0x15   :  { %3889 = vsyncadd [#allocation5], 4294967280 }
  0x16   :  { %3890 = dma.done.wait [#allocation8], 16  }
  0x17   :  { %3891 = vsyncadd [#allocation8], 4294967280 }
  0x18   :  { %3892 = dma.done.wait [#allocation6], 16  }
  0x19   :  { %3893 = vsyncadd [#allocation6], 4294967280 }
  0x1a   :  { %3894 = dma.done.wait [#allocation3], 256  }
  0x1b   :  { %3895 = vsyncadd [#allocation3], 4294967040 }
  0x1c   :  { %3896 = dma.done.wait [#allocation12], 512  }
  0x1d   :  { %3897 = vsyncadd [#allocation12], 4294966784 }
  0x1e   :  { %107 = sfence }
  0x1f   :  { %v3964_v0 = vld [vmem:[#allocation10] sm:$0xff]  ;;  %v3966_v1 = vld [vmem:[#allocation11] sm:$0xff]  ;;  %v3968_v2 = vld [vmem:[#allocation10 + $0x8] sm:$0xff]  ;;  %s3970_s3 = sld [smem:[#allocation7]] }
  0x20   :  { %v3972_v3 = vld [vmem:[#allocation11 + $0x8] sm:$0xff]  ;;  %v3976_v4 = vmul.f32 %v3964_v0, %v3964_v0  ;;  %v120_v5 = vmul.f32 %v3966_v1, %v3966_v1  ;;  %s3980_s5 = sld [smem:[#allocation7 + $0x1]]  ;;  %v3984_v6 = vmul.f32 %v3968_v2, %v3968_v2 }
  0x21   :  { %8393 = vst [vmem:[#allocation21_spill] sm:$0xff] %v3972_v3  ;;  %v121_v7 = vmul.f32 %v3972_v3, %v3972_v3  ;;  %s4025_s24 = sld [smem:[#allocation7 + $0x2]] }
  0x22   :  { %8394 = vst [vmem:[#allocation22_spill] sm:$0xff] %v3976_v4  ;;  %v3989_v8 = vadd.f32 %v120_v5, %v3976_v4  ;;  %s108_s25 = sld [smem:[#allocation2]] }
  0x23   :  { %8395 = vst [vmem:[#allocation23_spill] sm:$0xff] %v3984_v6  ;;  %v3994_v9 = vadd.f32 %v121_v7, %v3984_v6  ;;  %s4042_s27 = sld [smem:[#allocation2 + $0x1]] }
  0x24   :  { %8396 = vst [vmem:[#allocation24_spill] sm:$0xff] %v3989_v8  ;;  %s3341_s28 = sld [smem:[#allocation2 + $0x2]] }
  0x25   :  { %s128_s22 = smul.f32 %s3970_s3, %s3970_s3  ;;  %8397 = vst [vmem:[#allocation25_spill] sm:$0xff] %v3994_v9  ;;  %v4062_v48 = vstv %s3970_s3  ;;  %s4221_s29 = sld [smem:[#allocation9]] }
  0x26   :  { %s536_s23 = smul.f32 %s3980_s5, %s3980_s5  ;;  %8404 = vst [vmem:[#allocation32_spill] sm:$0xff] %v4062_v48  ;;  %v4073_v57 = vstv %s3980_s5  ;;  %s4391_s30 = sld [smem:[#allocation9 + $0x1]] }
  0x27   :  { %v3996_v10 = vstv %s128_s22  ;;  %s934_s26 = smul.f32 %s4025_s24, %s4025_s24  ;;  %8405 = vst [vmem:[#allocation33_spill] sm:$0xff] %v4073_v57  ;;  %s4486_s7 = sld [smem:[#allocation7 + $0x3]] }
  0x28   :  { %8398 = vst [vmem:[#allocation26_spill] sm:$0xff] %v3996_v10  ;;  %v4002_v11 = vadd.f32 %v3996_v10, %v3989_v8  ;;  %v4006_v12 = vadd.f32 %v3996_v10, %v3976_v4  ;;  %v4008_v13 = vstv %s536_s23  ;;  %v4021_v16 = vadd.f32 %v3996_v10, %v3994_v9  ;;  %s4635_s9 = sld [smem:[#allocation9 + $0x2]]  ;;  %s379_s4 = smul.f32 2.0, %s3970_s3 }
  0x29   :  { %8400 = vst [vmem:[#allocation28_spill] sm:$0xff] %v4008_v13  ;;  %v4013_v14 = vadd.f32 %v4008_v13, %v3989_v8  ;;  %v4017_v15 = vadd.f32 %v4008_v13, %v3976_v4  ;;  %v4031_v19 = vadd.f32 %v3996_v10, %v3984_v6  ;;  %v4044_v38 = vstv %s934_s26  ;;  %s5028_s10 = sld [smem:[#allocation9 + $0x3]]  ;;  %s784_s11 = smul.f32 2.0, %s3980_s5 }
  0x2a   :  { %8399 = vst [vmem:[#allocation27_spill] sm:$0xff] %v4006_v12  ;;  %3415 = vlog2.f32 %v4002_v11  ;;  %vm240_vm0 = vweird.f32 %v4006_v12  ;;  %v4051_v42 = vstv %s108_s25  ;;  %v4057_v45 = vadd.f32 %v4044_v38, %v3989_v8  ;;  %s1182_s12 = smul.f32 2.0, %s4025_s24  ;;  %s5822_s14 = sld [smem:[#allocation7 + $0x4]] }
  0x2b   :  { %3417 = vrsqrt.f32 %v4006_v12  ;;  %8401 = vst [vmem:[#allocation29_spill] sm:$0xff] %v4031_v19  ;;  %vm645_vm3 = vweird.f32 %v4017_v15  ;;  %v4078_v59 = vstv %s4042_s27  ;;  %v4080_v60 = vstv %s3341_s28  ;;  %s5961_s15 = sld [smem:[#allocation7 + $0x5]]  ;;  %s3910_s25 = smov [#allocation14]  }
  0x2c   :  { %3419 = vlog2.f32 %v4013_v14  ;;  %8402 = vst [vmem:[#allocation30_spill] sm:$0xff] %v4044_v38  ;;  %v4090_v5 = vadd.f32 %v4008_v13, %v3984_v6  ;;  %vm183_vm6 = vweird.f32 %v4002_v11  ;;  %vm588_vm9 = vweird.f32 %v4013_v14  ;;  %s6086_s17 = sld [smem:[#allocation9 + $0x4]]  ;;  %s3324_s26 = sshll.u32 %s3910_s25, 4  ;;  %s3325_s26 = int_to_ptr.vmem [resolvable:$true] %s3324_s26 }
  0x2d   :  { %3421 = vrsqrt.f32 %v4017_v15  ;;  %8403 = vst [vmem:[#allocation31_spill] sm:$0xff] %v4051_v42  ;;  %vm250_vm12 = vweird.f32 %v4031_v19  ;;  %v203_v6 = vand.u32 2147483648, %v4021_v16  ;;  %s1332_s8 = smul.f32 %s4486_s7, %s4486_s7  ;;  %s6493_s19 = sld [smem:[#allocation7 + $0x6]] }
  0x2e   :  { %3423 = vlog2.f32 %v4021_v16  ;;  %8406 = vst [vmem:[#allocation34_spill] sm:$0xff] %v4078_v59  ;;  %s1580_s13 = smul.f32 2.0, %s4486_s7  ;;  %s6554_s20 = sld [smem:[#allocation9 + $0x5]] }
  0x2f   :  { %3425 = vrcp.f32 %v4002_v11  ;;  %8407 = vst [vmem:[#allocation35_spill] sm:$0xff] %v4080_v60  ;;  %s7001_s21 = sld [smem:[#allocation7 + $0x7]] }
  0x30   :  { %v3416_v17 = vpop.eup %3415  ;;  %3427 = vrsqrt.f32 %v4031_v19  ;;  %s1730_s0 = smul.f32 %s5822_s14, %s5822_s14  ;;  %s7156_s5 = sld [smem:[#allocation9 + $0x6]] }
  0x31   :  { %v3418_v18 = vpop.eup %3417  ;;  %v135_v20 = vmul.f32 0.6931472, %v3416_v17  ;;  %s2128_s16 = smul.f32 %s5961_s15, %s5961_s15  ;;  %s7643_s23 = sld [smem:[#allocation9 + $0x7]] }
  0x32   :  { %v3420_v21 = vpop.eup %3419  ;;  %v235_v22 = vmul.f32 %v3418_v18, %v4006_v12  ;;  %vm241_vm1 = vweird.f32 %v3418_v18  ;;  %s1978_s18 = smul.f32 2.0, %s5822_s14 }
  0x33   :  { %v3422_v23 = vpop.eup %3421  ;;  %v138_v24 = vmul.f32 -0.33333334, %v135_v20  ;;  %v543_v25 = vmul.f32 0.6931472, %v3420_v21  ;;  %vm242_vm2 = vmor %vm240_vm0, %vm241_vm1  ;;  %s2526_s1 = smul.f32 %s6493_s19, %s6493_s19 }
  0x34   :  { %v3424_v26 = vpop.eup %3423  ;;  %v236_v27 = vmul.f32 %v3418_v18, %v235_v22  ;;  %v640_v28 = vmul.f32 %v3422_v23, %v4017_v15  ;;  %vm646_vm4 = vweird.f32 %v3422_v23  ;;  %s2376_s2 = smul.f32 2.0, %s5961_s15 }
  0x35   :  { %v140_v29 = vmul.f32 1.442695, %v138_v24  ;;  %v546_v30 = vmul.f32 -0.33333334, %v543_v25  ;;  %v137_v33 = vmul.f32 0.6931472, %v3424_v26  ;;  %v4040_v35 = vpop.eup %3425  ;;  %vm647_vm5 = vmor %vm645_vm3, %vm646_vm4  ;;  %s2924_s3 = smul.f32 %s7001_s21, %s7001_s21 }
  0x36   :  { %v237_v31 = vmul.f32 0.5, %v236_v27  ;;  %v641_v32 = vmul.f32 %v3422_v23, %v640_v28  ;;  %v4049_v41 = vpop.eup %3427  ;;  %v179_v43 = vmul.f32 %v4040_v35, %v4002_v11  ;;  %vm184_vm7 = vweird.f32 %v4040_v35  ;;  %s2774_s22 = smul.f32 2.0, %s6493_s19 }
  0x37   :  { %3429 = vpow2.f32 %v140_v29  ;;  %v548_v34 = vmul.f32 1.442695, %v546_v30  ;;  %v139_v40 = vmul.f32 -0.33333334, %v137_v33  ;;  %v245_v58 = vmul.f32 %v4049_v41, %v4031_v19  ;;  %vm4125_vm8 = vmor %vm183_vm6, %vm184_vm7 }
  0x38   :  { %v238_v36 = vsub.f32 1.5, %v237_v31  ;;  %v642_v37 = vmul.f32 0.5, %v641_v32  ;;  %v180_v53 = vsub.f32 1.0, %v179_v43  ;;  %v189_v28 = vand.u32 2147483648, %v4002_v11 }
  0x39   :  { %3431 = vpow2.f32 %v548_v34  ;;  %v142_v51 = vmul.f32 1.442695, %v139_v40  ;;  %v246_v24 = vmul.f32 %v4049_v41, %v245_v58  ;;  %v4121_v34 = vadd.f32 %v4044_v38, %v3976_v4 }
  0x3a   :  { %v239_v39 = vmul.f32 %v3418_v18, %v238_v36  ;;  %3433 = vrcp.f32 %v4013_v14  ;;  %v643_v44 = vsub.f32 1.5, %v642_v37  ;;  %v181_v7 = vmul.f32 %v4040_v35, %v180_v53 }
  0x3b   :  { %3435 = vlog2.f32 %v4057_v45  ;;  %8411 = vst [vmem:[#allocation39_spill] sm:$0xff] %v4121_v34  ;;  %v190_v58 = vor.u32 1.1754944e-38, %v189_v28  ;;  %v594_v28 = vand.u32 2147483648, %v4013_v14  ;;  %vm251_vm13 = vweird.f32 %v4049_v41 }
  0x3c   :  { %v4059_v46 = vsel %vm242_vm2, %v3418_v18, %v239_v39  ;;  %v644_v54 = vmul.f32 %v3422_v23, %v643_v44  ;;  %3437 = vpow2.f32 %v142_v51  ;;  %v182_v31 = vadd.f32 %v4040_v35, %v181_v7 }
  0x3d   :  { %v3430_v47 = vpop.eup %3429  ;;  %v254_v50 = vmul.f32 %v4059_v46, %v4006_v12  ;;  %vm3908_vm2 = vmmov 1  }
  0x3e   :  { %v145_v49 = vmul.f32 %v3430_v47, %v4051_v42  ;;  %v4097_v20 = vsel %vm647_vm5, %v3422_v23, %v644_v54  ;;  %vm252_vm5 = vmor %vm250_vm12, %vm251_vm13 }
  0x3f   :  { %v3432_v52 = vpop.eup %3431  ;;  %v659_v30 = vmul.f32 %v4097_v20, %v4017_v15 }
  0x40   :  { %v4069_v55 = vpop.eup %3433  ;;  %v148_v56 = vmul.f32 %v4062_v48, %v145_v49  ;;  %v4083_v61 = vmul.f32 %v3432_v52, %v4051_v42  ;;  %v260_v40 = vmul.f32 %v145_v49, %v3996_v10  ;;  %v4135_v52 = vmul.f32 0.5, %v246_v24 }
  0x41   :  { %v584_v18 = vmul.f32 %v4069_v55, %v4013_v14  ;;  %v3436_v25 = vpop.eup %3435  ;;  %v186_v49 = vsel %vm4125_vm8, %v4040_v35, %v182_v31  ;;  %vm589_vm10 = vweird.f32 %v4069_v55  ;;  %v592_v31 = vand.u32 2147483647, %v4013_v14 }
  0x42   :  { %v4086_v62 = vadd.f32 %v148_v56, %v3966_v1  ;;  %v282_v63 = vmul.f32 %v254_v50, %v148_v56  ;;  %v555_v17 = vmul.f32 %v4073_v57, %v4083_v61  ;;  %v3438_v36 = vpop.eup %3437  ;;  %v941_v44 = vmul.f32 0.6931472, %v3436_v25  ;;  %vm4174_vm14 = vmor %vm588_vm9, %vm589_vm10 }
  0x43   :  { %v585_v33 = vsub.f32 1.0, %v584_v18  ;;  %v248_v14 = vsub.f32 1.5, %v4135_v52  ;;  %vm593_vm0 = vcmp.eq.f32.partialorder %v592_v31, 8.507059e+37  ;;  %vm197_vm10 = vweird.f32 %v4021_v16 }
  0x44   :  { %8408 = vst [vmem:[#allocation36_spill] sm:$0xff] %v4086_v62  ;;  %v152_v21 = vmul.f32 %v4086_v62, %v4086_v62  ;;  %v262_v22 = vmul.f32 2.0, %v4086_v62  ;;  %3439 = vrcp.f32 %v282_v63  ;;  %v268_v26 = vmul.f32 %v4086_v62, %v148_v56 }
  0x45   :  { %v4107_v27 = vadd.f32 %v555_v17, %v3966_v1  ;;  %v687_v51 = vmul.f32 %v659_v30, %v555_v17  ;;  %v187_v56 = vand.u32 2147483647, %v4002_v11 }
  0x46   :  { %v4110_v23 = vadd.f32 %v152_v21, %v4006_v12  ;;  %v264_v29 = vmul.f32 %v262_v22, %v4086_v62  ;;  %v586_v21 = vmul.f32 %v4069_v55, %v585_v33 }
  0x47   :  { %8409 = vst [vmem:[#allocation37_spill] sm:$0xff] %v4107_v27  ;;  %v559_v32 = vmul.f32 %v4107_v27, %v4107_v27  ;;  %v4150_v11 = vmul.f32 %v4107_v27, %v555_v17  ;;  %vm4156_vm11 = vcmp.eq.f32.partialorder %v187_v56, 8.507059e+37 }
  0x48   :  { %8410 = vst [vmem:[#allocation38_spill] sm:$0xff] %v4110_v23  ;;  %v162_v37 = vmul.f32 %v4080_v60, %v4110_v23  ;;  %v266_v43 = vsub.f32 %v4110_v23, %v264_v29  ;;  %v284_v47 = vsub.f32 %v4110_v23, %v268_v26  ;;  %v4164_v29 = vmul.f32 %v3438_v36, %v4051_v42 }
  0x49   :  { %v4133_v50 = vadd.f32 %v559_v32, %v4017_v15  ;;  %v587_v30 = vadd.f32 %v4069_v55, %v586_v21  ;;  %v156_v39 = vmul.f32 %v4110_v23, %v4110_v23 }
  0x4a   :  { %v3440_v53 = vpop.eup %3439  ;;  %v164_v54 = vadd.f32 1.0, %v162_v37  ;;  %v270_v63 = vadd.f32 %v268_v26, %v266_v43  ;;  %v256_v26 = vmul.f32 %v4059_v46, %v4059_v46  ;;  %v4182_v36 = vmul.f32 %v4062_v48, %v4164_v29 }
  0x4b   :  { %8414 = vst [vmem:[#allocation40_spill] sm:$0xff] %v4133_v50  ;;  %v4141_v7 = vmul.f32 %v3440_v53, %v284_v47  ;;  %v567_v18 = vmul.f32 %v4133_v50, %v4080_v60  ;;  %v689_v33 = vsub.f32 %v4133_v50, %v4150_v11  ;;  %v4184_v37 = vmul.f32 -0.33333334, %v941_v44 }
  0x4c   :  { %3441 = vlog2.f32 %v164_v54  ;;  %v4146_v22 = vmul.f32 %v270_v63, %v260_v40  ;;  %v4192_v43 = vsel %vm4156_vm11, %v190_v58, %v186_v49  ;;  %v258_v47 = vmul.f32 %v256_v26, %v4059_v46 }
  0x4d   :  { %v4153_v24 = vand.u32 2147483647, %v4141_v7  ;;  %v569_v25 = vadd.f32 1.0, %v567_v18  ;;  %3443 = vrcp.f32 %v687_v51  ;;  %8419 = vst [vmem:[#allocation41_spill] sm:$0xff] %v4192_v43  ;;  %v278_v51 = vmul.f32 %v4110_v23, %v3964_v0 }
  0x4e   :  { %v595_v44 = vor.u32 1.1754944e-38, %v594_v28  ;;  %v591_v56 = vsel %vm4174_vm14, %v4069_v55, %v587_v30  ;;  %v4202_v52 = vadd.f32 %v4182_v36, %v3972_v3  ;;  %v159_v49 = vmul.f32 %v4078_v59, %v156_v39 }
  0x4f   :  { %3445 = vrcp.f32 %v4153_v24  ;;  %v302_v17 = vadd.f32 1.0, %v4153_v24  ;;  %vm292_vm15 = vcmp.gt.f32.partialorder %v4153_v24, 2.4142137  ;;  %vm294_vm1 = vcmp.gt.f32.partialorder %v4153_v24, 0.41421357 }
  0x50   :  { %3447 = vlog2.f32 %v569_v25  ;;  %8420 = vst [vmem:[#allocation42_spill] sm:$0xff] %v4202_v52  ;;  %vm4208_vm3 = vmxor %vm292_vm15, %vm3908_vm2  ;;  %v3342_v58 = vadd.f32 -1.0, %v4153_v24  ;;  %v274_v21 = vmul.f32 %v256_v26, %v4192_v43  ;;  %v4219_v25 = vmul.f32 %v4192_v43, %v4192_v43 }
  0x51   :  { %3449 = vrcp.f32 %v302_v17  ;;  %v4223_v28 = vmul.f32 %v278_v51, %v258_v47  ;;  %v4225_v17 = vsel %vm593_vm0, %v595_v44, %v591_v56  ;;  %v667_v30 = vmul.f32 2.0, %v4107_v27  ;;  %vm4235_vm4 = vmand %vm294_vm1, %vm4208_vm3 }
  0x52   :  { %v3442_v40 = vpop.eup %3441  ;;  %8423 = vst [vmem:[#allocation43_spill] sm:$0xff] %v4225_v17  ;;  %v153_v47 = vmul.f32 %v4202_v52, %v4202_v52  ;;  %v563_v44 = vmul.f32 %v4133_v50, %v4133_v50  ;;  %3451 = vrcp.f32 %v4021_v16  ;;  %v249_v46 = vmul.f32 %v4049_v41, %v248_v14 }
  0x53   :  { %v3444_v53 = vpop.eup %3443  ;;  %v167_v54 = vmul.f32 0.6931472, %v3442_v40  ;;  %vm342_vm11 = vcmp.lt.f32.partialorder %v4141_v7, 0.0  ;;  %v261_v3 = vmul.f32 %v4164_v29, %v3996_v10 }
  0x54   :  { %v4213_v63 = vmul.f32 %v3444_v53, %v689_v33  ;;  %v669_v53 = vmul.f32 %v667_v30, %v4107_v27  ;;  %v665_v30 = vmul.f32 %v4083_v61, %v4008_v13  ;;  %v4280_v61 = vsel %vm252_vm5, %v4049_v41, %v249_v46 }
  0x55   :  { %v3446_v55 = vpop.eup %3445  ;;  %v170_v18 = vmul.f32 -2.8333333, %v167_v54  ;;  %v8429_v27 = vstv %s4221_s29 }
  0x56   :  { %v3448_v35 = vpop.eup %3447  ;;  %v4229_v31 = vand.u32 2147483647, %v4213_v63  ;;  %v306_v39 = vsub.f32 0.0, %v3446_v55  ;;  %v4313_v43 = vmul.f32 %v8429_v27, %v3964_v0  ;;  %vm747_vm3 = vcmp.lt.f32.partialorder %v4213_v63, 0.0 }
  0x57   :  { %v3450_v32 = vpop.eup %3449  ;;  %v172_v33 = vmul.f32 1.442695, %v170_v18  ;;  %v572_v40 = vmul.f32 0.6931472, %v3448_v35  ;;  %v671_v18 = vsub.f32 %v4133_v50, %v669_v53 }
  0x58   :  { %v310_v51 = vmul.f32 %v3450_v32, %v3342_v58  ;;  %v707_v56 = vadd.f32 1.0, %v4229_v31  ;;  %v4254_v58 = vmul.f32 %v4225_v17, %v4225_v17  ;;  %v4267_v32 = vadd.f32 %v153_v47, %v4031_v19  ;;  %v4282_v47 = vpop.eup %3451 }
  0x59   :  { %3453 = vpow2.f32 %v172_v33  ;;  %v575_v54 = vmul.f32 -2.8333333, %v572_v40  ;;  %v675_v40 = vadd.f32 %v4150_v11, %v671_v18  ;;  %vm697_vm6 = vcmp.gt.f32.partialorder %v4229_v31, 2.4142137  ;;  %v4289_v18 = vld [vmem:[#allocation13] sm:$0xff] }
  0x5a   :  { %v312_v55 = vsel %vm4235_vm4, %v310_v51, %v4153_v24  ;;  %3455 = vrcp.f32 %v4229_v31  ;;  %v565_v51 = vmul.f32 %v563_v44, %v4078_v59  ;;  %vm699_vm7 = vcmp.gt.f32.partialorder %v4229_v31, 0.41421357  ;;  %vm4295_vm8 = vmxor %vm697_vm6, %vm3908_vm2 }
  0x5b   :  { %v4262_v14 = vsel %vm292_vm15, %v306_v39, %v312_v55  ;;  %v577_v35 = vmul.f32 1.442695, %v575_v54  ;;  %3457 = vrcp.f32 %v707_v56  ;;  %v4276_v39 = vmul.f32 %v274_v21, %v4146_v22  ;;  %vm4326_vm9 = vmand %vm699_vm7, %vm4295_vm8 }
  0x5c   :  { %v4271_v33 = vmul.f32 %v4262_v14, %v4262_v14  ;;  %v4286_v11 = vmul.f32 %v675_v40, %v665_v30  ;;  %v946_v56 = vmul.f32 1.442695, %v4184_v37  ;;  %v3350_v22 = vadd.f32 -1.0, %v4229_v31 }
  0x5d   :  { %3459 = vpow2.f32 %v577_v35  ;;  %v163_v21 = vmul.f32 %v4080_v60, %v4267_v32  ;;  %v4303_v44 = vstv %s4025_s24  ;;  %v8186_v35 = vmov 0.0   ;;  %s3172_s24 = smul.f32 2.0, %s7001_s21 }
  0x5e   :  { %v322_v53 = vmul.f32 0.080537446, %v4271_v33  ;;  %8428 = vst [vmem:[#allocation44_spill] sm:$0xff] %v4303_v44  ;;  %v316_v30 = vsel %vm4235_vm4, 0.7853982, %v8186_v35  ;;  %v255_v54 = vmul.f32 %v4280_v61, %v4031_v19  ;;  %v193_v62 = vmul.f32 %v4282_v47, %v4021_v16 }
  0x5f   :  { %v3454_v55 = vpop.eup %3453  ;;  %v165_v48 = vadd.f32 1.0, %v163_v21  ;;  %3461 = vrsqrt.f32 %v4121_v34  ;;  %v318_v35 = vsel %vm292_vm15, 1.5707964, %v316_v30  ;;  %vm198_vm12 = vweird.f32 %v4282_v47 }
  0x60   :  { %v3456_v37 = vpop.eup %3455  ;;  %v176_v46 = vmul.f32 %v3454_v55, %v159_v49  ;;  %v3344_v40 = vadd.f32 -0.13877685, %v322_v53  ;;  %3463 = vpow2.f32 %v946_v56  ;;  %v4341_v56 = vmul.f32 %v4313_v43, %v4276_v39  ;;  %vm4413_vm13 = vmor %vm197_vm10, %vm198_vm12 }
  0x61   :  { %v3458_v49 = vpop.eup %3457  ;;  %v711_v27 = vsub.f32 0.0, %v3456_v37  ;;  %3465 = vlog2.f32 %v165_v48  ;;  %v194_v48 = vsub.f32 1.0, %v193_v62  ;;  %vm1043_vm15 = vweird.f32 %v4121_v34 }
  0x62   :  { %v326_v55 = vmul.f32 %v3344_v40, %v4271_v33  ;;  %v4320_v26 = vmul.f32 %v176_v46, %v4289_v18  ;;  %v715_v23 = vmul.f32 %v3458_v49, %v3350_v22  ;;  %v4334_v46 = vadd.f32 %v4008_v13, %v3994_v9 }
  0x63   :  { %v3460_v21 = vpop.eup %3459  ;;  %v661_v49 = vmul.f32 %v4097_v20, %v4097_v20  ;;  %v201_v13 = vand.u32 2147483647, %v4021_v16  ;;  %v204_v16 = vor.u32 1.1754944e-38, %v203_v6  ;;  %vm986_vm8 = vweird.f32 %v4057_v45 }
  0x64   :  { %8430 = vst [vmem:[#allocation45_spill] sm:$0xff] %v4320_v26  ;;  %v328_v40 = vadd.f32 0.19977711, %v326_v55  ;;  %v375_v41 = vmul.f32 %v4219_v25, %v4320_v26  ;;  %v581_v4 = vmul.f32 %v3460_v21, %v565_v51  ;;  %v717_v24 = vsel %vm4326_vm9, %v715_v23, %v4229_v31 }
  0x65   :  { %v4351_v25 = vsel %vm697_vm6, %v711_v27, %v717_v24  ;;  %v4356_v30 = vpop.eup %3461  ;;  %v157_v23 = vmul.f32 %v4267_v32, %v4267_v32  ;;  %v283_v55 = vmul.f32 %v255_v54, %v4182_v36  ;;  %v269_v54 = vmul.f32 %v4202_v52, %v4182_v36 }
  0x66   :  { %v330_v22 = vmul.f32 %v328_v40, %v4271_v33  ;;  %v413_v37 = vmul.f32 %v375_v41, %v4006_v12  ;;  %v4354_v51 = vmul.f32 %v581_v4, %v4289_v18  ;;  %v4362_v62 = vmul.f32 %v4351_v25, %v4351_v25  ;;  %v3464_v21 = vpop.eup %3463 }
  0x67   :  { %v4369_v4 = vmul.f32 %v4133_v50, %v3964_v0  ;;  %v263_v41 = vmul.f32 2.0, %v4202_v52  ;;  %v3466_v24 = vpop.eup %3465  ;;  %v195_v12 = vmul.f32 %v4282_v47, %v194_v48  ;;  %3467 = vrcp.f32 %v283_v55 }
  0x68   :  { %8433 = vst [vmem:[#allocation46_spill] sm:$0xff] %v4354_v51  ;;  %v3346_v27 = vadd.f32 -0.3333295, %v330_v22  ;;  %471 = vadd.xlane.f32.xlu2 %v413_v37  ;;  %v780_v40 = vmul.f32 %v4254_v58, %v4354_v51  ;;  %v727_v26 = vmul.f32 0.080537446, %v4362_v62  ;;  %v1038_v29 = vmul.f32 %v4356_v30, %v4121_v34 }
  0x69   :  { %v169_v50 = vmul.f32 0.6931472, %v3466_v24  ;;  %v265_v58 = vmul.f32 %v263_v41, %v4202_v52  ;;  %3469 = vrcp.f32 %v4057_v45  ;;  %vm4425_vm14 = vcmp.eq.f32.partialorder %v201_v13, 8.507059e+37 }
  0x6a   :  { %v334_v22 = vmul.f32 %v3346_v27, %v4271_v33  ;;  %v818_v37 = vmul.f32 %v780_v40, %v4017_v15  ;;  %v3352_v51 = vadd.f32 -0.13877685, %v727_v26  ;;  %v4389_v33 = vmul.f32 %v3464_v21, %v4051_v42 }
  0x6b   :  { %v171_v9 = vmul.f32 -2.8333333, %v169_v50  ;;  %v267_v36 = vsub.f32 %v4267_v32, %v265_v58  ;;  %v196_v26 = vadd.f32 %v4282_v47, %v195_v12  ;;  %v285_v40 = vsub.f32 %v4267_v32, %v269_v54 }
  0x6c   :  { %v336_v48 = vmul.f32 %v334_v22, %v4262_v14  ;;  %876 = vadd.xlane.f32.xlu1 %v818_v37  ;;  %v731_v27 = vmul.f32 %v3352_v51, %v4362_v62  ;;  %v4401_v24 = vmul.f32 %v4303_v44, %v4389_v33  ;;  %v4404_v21 = vmul.f32 %v661_v49, %v4097_v20 }
  0x6d   :  { %v174_v41 = vmul.f32 1.442695, %v171_v9  ;;  %v271_v50 = vadd.f32 %v269_v54, %v267_v36  ;;  %v8434_v22 = vmov 0.0   ;;  %v3468_v53 = vpop.eup %3467  ;;  %vm1044_vm0 = vweird.f32 %v4356_v30 }
  0x6e   :  { %v338_v55 = vadd.f32 %v336_v48, %v4262_v14  ;;  %v721_v12 = vsel %vm4326_vm9, 0.7853982, %v8434_v22  ;;  %v733_v51 = vadd.f32 0.19977711, %v731_v27  ;;  %v4422_v20 = vadd.f32 %v4401_v24, %v3966_v1  ;;  %vm1045_vm5 = vmor %vm1043_vm15, %vm1044_vm0 }
  0x6f   :  { %3471 = vpow2.f32 %v174_v41  ;;  %v4418_v54 = vmul.f32 %v271_v50, %v261_v3  ;;  %v1039_v48 = vmul.f32 %v4356_v30, %v1038_v29  ;;  %v200_v3 = vsel %vm4413_vm13, %v4282_v47, %v196_v26  ;;  %v4449_v26 = vpop.eup %3469 }
  0x70   :  { %v340_v9 = vadd.f32 %v338_v55, %v318_v35  ;;  %8437 = vst [vmem:[#allocation47_spill] sm:$0xff] %v4422_v20  ;;  %v735_v37 = vmul.f32 %v733_v51, %v4362_v62  ;;  %v4433_v35 = vmul.f32 %v3468_v53, %v285_v40  ;;  %v957_v1 = vmul.f32 %v4422_v20, %v4422_v20 }
  0x71   :  { %v679_v27 = vmul.f32 %v661_v49, %v4225_v17  ;;  %v160_v55 = vmul.f32 %v4078_v59, %v157_v23  ;;  %v1040_v41 = vmul.f32 0.5, %v1039_v48  ;;  %v723_v29 = vsel %vm697_vm6, 1.5707964, %v721_v12 }
  0x72   :  { %v344_v36 = vsub.f32 0.0, %v340_v9  ;;  %v3354_v13 = vadd.f32 -0.3333295, %v735_v37  ;;  %v4444_v50 = vand.u32 2147483647, %v4433_v35  ;;  %v4447_v47 = vadd.f32 %v957_v1, %v4121_v34 }
  0x73   :  { %v8207_v51 = vstv %s4391_s30  ;;  %v4455_v23 = vsel %vm4425_vm14, %v204_v16, %v200_v3  ;;  %v1041_v53 = vsub.f32 1.5, %v1040_v41  ;;  %v681_v41 = vmul.f32 %v679_v27, %v4286_v11 }
  0x74   :  { %v346_v6 = vsel %vm342_vm11, %v344_v36, %v340_v9  ;;  %8440 = vst [vmem:[#allocation48_spill] sm:$0xff] %v4447_v47  ;;  %v739_v49 = vmul.f32 %v3354_v13, %v4362_v62  ;;  %3473 = vrcp.f32 %v4444_v50  ;;  %v303_v31 = vadd.f32 1.0, %v4444_v50  ;;  %v4463_v9 = vld [vmem:[#allocation13 + $0x8] sm:$0xff] }
  0x75   :  { %v348_v40 = vsub.f32 1.5707964, %v346_v6  ;;  %8441 = vst [vmem:[#allocation49_spill] sm:$0xff] %v4455_v23  ;;  %v3472_v7 = vpop.eup %3471  ;;  %vm293_vm1 = vcmp.gt.f32.partialorder %v4444_v50, 2.4142137  ;;  %v374_v37 = vmul.f32 %v4455_v23, %v4455_v23  ;;  %v965_v58 = vmul.f32 %v4447_v47, %v4080_v60 }
  0x76   :  { %v741_v14 = vmul.f32 %v739_v49, %v4351_v25  ;;  %v177_v62 = vmul.f32 %v3472_v7, %v160_v55  ;;  %3475 = vrcp.f32 %v303_v31  ;;  %v982_v36 = vmul.f32 %v4449_v26, %v4057_v45  ;;  %vm297_vm6 = vmxor %vm293_vm1, %vm3908_vm2 }
  0x77   :  { %v350_v12 = vmul.f32 %v348_v40, %v4223_v28  ;;  %vm295_vm4 = vcmp.gt.f32.partialorder %v4444_v50, 0.41421357  ;;  %v967_v1 = vadd.f32 1.0, %v965_v58  ;;  %v1042_v13 = vmul.f32 %v4356_v30, %v1041_v53 }
  0x78   :  { %v743_v28 = vadd.f32 %v741_v14, %v4351_v25  ;;  %v4480_v3 = vmul.f32 %v177_v62, %v4463_v9  ;;  %v3343_v25 = vadd.f32 -1.0, %v4444_v50  ;;  %v758_v6 = vmul.f32 %v8207_v51, %v3964_v0  ;;  %vm4508_vm7 = vmand %vm295_vm4, %vm297_vm6 }
  0x79   :  { %v355_v16 = vmul.f32 %v4313_v43, %v350_v12  ;;  %v4472_v48 = vadd.f32 %v4341_v56, %v350_v12  ;;  %3477 = vlog2.f32 %v967_v1  ;;  %v983_v49 = vsub.f32 1.0, %v982_v36 }
  0x7a   :  { %8442 = vst [vmem:[#allocation50_spill] sm:$0xff] %v4480_v3  ;;  %v745_v56 = vadd.f32 %v743_v28, %v723_v29  ;;  %v3474_v55 = vpop.eup %3473  ;;  %v376_v40 = vmul.f32 %v374_v37, %v4480_v3  ;;  %v4504_v7 = vsel %vm1045_vm5, %v4356_v30, %v1042_v13  ;;  %3479 = vlog2.f32 %v4334_v46 }
  0x7b   :  { %v4489_v43 = vsub.f32 %v4276_v39, %v355_v16  ;;  %v685_v39 = vmul.f32 %v4369_v4, %v4404_v21  ;;  %v307_v11 = vsub.f32 0.0, %v3474_v55  ;;  %v1057_v14 = vmul.f32 %v4504_v7, %v4121_v34 }
  0x7c   :  { %v749_v29 = vsub.f32 0.0, %v745_v56  ;;  %v3476_v31 = vpop.eup %3475  ;;  %v414_v27 = vmul.f32 %v376_v40, %v4031_v19  ;;  %3481 = vrsqrt.f32 %v4090_v5  ;;  %v764_v62 = vmul.f32 %v758_v6, %v681_v41 }
  0x7d   :  { %8443 = vst [vmem:[#allocation51_spill] sm:$0xff] %v4489_v43  ;;  %v311_v4 = vmul.f32 %v3476_v31, %v3343_v25  ;;  %v984_v37 = vmul.f32 %v4449_v26, %v983_v49  ;;  %v992_v58 = vand.u32 2147483648, %v4057_v45  ;;  %v990_v36 = vand.u32 2147483647, %v4057_v45 }
  0x7e   :  { %v751_v30 = vsel %vm747_vm3, %v749_v29, %v745_v56  ;;  %473 = vadd.xlane.f32.xlu2 %v414_v27  ;;  %v1085_v1 = vmul.f32 %v1057_v14, %v4401_v24  ;;  %v1065_v13 = vmul.f32 2.0, %v4422_v20  ;;  %v1071_v55 = vmul.f32 %v4422_v20, %v4401_v24 }
  0x7f   :  { %v753_v21 = vsub.f32 1.5707964, %v751_v30  ;;  %v313_v53 = vsel %vm4508_vm7, %v311_v4, %v4444_v50  ;;  %v3478_v16 = vpop.eup %3477  ;;  %v961_v49 = vmul.f32 %v4447_v47, %v4447_v47  ;;  %vm987_vm9 = vweird.f32 %v4449_v26 }
  0x80   :  { %v4527_v28 = vsel %vm293_vm1, %v307_v11, %v313_v53  ;;  %v970_v25 = vmul.f32 0.6931472, %v3478_v16  ;;  %v3480_v40 = vpop.eup %3479  ;;  %v985_v14 = vadd.f32 %v4449_v26, %v984_v37  ;;  %v1067_v30 = vmul.f32 %v1065_v13, %v4422_v20  ;;  %vm4551_vm10 = vmor %vm986_vm8, %vm987_vm9 }
  0x81   :  { %v755_v63 = vmul.f32 %v753_v21, %v685_v39  ;;  %v321_v56 = vmul.f32 %v4527_v28, %v4527_v28  ;;  %3483 = vrcp.f32 %v1085_v1  ;;  %v545_v24 = vmul.f32 0.6931472, %v3480_v40 }
  0x82   :  { %v3482_v31 = vpop.eup %3481  ;;  %v973_v27 = vmul.f32 -2.8333333, %v970_v25  ;;  %v4547_v21 = vstv %s1332_s8  ;;  %v1063_v16 = vmul.f32 %v4389_v33, %v4044_v38  ;;  %v1069_v37 = vsub.f32 %v4447_v47, %v1067_v30 }
  0x83   :  { %v760_v39 = vmul.f32 %v758_v6, %v755_v63  ;;  %v4538_v29 = vadd.f32 %v764_v62, %v755_v63  ;;  %v323_v11 = vmul.f32 0.080537446, %v321_v56  ;;  %8448 = vst [vmem:[#allocation54_spill] sm:$0xff] %v4547_v21  ;;  %v993_v63 = vor.u32 1.1754944e-38, %v992_v58 }
  0x84   :  { %v975_v62 = vmul.f32 1.442695, %v973_v27  ;;  %v547_v1 = vmul.f32 -0.33333334, %v545_v24  ;;  %v650_v25 = vmul.f32 %v3482_v31, %v4090_v5  ;;  %v1073_v40 = vadd.f32 %v1071_v55, %v1069_v37 }
  0x85   :  { %8446 = vst [vmem:[#allocation52_spill] sm:$0xff] %v4538_v29  ;;  %v4545_v4 = vsub.f32 %v681_v41, %v760_v39  ;;  %v3345_v6 = vadd.f32 -0.13877685, %v323_v11  ;;  %v1087_v41 = vsub.f32 %v4447_v47, %v1071_v55  ;;  %v4562_v45 = vadd.f32 %v4547_v21, %v3989_v8  ;;  %v8457_v8 = vld [vmem:[#allocation23_spill] sm:$0xff] }
  0x86   :  { %3485 = vpow2.f32 %v975_v62  ;;  %v989_v39 = vsel %vm4551_vm10, %v4449_v26, %v985_v14  ;;  %vm991_vm11 = vcmp.eq.f32.partialorder %v990_v36, 8.507059e+37  ;;  %v550_v33 = vmul.f32 1.442695, %v547_v1 }
  0x87   :  { %8447 = vst [vmem:[#allocation53_spill] sm:$0xff] %v4545_v4  ;;  %v327_v13 = vmul.f32 %v3345_v6, %v321_v56  ;;  %v651_v11 = vmul.f32 %v3482_v31, %v650_v25  ;;  %v257_v58 = vmul.f32 %v4280_v61, %v4280_v61  ;;  %v963_v30 = vmul.f32 %v961_v49, %v4078_v59  ;;  %v3484_v55 = vpop.eup %3483 }
  0x88   :  { %v4570_v24 = vmul.f32 %v1073_v40, %v1063_v16  ;;  %3487 = vpow2.f32 %v550_v33  ;;  %vm655_vm12 = vweird.f32 %v4090_v5  ;;  %vm656_vm13 = vweird.f32 %v3482_v31 }
  0x89   :  { %v329_v27 = vadd.f32 0.19977711, %v327_v13  ;;  %v652_v6 = vmul.f32 0.5, %v651_v11  ;;  %v4573_v53 = vsel %vm991_vm11, %v993_v63, %v989_v39  ;;  %v4575_v26 = vmul.f32 %v3484_v55, %v1087_v41  ;;  %vm657_vm14 = vmor %vm655_vm12, %vm656_vm13 }
  0x8a   :  { %8451 = vst [vmem:[#allocation55_spill] sm:$0xff] %v4573_v53  ;;  %3489 = vlog2.f32 %v4562_v45  ;;  %v317_v37 = vsel %vm4508_vm7, 0.7853982, %v8434_v22  ;;  %v1176_v63 = vmul.f32 %v4573_v53, %v4573_v53  ;;  %v275_v25 = vmul.f32 %v257_v58, %v4455_v23 }
  0x8b   :  { %v331_v62 = vmul.f32 %v329_v27, %v321_v56  ;;  %3491 = vrcp.f32 %v4334_v46  ;;  %v653_v36 = vsub.f32 1.5, %v652_v6  ;;  %v4580_v16 = vand.u32 2147483647, %v4575_v26 }
  0x8c   :  { %v3486_v14 = vpop.eup %3485  ;;  %v279_v13 = vmul.f32 %v4267_v32, %v3968_v2  ;;  %v259_v33 = vmul.f32 %v257_v58, %v4280_v61  ;;  %v319_v55 = vsel %vm293_vm1, 1.5707964, %v317_v37  ;;  %v277_v58 = vmul.f32 %v275_v25, %v4418_v54 }
  0x8d   :  { %v3347_v49 = vadd.f32 -0.3333295, %v331_v62  ;;  %v979_v1 = vmul.f32 %v3486_v14, %v963_v30  ;;  %v654_v41 = vmul.f32 %v3482_v31, %v653_v36  ;;  %3493 = vrcp.f32 %v4580_v16 }
  0x8e   :  { %v3488_v39 = vpop.eup %3487  ;;  %v1105_v11 = vadd.f32 1.0, %v4580_v16  ;;  %vm1095_vm15 = vcmp.gt.f32.partialorder %v4580_v16, 2.4142137  ;;  %vm343_vm0 = vcmp.lt.f32.partialorder %v4433_v35, 0.0  ;;  %vm1097_vm1 = vcmp.gt.f32.partialorder %v4580_v16, 0.41421357 }
  0x8f   :  { %v335_v40 = vmul.f32 %v3347_v49, %v321_v56  ;;  %v4594_v12 = vmul.f32 %v979_v1, %v4289_v18  ;;  %v4596_v27 = vsel %vm657_vm14, %v3482_v31, %v654_v41  ;;  %v1059_v56 = vmul.f32 %v4504_v7, %v4504_v7  ;;  %vm1099_vm3 = vmxor %vm1095_vm15, %vm3908_vm2 }
  0x90   :  { %v3490_v30 = vpop.eup %3489  ;;  %v4604_v62 = vmul.f32 %v3488_v39, %v4051_v42  ;;  %3495 = vrcp.f32 %v1105_v11  ;;  %v660_v50 = vmul.f32 %v4596_v27, %v4090_v5  ;;  %v3358_v54 = vadd.f32 -1.0, %v4580_v16  ;;  %vm4648_vm4 = vmand %vm1097_vm1, %vm1099_vm3 }
  0x91   :  { %8452 = vst [vmem:[#allocation56_spill] sm:$0xff] %v4594_v12  ;;  %v337_v6 = vmul.f32 %v335_v40, %v4527_v28  ;;  %v4606_v61 = vpop.eup %3491  ;;  %v1178_v31 = vmul.f32 %v1176_v63, %v4594_v12  ;;  %v1339_v1 = vmul.f32 0.6931472, %v3490_v30  ;;  %v8453_v63 = vld [vmem:[#allocation25_spill] sm:$0xff]  ;;  %v8456_v11 = vstv %s4221_s29  ;;  %s3326_s29 = sshll.u32 %s8178_s6, 4  ;;  %s3327_s29 = int_to_ptr.hbm [resolvable:$true] %s3326_s29 }
  0x92   :  { %v556_v14 = vmul.f32 %v4073_v57, %v4604_v62  ;;  %v598_v37 = vmul.f32 %v4606_v61, %v4334_v46  ;;  %v4622_v41 = vadd.f32 %v4044_v38, %v8453_v63  ;;  %v354_v30 = vmul.f32 %v8456_v11, %v3968_v2 }
  0x93   :  { %v339_v36 = vadd.f32 %v337_v6, %v4527_v28  ;;  %v1216_v49 = vmul.f32 %v1178_v31, %v4121_v34  ;;  %v3494_v40 = vpop.eup %3493  ;;  %v8454_v28 = vld [vmem:[#allocation21_spill] sm:$0xff]  ;;  %v1061_v6 = vmul.f32 %v1059_v56, %v4504_v7  ;;  %v4642_v10 = vadd.f32 %v4044_v38, %v8457_v8 }
  0x94   :  { %v4630_v25 = vadd.f32 %v556_v14, %v8454_v28  ;;  %v688_v31 = vmul.f32 %v660_v50, %v556_v14  ;;  %v1109_v7 = vsub.f32 0.0, %v3494_v40  ;;  %3497 = vlog2.f32 %v4622_v41 }
  0x95   :  { %v341_v39 = vadd.f32 %v339_v36, %v319_v55  ;;  %v1081_v55 = vmul.f32 %v4447_v47, %v3964_v0  ;;  %1274 = vadd.xlane.f32.xlu1 %v1216_v49  ;;  %v281_v36 = vmul.f32 %v279_v13, %v259_v33  ;;  %v599_v0 = vsub.f32 1.0, %v598_v37 }
  0x96   :  { %8455 = vst [vmem:[#allocation21_spill] sm:$0xff] %v4630_v25  ;;  %v560_v28 = vmul.f32 %v4630_v25, %v4630_v25  ;;  %v3496_v12 = vpop.eup %3495  ;;  %v1342_v49 = vmul.f32 -0.33333334, %v1339_v1  ;;  %3499 = vrcp.f32 %v688_v31  ;;  %v360_v3 = vmul.f32 %v354_v30, %v277_v58 }
  0x97   :  { %v345_v51 = vsub.f32 0.0, %v341_v39  ;;  %v1113_v33 = vmul.f32 %v3496_v12, %v3358_v54  ;;  %v1077_v23 = vmul.f32 %v1059_v56, %v4573_v53  ;;  %v4659_v34 = vmul.f32 %v1081_v55, %v1061_v6 }
  0x98   :  { %v4656_v50 = vadd.f32 %v560_v28, %v4090_v5  ;;  %v4672_v1 = vadd.f32 %v4547_v21, %v8457_v8  ;;  %v4680_v54 = vmul.f32 %v4630_v25, %v556_v14  ;;  %v1344_v31 = vmul.f32 1.442695, %v1342_v49 }
  0x99   :  { %v347_v13 = vsel %vm343_vm0, %v345_v51, %v341_v39  ;;  %v1115_v37 = vsel %vm4648_vm4, %v1113_v33, %v4580_v16  ;;  %v8461_v51 = vld [vmem:[#allocation22_spill] sm:$0xff]  ;;  %v600_v39 = vmul.f32 %v4606_v61, %v599_v0  ;;  %3501 = vrsqrt.f32 %v4642_v10 }
  0x9a   :  { %8460 = vst [vmem:[#allocation57_spill] sm:$0xff] %v4656_v50  ;;  %v349_v11 = vsub.f32 1.5707964, %v347_v13  ;;  %v568_v35 = vmul.f32 %v4656_v50, %v4080_v60  ;;  %v4668_v12 = vadd.f32 %v4547_v21, %v8461_v51  ;;  %v4676_v56 = vsel %vm1095_vm15, %v1109_v7, %v1115_v37  ;;  %v3498_v28 = vpop.eup %3497 }
  0x9b   :  { %v4684_v6 = vmul.f32 %v4676_v56, %v4676_v56  ;;  %v1119_v7 = vsel %vm4648_vm4, 0.7853982, %v8434_v22  ;;  %vm602_vm5 = vweird.f32 %v4334_v46  ;;  %vm603_vm6 = vweird.f32 %v4606_v61 }
  0x9c   :  { %8462 = vst [vmem:[#allocation58_spill] sm:$0xff] %v4668_v12  ;;  %v351_v40 = vmul.f32 %v349_v11, %v281_v36  ;;  %v570_v55 = vadd.f32 1.0, %v568_v35  ;;  %v3500_v33 = vpop.eup %3499  ;;  %v690_v2 = vsub.f32 %v4656_v50, %v4680_v54  ;;  %v606_v37 = vand.u32 2147483647, %v4334_v46  ;;  %vm4707_vm7 = vmor %vm602_vm5, %vm603_vm6 }
  0x9d   :  { %v1125_v14 = vmul.f32 0.080537446, %v4684_v6  ;;  %v668_v35 = vmul.f32 2.0, %v4630_v25  ;;  %vm1145_vm10 = vcmp.lt.f32.partialorder %v4575_v26, 0.0  ;;  %vm1441_vm14 = vweird.f32 %v4668_v12 }
  0x9e   :  { %v356_v13 = vmul.f32 %v354_v30, %v351_v40  ;;  %v4687_v36 = vadd.f32 %v360_v3, %v351_v40  ;;  %3503 = vlog2.f32 %v570_v55  ;;  %v601_v30 = vadd.f32 %v4606_v61, %v600_v39 }
  0x9f   :  { %v608_v3 = vand.u32 2147483648, %v4334_v46  ;;  %v3360_v11 = vadd.f32 -0.13877685, %v1125_v14  ;;  %3505 = vpow2.f32 %v1344_v31  ;;  %v4705_v40 = vmul.f32 %v1077_v23, %v4570_v24  ;;  %v4716_v0 = vpop.eup %3501  ;;  %v4723_v14 = vld [vmem:[#allocation10] sm:$0xff] }
  0xa0   :  { %8463 = vst [vmem:[#allocation59_spill] sm:$0xff] %v4687_v36  ;;  %v4696_v49 = vsub.f32 %v277_v58, %v356_v13  ;;  %v4711_v39 = vmul.f32 %v3500_v33, %v690_v2  ;;  %v4714_v55 = vstv %s4486_s7  ;;  %v943_v13 = vmul.f32 0.6931472, %v3498_v28 }
  0xa1   :  { %8467 = vst [vmem:[#allocation61_spill] sm:$0xff] %v4714_v55  ;;  %v4720_v46 = vsel %vm1095_vm15, 1.5707964, %v1119_v7  ;;  %v1129_v31 = vmul.f32 %v3360_v11, %v4684_v6  ;;  %v8468_v23 = vstv %s4635_s9  ;;  %3507 = vrsqrt.f32 %v4668_v12 }
  0xa2   :  { %8464 = vst [vmem:[#allocation60_spill] sm:$0xff] %v4696_v49  ;;  %v4728_v24 = vmul.f32 %v4723_v14, %v8468_v23  ;;  %v564_v33 = vmul.f32 %v4656_v50, %v4656_v50  ;;  %v609_v28 = vor.u32 1.1754944e-38, %v608_v3  ;;  %v4734_v2 = vand.u32 2147483647, %v4711_v39 }
  0xa3   :  { %3509 = vrcp.f32 %v4562_v45  ;;  %v1131_v7 = vadd.f32 0.19977711, %v1129_v31  ;;  %v605_v11 = vsel %vm4707_vm7, %v4606_v61, %v601_v30  ;;  %vm607_vm8 = vcmp.eq.f32.partialorder %v606_v37, 8.507059e+37 }
  0xa4   :  { %v3504_v16 = vpop.eup %3503  ;;  %v670_v23 = vmul.f32 %v668_v35, %v4630_v25  ;;  %3511 = vrcp.f32 %v4734_v2  ;;  %v945_v53 = vmul.f32 -0.33333334, %v943_v13  ;;  %v1048_v3 = vmul.f32 %v4716_v0, %v4642_v10 }
  0xa5   :  { %v574_v49 = vmul.f32 0.6931472, %v3504_v16  ;;  %v3506_v51 = vpop.eup %3505  ;;  %v1133_v20 = vmul.f32 %v1131_v7, %v4684_v6  ;;  %v4747_v31 = vmul.f32 %v4728_v24, %v4705_v40  ;;  %v662_v61 = vmul.f32 %v4596_v27, %v4596_v27 }
  0xa6   :  { %v708_v30 = vadd.f32 1.0, %v4734_v2  ;;  %v566_v37 = vmul.f32 %v564_v33, %v4078_v59  ;;  %v4753_v58 = vsel %vm607_vm8, %v609_v28, %v605_v11  ;;  %v4756_v13 = vmul.f32 %v3506_v51, %v4051_v42  ;;  %v4765_v33 = vld [vmem:[#allocation10 + $0x8] sm:$0xff] }
  0xa7   :  { %v576_v35 = vmul.f32 -2.8333333, %v574_v49  ;;  %v4758_v16 = vpop.eup %3507  ;;  %v3362_v7 = vadd.f32 -0.3333295, %v1133_v20  ;;  %v672_v57 = vsub.f32 %v4656_v50, %v670_v23  ;;  %vm698_vm9 = vcmp.gt.f32.partialorder %v4734_v2, 2.4142137 }
  0xa8   :  { %3513 = vrcp.f32 %v708_v30  ;;  %v684_v49 = vmul.f32 %v4765_v33, %v4656_v50  ;;  %v4771_v51 = vmul.f32 %v4714_v55, %v4756_v13  ;;  %v948_v20 = vmul.f32 1.442695, %v945_v53  ;;  %vm4780_vm12 = vmxor %vm698_vm9, %vm3908_vm2  ;;  %v3737_v53 = vld [vmem:[#allocation11] sm:$0xff] }
  0xa9   :  { %v4762_v4 = vpop.eup %3509  ;;  %v579_v47 = vmul.f32 1.442695, %v576_v35  ;;  %v1137_v28 = vmul.f32 %v3362_v7, %v4684_v6  ;;  %v664_v11 = vmul.f32 %v662_v61, %v4596_v27  ;;  %vm700_vm11 = vcmp.gt.f32.partialorder %v4734_v2, 0.41421357  ;;  %v8472_v7 = vld [vmem:[#allocation28_spill] sm:$0xff] }
  0xaa   :  { %v1049_v23 = vmul.f32 %v4716_v0, %v1048_v3  ;;  %v3512_v30 = vpop.eup %3511  ;;  %v3351_v36 = vadd.f32 -1.0, %v4734_v2  ;;  %v4786_v6 = vadd.f32 %v3737_v53, %v4771_v51  ;;  %v1436_v27 = vmul.f32 %v4758_v16, %v4668_v12  ;;  %vm4809_vm13 = vmand %vm700_vm11, %vm4780_vm12 }
  0xab   :  { %3515 = vpow2.f32 %v579_v47  ;;  %v1139_v3 = vmul.f32 %v1137_v28, %v4676_v56  ;;  %v666_v47 = vmul.f32 %v4604_v62, %v8472_v7  ;;  %v676_v19 = vadd.f32 %v4680_v54, %v672_v57 }
  0xac   :  { %8471 = vst [vmem:[#allocation62_spill] sm:$0xff] %v4786_v6  ;;  %v1380_v52 = vmul.f32 %v4762_v4, %v4562_v45  ;;  %v4797_v8 = vmul.f32 %v662_v61, %v4753_v58  ;;  %v1355_v53 = vmul.f32 %v4786_v6, %v4786_v6  ;;  %v1437_v17 = vmul.f32 %v4758_v16, %v1436_v27 }
  0xad   :  { %3517 = vpow2.f32 %v948_v20  ;;  %v1141_v28 = vadd.f32 %v1139_v3, %v4676_v56  ;;  %v4803_v29 = vmul.f32 %v684_v49, %v664_v11  ;;  %v712_v62 = vsub.f32 0.0, %v3512_v30 }
  0xae   :  { %v3514_v25 = vpop.eup %3513  ;;  %v779_v54 = vmul.f32 %v4753_v58, %v4753_v58  ;;  %v4816_v20 = vadd.f32 %v1355_v53, %v4668_v12  ;;  %v1438_v27 = vmul.f32 0.5, %v1437_v17  ;;  %v4818_v56 = vmul.f32 0.5, %v1049_v23 }
  0xaf   :  { %v716_v61 = vmul.f32 %v3514_v25, %v3351_v36  ;;  %v1143_v49 = vadd.f32 %v1141_v28, %v4720_v46  ;;  %v4821_v11 = vmul.f32 %v676_v19, %v666_v47  ;;  %v1381_v35 = vsub.f32 1.0, %v1380_v52 }
  0xb0   :  { %8475 = vst [vmem:[#allocation63_spill] sm:$0xff] %v4816_v20  ;;  %v4825_v3 = vadd.f32 %v4547_v21, %v8453_v63  ;;  %v1363_v36 = vmul.f32 %v4816_v20, %v4080_v60  ;;  %vm1442_vm15 = vweird.f32 %v4758_v16  ;;  %3519 = vrcp.f32 %v4622_v41 }
  0xb1   :  { %v3516_v30 = vpop.eup %3515  ;;  %v718_v25 = vsel %vm4809_vm13, %v716_v61, %v4734_v2  ;;  %v1147_v17 = vsub.f32 0.0, %v1143_v49  ;;  %vm1384_vm0 = vweird.f32 %v4562_v45  ;;  %v1439_v53 = vsub.f32 1.5, %v1438_v27  ;;  %vm1443_vm3 = vmor %vm1441_vm14, %vm1442_vm15 }
  0xb2   :  { %v582_v19 = vmul.f32 %v3516_v30, %v566_v37  ;;  %v4836_v52 = vsel %vm698_vm9, %v712_v62, %v718_v25  ;;  %v1365_v47 = vadd.f32 1.0, %v1363_v36  ;;  %vm1385_vm1 = vweird.f32 %v4762_v4 }
  0xb3   :  { %v3518_v46 = vpop.eup %3517  ;;  %v4841_v23 = vmul.f32 %v4836_v52, %v4836_v52  ;;  %v1149_v28 = vsel %vm1145_vm10, %v1147_v17, %v1143_v49  ;;  %v1463_v62 = vmul.f32 2.0, %v4786_v6  ;;  %vm1053_vm4 = vweird.f32 %v4642_v10  ;;  %vm4891_vm6 = vmor %vm1384_vm0, %vm1385_vm1 }
  0xb4   :  { %v4847_v37 = vmul.f32 %v582_v19, %v4463_v9  ;;  %vm1054_vm5 = vweird.f32 %v4716_v0  ;;  %v1151_v61 = vsub.f32 1.5707964, %v1149_v28  ;;  %3521 = vlog2.f32 %v1365_v47 }
  0xb5   :  { %v728_v30 = vmul.f32 0.080537446, %v4841_v23  ;;  %v1440_v27 = vmul.f32 %v4758_v16, %v1439_v53  ;;  %v1382_v49 = vmul.f32 %v4762_v4, %v1381_v35  ;;  %v1465_v25 = vmul.f32 %v1463_v62, %v4786_v6  ;;  %vm1055_vm8 = vmor %vm1053_vm4, %vm1054_vm5 }
  0xb6   :  { %v781_v26 = vmul.f32 %v779_v54, %v4847_v37  ;;  %v4859_v36 = vmul.f32 %v3518_v46, %v4051_v42  ;;  %v1153_v17 = vmul.f32 %v1151_v61, %v4659_v34  ;;  %v1461_v47 = vmul.f32 %v4756_v13, %v4547_v21  ;;  %v4867_v28 = vpop.eup %3519 }
  0xb7   :  { %v3353_v19 = vadd.f32 -0.13877685, %v728_v30  ;;  %v4863_v63 = vsel %vm1443_vm3, %v4758_v16, %v1440_v27  ;;  %v1467_v53 = vsub.f32 %v4816_v20, %v1465_v25  ;;  %v1469_v46 = vmul.f32 %v4786_v6, %v4771_v51 }
  0xb8   :  { %v819_v54 = vmul.f32 %v781_v26, %v4090_v5  ;;  %v1455_v35 = vmul.f32 %v4863_v63, %v4668_v12  ;;  %v1158_v34 = vmul.f32 %v4728_v24, %v1153_v17  ;;  %v4877_v16 = vadd.f32 %v4747_v31, %v1153_v17 }
  0xb9   :  { %v732_v62 = vmul.f32 %v3353_v19, %v4841_v23  ;;  %v1390_v13 = vand.u32 2147483648, %v4562_v45  ;;  %v1383_v61 = vadd.f32 %v4762_v4, %v1382_v49  ;;  %v1388_v30 = vand.u32 2147483647, %v4562_v45 }
  0xba   :  { %878 = vadd.xlane.f32.xlu2 %v819_v54  ;;  %v1471_v27 = vadd.f32 %v1469_v46, %v1467_v53  ;;  %v1483_v26 = vmul.f32 %v1455_v35, %v4771_v51  ;;  %v3522_v25 = vpop.eup %3521  ;;  %v4885_v7 = vsub.f32 %v4705_v40, %v1158_v34  ;;  %v954_v49 = vmul.f32 %v4303_v44, %v4859_v36  ;;  %v4906_v53 = vld [vmem:[#allocation11 + $0x8] sm:$0xff] }
  0xbb   :  { %v734_v24 = vadd.f32 0.19977711, %v732_v62  ;;  %v996_v17 = vmul.f32 %v4867_v28, %v4622_v41  ;;  %v1368_v51 = vmul.f32 0.6931472, %v3522_v25  ;;  %v1051_v40 = vsub.f32 1.5, %v4818_v56 }
  0xbc   :  { %8476 = vst [vmem:[#allocation64_spill] sm:$0xff] %v4885_v7  ;;  %v4899_v19 = vmul.f32 %v1471_v27, %v1461_v47  ;;  %3523 = vrcp.f32 %v1483_v26  ;;  %v722_v45 = vsel %vm4809_vm13, 0.7853982, %v8434_v22  ;;  %v1391_v35 = vor.u32 1.1754944e-38, %v1390_v13 }
  0xbd   :  { %v736_v54 = vmul.f32 %v734_v24, %v4841_v23  ;;  %v4909_v34 = vadd.f32 %v4906_v53, %v954_v49  ;;  %v1359_v47 = vmul.f32 %v4816_v20, %v4816_v20  ;;  %v1371_v62 = vmul.f32 -2.8333333, %v1368_v51 }
  0xbe   :  { %v1387_v56 = vsel %vm4891_vm6, %v4762_v4, %v1383_v61  ;;  %vm1389_vm7 = vcmp.eq.f32.partialorder %v1388_v30, 8.507059e+37  ;;  %v1485_v27 = vsub.f32 %v4816_v20, %v1469_v46  ;;  %v997_v26 = vsub.f32 1.0, %v996_v17 }
  0xbf   :  { %8479 = vst [vmem:[#allocation65_spill] sm:$0xff] %v4909_v34  ;;  %v3355_v57 = vadd.f32 -0.3333295, %v736_v54  ;;  %v958_v13 = vmul.f32 %v4909_v34, %v4909_v34  ;;  %v4925_v25 = vmul.f32 %v4797_v8, %v4821_v11  ;;  %v724_v4 = vsel %vm698_vm9, 1.5707964, %v722_v45 }
  0xc0   :  { %v1373_v61 = vmul.f32 1.442695, %v1371_v62  ;;  %v1052_v30 = vmul.f32 %v4716_v0, %v1051_v40  ;;  %vm748_vm10 = vcmp.lt.f32.partialorder %v4711_v39, 0.0  ;;  %v8480_v24 = vstv %s4391_s30 }
  0xc1   :  { %v740_v46 = vmul.f32 %v3355_v57, %v4841_v23  ;;  %v4935_v31 = vmul.f32 %v4765_v33, %v8480_v24  ;;  %v4937_v17 = vsel %vm1389_vm7, %v1391_v35, %v1387_v56  ;;  %v4940_v51 = vadd.f32 %v958_v13, %v4642_v10  ;;  %v8483_v56 = vld [vmem:[#allocation38_spill] sm:$0xff] }
  0xc2   :  { %8481 = vst [vmem:[#allocation66_spill] sm:$0xff] %v4937_v17  ;;  %v3524_v8 = vpop.eup %3523  ;;  %v1361_v2 = vmul.f32 %v1359_v47, %v4078_v59  ;;  %3525 = vpow2.f32 %v1373_v61  ;;  %v1479_v11 = vmul.f32 %v4723_v14, %v4816_v20  ;;  %v4946_v23 = vsel %vm1055_vm8, %v4716_v0, %v1052_v30 }
  0xc3   :  { %8482 = vst [vmem:[#allocation67_spill] sm:$0xff] %v4940_v51  ;;  %v742_v40 = vmul.f32 %v740_v46, %v4836_v52  ;;  %v4949_v45 = vmul.f32 %v3524_v8, %v1485_v27  ;;  %v966_v54 = vmul.f32 %v4940_v51, %v4080_v60  ;;  %v998_v35 = vmul.f32 %v4867_v28, %v997_v26 }
  0xc4   :  { %v1457_v62 = vmul.f32 %v4863_v63, %v4863_v63  ;;  %vm1000_vm9 = vweird.f32 %v4622_v41  ;;  %v1058_v47 = vmul.f32 %v4946_v23, %v4642_v10  ;;  %3527 = vrcp.f32 %v8483_v56 }
  0xc5   :  { %v744_v0 = vadd.f32 %v742_v40, %v4836_v52  ;;  %v4962_v57 = vand.u32 2147483647, %v4949_v45  ;;  %v968_v27 = vadd.f32 1.0, %v966_v54  ;;  %vm1001_vm11 = vweird.f32 %v4867_v28 }
  0xc6   :  { %v1574_v13 = vmul.f32 %v4937_v17, %v4937_v17  ;;  %v1004_v26 = vand.u32 2147483647, %v4622_v41  ;;  %v1006_v61 = vand.u32 2147483648, %v4622_v41  ;;  %v1086_v30 = vmul.f32 %v1058_v47, %v954_v49  ;;  %vm4976_vm13 = vmor %vm1000_vm9, %vm1001_vm11 }
  0xc7   :  { %v746_v46 = vadd.f32 %v744_v0, %v724_v4  ;;  %vm1493_vm12 = vcmp.gt.f32.partialorder %v4962_v57, 2.4142137  ;;  %3529 = vrcp.f32 %v4962_v57  ;;  %v999_v52 = vadd.f32 %v4867_v28, %v998_v35 }
  0xc8   :  { %v3526_v24 = vpop.eup %3525  ;;  %v1459_v8 = vmul.f32 %v1457_v62, %v4863_v63  ;;  %v1503_v40 = vadd.f32 1.0, %v4962_v57  ;;  %3531 = vlog2.f32 %v968_v27  ;;  %v4981_v4 = vmul.f32 %v4909_v34, %v954_v49  ;;  %vm1497_vm15 = vmxor %vm1493_vm12, %vm3908_vm2 }
  0xc9   :  { %v750_v47 = vsub.f32 0.0, %v746_v46  ;;  %v1377_v0 = vmul.f32 %v3526_v24, %v1361_v2  ;;  %v1475_v6 = vmul.f32 %v1457_v62, %v4937_v17  ;;  %3533 = vrcp.f32 %v1086_v30 }
  0xca   :  { %v4984_v35 = vpop.eup %3527  ;;  %vm1495_vm14 = vcmp.gt.f32.partialorder %v4962_v57, 0.41421357  ;;  %3535 = vrcp.f32 %v1503_v40  ;;  %v962_v63 = vmul.f32 %v4940_v51, %v4940_v51  ;;  %v1007_v41 = vor.u32 1.1754944e-38, %v1006_v61 }
  0xcb   :  { %v4993_v49 = vmul.f32 %v1377_v0, %v4289_v18  ;;  %v1003_v2 = vsel %vm4976_vm13, %v4867_v28, %v999_v52  ;;  %vm1005_vm0 = vcmp.eq.f32.partialorder %v1004_v26, 8.507059e+37  ;;  %v207_v62 = vmul.f32 %v4984_v35, %v8483_v56  ;;  %vm5013_vm1 = vmand %vm1495_vm14, %vm1497_vm15 }
  0xcc   :  { %v752_v27 = vsel %vm748_vm10, %v750_v47, %v746_v46  ;;  %v765_v30 = vmul.f32 %v4935_v31, %v4925_v25  ;;  %v5004_v24 = vmul.f32 %v1479_v11, %v1459_v8  ;;  %v1088_v18 = vsub.f32 %v4940_v51, %v4981_v4 }
  0xcd   :  { %8486 = vst [vmem:[#allocation38_spill] sm:$0xff] %v4993_v49  ;;  %v3530_v61 = vpop.eup %3529  ;;  %v5009_v40 = vmul.f32 %v1475_v6, %v4899_v19  ;;  %v3366_v39 = vadd.f32 -1.0, %v4962_v57  ;;  %v1576_v26 = vmul.f32 %v1574_v13, %v4993_v49  ;;  %v208_v46 = vsub.f32 1.0, %v207_v62 }
  0xce   :  { %v3532_v11 = vpop.eup %3531  ;;  %v1517_v52 = vsel %vm5013_vm1, 0.7853982, %v8434_v22  ;;  %v964_v8 = vmul.f32 %v962_v63, %v4078_v59  ;;  %v5023_v6 = vsel %vm1005_vm0, %v1007_v41, %v1003_v2  ;;  %v217_v19 = vand.u32 2147483648, %v8483_v56 }
  0xcf   :  { %v3534_v54 = vpop.eup %3533  ;;  %v754_v47 = vsub.f32 1.5707964, %v752_v27  ;;  %v1614_v0 = vmul.f32 %v1576_v26, %v4668_v12  ;;  %v972_v17 = vmul.f32 0.6931472, %v3532_v11  ;;  %v1066_v20 = vmul.f32 2.0, %v4909_v34 }
  0xd0   :  { %v3536_v13 = vpop.eup %3535  ;;  %v1507_v62 = vsub.f32 0.0, %v3530_v61  ;;  %v5030_v49 = vmul.f32 %v3534_v54, %v1088_v18  ;;  %v209_v44 = vmul.f32 %v4984_v35, %v208_v46  ;;  %3537 = vlog2.f32 %v4825_v3 }
  0xd1   :  { %v1511_v63 = vmul.f32 %v3536_v13, %v3366_v39  ;;  %1672 = vadd.xlane.f32.xlu1 %v1614_v0  ;;  %v974_v41 = vmul.f32 -2.8333333, %v972_v17  ;;  %vm211_vm3 = vweird.f32 %v8483_v56  ;;  %v215_v2 = vand.u32 2147483647, %v8483_v56  ;;  %v8491_v0 = vld [vmem:[#allocation27_spill] sm:$0xff] }
  0xd2   :  { %v5038_v27 = vsel %vm1493_vm12, 1.5707964, %v1517_v52  ;;  %v1068_v26 = vmul.f32 %v1066_v20, %v4909_v34  ;;  %v5043_v18 = vmul.f32 %v5023_v6, %v5023_v6  ;;  %vm212_vm4 = vweird.f32 %v4984_v35  ;;  %v8489_v52 = vld [vmem:[#allocation36_spill] sm:$0xff] }
  0xd3   :  { %v756_v61 = vmul.f32 %v754_v47, %v4803_v29  ;;  %v1513_v17 = vsel %vm5013_vm1, %v1511_v63, %v4962_v57  ;;  %v977_v39 = vmul.f32 1.442695, %v974_v41  ;;  %v5051_v46 = vand.u32 2147483647, %v5030_v49  ;;  %vm5070_vm5 = vmor %vm211_vm3, %vm212_vm4 }
  0xd4   :  { %v5055_v11 = vsel %vm1493_vm12, %v1507_v62, %v1513_v17  ;;  %v210_v20 = vadd.f32 %v4984_v35, %v209_v44  ;;  %v5060_v54 = vmul.f32 %v4723_v14, %v8489_v52  ;;  %v441_v29 = vmul.f32 %v4472_v48, %v8491_v0  ;;  %v8496_v17 = vld [vmem:[#allocation32_spill] sm:$0xff] }
  0xd5   :  { %v5066_v28 = vmul.f32 %v5055_v11, %v5055_v11  ;;  %3539 = vpow2.f32 %v977_v39  ;;  %vm5074_vm6 = vcmp.eq.f32.partialorder %v215_v2, 8.507059e+37  ;;  %v218_v47 = vor.u32 1.1754944e-38, %v217_v19 }
  0xd6   :  { %8490 = vst [vmem:[#allocation68_spill] sm:$0xff] %v5060_v54  ;;  %v3538_v13 = vpop.eup %3537  ;;  %v761_v62 = vmul.f32 %v4935_v31, %v756_v61  ;;  %v1070_v63 = vsub.f32 %v4940_v51, %v1068_v26  ;;  %v415_v41 = vmul.f32 %v4489_v43, %v8491_v0  ;;  %v5084_v39 = vmul.f32 %v8489_v52, %v8496_v17 }
  0xd7   :  { %v5086_v12 = vadd.f32 %v765_v30, %v756_v61  ;;  %v1523_v2 = vmul.f32 0.080537446, %v5066_v28  ;;  %3541 = vrcp.f32 %v5051_v46  ;;  %v1106_v19 = vadd.f32 1.0, %v5051_v46 }
  0xd8   :  { %8497 = vst [vmem:[#allocation27_spill] sm:$0xff] %v5084_v39  ;;  %v1060_v31 = vmul.f32 %v4946_v23, %v4946_v23  ;;  %v214_v26 = vsel %vm5070_vm5, %v4984_v35, %v210_v20  ;;  %v443_v43 = vsub.f32 %v441_v29, %v5060_v54  ;;  %v1064_v30 = vmul.f32 %v4859_v36, %v4044_v38  ;;  %v8499_v29 = vld [vmem:[#allocation41_spill] sm:$0xff] }
  0xd9   :  { %8498 = vst [vmem:[#allocation69_spill] sm:$0xff] %v5086_v12  ;;  %v3368_v52 = vadd.f32 -0.13877685, %v1523_v2  ;;  %vm1096_vm7 = vcmp.gt.f32.partialorder %v5051_v46, 2.4142137  ;;  %3543 = vrcp.f32 %v1106_v19  ;;  %v1074_v61 = vadd.f32 %v4981_v4, %v1070_v63  ;;  %v8501_v19 = vld [vmem:[#allocation45_spill] sm:$0xff] }
  0xda   :  { %v5104_v7 = vsel %vm5074_vm6, %v218_v47, %v214_v26  ;;  %v1341_v17 = vmul.f32 0.6931472, %v3538_v13  ;;  %3545 = vrcp.f32 %v4825_v3  ;;  %v419_v36 = vsub.f32 %v415_v41, %v5084_v39  ;;  %vm1100_vm10 = vmxor %vm1096_vm7, %vm3908_vm2  ;;  %v8502_v26 = vld [vmem:[#allocation40_spill] sm:$0xff] }
  0xdb   :  { %v3540_v35 = vpop.eup %3539  ;;  %v1527_v20 = vmul.f32 %v3368_v52, %v5066_v28  ;;  %v369_v57 = vmul.f32 %v5104_v7, %v8499_v29  ;;  %3547 = vrsqrt.f32 %v4672_v1  ;;  %vm1098_vm8 = vcmp.gt.f32.partialorder %v5051_v46, 0.41421357 }
  0xdc   :  { %v980_v2 = vmul.f32 %v3540_v35, %v964_v8  ;;  %v3359_v4 = vadd.f32 -1.0, %v5051_v46  ;;  %v1343_v44 = vmul.f32 -0.33333334, %v1341_v17  ;;  %v8500_v52 = vstv %s5028_s10  ;;  %vm5131_vm9 = vmand %vm1098_vm8, %vm1100_vm10 }
  0xdd   :  { %v3542_v47 = vpop.eup %3541  ;;  %v1529_v13 = vadd.f32 0.19977711, %v1527_v20  ;;  %v5120_v63 = vmul.f32 %v4723_v14, %v8500_v52  ;;  %v371_v41 = vmul.f32 %v369_v57, %v8501_v19  ;;  %3549 = vrcp.f32 %v8502_v26 }
  0xde   :  { %v1076_v8 = vmul.f32 %v1074_v61, %v1064_v30  ;;  %v1078_v35 = vmul.f32 %v1060_v31, %v5023_v6  ;;  %v5126_v29 = vmul.f32 %v980_v2, %v4463_v9  ;;  %v1346_v38 = vmul.f32 1.442695, %v1343_v44 }
  0xdf   :  { %v3544_v39 = vpop.eup %3543  ;;  %v1531_v17 = vmul.f32 %v1529_v13, %v5066_v28  ;;  %v1110_v52 = vsub.f32 0.0, %v3542_v47  ;;  %v445_v57 = vmul.f32 %v443_v43, %v371_v41  ;;  %v421_v34 = vmul.f32 %v419_v36, %v371_v41 }
  0xe0   :  { %v5135_v19 = vpop.eup %3545  ;;  %v5138_v30 = vsub.f32 %v4925_v25, %v761_v62  ;;  %v1114_v9 = vmul.f32 %v3544_v39, %v3359_v4  ;;  %v1179_v61 = vmul.f32 %v5043_v18, %v5126_v29  ;;  %3551 = vpow2.f32 %v1346_v38 }
  0xe1   :  { %v3548_v2 = vpop.eup %3547  ;;  %v3370_v44 = vadd.f32 -0.3333295, %v1531_v17  ;;  %v5144_v13 = vmul.f32 %v5120_v63, %v5009_v40  ;;  %v1082_v43 = vmul.f32 %v4765_v33, %v4940_v51  ;;  %507 = vadd.xlane.f32.xlu1 %v445_v57  ;;  %483 = vadd.xlane.f32.xlu0 %v421_v34  ;;  %v1394_v25 = vmul.f32 %v5135_v19, %v4825_v3 }
  0xe2   :  { %8505 = vst [vmem:[#allocation41_spill] sm:$0xff] %v5138_v30  ;;  %vm1543_vm11 = vcmp.lt.f32.partialorder %v4949_v45, 0.0  ;;  %v1062_v18 = vmul.f32 %v1060_v31, %v4946_v23  ;;  %v1116_v38 = vsel %vm5131_vm9, %v1114_v9, %v5051_v46  ;;  %v1217_v62 = vmul.f32 %v1179_v61, %v4642_v10 }
  0xe3   :  { %v1446_v39 = vmul.f32 %v3548_v2, %v4672_v1  ;;  %v5157_v36 = vpop.eup %3549  ;;  %v1535_v34 = vmul.f32 %v3370_v44, %v5066_v28  ;;  %v5160_v4 = vmul.f32 %v1078_v35, %v1076_v8  ;;  %v5164_v47 = vsel %vm1096_vm7, %v1110_v52, %v1116_v38 }
  0xe4   :  { %3553 = vrcp.f32 %v4656_v50  ;;  %v1120_v23 = vsel %vm5131_vm9, 0.7853982, %v8434_v22  ;;  %v5172_v31 = vmul.f32 %v5164_v47, %v5164_v47  ;;  %1276 = vadd.xlane.f32.xlu2 %v1217_v62  ;;  %v1395_v41 = vsub.f32 1.0, %v1394_v25 }
  0xe5   :  { %8506 = vst [vmem:[#allocation40_spill] sm:$0xff] %v5160_v4  ;;  %v1447_v17 = vmul.f32 %v3548_v2, %v1446_v39  ;;  %v1537_v28 = vmul.f32 %v1535_v34, %v5055_v11  ;;  %v8507_v8 = vstv %s4635_s9  ;;  %vm1451_vm12 = vweird.f32 %v4672_v1 }
  0xe6   :  { %v5178_v35 = vmul.f32 %v4765_v33, %v8507_v8  ;;  %vm1452_vm13 = vweird.f32 %v3548_v2  ;;  %v3552_v52 = vpop.eup %3551  ;;  %v1126_v20 = vmul.f32 0.080537446, %v5172_v31  ;;  %v1396_v57 = vmul.f32 %v5135_v19, %v1395_v41 }
  0xe7   :  { %v1448_v9 = vmul.f32 0.5, %v1447_v17  ;;  %v612_v61 = vmul.f32 %v5157_v36, %v8502_v26  ;;  %v1539_v44 = vadd.f32 %v1537_v28, %v5055_v11  ;;  %v1349_v25 = vmul.f32 %v3552_v52, %v4051_v42  ;;  %vm1453_vm1 = vmor %vm1451_vm12, %vm1452_vm13 }
  0xe8   :  { %vm1398_vm14 = vweird.f32 %v4825_v3  ;;  %vm1399_vm15 = vweird.f32 %v5135_v19  ;;  %v5189_v38 = vmul.f32 %v1082_v43, %v1062_v18  ;;  %v3361_v62 = vadd.f32 -0.13877685, %v1126_v20 }
  0xe9   :  { %v1397_v39 = vadd.f32 %v5135_v19, %v1396_v57  ;;  %v1404_v34 = vand.u32 2147483648, %v4825_v3  ;;  %v1541_v17 = vadd.f32 %v1539_v44, %v5038_v27  ;;  %v5198_v11 = vsel %vm1096_vm7, 1.5707964, %v1120_v23  ;;  %vm5201_vm0 = vmor %vm1398_vm14, %vm1399_vm15 }
  0xea   :  { %v5193_v41 = vpop.eup %3553  ;;  %v1352_v28 = vmul.f32 %v4714_v55, %v1349_v25  ;;  %v1449_v43 = vsub.f32 1.5, %v1448_v9  ;;  %v1130_v18 = vmul.f32 %v3361_v62, %v5172_v31  ;;  %v5208_v52 = vmul.f32 %v5178_v35, %v5160_v4 }
  0xeb   :  { %v5212_v27 = vmul.f32 %v5104_v7, %v5104_v7  ;;  %v1402_v46 = vand.u32 2147483647, %v4825_v3  ;;  %v1545_v23 = vsub.f32 0.0, %v1541_v17  ;;  %v613_v9 = vsub.f32 1.0, %v612_v61 }
  0xec   :  { %v5219_v20 = vadd.f32 %v4906_v53, %v1352_v28  ;;  %v1450_v57 = vmul.f32 %v3548_v2, %v1449_v43  ;;  %v1132_v44 = vadd.f32 0.19977711, %v1130_v18  ;;  %v1401_v62 = vsel %vm5201_vm0, %v5135_v19, %v1397_v39 }
  0xed   :  { %v1405_v42 = vor.u32 1.1754944e-38, %v1404_v34  ;;  %v626_v7 = vmul.f32 %v5193_v41, %v4656_v50  ;;  %v1547_v3 = vsel %vm1543_vm11, %v1545_v23, %v1541_v17  ;;  %vm1403_vm3 = vcmp.eq.f32.partialorder %v1402_v46, 8.507059e+37 }
  0xee   :  { %8510 = vst [vmem:[#allocation70_spill] sm:$0xff] %v5219_v20  ;;  %v1356_v55 = vmul.f32 %v5219_v20, %v5219_v20  ;;  %v1454_v4 = vsel %vm1453_vm1, %v3548_v2, %v1450_v57  ;;  %v1464_v53 = vmul.f32 2.0, %v5219_v20  ;;  %v1549_v43 = vsub.f32 1.5707964, %v1547_v3 }
  0xef   :  { %v1134_v61 = vmul.f32 %v1132_v44, %v5172_v31  ;;  %v1456_v8 = vmul.f32 %v1454_v4, %v4672_v1  ;;  %v5236_v39 = vmul.f32 %v1454_v4, %v1454_v4  ;;  %v614_v45 = vmul.f32 %v5157_v36, %v613_v9 }
  0xf0   :  { %v5234_v19 = vadd.f32 %v1356_v55, %v4672_v1  ;;  %3555 = vrcp.f32 %v4267_v32  ;;  %v1551_v34 = vmul.f32 %v1549_v43, %v5004_v24  ;;  %v5242_v17 = vmul.f32 %v1349_v25, %v4547_v21 }
  0xf1   :  { %v3363_v2 = vadd.f32 -0.3333295, %v1134_v61  ;;  %v1466_v18 = vmul.f32 %v1464_v53, %v5219_v20  ;;  %vm1146_vm4 = vcmp.lt.f32.partialorder %v5030_v49, 0.0  ;;  %v5248_v46 = vsel %vm1403_vm3, %v1405_v42, %v1401_v62 }
  0xf2   :  { %v1364_v55 = vmul.f32 %v5234_v19, %v4080_v60  ;;  %8511 = vst [vmem:[#allocation71_spill] sm:$0xff] %v5248_v46  ;;  %v1470_v23 = vmul.f32 %v5219_v20, %v1352_v28  ;;  %vm616_vm5 = vweird.f32 %v8502_v26  ;;  %v1556_v57 = vmul.f32 %v5120_v63, %v1551_v34 }
  0xf3   :  { %v5254_v24 = vadd.f32 %v5144_v13, %v1551_v34  ;;  %v1138_v25 = vmul.f32 %v3363_v2, %v5172_v31  ;;  %v1484_v9 = vmul.f32 %v1456_v8, %v1352_v28  ;;  %v1360_v44 = vmul.f32 %v5234_v19, %v5234_v19  ;;  %v8516_v8 = vld [vmem:[#allocation37_spill] sm:$0xff]  ;;  %v8518_v34 = vld [vmem:[#allocation52_spill] sm:$0xff] }
  0xf4   :  { %v1366_v3 = vadd.f32 1.0, %v1364_v55  ;;  %v5260_v53 = vmul.f32 %v5236_v39, %v1454_v4  ;;  %v615_v42 = vadd.f32 %v5157_v36, %v614_v45  ;;  %v5264_v62 = vsub.f32 %v5009_v40, %v1556_v57 }
  0xf5   :  { %8512 = vst [vmem:[#allocation72_spill] sm:$0xff] %v5254_v24  ;;  %v1140_v63 = vmul.f32 %v1138_v25, %v5164_v47  ;;  %v1468_v13 = vsub.f32 %v5234_v19, %v1466_v18  ;;  %3557 = vrcp.f32 %v1484_v9  ;;  %v1480_v31 = vmul.f32 %v4765_v33, %v5234_v19 }
  0xf6   :  { %8513 = vst [vmem:[#allocation73_spill] sm:$0xff] %v5264_v62  ;;  %v5268_v43 = vpop.eup %3555  ;;  %3559 = vlog2.f32 %v1366_v3  ;;  %vm617_vm6 = vweird.f32 %v5157_v36  ;;  %v620_v4 = vand.u32 2147483647, %v8502_v26  ;;  %v622_v61 = vand.u32 2147483648, %v8502_v26 }
  0xf7   :  { %v1142_v28 = vadd.f32 %v1140_v63, %v5164_v47  ;;  %vm5277_vm7 = vmor %vm616_vm5, %vm617_vm6  ;;  %v5284_v45 = vmul.f32 %v4723_v14, %v8516_v8  ;;  %v846_v2 = vmul.f32 %v8518_v34, %v4017_v15  ;;  %v1486_v18 = vsub.f32 %v5234_v19, %v1470_v23 }
  0xf8   :  { %v619_v47 = vsel %vm5277_vm7, %v5157_v36, %v615_v42  ;;  %vm621_vm8 = vcmp.eq.f32.partialorder %v620_v4, 8.507059e+37  ;;  %v627_v55 = vsub.f32 1.0, %v626_v7  ;;  %v1472_v25 = vadd.f32 %v1470_v23, %v1468_v13  ;;  %v8521_v7 = vld [vmem:[#allocation21_spill] sm:$0xff]  ;;  %v8523_v4 = vld [vmem:[#allocation43_spill] sm:$0xff] }
  0xf9   :  { %8517 = vst [vmem:[#allocation74_spill] sm:$0xff] %v5284_v45  ;;  %v1144_v57 = vadd.f32 %v1142_v28, %v5198_v11  ;;  %v623_v9 = vor.u32 1.1754944e-38, %v622_v61  ;;  %vm630_vm10 = vweird.f32 %v4656_v50  ;;  %vm631_vm9 = vweird.f32 %v5193_v41 }
  0xfa   :  { %v628_v3 = vmul.f32 %v5193_v41, %v627_v55  ;;  %v634_v63 = vand.u32 2147483647, %v4656_v50  ;;  %v636_v60 = vand.u32 2147483648, %v4656_v50  ;;  %v848_v36 = vsub.f32 %v846_v2, %v5284_v45  ;;  %vm5301_vm11 = vmor %vm630_vm10, %vm631_vm9 }
  0xfb   :  { %v3558_v62 = vpop.eup %3557  ;;  %v1148_v21 = vsub.f32 0.0, %v1144_v57  ;;  %v5298_v40 = vsel %vm621_vm8, %v623_v9, %v619_v47  ;;  %v5307_v23 = vmul.f32 %v4765_v33, %v8521_v7  ;;  %v8524_v7 = vld [vmem:[#allocation46_spill] sm:$0xff]  ;;  %v5337_v11 = vmul.f32 %v5248_v46, %v5248_v46 }
  0xfc   :  { %v3560_v42 = vpop.eup %3559  ;;  %v5309_v13 = vmul.f32 %v3558_v62, %v1486_v18  ;;  %v774_v28 = vmul.f32 %v5298_v40, %v8523_v4  ;;  %v629_v61 = vadd.f32 %v5193_v41, %v628_v3  ;;  %vm635_vm12 = vcmp.eq.f32.partialorder %v634_v63, 8.507059e+37  ;;  %v8525_v18 = vld [vmem:[#allocation23_spill] sm:$0xff] }
  0xfd   :  { %8522 = vst [vmem:[#allocation75_spill] sm:$0xff] %v5307_v23  ;;  %v1150_v2 = vsel %vm1146_vm4, %v1148_v21, %v1144_v57  ;;  %v1370_v47 = vmul.f32 0.6931472, %v3560_v42  ;;  %v637_v55 = vor.u32 1.1754944e-38, %v636_v60  ;;  %v805_v9 = vmul.f32 2.0, %v5307_v23 }
  0xfe   :  { %v5318_v24 = vand.u32 2147483647, %v5309_v13  ;;  %v5321_v30 = vmul.f32 %v774_v28, %v8524_v7  ;;  %v633_v62 = vsel %vm5301_vm11, %v5193_v41, %v629_v61  ;;  %v801_v3 = vsub.f32 %v4656_v50, %v8525_v18 }
  0xff   :  { %v1372_v63 = vmul.f32 -2.8333333, %v1370_v47  ;;  %v5328_v49 = vsel %vm635_vm12, %v637_v55, %v633_v62  ;;  %v807_v60 = vmul.f32 %v805_v9, %v5086_v12  ;;  %v811_v21 = vmul.f32 %v5086_v12, %v5086_v12 }
 0x100   :  { %v1152_v57 = vsub.f32 1.5707964, %v1150_v2  ;;  %vm1494_vm13 = vcmp.gt.f32.partialorder %v5318_v24, 2.4142137  ;;  %3561 = vrcp.f32 %v5318_v24  ;;  %vm1496_vm14 = vcmp.gt.f32.partialorder %v5318_v24, 0.41421357 }
 0x101   :  { %v1375_v41 = vmul.f32 1.442695, %v1372_v63  ;;  %vm1498_vm15 = vmxor %vm1494_vm13, %vm3908_vm2  ;;  %v1504_v42 = vadd.f32 1.0, %v5318_v24  ;;  %v850_v4 = vmul.f32 %v848_v36, %v5321_v30  ;;  %v1362_v28 = vmul.f32 %v1360_v44, %v4078_v59 }
 0x102   :  { %v1476_v61 = vmul.f32 %v5236_v39, %v5248_v46  ;;  %v771_v2 = vmul.f32 %v5328_v49, %v5328_v49  ;;  %v809_v47 = vsub.f32 %v801_v3, %v807_v60  ;;  %v1474_v55 = vmul.f32 %v1472_v25, %v5242_v17  ;;  %vm5356_vm0 = vmand %vm1496_vm14, %vm1498_vm15  ;;  %v8530_v60 = vld [vmem:[#allocation42_spill] sm:$0xff] }
 0x103   :  { %3563 = vpow2.f32 %v1375_v41  ;;  %v5352_v9 = vmul.f32 %v1480_v31, %v5260_v53  ;;  %912 = vadd.xlane.f32.xlu1 %v850_v4  ;;  %v813_v62 = vmul.f32 %v811_v21, %v4090_v5  ;;  %v1154_v36 = vmul.f32 %v1152_v57, %v5189_v38  ;;  %v8532_v57 = vld [vmem:[#allocation29_spill] sm:$0xff]  ;;  %v8533_v41 = vld [vmem:[#allocation59_spill] sm:$0xff] }
 0x104   :  { %3565 = vrcp.f32 %v1504_v42  ;;  %v3367_v39 = vadd.f32 -1.0, %v5318_v24  ;;  %v5362_v3 = vmul.f32 %v771_v2, %v4847_v37  ;;  %v1518_v17 = vsel %vm5356_vm0, 0.7853982, %v8434_v22 }
 0x105   :  { %8526 = vst [vmem:[#allocation43_spill] sm:$0xff] %v5352_v9  ;;  %v815_v53 = vadd.f32 %v813_v62, %v809_v47  ;;  %v221_v31 = vmul.f32 %v5268_v43, %v4267_v32  ;;  %vm225_vm1 = vweird.f32 %v4267_v32  ;;  %v229_v25 = vand.u32 2147483647, %v4267_v32  ;;  %v8534_v47 = vld [vmem:[#allocation48_spill] sm:$0xff] }
 0x106   :  { %8529 = vst [vmem:[#allocation46_spill] sm:$0xff] %v5362_v3  ;;  %v3562_v38 = vpop.eup %3561  ;;  %v231_v63 = vand.u32 2147483648, %v4267_v32  ;;  %v5374_v21 = vmul.f32 %v4765_v33, %v8530_v60  ;;  %v5378_v42 = vmul.f32 %v8533_v41, %v8532_v57  ;;  %vm226_vm3 = vweird.f32 %v5268_v43 }
 0x107   :  { %v817_v4 = vmul.f32 %v815_v53, %v5362_v3  ;;  %v222_v2 = vsub.f32 1.0, %v221_v31  ;;  %3567 = vrcp.f32 %v8534_v47  ;;  %v5384_v62 = vmul.f32 %v5178_v35, %v1154_v36  ;;  %vm5407_vm5 = vmor %vm225_vm1, %vm226_vm3 }
 0x108   :  { %8531 = vst [vmem:[#allocation42_spill] sm:$0xff] %v5374_v21  ;;  %v5387_v22 = vadd.f32 %v5208_v52, %v1154_v36  ;;  %v5389_v59 = vmul.f32 %v1476_v61, %v1474_v55  ;;  %v8538_v46 = vstv %s5028_s10  ;;  %v1508_v20 = vsub.f32 0.0, %v3562_v38 }
 0x109   :  { %8535 = vst [vmem:[#allocation29_spill] sm:$0xff] %v5384_v62  ;;  %v5394_v50 = vmul.f32 %v4765_v33, %v8538_v46  ;;  %v3564_v9 = vpop.eup %3563  ;;  %v5398_v53 = vsel %vm1494_vm13, 1.5707964, %v1518_v17  ;;  %866 = vadd.xlane.f32.xlu0 %v817_v4  ;;  %v223_v31 = vmul.f32 %v5268_v43, %v222_v2  ;;  %vm5401_vm4 = vcmp.eq.f32.partialorder %v229_v25, 8.507059e+37  ;;  %v8552_v46 = vld [vmem:[#allocation49_spill] sm:$0xff] }
 0x10a   :  { %8536 = vst [vmem:[#allocation48_spill] sm:$0xff] %v5387_v22  ;;  %v3566_v52 = vpop.eup %3565  ;;  %v1378_v61 = vmul.f32 %v3564_v9, %v1362_v28  ;;  %v232_v55 = vor.u32 1.1754944e-38, %v231_v63  ;;  %v444_v36 = vsub.f32 %v5378_v42, %v5374_v21  ;;  %vm1014_vm6 = vweird.f32 %v8534_v47  ;;  %v3739_v9 = vld [vmem:[#allocation13 + $0x8] sm:$0xff]  ;;  %v8546_v63 = vld [vmem:[#allocation53_spill] sm:$0xff] }
 0x10b   :  { %8537 = vst [vmem:[#allocation76_spill] sm:$0xff] %v5389_v59  ;;  %v1512_v17 = vmul.f32 %v3566_v52, %v3367_v39  ;;  %v224_v38 = vadd.f32 %v5268_v43, %v223_v31  ;;  %v1018_v25 = vand.u32 2147483647, %v8534_v47  ;;  %v1020_v4 = vand.u32 2147483648, %v8534_v47  ;;  %v8547_v42 = vld [vmem:[#allocation33_spill] sm:$0xff] }
 0x10c   :  { %8539 = vst [vmem:[#allocation77_spill] sm:$0xff] %v5394_v50  ;;  %v5419_v28 = vmul.f32 %v5394_v50, %v5389_v59  ;;  %v5421_v2 = vmul.f32 %v3739_v9, %v1378_v61  ;;  %v820_v3 = vmul.f32 %v8546_v63, %v4017_v15  ;;  %v5427_v62 = vmul.f32 %v8516_v8, %v8547_v42  ;;  %v8549_v59 = vld [vmem:[#allocation47_spill] sm:$0xff] }
 0x10d   :  { %v3568_v39 = vpop.eup %3567  ;;  %v1514_v31 = vsel %vm5356_vm0, %v1512_v17, %v5318_v24  ;;  %v228_v52 = vsel %vm5407_vm5, %v5268_v43, %v224_v38  ;;  %v5437_v61 = vmul.f32 %v4723_v14, %v8549_v59  ;;  %v8551_v9 = vld [vmem:[#allocation39_spill] sm:$0xff]  ;;  %vm5455_vm7 = vcmp.eq.f32.partialorder %v1018_v25, 8.507059e+37 }
 0x10e   :  { %8544 = vst [vmem:[#allocation78_spill] sm:$0xff] %v5419_v28  ;;  %v5441_v50 = vmul.f32 %v4877_v16, %v8551_v9  ;;  %v5445_v63 = vsel %vm1494_vm13, %v1508_v20, %v1514_v31  ;;  %v1577_v44 = vmul.f32 %v5337_v11, %v5421_v2  ;;  %v233_v17 = vsel %vm5401_vm4, %v232_v55, %v228_v52  ;;  %v8555_v31 = vld [vmem:[#allocation50_spill] sm:$0xff] }
 0x10f   :  { %8545 = vst [vmem:[#allocation79_spill] sm:$0xff] %v5421_v2  ;;  %v1010_v43 = vmul.f32 %v3568_v39, %v8534_v47  ;;  %v1522_v14 = vmul.f32 %v5445_v63, %v5445_v63  ;;  %v370_v38 = vmul.f32 %v233_v17, %v8552_v46  ;;  %v775_v20 = vmul.f32 %v5328_v49, %v4753_v58  ;;  %v8556_v28 = vld [vmem:[#allocation22_spill] sm:$0xff] }
 0x110   :  { %8548 = vst [vmem:[#allocation80_spill] sm:$0xff] %v5427_v62  ;;  %v1615_v24 = vmul.f32 %v1577_v44, %v4672_v1  ;;  %vm1015_vm8 = vweird.f32 %v3568_v39  ;;  %v824_v35 = vsub.f32 %v820_v3, %v5427_v62  ;;  %v1021_v2 = vor.u32 1.1754944e-38, %v1020_v4  ;;  %v8563_v4 = vld [vmem:[#allocation55_spill] sm:$0xff] }
 0x111   :  { %8550 = vst [vmem:[#allocation47_spill] sm:$0xff] %v5437_v61  ;;  %v1011_v11 = vsub.f32 1.0, %v1010_v43  ;;  %v1524_v55 = vmul.f32 0.080537446, %v1522_v14  ;;  %v5464_v52 = vmul.f32 %v370_v38, %v8555_v31  ;;  %v847_v25 = vmul.f32 %v5086_v12, %v4090_v5  ;;  %vm5478_vm10 = vmor %vm1014_vm6, %vm1015_vm8 }
 0x112   :  { %1674 = vadd.xlane.f32.xlu2 %v1615_v24  ;;  %v826_v42 = vmul.f32 %v824_v35, %v5321_v30  ;;  %v395_v58 = vsub.f32 %v8483_v56, %v8556_v28  ;;  %v399_v49 = vmul.f32 2.0, %v5060_v54  ;;  %v5474_v3 = vmul.f32 %v5298_v40, %v5298_v40 }
 0x113   :  { %v1012_v46 = vmul.f32 %v3568_v39, %v1011_v11  ;;  %v3369_v44 = vadd.f32 -0.13877685, %v1524_v55  ;;  %v1246_v43 = vsub.f32 %v5441_v50, %v5437_v61  ;;  %v405_v30 = vmul.f32 %v4472_v48, %v4472_v48 }
 0x114   :  { %888 = vadd.xlane.f32.xlu0 %v826_v42  ;;  %v5487_v24 = vmul.f32 %v775_v20, %v4847_v37  ;;  %v401_v40 = vmul.f32 %v399_v49, %v4472_v48  ;;  %3569 = vrcp.f32 %v4940_v51  ;;  %v446_v35 = vmul.f32 %v444_v36, %v5464_v52  ;;  %v8559_v49 = vld [vmem:[#allocation45_spill] sm:$0xff] }
 0x115   :  { %v1013_v38 = vadd.f32 %v3568_v39, %v1012_v46  ;;  %v1528_v11 = vmul.f32 %v3369_v44, %v1522_v14  ;;  %v849_v55 = vsub.f32 %v847_v25, %v5307_v23  ;;  %v407_v12 = vmul.f32 %v405_v30, %v8491_v0  ;;  %v8561_v36 = vld [vmem:[#allocation65_spill] sm:$0xff] }
 0x116   :  { %v403_v62 = vsub.f32 %v395_v58, %v401_v40  ;;  %v1032_v42 = vand.u32 2147483647, %v4940_v51  ;;  %v1034_v37 = vand.u32 2147483648, %v4940_v51  ;;  %v5502_v44 = vmul.f32 %v5212_v27, %v8559_v49 }
 0x117   :  { %v1017_v50 = vsel %vm5478_vm10, %v3568_v39, %v1013_v38  ;;  %v1530_v20 = vadd.f32 0.19977711, %v1528_v11  ;;  %v5506_v25 = vmul.f32 %v4765_v33, %v8561_v36  ;;  %v366_v30 = vmul.f32 %v233_v17, %v233_v17  ;;  %v8564_v11 = vld [vmem:[#allocation56_spill] sm:$0xff] }
 0x118   :  { %v1022_v46 = vsel %vm5455_vm7, %v1021_v2, %v1017_v50  ;;  %8560 = vst [vmem:[#allocation39_spill] sm:$0xff] %v5502_v44  ;;  %v409_v58 = vadd.f32 %v407_v12, %v403_v62  ;;  %vm1028_vm9 = vweird.f32 %v4940_v51  ;;  %v851_v40 = vmul.f32 %v849_v55, %v5487_v24 }
 0x119   :  { %8562 = vst [vmem:[#allocation49_spill] sm:$0xff] %v5506_v25  ;;  %v1172_v39 = vmul.f32 %v1022_v46, %v8563_v4  ;;  %v1532_v38 = vmul.f32 %v1530_v20, %v1522_v14  ;;  %v1199_v8 = vsub.f32 %v4940_v51, %v8525_v18  ;;  %v1203_v2 = vmul.f32 2.0, %v5506_v25 }
 0x11a   :  { %v3570_v27 = vpop.eup %3569  ;;  %509 = vadd.xlane.f32.xlu2 %v446_v35  ;;  %vm5515_vm11 = vcmp.eq.f32.partialorder %v1032_v42, 8.507059e+37  ;;  %v1035_v17 = vor.u32 1.1754944e-38, %v1034_v37  ;;  %v1209_v12 = vmul.f32 %v5387_v22, %v5387_v22  ;;  %v411_v55 = vmul.f32 %v409_v58, %v5502_v44 }
 0x11b   :  { %v1174_v50 = vmul.f32 %v1172_v39, %v8564_v11  ;;  %v3371_v62 = vadd.f32 -0.3333295, %v1532_v38  ;;  %v1024_v20 = vmul.f32 %v3570_v27, %v4940_v51  ;;  %v1245_v49 = vmul.f32 %v5387_v22, %v4642_v10 }
 0x11c   :  { %vm1544_vm12 = vcmp.lt.f32.partialorder %v5309_v13, 0.0  ;;  %v1205_v42 = vmul.f32 %v1203_v2, %v5387_v22  ;;  %v396_v4 = vsub.f32 %v4267_v32, %v8525_v18  ;;  %v400_v37 = vmul.f32 2.0, %v5374_v21  ;;  %v8568_v22 = vld [vmem:[#allocation44_spill] sm:$0xff] }
 0x11d   :  { %v1248_v35 = vmul.f32 %v1246_v43, %v1174_v50  ;;  %v1536_v39 = vmul.f32 %v3371_v62, %v1522_v14  ;;  %v1025_v23 = vsub.f32 1.0, %v1024_v20  ;;  %vm1029_vm13 = vweird.f32 %v3570_v27  ;;  %v8567_v43 = vld [vmem:[#allocation64_spill] sm:$0xff] }
 0x11e   :  { %v406_v58 = vmul.f32 %v8533_v41, %v8533_v41  ;;  %v5533_v38 = vmul.f32 %v366_v30, %v8555_v31  ;;  %v402_v54 = vmul.f32 %v400_v37, %v8533_v41  ;;  %v1218_v2 = vmul.f32 %v8567_v43, %v8551_v9  ;;  %vm5547_vm14 = vmor %vm1028_vm9, %vm1029_vm13 }
 0x11f   :  { %1310 = vadd.xlane.f32.xlu1 %v1248_v35  ;;  %v5540_v44 = vmul.f32 %v8549_v59, %v8568_v22  ;;  %v1538_v14 = vmul.f32 %v1536_v39, %v5445_v63  ;;  %v1026_v62 = vmul.f32 %v3570_v27, %v1025_v23  ;;  %v1211_v20 = vmul.f32 %v1209_v12, %v4642_v10 }
 0x120   :  { %v408_v21 = vmul.f32 %v406_v58, %v8532_v57  ;;  %v1207_v30 = vsub.f32 %v1199_v8, %v1205_v42  ;;  %v404_v35 = vsub.f32 %v396_v4, %v402_v54  ;;  %v800_v37 = vsub.f32 %v8502_v26, %v8556_v28  ;;  %v8572_v8 = vld [vmem:[#allocation60_spill] sm:$0xff] }
 0x121   :  { %8569 = vst [vmem:[#allocation50_spill] sm:$0xff] %v5540_v44  ;;  %v804_v41 = vmul.f32 2.0, %v5284_v45  ;;  %v1540_v39 = vadd.f32 %v1538_v14, %v5445_v63  ;;  %v1027_v23 = vadd.f32 %v3570_v27, %v1026_v62  ;;  %v1222_v12 = vsub.f32 %v1218_v2, %v5540_v44  ;;  %v8573_v42 = vld [vmem:[#allocation32_spill] sm:$0xff] }
 0x122   :  { %v810_v58 = vmul.f32 %v8518_v34, %v8518_v34  ;;  %914 = vadd.xlane.f32.xlu2 %v851_v40  ;;  %v410_v51 = vadd.f32 %v408_v21, %v404_v35  ;;  %v5561_v54 = vmul.f32 %v8572_v8, %v8532_v57  ;;  %v5565_v4 = vmul.f32 %v8530_v60, %v8573_v42 }
 0x123   :  { %v806_v43 = vmul.f32 %v804_v41, %v8518_v34  ;;  %v1542_v63 = vadd.f32 %v1540_v39, %v5398_v53  ;;  %v1031_v2 = vsel %vm5547_vm14, %v3570_v27, %v1027_v23  ;;  %3571 = vrcp.f32 %v5234_v19 }
 0x124   :  { %8574 = vst [vmem:[#allocation45_spill] sm:$0xff] %v5565_v4  ;;  %v812_v14 = vmul.f32 %v810_v58, %v4017_v15  ;;  %v1168_v21 = vmul.f32 %v1022_v46, %v1022_v46  ;;  %v1036_v41 = vsel %vm5515_vm11, %v1035_v17, %v1031_v2  ;;  %v1247_v40 = vsub.f32 %v1245_v49, %v5506_v25 }
 0x125   :  { %v808_v62 = vsub.f32 %v800_v37, %v806_v43  ;;  %v1546_v35 = vsub.f32 0.0, %v1542_v63  ;;  %v1169_v44 = vmul.f32 %v1036_v41, %v1036_v41  ;;  %v1213_v45 = vadd.f32 %v1211_v20, %v1207_v30  ;;  %v8579_v20 = vld [vmem:[#allocation43_spill] sm:$0xff] }
 0x126   :  { %v1173_v34 = vmul.f32 %v1036_v41, %v5023_v6  ;;  %v412_v53 = vmul.f32 %v410_v51, %v5533_v38  ;;  %v1224_v27 = vmul.f32 %v1222_v12, %v1174_v50  ;;  %v5579_v31 = vmul.f32 %v5474_v3, %v8524_v7  ;;  %v8577_v50 = vld [vmem:[#allocation70_spill] sm:$0xff] }
 0x127   :  { %459 = vadd.xlane.f32.xlu1 %v411_v55  ;;  %v814_v46 = vadd.f32 %v812_v14, %v808_v62  ;;  %v1548_v33 = vsel %vm1544_vm12, %v1546_v35, %v1542_v63  ;;  %v5584_v17 = vmul.f32 %v1169_v44, %v5126_v29  ;;  %v420_v6 = vsub.f32 %v5561_v54, %v5565_v4  ;;  %v8580_v54 = vld [vmem:[#allocation78_spill] sm:$0xff]  ;;  %v8582_v14 = vld [vmem:[#allocation41_spill] sm:$0xff] }
 0x128   :  { %v5587_v49 = vmul.f32 %v1173_v34, %v5126_v29  ;;  %v1550_v55 = vsub.f32 1.5707964, %v1548_v33  ;;  %vm1426_vm15 = vweird.f32 %v5234_v19  ;;  %v1430_v51 = vand.u32 2147483647, %v5234_v19  ;;  %v5598_v34 = vld [vmem:[#allocation10 + $0x8] sm:$0xff]  ;;  %v8584_v62 = vld [vmem:[#allocation21_spill] sm:$0xff] }
 0x129   :  { %8575 = vst [vmem:[#allocation65_spill] sm:$0xff] %v5584_v17  ;;  %v1432_v7 = vand.u32 2147483648, %v5234_v19  ;;  %v3572_v3 = vpop.eup %3571  ;;  %v1215_v13 = vmul.f32 %v1213_v45, %v5584_v17  ;;  %v1597_v29 = vsub.f32 %v5234_v19, %v8525_v18  ;;  %v5602_v43 = vmul.f32 %v5598_v34, %v8577_v50 }
 0x12a   :  { %v1249_v44 = vmul.f32 %v1247_v40, %v5587_v49  ;;  %8576 = vst [vmem:[#allocation55_spill] sm:$0xff] %v5598_v34  ;;  %v5605_v30 = vmul.f32 %v1550_v55, %v8579_v20  ;;  %v816_v37 = vmul.f32 %v814_v46, %v5579_v31  ;;  %v1422_v39 = vmul.f32 %v3572_v3, %v5234_v19  ;;  %v8583_v40 = vld [vmem:[#allocation33_spill] sm:$0xff]  ;;  %v8598_v46 = vld [vmem:[#allocation79_spill] sm:$0xff] }
 0x12b   :  { %8578 = vst [vmem:[#allocation56_spill] sm:$0xff] %v5602_v43  ;;  %vm1427_vm0 = vweird.f32 %v3572_v3  ;;  %1264 = vadd.xlane.f32.xlu0 %v1215_v13  ;;  %v1601_v45 = vmul.f32 2.0, %v5602_v43  ;;  %v1198_v23 = vsub.f32 %v8534_v47, %v8556_v28  ;;  %v1202_v12 = vmul.f32 2.0, %v5437_v61  ;;  %v8588_v13 = vld [vmem:[#allocation36_spill] sm:$0xff]  ;;  %v8593_v61 = vld [vmem:[#allocation63_spill] sm:$0xff] }
 0x12c   :  { %1312 = vadd.xlane.f32.xlu2 %v1249_v44  ;;  %v1208_v58 = vmul.f32 %v4877_v16, %v4877_v16  ;;  %v5618_v63 = vadd.f32 %v8580_v54, %v5605_v30  ;;  %v1423_v2 = vsub.f32 1.0, %v1422_v39  ;;  %v821_v41 = vmul.f32 %v8582_v14, %v4090_v5  ;;  %v8589_v44 = vld [vmem:[#allocation51_spill] sm:$0xff]  ;;  %vm5640_vm3 = vmor %vm1426_vm15, %vm1427_vm0 }
 0x12d   :  { %v5624_v35 = vmul.f32 %v8584_v62, %v8583_v40  ;;  %vm5626_vm1 = vcmp.eq.f32.partialorder %v1430_v51, 8.507059e+37  ;;  %v1204_v33 = vmul.f32 %v1202_v12, %v4877_v16  ;;  %v380_v20 = vmul.f32 %v8589_v44, %v8588_v13  ;;  %v8592_v13 = vld [vmem:[#allocation26_spill] sm:$0xff] }
 0x12e   :  { %8581 = vst [vmem:[#allocation60_spill] sm:$0xff] %v5618_v63  ;;  %v1210_v55 = vmul.f32 %v1208_v58, %v8551_v9  ;;  %v1424_v39 = vmul.f32 %v3572_v3, %v1423_v2  ;;  %v1433_v54 = vor.u32 1.1754944e-38, %v1432_v7  ;;  %v1603_v18 = vmul.f32 %v1601_v45, %v5618_v63 }
 0x12f   :  { %8585 = vst [vmem:[#allocation70_spill] sm:$0xff] %v5624_v35  ;;  %461 = vadd.xlane.f32.xlu1 %v412_v53  ;;  %v1607_v43 = vmul.f32 %v5618_v63, %v5618_v63  ;;  %v5645_v12 = vmul.f32 %v1168_v21, %v8564_v11  ;;  %v1206_v58 = vsub.f32 %v1198_v23, %v1204_v33  ;;  %v382_v7 = vstv %s379_s4  ;;  %v8595_v23 = vld [vmem:[#allocation40_spill] sm:$0xff] }
 0x130   :  { %v377_v53 = vsub.f32 %v8483_v56, %v8592_v13  ;;  %v1425_v2 = vadd.f32 %v3572_v3, %v1424_v39  ;;  %v1605_v45 = vsub.f32 %v1597_v29, %v1603_v18  ;;  %v825_v63 = vsub.f32 %v821_v41, %v5624_v35  ;;  %v8594_v56 = vld [vmem:[#allocation29_spill] sm:$0xff]  ;;  %v5667_v41 = vld [vmem:[#allocation10] sm:$0xff] }
 0x131   :  { %v1609_v25 = vmul.f32 %v1607_v43, %v4672_v1  ;;  %v1212_v4 = vadd.f32 %v1210_v55, %v1206_v58  ;;  %v383_v34 = vmul.f32 %v382_v7, %v380_v20  ;;  %v387_v17 = vmul.f32 %v8589_v44, %v8589_v44 }
 0x132   :  { %3573 = vrcp.f32 %v8593_v61  ;;  %v422_v11 = vmul.f32 %v420_v6, %v5464_v52  ;;  %v1429_v21 = vsel %vm5640_vm3, %v3572_v3, %v1425_v2  ;;  %v5659_v33 = vsub.f32 %v8595_v23, %v8594_v56  ;;  %v8597_v52 = vld [vmem:[#allocation62_spill] sm:$0xff] }
 0x133   :  { %1286 = vadd.xlane.f32.xlu0 %v1224_v27  ;;  %v5663_v18 = vsel %vm5626_vm1, %v1433_v54, %v1429_v21  ;;  %v1611_v43 = vadd.f32 %v1609_v25, %v1605_v45  ;;  %v5671_v6 = vmul.f32 %v5667_v41, %v8597_v52  ;;  %v1214_v3 = vmul.f32 %v1212_v4, %v5645_v12  ;;  %v8599_v54 = vld [vmem:[#allocation72_spill] sm:$0xff] }
 0x134   :  { %864 = vadd.xlane.f32.xlu2 %v816_v37  ;;  %8596 = vst [vmem:[#allocation43_spill] sm:$0xff] %v5663_v18  ;;  %v1567_v29 = vmul.f32 %v5663_v18, %v5663_v18  ;;  %v827_v27 = vmul.f32 %v825_v63, %v5487_v24  ;;  %v385_v55 = vsub.f32 %v377_v53, %v383_v34  ;;  %vm1412_vm4 = vweird.f32 %v8593_v61 }
 0x135   :  { %v389_v37 = vmul.f32 %v387_v17, %v8491_v0  ;;  %v1596_v25 = vsub.f32 %v8593_v61, %v8556_v28  ;;  %v1600_v39 = vmul.f32 2.0, %v5671_v6  ;;  %v1606_v51 = vmul.f32 %v8599_v54, %v8599_v54 }
 0x136   :  { %v5677_v20 = vmul.f32 %v1567_v29, %v8598_v46  ;;  %v1219_v24 = vmul.f32 %v5659_v33, %v4642_v10  ;;  %v5689_v4 = vmul.f32 %v8561_v36, %v8568_v22  ;;  %v378_v17 = vsub.f32 %v4267_v32, %v8592_v13  ;;  %v8600_v29 = vld [vmem:[#allocation58_spill] sm:$0xff] }
 0x137   :  { %485 = vadd.xlane.f32.xlu1 %v422_v11  ;;  %v381_v34 = vmul.f32 %v8572_v8, %v8530_v60  ;;  %v1602_v2 = vmul.f32 %v1600_v39, %v8599_v54  ;;  %v388_v45 = vmul.f32 %v8572_v8, %v8572_v8  ;;  %v1416_v11 = vand.u32 2147483647, %v8593_v61 }
 0x138   :  { %v3574_v58 = vpop.eup %3573  ;;  %v1613_v63 = vmul.f32 %v1611_v43, %v5677_v20  ;;  %v1418_v21 = vand.u32 2147483648, %v8593_v61  ;;  %v786_v60 = vmul.f32 %v8582_v14, %v8584_v62  ;;  %v787_v13 = vstv %s784_s11 }
 0x139   :  { %v1408_v53 = vmul.f32 %v3574_v58, %v8593_v61  ;;  %v384_v56 = vmul.f32 %v382_v7, %v381_v34  ;;  %vm1413_vm5 = vweird.f32 %v3574_v58  ;;  %v391_v23 = vadd.f32 %v389_v37, %v385_v55  ;;  %v8603_v34 = vld [vmem:[#allocation28_spill] sm:$0xff] }
 0x13a   :  { %v1608_v43 = vmul.f32 %v1606_v51, %v8600_v29  ;;  %v1223_v39 = vsub.f32 %v1219_v24, %v5689_v4  ;;  %v1604_v28 = vsub.f32 %v1596_v25, %v1602_v2  ;;  %v390_v18 = vmul.f32 %v388_v45, %v8532_v57  ;;  %vm5710_vm6 = vmor %vm1412_vm4, %vm1413_vm5  ;;  %v8605_v25 = vld [vmem:[#allocation37_spill] sm:$0xff] }
 0x13b   :  { %v1409_v32 = vsub.f32 1.0, %v1408_v53  ;;  %1662 = vadd.xlane.f32.xlu0 %v1613_v63  ;;  %v386_v46 = vsub.f32 %v378_v17, %v384_v56  ;;  %v1419_v62 = vor.u32 1.1754944e-38, %v1418_v21  ;;  %v789_v37 = vmul.f32 %v787_v13, %v786_v60  ;;  %v8606_v17 = vld [vmem:[#allocation53_spill] sm:$0xff]  ;;  %v8607_v53 = vld [vmem:[#allocation27_spill] sm:$0xff] }
 0x13c   :  { %1262 = vadd.xlane.f32.xlu2 %v1214_v3  ;;  %v8604_v3 = vld [vmem:[#allocation57_spill] sm:$0xff]  ;;  %v793_v51 = vmul.f32 %v8582_v14, %v8582_v14  ;;  %vm1417_vm7 = vcmp.eq.f32.partialorder %v1416_v11, 8.507059e+37  ;;  %v785_v63 = vmul.f32 %v8606_v17, %v8605_v25  ;;  %v431_v2 = vmul.f32 %v8607_v53, %v4472_v48  ;;  %v8609_v21 = vld [vmem:[#allocation39_spill] sm:$0xff] }
 0x13d   :  { %v1410_v35 = vmul.f32 %v3574_v58, %v1409_v32  ;;  %v783_v55 = vsub.f32 %v8604_v3, %v8603_v34  ;;  %v8608_v45 = vld [vmem:[#allocation77_spill] sm:$0xff]  ;;  %v393_v32 = vmul.f32 %v391_v23, %v8609_v21  ;;  %v1610_v3 = vadd.f32 %v1608_v43, %v1604_v28 }
 0x13e   :  { %v1557_v56 = vmul.f32 %v8608_v45, %v5605_v30  ;;  %v795_v25 = vmul.f32 %v793_v51, %v4090_v5  ;;  %v792_v53 = vmul.f32 %v8606_v17, %v8606_v17  ;;  %v782_v23 = vsub.f32 %v8502_v26, %v8603_v34  ;;  %v8612_v26 = vld [vmem:[#allocation38_spill] sm:$0xff]  ;;  %v8614_v34 = vld [vmem:[#allocation67_spill] sm:$0xff] }
 0x13f   :  { %890 = vadd.xlane.f32.xlu1 %v827_v27  ;;  %v1411_v24 = vadd.f32 %v3574_v58, %v1410_v35  ;;  %v1225_v27 = vmul.f32 %v1223_v39, %v5587_v49  ;;  %v392_v35 = vadd.f32 %v390_v18, %v386_v46  ;;  %v791_v14 = vsub.f32 %v783_v55, %v789_v37  ;;  %v8610_v18 = vld [vmem:[#allocation64_spill] sm:$0xff]  ;;  %v472_v39 = vpop.xlane.xlu2 %471 }
 0x140   :  { %v788_v7 = vmul.f32 %v787_v13, %v785_v63  ;;  %v1184_v28 = vmul.f32 %v5659_v33, %v8561_v36  ;;  %v1185_v49 = vstv %s1182_s12  ;;  %v1183_v46 = vmul.f32 %v8610_v18, %v8549_v59  ;;  %v8613_v36 = vld [vmem:[#allocation30_spill] sm:$0xff] }
 0x141   :  { %v1415_v60 = vsel %vm5710_vm6, %v3574_v58, %v1411_v24  ;;  %v423_v58 = vmul.f32 %v4472_v48, %v8589_v44  ;;  %v427_v43 = vmul.f32 %v5667_v41, %v8573_v42  ;;  %v1181_v37 = vsub.f32 %v8614_v34, %v8613_v36 }
 0x142   :  { %v5729_v11 = vsel %vm1417_vm7, %v1419_v62, %v1415_v60  ;;  %v8611_v62 = vld [vmem:[#allocation76_spill] sm:$0xff]  ;;  %v1191_v59 = vmul.f32 %v5659_v33, %v5659_v33  ;;  %v394_v51 = vmul.f32 %v392_v35, %v5533_v38  ;;  %v797_v48 = vadd.f32 %v795_v25, %v791_v14  ;;  %v8617_v25 = vld [vmem:[#allocation46_spill] sm:$0xff] }
 0x143   :  { %v1566_v30 = vmul.f32 %v5729_v11, %v5729_v11  ;;  %447 = vadd.xlane.f32.xlu0 %v393_v32  ;;  %v5747_v55 = vsub.f32 %v8611_v62, %v1557_v56  ;;  %v794_v24 = vmul.f32 %v792_v53, %v4017_v15  ;;  %v425_v63 = vmul.f32 %v423_v58, %v8491_v0  ;;  %v8615_v14 = vld [vmem:[#allocation68_spill] sm:$0xff] }
 0x144   :  { %v790_v56 = vsub.f32 %v782_v23, %v788_v7  ;;  %v1187_v32 = vmul.f32 %v1185_v49, %v1184_v28  ;;  %v1180_v60 = vsub.f32 %v8534_v47, %v8613_v36  ;;  %v1190_v62 = vmul.f32 %v8610_v18, %v8610_v18 }
 0x145   :  { %v5750_v13 = vmul.f32 %v1566_v30, %v8612_v26  ;;  %v1186_v30 = vmul.f32 %v1185_v49, %v1183_v46  ;;  %v429_v34 = vsub.f32 %v425_v63, %v427_v43  ;;  %v435_v35 = vmul.f32 %v8615_v14, %v8589_v44  ;;  %v8619_v63 = vld [vmem:[#allocation54_spill] sm:$0xff] }
 0x146   :  { %v1193_v0 = vmul.f32 %v1191_v59, %v4642_v10  ;;  %v799_v53 = vmul.f32 %v797_v48, %v8617_v25  ;;  %v1582_v47 = vmul.f32 %v5747_v55, %v8577_v50  ;;  %v832_v7 = vmul.f32 %v5667_v41, %v8583_v40  ;;  %v8618_v59 = vld [vmem:[#allocation80_spill] sm:$0xff]  ;;  %v8620_v14 = vld [vmem:[#allocation74_spill] sm:$0xff] }
 0x147   :  { %v1612_v45 = vmul.f32 %v1610_v3, %v5750_v13  ;;  %1288 = vadd.xlane.f32.xlu1 %v1225_v27  ;;  %v8616_v3 = vld [vmem:[#allocation52_spill] sm:$0xff]  ;;  %v433_v23 = vsub.f32 %v429_v34, %v431_v2  ;;  %v796_v28 = vadd.f32 %v794_v24, %v790_v56  ;;  %v1189_v49 = vsub.f32 %v1181_v37, %v1187_v32  ;;  %v474_v2 = vpop.xlane.xlu2 %473 }
 0x148   :  { %v828_v27 = vmul.f32 %v8616_v3, %v8606_v17  ;;  %v1583_v46 = vstv %s1580_s13  ;;  %v1188_v58 = vsub.f32 %v1180_v60, %v1186_v30  ;;  %v1192_v43 = vmul.f32 %v1190_v62, %v8551_v9 }
 0x149   :  { %1660 = vadd.xlane.f32.xlu2 %v1612_v45  ;;  %v437_v36 = vsub.f32 %v433_v23, %v435_v35  ;;  %v836_v48 = vmul.f32 %v8618_v59, %v8616_v3  ;;  %v1579_v45 = vsub.f32 %v5234_v19, %v8619_v63  ;;  %v840_v24 = vmul.f32 %v8620_v14, %v8606_v17  ;;  %v8622_v3 = vld [vmem:[#allocation47_spill] sm:$0xff] }
 0x14a   :  { %v830_v44 = vmul.f32 %v828_v27, %v4017_v15  ;;  %v1585_v56 = vmul.f32 %v1583_v46, %v1582_v47  ;;  %v1589_v15 = vmul.f32 %v5747_v55, %v5747_v55  ;;  %v798_v60 = vmul.f32 %v796_v28, %v5579_v31 }
 0x14b   :  { %449 = vadd.xlane.f32.xlu0 %v394_v51  ;;  %v439_v37 = vmul.f32 %v437_v36, %v8609_v21  ;;  %v8621_v51 = vld [vmem:[#allocation73_spill] sm:$0xff]  ;;  %v1195_v30 = vadd.f32 %v1193_v0, %v1189_v49  ;;  %v1226_v19 = vmul.f32 %v4877_v16, %v8610_v18  ;;  %v1194_v35 = vadd.f32 %v1192_v43, %v1188_v58  ;;  %v8623_v0 = vld [vmem:[#allocation50_spill] sm:$0xff] }
 0x14c   :  { %v834_v34 = vsub.f32 %v830_v44, %v832_v7  ;;  %v1581_v32 = vmul.f32 %v8621_v51, %v8597_v52  ;;  %v1588_v17 = vmul.f32 %v8621_v51, %v8621_v51  ;;  %v1230_v21 = vmul.f32 %v5667_v41, %v8568_v22  ;;  %v8625_v43 = vld [vmem:[#allocation65_spill] sm:$0xff] }
 0x14d   :  { %v1238_v27 = vmul.f32 %v8622_v3, %v8610_v18  ;;  %v1234_v47 = vmul.f32 %v8623_v0, %v4877_v16  ;;  %v5800_v7 = vadd.f32 %v474_v2, %v472_v39  ;;  %v1587_v28 = vsub.f32 %v1579_v45, %v1585_v56 }
 0x14e   :  { %v838_v62 = vsub.f32 %v834_v34, %v836_v48  ;;  %v1591_v49 = vmul.f32 %v1589_v15, %v4672_v1  ;;  %v1578_v44 = vsub.f32 %v8593_v61, %v8619_v63  ;;  %v1584_v58 = vmul.f32 %v1583_v46, %v1581_v32  ;;  %v8627_v34 = vld [vmem:[#allocation61_spill] sm:$0xff]  ;;  %v8628_v15 = vld [vmem:[#allocation55_spill] sm:$0xff] }
 0x14f   :  { %854 = vadd.xlane.f32.xlu1 %v799_v53  ;;  %v1228_v53 = vmul.f32 %v1226_v19, %v8551_v9  ;;  %8624 = vst [vmem:[#allocation78_spill] sm:$0xff] %v5800_v7  ;;  %v1197_v36 = vmul.f32 %v1195_v30, %v8625_v43  ;;  %v1196_v18 = vmul.f32 %v1194_v35, %v5645_v12  ;;  %v8626_v9 = vld [vmem:[#allocation59_spill] sm:$0xff]  ;;  %v879_v56 = vpop.xlane.xlu2 %878  ;;  %v8630_v30 = vld [vmem:[#allocation48_spill] sm:$0xff] }
 0x150   :  { %v842_v23 = vsub.f32 %v838_v62, %v840_v24  ;;  %v424_v48 = vmul.f32 %v8626_v9, %v8572_v8  ;;  %v5811_v16 = vmul.f32 %v8597_v52, %v8627_v34  ;;  %v1624_v39 = vmul.f32 %v8599_v54, %v8621_v51  ;;  %v877_v24 = vpop.xlane.xlu1 %876 }
 0x151   :  { %495 = vadd.xlane.f32.xlu2 %v439_v37  ;;  %v1232_v59 = vsub.f32 %v1228_v53, %v1230_v21  ;;  %v1590_v2 = vmul.f32 %v1588_v17, %v8600_v29  ;;  %v1628_v63 = vmul.f32 %v5667_v41, %v8627_v34  ;;  %v1593_v45 = vadd.f32 %v1591_v49, %v1587_v28  ;;  %v8631_v53 = vld [vmem:[#allocation45_spill] sm:$0xff] }
 0x152   :  { %v844_v61 = vmul.f32 %v842_v23, %v5579_v31  ;;  %v1586_v14 = vsub.f32 %v1578_v44, %v1584_v58  ;;  %v1626_v37 = vmul.f32 %v1624_v39, %v8600_v29  ;;  %v1632_v52 = vmul.f32 %v5811_v16, %v8599_v54  ;;  %v8633_v58 = vld [vmem:[#allocation71_spill] sm:$0xff]  ;;  %v8636_v39 = vld [vmem:[#allocation69_spill] sm:$0xff] }
 0x153   :  { %852 = vadd.xlane.f32.xlu0 %v798_v60  ;;  %v1236_v46 = vsub.f32 %v1232_v59, %v1234_v47  ;;  %v428_v32 = vmul.f32 %v8628_v15, %v8573_v42  ;;  %v5826_v60 = vadd.f32 %v879_v56, %v877_v24  ;;  %v1227_v62 = vmul.f32 %v8630_v30, %v5659_v33  ;;  %v8632_v47 = vld [vmem:[#allocation49_spill] sm:$0xff] }
 0x154   :  { %v426_v19 = vmul.f32 %v424_v48, %v8532_v57  ;;  %v1630_v35 = vsub.f32 %v1626_v37, %v1628_v63  ;;  %v1636_v17 = vmul.f32 %v5671_v6, %v8621_v51  ;;  %v1231_v21 = vmul.f32 %v8628_v15, %v8568_v22  ;;  %v8635_v48 = vld [vmem:[#allocation41_spill] sm:$0xff]  ;;  %v8637_v63 = vld [vmem:[#allocation42_spill] sm:$0xff] }
 0x155   :  { %v1240_v31 = vsub.f32 %v1236_v46, %v1238_v27  ;;  %8629 = vst [vmem:[#allocation21_spill] sm:$0xff] %v5826_v60  ;;  %v1229_v3 = vmul.f32 %v1227_v62, %v4642_v10  ;;  %v1235_v27 = vmul.f32 %v5689_v4, %v8630_v30  ;;  %v1595_v23 = vmul.f32 %v1593_v45, %v5677_v20 }
 0x156   :  { %v432_v0 = vmul.f32 %v8631_v53, %v8626_v9  ;;  %v1634_v57 = vsub.f32 %v1630_v35, %v1632_v52  ;;  %v1239_v28 = vmul.f32 %v8632_v47, %v5659_v33  ;;  %v1592_v49 = vadd.f32 %v1590_v2, %v1586_v14  ;;  %v8640_v35 = vld [vmem:[#allocation24_spill] sm:$0xff] }
 0x157   :  { %1252 = vadd.xlane.f32.xlu1 %v1197_v36  ;;  %v1233_v44 = vsub.f32 %v1229_v3, %v1231_v21  ;;  %v8634_v36 = vld [vmem:[#allocation43_spill] sm:$0xff]  ;;  %v1617_v10 = vmul.f32 %v5747_v55, %v4672_v1  ;;  %v430_v4 = vsub.f32 %v426_v19, %v428_v32  ;;  %v5851_v9 = vmul.f32 %v8577_v50, %v8627_v34 }
 0x158   :  { %v1571_v59 = vmul.f32 %v8634_v36, %v8633_v58  ;;  %v1638_v46 = vsub.f32 %v1634_v57, %v1636_v17  ;;  %v1242_v33 = vmul.f32 %v1240_v31, %v5645_v12  ;;  %v436_v45 = vmul.f32 %v8637_v63, %v8572_v8  ;;  %v8639_v31 = vld [vmem:[#allocation66_spill] sm:$0xff]  ;;  %v8645_v58 = vld [vmem:[#allocation75_spill] sm:$0xff]  ;;  %v8646_v36 = vld [vmem:[#allocation56_spill] sm:$0xff] }
 0x159   :  { %900 = vadd.xlane.f32.xlu2 %v844_v61  ;;  %v829_v61 = vmul.f32 %v8636_v39, %v8635_v48  ;;  %v1237_v2 = vsub.f32 %v1233_v44, %v1235_v27  ;;  %v1621_v37 = vsub.f32 %v1617_v10, %v5851_v9  ;;  %v1594_v52 = vmul.f32 %v1592_v49, %v5750_v13  ;;  %v8642_v27 = vld [vmem:[#allocation70_spill] sm:$0xff] }
 0x15a   :  { %v434_v56 = vsub.f32 %v430_v4, %v432_v0  ;;  %v833_v12 = vmul.f32 %v8628_v15, %v8583_v40  ;;  %v1570_v8 = vmul.f32 %v5729_v11, %v8639_v31  ;;  %v5869_v30 = vstv %s1730_s0  ;;  %v8644_v0 = vld [vmem:[#allocation60_spill] sm:$0xff] }
 0x15b   :  { %1250 = vadd.xlane.f32.xlu0 %v1196_v18  ;;  %v1241_v14 = vsub.f32 %v1237_v2, %v1239_v28  ;;  %v8638_v18 = vld [vmem:[#allocation79_spill] sm:$0xff]  ;;  %v831_v50 = vmul.f32 %v829_v61, %v4090_v5  ;;  %v1642_v19 = vmul.f32 %v8599_v54, %v8600_v29  ;;  %v5875_v17 = vadd.f32 %v5869_v30, %v8640_v35  ;;  %v8641_v5 = vld [vmem:[#allocation22_spill] sm:$0xff] }
 0x15c   :  { %v1573_v24 = vmul.f32 %v1571_v59, %v8638_v18  ;;  %v5879_v21 = vadd.f32 %v5869_v30, %v8641_v5  ;;  %v837_v11 = vmul.f32 %v8642_v27, %v8636_v39  ;;  %v1640_v54 = vmul.f32 %v1638_v46, %v5750_v13 }
 0x15d   :  { %v5865_v32 = vmul.f32 %v1241_v14, %v8625_v43  ;;  %v438_v43 = vsub.f32 %v434_v56, %v436_v45  ;;  %v835_v3 = vsub.f32 %v831_v50, %v833_v12  ;;  %v1643_v57 = vmul.f32 %v8644_v0, %v4672_v1 }
 0x15e   :  { %v1623_v62 = vmul.f32 %v1621_v37, %v1573_v24  ;;  %3575 = vlog2.f32 %v5875_v17  ;;  %v1572_v47 = vmul.f32 %v1570_v8, %v8612_v26  ;;  %v1644_v28 = vsub.f32 %v1642_v19, %v5671_v6  ;;  %v8647_v6 = vld [vmem:[#allocation23_spill] sm:$0xff] }
 0x15f   :  { %1650 = vadd.xlane.f32.xlu1 %v1595_v23  ;;  %v8643_v23 = vld [vmem:[#allocation25_spill] sm:$0xff]  ;;  %3577 = vrsqrt.f32 %v5879_v21  ;;  %v440_v49 = vmul.f32 %v438_v43, %v5533_v38  ;;  %v839_v44 = vsub.f32 %v835_v3, %v837_v11  ;;  %v841_v13 = vmul.f32 %v8645_v58, %v8635_v48  ;;  %v8649_v19 = vld [vmem:[#allocation31_spill] sm:$0xff] }
 0x160   :  { %v5885_v53 = vadd.f32 %v5869_v30, %v8643_v23  ;;  %v1645_v59 = vsub.f32 %v1643_v57, %v8646_v36  ;;  %v1646_v4 = vmul.f32 %v1644_v28, %v1572_v47  ;;  %v5901_v2 = vadd.f32 %v5869_v30, %v8647_v6  ;;  %v5924_v28 = vld [vmem:[#allocation11] sm:$0xff] }
 0x161   :  { %1298 = vadd.xlane.f32.xlu2 %v1242_v33  ;;  %v843_v61 = vsub.f32 %v839_v44, %v841_v13  ;;  %vm1839_vm8 = vweird.f32 %v5879_v21  ;;  %v1616_v8 = vmul.f32 %v8621_v51, %v8600_v29  ;;  %vm1782_vm3 = vweird.f32 %v5875_v17 }
 0x162   :  { %3579 = vlog2.f32 %v5885_v53  ;;  %v1647_v33 = vmul.f32 %v1645_v59, %v1573_v24  ;;  %vm1849_vm11 = vweird.f32 %v5901_v2  ;;  %v1637_v60 = vmul.f32 %v8646_v36, %v5747_v55 }
 0x163   :  { %1648 = vadd.xlane.f32.xlu0 %v1594_v52  ;;  %v845_v14 = vmul.f32 %v843_v61, %v8617_v25  ;;  %3581 = vrsqrt.f32 %v5901_v2 }
 0x164   :  { %v3576_v10 = vpop.eup %3575 }
 0x165   :  { %v3578_v39 = vpop.eup %3577  ;;  %v1737_v46 = vmul.f32 0.6931472, %v3576_v10 }
 0x166   :  { %v1834_v38 = vmul.f32 %v3578_v39, %v5879_v21  ;;  %vm1840_vm10 = vweird.f32 %v3578_v39 }
 0x167   :  { %1686 = vadd.xlane.f32.xlu1 %v1623_v62  ;;  %v1740_v63 = vmul.f32 -0.33333334, %v1737_v46  ;;  %vm1841_vm9 = vmor %vm1839_vm8, %vm1840_vm10  ;;  %v5912_v62 = vstv %s5822_s14  ;;  %v5948_v46 = vld [vmem:[#allocation11 + $0x8] sm:$0xff] }
 0x168   :  { %v3580_v26 = vpop.eup %3579  ;;  %v1835_v48 = vmul.f32 %v3578_v39, %v1834_v38  ;;  %8648 = vst [vmem:[#allocation36_spill] sm:$0xff] %v5912_v62  ;;  %v8651_v38 = vld [vmem:[#allocation35_spill] sm:$0xff] }
 0x169   :  { %1696 = vadd.xlane.f32.xlu2 %v1640_v54  ;;  %v1739_v45 = vmul.f32 0.6931472, %v3580_v26  ;;  %v1742_v18 = vmul.f32 1.442695, %v1740_v63  ;;  %v3582_v12 = vpop.eup %3581  ;;  %v1620_v54 = vsub.f32 %v1616_v8, %v5811_v16  ;;  %8650 = vst [vmem:[#allocation51_spill] sm:$0xff] %v5948_v46 }
 0x16a   :  { %v1836_v52 = vmul.f32 0.5, %v1835_v48  ;;  %v1844_v27 = vmul.f32 %v3582_v12, %v5901_v2  ;;  %vm1850_vm12 = vweird.f32 %v3582_v12 }
 0x16b   :  { %497 = vadd.xlane.f32.xlu0 %v440_v49  ;;  %v1741_v37 = vmul.f32 -0.33333334, %v1739_v45  ;;  %3583 = vpow2.f32 %v1742_v18  ;;  %v1622_v58 = vmul.f32 %v1620_v54, %v1572_v47  ;;  %vm1851_vm13 = vmor %vm1849_vm11, %vm1850_vm12 }
 0x16c   :  { %v1837_v24 = vsub.f32 1.5, %v1836_v52  ;;  %v1845_v49 = vmul.f32 %v3582_v12, %v1844_v27  ;;  %v1788_v27 = vand.u32 2147483648, %v5875_v17 }
 0x16d   :  { %v1744_v56 = vmul.f32 1.442695, %v1741_v37 }
 0x16e   :  { %v1838_v50 = vmul.f32 %v3578_v39, %v1837_v24  ;;  %v1846_v59 = vmul.f32 0.5, %v1845_v49 }
 0x16f   :  { %1708 = vadd.xlane.f32.xlu1 %v1646_v4  ;;  %3585 = vpow2.f32 %v1744_v56 }
 0x170   :  { %v5907_v31 = vsel %vm1841_vm9, %v3578_v39, %v1838_v50  ;;  %v1847_v47 = vsub.f32 1.5, %v1846_v59  ;;  %v6002_v59 = vpop.xlane.xlu2 %1276 }
 0x171   :  { %1710 = vadd.xlane.f32.xlu2 %v1647_v33  ;;  %v3584_v25 = vpop.eup %3583  ;;  %v1853_v3 = vmul.f32 %v5907_v31, %v5879_v21  ;;  %8655 = vst [vmem:[#allocation63_spill] sm:$0xff] %v6002_v59 }
 0x172   :  { %v5915_v43 = vmul.f32 %v3584_v25, %v8649_v19  ;;  %v1848_v45 = vmul.f32 %v3582_v12, %v1847_v47 }
 0x173   :  { %902 = vadd.xlane.f32.xlu0 %v845_v14 }
 0x174   :  { %v1749_v11 = vmul.f32 %v5912_v62, %v5915_v43  ;;  %v5968_v37 = vsel %vm1851_vm13, %v3582_v12, %v1848_v45  ;;  %v1859_v45 = vmul.f32 %v5915_v43, %v5869_v30 }
 0x175   :  { %v3586_v57 = vpop.eup %3585  ;;  %v1854_v25 = vmul.f32 %v5968_v37, %v5901_v2 }
 0x176   :  { %v5927_v29 = vadd.f32 %v5924_v28, %v1749_v11  ;;  %v1881_v51 = vmul.f32 %v1853_v3, %v1749_v11  ;;  %v5932_v13 = vmul.f32 %v3586_v57, %v8649_v19 }
 0x178   :  { %v1753_v44 = vmul.f32 %v5927_v29, %v5927_v29  ;;  %3587 = vrcp.f32 %v1881_v51  ;;  %v5938_v16 = vmul.f32 %v5927_v29, %v1749_v11  ;;  %v5942_v10 = vmul.f32 %v5912_v62, %v5932_v13 }
 0x179   :  { %3589 = vrcp.f32 %v5875_v17  ;;  %v1861_v11 = vmul.f32 2.0, %v5927_v29  ;;  %v5997_v51 = vmul.f32 %v5907_v31, %v5907_v31 }
 0x17a   :  { %v5952_v26 = vadd.f32 %v5948_v46, %v5942_v10 }
 0x17b   :  { %1300 = vadd.xlane.f32.xlu0 %v5865_v32  ;;  %v5935_v32 = vadd.f32 %v1753_v44, %v5879_v21  ;;  %v1882_v44 = vmul.f32 %v1854_v25, %v5942_v10  ;;  %v1857_v25 = vmul.f32 %v5997_v51, %v5907_v31  ;;  %v1625_v31 = vmul.f32 %v8644_v0, %v5747_v55 }
 0x17c   :  { %v1754_v14 = vmul.f32 %v5952_v26, %v5952_v26 }
 0x17d   :  { %v1883_v39 = vsub.f32 %v5935_v32, %v5938_v16  ;;  %v1761_v63 = vmul.f32 %v5935_v32, %v8651_v38  ;;  %vm1810_vm7 = vweird.f32 %v5935_v32 }
 0x17e   :  { %v3588_v4 = vpop.eup %3587  ;;  %v5973_v24 = vadd.f32 %v1754_v14, %v5901_v2 }
 0x17f   :  { %v5946_v61 = vmul.f32 %v3588_v4, %v1883_v39  ;;  %v1763_v18 = vadd.f32 1.0, %v1761_v63  ;;  %v5970_v52 = vpop.eup %3589  ;;  %v1786_v39 = vand.u32 2147483647, %v5875_v17  ;;  %v6005_v63 = vstv %s2128_s16 }
 0x180   :  { %v1778_v12 = vmul.f32 %v5970_v52, %v5875_v17  ;;  %v1762_v8 = vmul.f32 %v5973_v24, %v8651_v38  ;;  %vm1783_vm5 = vweird.f32 %v5970_v52 }
 0x181   :  { %v5957_v33 = vand.u32 2147483647, %v5946_v61  ;;  %vm6034_vm4 = vcmp.eq.f32.partialorder %v1786_v39, 8.507059e+37  ;;  %vm6071_vm6 = vmor %vm1782_vm3, %vm1783_vm5  ;;  %vm1941_vm11 = vcmp.lt.f32.partialorder %v5946_v61, 0.0  ;;  %vm1824_vm5 = vweird.f32 %v5973_v24 }
 0x182   :  { %v1779_v4 = vsub.f32 1.0, %v1778_v12  ;;  %v1764_v47 = vadd.f32 1.0, %v1762_v8  ;;  %v6029_v12 = vadd.f32 %v6005_v63, %v8640_v35 }
 0x183   :  { %1684 = vadd.xlane.f32.xlu0 %v1622_v58  ;;  %3591 = vrcp.f32 %v5957_v33  ;;  %v1901_v48 = vadd.f32 1.0, %v5957_v33  ;;  %vm1891_vm14 = vcmp.gt.f32.partialorder %v5957_v33, 2.4142137  ;;  %vm1893_vm15 = vcmp.gt.f32.partialorder %v5957_v33, 0.41421357  ;;  %v6000_v58 = vpop.xlane.xlu1 %1274 }
 0x184   :  { %vm1895_vm0 = vmxor %vm1891_vm14, %vm3908_vm2  ;;  %v3374_v50 = vadd.f32 -1.0, %v5957_v33  ;;  %8654 = vst [vmem:[#allocation26_spill] sm:$0xff] %v6000_v58 }
 0x185   :  { %3593 = vrcp.f32 %v1901_v48  ;;  %vm5991_vm1 = vmand %vm1893_vm15, %vm1895_vm0  ;;  %8656 = vst [vmem:[#allocation29_spill] sm:$0xff] %v6029_v12  ;;  %v1675_v59 = vpop.xlane.xlu2 %1674 }
 0x186   :  { %3595 = vlog2.f32 %v1763_v18  ;;  %v6013_v18 = vor.u32 1.1754944e-38, %v1788_v27 }
 0x187   :  { %3597 = vrcp.f32 %v5935_v32 }
 0x188   :  { %3599 = vrcp.f32 %v5885_v53 }
 0x189   :  { %v3592_v56 = vpop.eup %3591  ;;  %3601 = vrcp.f32 %v1882_v44  ;;  %v6048_v44 = vadd.f32 %v6005_v63, %v8641_v5 }
 0x18a   :  { %v1905_v57 = vsub.f32 0.0, %v3592_v56  ;;  %v1863_v56 = vmul.f32 %v1861_v11, %v5927_v29  ;;  %3603 = vlog2.f32 %v1764_v47  ;;  %v6042_v11 = vmul.f32 %v5952_v26, %v5942_v10 }
 0x18b   :  { %v3594_v3 = vpop.eup %3593  ;;  %v1627_v47 = vmul.f32 %v1625_v31, %v4672_v1  ;;  %v1629_v10 = vmul.f32 %v8628_v15, %v8627_v34  ;;  %3605 = vlog2.f32 %v6029_v12 }
 0x18c   :  { %v1909_v49 = vmul.f32 %v3594_v3, %v3374_v50  ;;  %v3596_v14 = vpop.eup %3595  ;;  %v1780_v3 = vmul.f32 %v5970_v52, %v1779_v4  ;;  %v1757_v4 = vmul.f32 %v5935_v32, %v5935_v32  ;;  %v1865_v39 = vsub.f32 %v5935_v32, %v1863_v56 }
 0x18d   :  { %v6031_v8 = vpop.eup %3597  ;;  %v1631_v35 = vsub.f32 %v1627_v47, %v1629_v10  ;;  %v1633_v56 = vmul.f32 %v5851_v9, %v8644_v0  ;;  %v1884_v1 = vsub.f32 %v5973_v24, %v6042_v11  ;;  %v1877_v9 = vmul.f32 %v5667_v41, %v5935_v32  ;;  %v1673_v10 = vpop.xlane.xlu1 %1672 }
 0x18e   :  { %v1911_v48 = vsel %vm5991_vm1, %v1909_v49, %v5957_v33  ;;  %v6060_v40 = vpop.eup %3599  ;;  %v1781_v42 = vadd.f32 %v5970_v52, %v1780_v3  ;;  %v1814_v3 = vand.u32 2147483647, %v5935_v32  ;;  %v1869_v17 = vadd.f32 %v5938_v16, %v1865_v39 }
 0x18f   :  { %v6018_v50 = vsel %vm1891_vm14, %v1905_v57, %v1911_v48  ;;  %v1766_v57 = vmul.f32 0.6931472, %v3596_v14  ;;  %v1806_v48 = vmul.f32 %v6031_v8, %v5935_v32  ;;  %v1816_v14 = vand.u32 2147483648, %v5935_v32  ;;  %v3602_v15 = vpop.eup %3601 }
 0x190   :  { %v6025_v43 = vmul.f32 %v6018_v50, %v6018_v50  ;;  %v3604_v47 = vpop.eup %3603  ;;  %v1635_v58 = vsub.f32 %v1631_v35, %v1633_v56  ;;  %v6090_v38 = vadd.f32 %v1675_v59, %v1673_v10  ;;  %v1792_v16 = vmul.f32 %v6060_v40, %v5885_v53 }
 0x191   :  { %v1769_v31 = vmul.f32 -2.8333333, %v1766_v57  ;;  %v8661_v57 = vld [vmem:[#allocation34_spill] sm:$0xff]  ;;  %v1807_v46 = vsub.f32 1.0, %v1806_v48  ;;  %v6088_v7 = vor.u32 1.1754944e-38, %v1816_v14  ;;  %v6097_v35 = vmul.f32 %v3602_v15, %v1884_v1  ;;  %v3606_v39 = vpop.eup %3605 }
 0x192   :  { %v1921_v49 = vmul.f32 0.080537446, %v6025_v43  ;;  %v6081_v34 = vmul.f32 %v1757_v4, %v8661_v57  ;;  %v1639_v4 = vsub.f32 %v1635_v58, %v1637_v60  ;;  %v6099_v36 = vmul.f32 %v1877_v9, %v1857_v25 }
 0x193   :  { %v1771_v55 = vmul.f32 1.442695, %v1769_v31  ;;  %v1768_v14 = vmul.f32 0.6931472, %v3604_v47  ;;  %v1871_v56 = vmul.f32 %v1869_v17, %v1859_v45  ;;  %vm6116_vm8 = vcmp.eq.f32.partialorder %v1814_v3, 8.507059e+37 }
 0x194   :  { %v3376_v22 = vadd.f32 -0.13877685, %v1921_v49  ;;  %v1641_v59 = vmul.f32 %v1639_v4, %v5677_v20  ;;  %3607 = vrcp.f32 %v5973_v24  ;;  %vm1811_vm10 = vweird.f32 %v6031_v8 }
 0x195   :  { %v1793_v20 = vsub.f32 1.0, %v1792_v16  ;;  %v1770_v27 = vmul.f32 -2.8333333, %v1768_v14  ;;  %v2135_v15 = vmul.f32 0.6931472, %v3606_v39  ;;  %v1951_v3 = vstv %s6086_s17  ;;  %vm6139_vm12 = vmor %vm1810_vm7, %vm1811_vm10 }
 0x196   :  { %v1925_v0 = vmul.f32 %v3376_v22, %v6025_v43  ;;  %v1785_v22 = vsel %vm6071_vm6, %v5970_v52, %v1781_v42  ;;  %v6108_v42 = vadd.f32 %v6005_v63, %v8647_v6  ;;  %v1808_v52 = vmul.f32 %v6031_v8, %v1807_v46  ;;  %1698 = vadd.xlane.f32.xlu0 %v1641_v59 }
 0x197   :  { %v6113_v60 = vsel %vm6034_vm4, %v6013_v18, %v1785_v22  ;;  %v8664_v18 = vmov 0.0   ;;  %v1862_v9 = vmul.f32 2.0, %v5952_v26  ;;  %v1773_v17 = vmul.f32 1.442695, %v1770_v27 }
 0x198   :  { %v1927_v12 = vadd.f32 0.19977711, %v1925_v0  ;;  %v6104_v0 = vand.u32 2147483647, %v6097_v35  ;;  %v1915_v46 = vsel %vm5991_vm1, 0.7853982, %v8664_v18  ;;  %v1873_v1 = vmul.f32 %v5997_v51, %v6113_v60 }
 0x199   :  { %v1809_v31 = vadd.f32 %v6031_v8, %v1808_v52  ;;  %v1917_v51 = vsel %vm1891_vm14, 1.5707964, %v1915_v46  ;;  %v1952_v39 = vmul.f32 %v5667_v41, %v1951_v3  ;;  %vm1796_vm14 = vweird.f32 %v5885_v53 }
 0x19a   :  { %v1929_v48 = vmul.f32 %v1927_v12, %v6025_v43  ;;  %3609 = vrcp.f32 %v6104_v0  ;;  %v1902_v25 = vadd.f32 1.0, %v6104_v0  ;;  %vm1892_vm9 = vcmp.gt.f32.partialorder %v6104_v0, 2.4142137  ;;  %v6148_v47 = vpop.eup %3607 }
 0x19b   :  { %3611 = vpow2.f32 %v1771_v55  ;;  %vm1894_vm13 = vcmp.gt.f32.partialorder %v6104_v0, 0.41421357  ;;  %vm6155_vm15 = vmxor %vm1892_vm9, %vm3908_vm2  ;;  %v3375_v33 = vadd.f32 -1.0, %v6104_v0  ;;  %v6160_v16 = vmul.f32 %v1873_v1, %v1871_v56 }
 0x19c   :  { %v3378_v45 = vadd.f32 -0.3333295, %v1929_v48  ;;  %3613 = vrcp.f32 %v1902_v25  ;;  %v2138_v55 = vmul.f32 -0.33333334, %v2135_v15  ;;  %v1813_v14 = vsel %vm6139_vm12, %v6031_v8, %v1809_v31  ;;  %vm6184_vm1 = vmand %vm1894_vm13, %vm6155_vm15 }
 0x19d   :  { %3615 = vrsqrt.f32 %v6048_v44  ;;  %vm1797_vm0 = vweird.f32 %v6060_v40  ;;  %v6176_v52 = vmul.f32 %v5667_v41, %v5927_v29  ;;  %v6194_v15 = vsel %vm6116_vm8, %v6088_v7, %v1813_v14 }
 0x19e   :  { %v1933_v12 = vmul.f32 %v3378_v45, %v6025_v43  ;;  %v1794_v43 = vmul.f32 %v6060_v40, %v1793_v20  ;;  %v1864_v20 = vmul.f32 %v1862_v9, %v5952_v26  ;;  %3617 = vpow2.f32 %v1773_v17  ;;  %vm6203_vm3 = vmor %vm1796_vm14, %vm1797_vm0 }
 0x19f   :  { %v1958_v31 = vmul.f32 %v1952_v39, %v6160_v16  ;;  %v1820_v58 = vmul.f32 %v6148_v47, %v5973_v24  ;;  %v1998_v17 = vmul.f32 2.0, %v6176_v52  ;;  %vm1825_vm6 = vweird.f32 %v6148_v47 }
 0x1a0   :  { %v1935_v49 = vmul.f32 %v1933_v12, %v6018_v50  ;;  %v3610_v4 = vpop.eup %3609  ;;  %v1795_v45 = vadd.f32 %v6060_v40, %v1794_v43  ;;  %v1802_v12 = vand.u32 2147483648, %v5885_v53  ;;  %v1866_v14 = vsub.f32 %v5973_v24, %v1864_v20  ;;  %vm6315_vm10 = vmor %vm1824_vm5, %vm1825_vm6 }
 0x1a1   :  { %v3612_v48 = vpop.eup %3611  ;;  %v1906_v25 = vsub.f32 0.0, %v3610_v4  ;;  %v6248_v20 = vmul.f32 %v5932_v13, %v5869_v30  ;;  %vm2237_vm7 = vweird.f32 %v6048_v44  ;;  %vm2247_vm13 = vweird.f32 %v6108_v42 }
 0x1a2   :  { %v1937_v10 = vadd.f32 %v1935_v49, %v6018_v50  ;;  %v6167_v50 = vmul.f32 %v5968_v37, %v5968_v37  ;;  %v3614_v56 = vpop.eup %3613  ;;  %v1758_v49 = vmul.f32 %v5973_v24, %v5973_v24  ;;  %v1775_v43 = vmul.f32 %v3612_v48, %v6081_v34 }
 0x1a3   :  { %v1910_v27 = vmul.f32 %v3614_v56, %v3375_v33  ;;  %v6189_v1 = vpop.eup %3615  ;;  %v1803_v61 = vor.u32 1.1754944e-38, %v1802_v12  ;;  %v6235_v56 = vld [vmem:[#allocation13] sm:$0xff] }
 0x1a4   :  { %v1939_v59 = vadd.f32 %v1937_v10, %v1917_v51  ;;  %v1800_v51 = vand.u32 2147483647, %v5885_v53  ;;  %v6219_v22 = vmul.f32 %v6167_v50, %v5968_v37  ;;  %v1799_v53 = vsel %vm6203_vm3, %v6060_v40, %v1795_v45 }
 0x1a5   :  { %v1912_v9 = vsel %vm6184_vm1, %v1910_v27, %v6104_v0  ;;  %v2232_v4 = vmul.f32 %v6189_v1, %v6048_v44  ;;  %v1760_v37 = vmul.f32 %v1758_v49, %v8661_v57  ;;  %v1964_v40 = vmul.f32 %v6194_v15, %v6194_v15 }
 0x1a6   :  { %v1943_v46 = vsub.f32 0.0, %v1939_v59  ;;  %v6223_v34 = vsel %vm1892_vm9, %v1906_v25, %v1912_v9  ;;  %vm1801_vm4 = vcmp.eq.f32.partialorder %v1800_v51, 8.507059e+37  ;;  %v6238_v25 = vmul.f32 %v6235_v56, %v1775_v43 }
 0x1a7   :  { %v1920_v33 = vmul.f32 %v6223_v34, %v6223_v34  ;;  %v1821_v45 = vsub.f32 1.0, %v1820_v58  ;;  %v2140_v27 = vmul.f32 1.442695, %v2138_v55  ;;  %v6250_v49 = vsel %vm1801_vm4, %v1803_v61, %v1799_v53 }
 0x1a8   :  { %v1945_v7 = vsel %vm1941_vm11, %v1943_v46, %v1939_v59  ;;  %v3618_v59 = vpop.eup %3617  ;;  %v2233_v43 = vmul.f32 %v6189_v1, %v2232_v4  ;;  %v1870_v9 = vadd.f32 %v6042_v11, %v1866_v14  ;;  %vm2238_vm8 = vweird.f32 %v6189_v1 }
 0x1a9   :  { %v1947_v10 = vsub.f32 1.5707964, %v1945_v7  ;;  %v1922_v46 = vmul.f32 0.080537446, %v1920_v33  ;;  %v1776_v58 = vmul.f32 %v3618_v59, %v1760_v37  ;;  %v1822_v13 = vmul.f32 %v6148_v47, %v1821_v45  ;;  %v6274_v59 = vld [vmem:[#allocation13 + $0x8] sm:$0xff] }
 0x1aa   :  { %3619 = vpow2.f32 %v2140_v27  ;;  %v2234_v37 = vmul.f32 0.5, %v2233_v43  ;;  %v1973_v45 = vmul.f32 %v6250_v49, %v6250_v49  ;;  %v1976_v27 = vsub.f32 %v5935_v32, %v5869_v30 }
 0x1ab   :  { %v1949_v48 = vmul.f32 %v1947_v10, %v6099_v36  ;;  %v1994_v36 = vsub.f32 %v5935_v32, %v8641_v5  ;;  %v3377_v54 = vadd.f32 -0.13877685, %v1922_v46  ;;  %v6259_v10 = vmul.f32 %v1964_v40, %v6238_v25 }
 0x1ac   :  { %v6279_v40 = vstv %s1978_s18  ;;  %v1916_v46 = vsel %vm6184_vm1, 0.7853982, %v8664_v18  ;;  %vm1942_vm11 = vcmp.lt.f32.partialorder %v6097_v35, 0.0 }
 0x1ad   :  { %v6242_v12 = vadd.f32 %v1958_v31, %v1949_v48  ;;  %v1954_v51 = vmul.f32 %v1952_v39, %v1949_v48  ;;  %v1926_v55 = vmul.f32 %v3377_v54, %v1920_v33 }
 0x1af   :  { %v2000_v7 = vmul.f32 %v1998_v17, %v6242_v12  ;;  %v2004_v31 = vmul.f32 %v6242_v12, %v6242_v12  ;;  %v6263_v53 = vsub.f32 %v6160_v16, %v1954_v51  ;;  %v6268_v17 = vadd.f32 %v6005_v63, %v8643_v23 }
 0x1b0   :  { %v1928_v4 = vadd.f32 0.19977711, %v1926_v55  ;;  %v6277_v16 = vmul.f32 %v6274_v59, %v1776_v58  ;;  %v2235_v55 = vsub.f32 1.5, %v2234_v37 }
 0x1b1   :  { %v2002_v39 = vsub.f32 %v1994_v36, %v2000_v7  ;;  %v2006_v61 = vmul.f32 %v2004_v31, %v5879_v21  ;;  %v1979_v11 = vmul.f32 %v6263_v53, %v5927_v29  ;;  %v2022_v48 = vmul.f32 %v6242_v12, %v6263_v53 }
 0x1b2   :  { %v1930_v36 = vmul.f32 %v1928_v4, %v1920_v33  ;;  %v1986_v43 = vmul.f32 %v6263_v53, %v6263_v53  ;;  %v6294_v7 = vmul.f32 %v5927_v29, %v5912_v62  ;;  %3621 = vlog2.f32 %v6268_v17 }
 0x1b3   :  { %v2008_v14 = vadd.f32 %v2006_v61, %v2002_v39  ;;  %v1982_v54 = vmul.f32 %v6279_v40, %v1979_v11  ;;  %v2024_v58 = vmul.f32 %v2022_v48, %v5879_v21  ;;  %v3620_v39 = vpop.eup %3619  ;;  %v1975_v32 = vmul.f32 %v1973_v45, %v6277_v16 }
 0x1b4   :  { %v3379_v31 = vadd.f32 -0.3333295, %v1930_v36  ;;  %v1988_v61 = vmul.f32 %v1986_v43, %v5879_v21  ;;  %v2026_v4 = vmul.f32 %v5667_v41, %v5912_v62  ;;  %v2030_v29 = vmul.f32 %v6294_v7, %v6242_v12 }
 0x1b5   :  { %v2010_v51 = vmul.f32 %v2008_v14, %v6259_v10  ;;  %v1984_v8 = vsub.f32 %v1976_v27, %v1982_v54  ;;  %v2034_v14 = vmul.f32 %v6176_v52, %v6263_v53  ;;  %v1823_v45 = vadd.f32 %v6148_v47, %v1822_v13 }
 0x1b6   :  { %v1934_v11 = vmul.f32 %v3379_v31, %v1920_v33  ;;  %v2028_v37 = vsub.f32 %v2024_v58, %v2026_v4  ;;  %v1830_v41 = vand.u32 2147483648, %v5973_v24  ;;  %v1918_v36 = vsel %vm1892_vm9, 1.5707964, %v1916_v46  ;;  %v6323_v58 = vld [vmem:[#allocation10 + $0x8] sm:$0xff]  ;;  %vm2239_vm9 = vmor %vm2237_vm7, %vm2238_vm8 }
 0x1b7   :  { %2058 = vadd.xlane.f32.xlu2 %v2010_v51  ;;  %v1990_v48 = vadd.f32 %v1988_v61, %v1984_v8  ;;  %v2013_v51 = vmul.f32 %v1975_v32, %v5901_v2  ;;  %v2236_v13 = vmul.f32 %v6189_v1, %v2235_v55  ;;  %v1828_v8 = vand.u32 2147483647, %v5973_v24 }
 0x1b8   :  { %v1936_v27 = vmul.f32 %v1934_v11, %v6223_v34  ;;  %v3622_v54 = vpop.eup %3621  ;;  %v2032_v31 = vsub.f32 %v2028_v37, %v2030_v29  ;;  %v1878_v0 = vmul.f32 %v6323_v58, %v5973_v24  ;;  %v6329_v61 = vmul.f32 %v3620_v39, %v8649_v19 }
 0x1b9   :  { %v1992_v43 = vmul.f32 %v1990_v48, %v6259_v10  ;;  %v1872_v32 = vmul.f32 %v1870_v9, %v6248_v20  ;;  %v1874_v55 = vmul.f32 %v6167_v50, %v6250_v49  ;;  %v6339_v29 = vstv %s5961_s15 }
 0x1ba   :  { %v1938_v46 = vadd.f32 %v1936_v27, %v6223_v34  ;;  %v2036_v4 = vsub.f32 %v2032_v31, %v2034_v14  ;;  %8675 = vst [vmem:[#allocation40_spill] sm:$0xff] %v6339_v29  ;;  %v1827_v34 = vsel %vm6315_vm10, %v6148_v47, %v1823_v45  ;;  %v1831_v11 = vor.u32 1.1754944e-38, %v1830_v41 }
 0x1bb   :  { %2046 = vadd.xlane.f32.xlu0 %v1992_v43  ;;  %v6346_v48 = vsel %vm2239_vm9, %v6189_v1, %v2236_v13  ;;  %3623 = vrsqrt.f32 %v6108_v42  ;;  %vm1829_vm12 = vcmp.eq.f32.partialorder %v1828_v8, 8.507059e+37  ;;  %v2147_v20 = vmul.f32 %v6339_v29, %v6329_v61 }
 0x1bc   :  { %v1940_v39 = vadd.f32 %v1938_v46, %v1918_v36  ;;  %v2137_v9 = vmul.f32 0.6931472, %v3622_v54  ;;  %v1876_v37 = vmul.f32 %v1874_v55, %v1872_v32  ;;  %v1880_v14 = vmul.f32 %v1878_v0, %v6219_v22 }
 0x1bd   :  { %v1953_v47 = vmul.f32 %v6323_v58, %v1951_v3  ;;  %v6357_v35 = vmul.f32 %v6323_v58, %v5952_v26  ;;  %v2251_v45 = vmul.f32 %v6346_v48, %v6048_v44  ;;  %v1832_v41 = vsel %vm1829_vm12, %v1831_v11, %v1827_v34 }
 0x1be   :  { %v1944_v50 = vsub.f32 0.0, %v1940_v39  ;;  %v2038_v27 = vmul.f32 %v2036_v4, %v6259_v10  ;;  %v6363_v54 = vadd.f32 %v5924_v28, %v2147_v20  ;;  %v2139_v22 = vmul.f32 -0.33333334, %v2137_v9 }
 0x1bf   :  { %2072 = vadd.xlane.f32.xlu2 %v2013_v51  ;;  %v1959_v33 = vmul.f32 %v1953_v47, %v1876_v37  ;;  %v1999_v43 = vmul.f32 2.0, %v6357_v35  ;;  %v1968_v31 = vmul.f32 %v6194_v15, %v6113_v60  ;;  %v2014_v13 = vmul.f32 %v6263_v53, %v5879_v21 }
 0x1c0   :  { %v1946_v1 = vsel %vm1942_vm11, %v1944_v50, %v1940_v39  ;;  %v1965_v8 = vmul.f32 %v1832_v41, %v1832_v41  ;;  %v1977_v10 = vsub.f32 %v5973_v24, %v5869_v30  ;;  %v1969_v0 = vmul.f32 %v1832_v41, %v6250_v49 }
 0x1c1   :  { %v1948_v36 = vsub.f32 1.5707964, %v1946_v1  ;;  %v6365_v51 = vpop.eup %3623  ;;  %v2279_v28 = vmul.f32 %v2251_v45, %v2147_v20  ;;  %v1995_v55 = vsub.f32 %v5973_v24, %v8647_v6  ;;  %v6380_v4 = vmul.f32 %v1968_v31, %v6238_v25 }
 0x1c2   :  { %v2018_v15 = vsub.f32 %v2014_v13, %v6294_v7  ;;  %v2151_v53 = vmul.f32 %v6363_v54, %v6363_v54  ;;  %v2142_v34 = vmul.f32 1.442695, %v2139_v22  ;;  %v2242_v30 = vmul.f32 %v6365_v51, %v6108_v42 }
 0x1c3   :  { %v1950_v3 = vmul.f32 %v1948_v36, %v1880_v14  ;;  %v6395_v50 = vmul.f32 %v1965_v8, %v6277_v16  ;;  %v6398_v7 = vmul.f32 %v1969_v0, %v6277_v16  ;;  %3625 = vrcp.f32 %v2279_v28 }
 0x1c4   :  { %v2020_v9 = vmul.f32 %v2018_v15, %v6380_v4  ;;  %v6408_v41 = vmul.f32 %v6363_v54, %v2147_v20  ;;  %3627 = vpow2.f32 %v2142_v34  ;;  %v2243_v16 = vmul.f32 %v6365_v51, %v2242_v30  ;;  %v8677_v30 = vld [vmem:[#allocation29_spill] sm:$0xff] }
 0x1c5   :  { %v1955_v46 = vmul.f32 %v1953_v47, %v1950_v3  ;;  %v6375_v32 = vadd.f32 %v1959_v33, %v1950_v3  ;;  %v6414_v22 = vadd.f32 %v2151_v53, %v6048_v44  ;;  %v1972_v20 = vmul.f32 %v6113_v60, %v6113_v60  ;;  %v8676_v60 = vld [vmem:[#allocation35_spill] sm:$0xff] }
 0x1c6   :  { %v2244_v0 = vmul.f32 0.5, %v2243_v16  ;;  %3629 = vrcp.f32 %v8677_v30  ;;  %vm2248_vm14 = vweird.f32 %v6365_v51  ;;  %vm2180_vm5 = vweird.f32 %v8677_v30 }
 0x1c7   :  { %2094 = vadd.xlane.f32.xlu2 %v2038_v27  ;;  %v6387_v49 = vsub.f32 %v1876_v37, %v1955_v46  ;;  %v2001_v39 = vmul.f32 %v1999_v43, %v6375_v32  ;;  %v2005_v11 = vmul.f32 %v6375_v32, %v6375_v32  ;;  %v2041_v24 = vmul.f32 %v6375_v32, %v5901_v2  ;;  %vm2249_vm0 = vmor %vm2247_vm13, %vm2248_vm14 }
 0x1c8   :  { %v2245_v53 = vsub.f32 1.5, %v2244_v0  ;;  %v2159_v34 = vmul.f32 %v6414_v22, %v8676_v60  ;;  %vm2208_vm10 = vweird.f32 %v6414_v22 }
 0x1c9   :  { %v1980_v37 = vmul.f32 %v6387_v49, %v5952_v26  ;;  %v1987_v14 = vmul.f32 %v6387_v49, %v6387_v49  ;;  %v2003_v47 = vsub.f32 %v1995_v55, %v2001_v39  ;;  %v2007_v1 = vmul.f32 %v2005_v11, %v5901_v2  ;;  %v3626_v13 = vpop.eup %3625 }
 0x1ca   :  { %v2043_v45 = vsub.f32 %v2041_v24, %v6357_v35  ;;  %v3628_v28 = vpop.eup %3627  ;;  %v1974_v55 = vmul.f32 %v1972_v20, %v6238_v25  ;;  %v2015_v24 = vmul.f32 %v6387_v49, %v5901_v2  ;;  %v2161_v16 = vadd.f32 1.0, %v2159_v34 }
 0x1cb   :  { %v1983_v36 = vmul.f32 %v6279_v40, %v1980_v37  ;;  %v1989_v27 = vmul.f32 %v1987_v14, %v5901_v2  ;;  %v2009_v33 = vadd.f32 %v2007_v1, %v2003_v47  ;;  %v2281_v40 = vsub.f32 %v6414_v22, %v6408_v41  ;;  %v8678_v1 = vld [vmem:[#allocation78_spill] sm:$0xff] }
 0x1cc   :  { %v2045_v3 = vmul.f32 %v2043_v45, %v6398_v7  ;;  %v6427_v15 = vmul.f32 %v3628_v28, %v8649_v19  ;;  %v2012_v25 = vmul.f32 %v1974_v55, %v5879_v21  ;;  %v6444_v37 = vmul.f32 %v5952_v26, %v5912_v62  ;;  %v6457_v26 = vpop.eup %3629 }
 0x1cd   :  { %v1985_v43 = vsub.f32 %v1977_v10, %v1983_v36  ;;  %v2011_v31 = vmul.f32 %v2009_v33, %v6395_v50  ;;  %v6424_v10 = vmul.f32 %v3626_v13, %v2281_v40  ;;  %v2246_v47 = vmul.f32 %v6365_v51, %v2245_v53  ;;  %v8679_v36 = vld [vmem:[#allocation51_spill] sm:$0xff] }
 0x1ce   :  { %v6437_v11 = vmul.f32 %v6339_v29, %v6427_v15  ;;  %v476_v45 = vrot.slane %v8678_v1, 4  ;;  %v2176_v20 = vmul.f32 %v6457_v26, %v8677_v30  ;;  %vm2181_vm6 = vweird.f32 %v6457_v26 }
 0x1cf   :  { %2108 = vadd.xlane.f32.xlu2 %v2045_v3  ;;  %v1991_v8 = vadd.f32 %v1989_v27, %v1985_v43  ;;  %2060 = vadd.xlane.f32.xlu0 %v2011_v31  ;;  %v6433_v39 = vand.u32 2147483647, %v6424_v10  ;;  %v6463_v3 = vsel %vm2249_vm0, %v6365_v51, %v2246_v47  ;;  %v2040_v51 = vmul.f32 %v6242_v12, %v5879_v21  ;;  %vm6536_vm7 = vmor %vm2180_vm5, %vm2181_vm6 }
 0x1d0   :  { %v6454_v27 = vadd.f32 %v8679_v36, %v6437_v11  ;;  %v477_v43 = vadd.f32 %v476_v45, %v8678_v1  ;;  %v2252_v40 = vmul.f32 %v6463_v3, %v6108_v42  ;;  %v2259_v47 = vmul.f32 2.0, %v6363_v54  ;;  %v8682_v36 = vld [vmem:[#allocation21_spill] sm:$0xff] }
 0x1d1   :  { %v1993_v46 = vmul.f32 %v1991_v8, %v6395_v50  ;;  %3631 = vrcp.f32 %v6433_v39  ;;  %v2299_v14 = vadd.f32 1.0, %v6433_v39  ;;  %vm2289_vm15 = vcmp.gt.f32.partialorder %v6433_v39, 2.4142137 }
 0x1d2   :  { %v2152_v33 = vmul.f32 %v6454_v27, %v6454_v27  ;;  %vm2291_vm1 = vcmp.gt.f32.partialorder %v6433_v39, 0.41421357  ;;  %vm2293_vm3 = vmxor %vm2289_vm15, %vm3908_vm2  ;;  %v3382_v31 = vadd.f32 -1.0, %v6433_v39  ;;  %v478_v34 = vrot.slane %v477_v43, 2 }
 0x1d3   :  { %2048 = vadd.xlane.f32.xlu1 %v1993_v46  ;;  %3633 = vrcp.f32 %v2299_v14  ;;  %vm6481_vm4 = vmand %vm2291_vm1, %vm2293_vm3  ;;  %v2042_v21 = vsub.f32 %v2040_v51, %v6176_v52  ;;  %v881_v52 = vrot.slane %v8682_v36, 4  ;;  %vm2339_vm13 = vcmp.lt.f32.partialorder %v6424_v10, 0.0 }
 0x1d4   :  { %3635 = vlog2.f32 %v2161_v16  ;;  %v6474_v8 = vadd.f32 %v2152_v33, %v6108_v42  ;;  %v479_v16 = vadd.f32 %v478_v34, %v477_v43  ;;  %vm2194_vm1 = vweird.f32 %v6268_v17 }
 0x1d5   :  { %3637 = vrcp.f32 %v6414_v22  ;;  %v2044_v43 = vmul.f32 %v2042_v21, %v6380_v4 }
 0x1d6   :  { %v2160_v53 = vmul.f32 %v6474_v8, %v8676_v60 }
 0x1d7   :  { %2082 = vadd.xlane.f32.xlu0 %v2020_v9  ;;  %v2019_v9 = vsub.f32 %v2015_v24, %v6444_v37  ;;  %v3632_v13 = vpop.eup %3631  ;;  %v2177_v24 = vsub.f32 1.0, %v2176_v20 }
 0x1d8   :  { %v2303_v55 = vsub.f32 0.0, %v3632_v13  ;;  %v2162_v45 = vadd.f32 1.0, %v2160_v53  ;;  %v2023_v13 = vmul.f32 %v6375_v32, %v6387_v49  ;;  %v2186_v53 = vand.u32 2147483648, %v8677_v30 }
 0x1d9   :  { %v3634_v0 = vpop.eup %3633  ;;  %v2021_v28 = vmul.f32 %v2019_v9, %v6398_v7  ;;  %v2280_v7 = vmul.f32 %v2252_v40, %v6437_v11  ;;  %v2178_v33 = vmul.f32 %v6457_v26, %v2177_v24 }
 0x1da   :  { %v3636_v14 = vpop.eup %3635 }
 0x1db   :  { %2070 = vadd.xlane.f32.xlu1 %v2012_v25  ;;  %v2307_v25 = vmul.f32 %v3634_v0, %v3382_v31  ;;  %v2184_v31 = vand.u32 2147483647, %v8677_v30  ;;  %v6511_v20 = vpop.eup %3637  ;;  %v2164_v51 = vmul.f32 0.6931472, %v3636_v14  ;;  %3639 = vrcp.f32 %v2280_v7 }
 0x1dc   :  { %v2261_v0 = vmul.f32 %v2259_v47, %v6363_v54  ;;  %3641 = vlog2.f32 %v2162_v45  ;;  %v2179_v4 = vadd.f32 %v6457_v26, %v2178_v33  ;;  %v2204_v24 = vmul.f32 %v6511_v20, %v6414_v22 }
 0x1dd   :  { %v2309_v12 = vsel %vm6481_vm4, %v2307_v25, %v6433_v39  ;;  %v6522_v25 = vmul.f32 %v6454_v27, %v6437_v11  ;;  %v6530_v7 = vadd.f32 %v881_v52, %v8682_v36  ;;  %v2167_v14 = vmul.f32 -2.8333333, %v2164_v51 }
 0x1de   :  { %v6498_v1 = vsel %vm2289_vm15, %v2303_v55, %v2309_v12  ;;  %v2027_v55 = vmul.f32 %v6323_v58, %v5912_v62  ;;  %v480_v12 = vrot.slane %v479_v16, 1  ;;  %vm6543_vm8 = vcmp.eq.f32.partialorder %v2184_v31, 8.507059e+37 }
 0x1df   :  { %v6504_v9 = vmul.f32 %v6498_v1, %v6498_v1  ;;  %v2035_v36 = vmul.f32 %v6357_v35, %v6387_v49  ;;  %v2155_v52 = vmul.f32 %v6414_v22, %v6414_v22  ;;  %v2187_v33 = vor.u32 1.1754944e-38, %v2186_v53 }
 0x1e0   :  { %v2282_v51 = vsub.f32 %v6474_v8, %v6522_v25  ;;  %v2183_v31 = vsel %vm6536_vm7, %v6457_v26, %v2179_v4  ;;  %3643 = vrcp.f32 %v6268_v17  ;;  %v6560_v35 = vadd.f32 %v480_v12, %v479_v16  ;;  %v8688_v12 = vld [vmem:[#allocation26_spill] sm:$0xff] }
 0x1e1   :  { %v2319_v40 = vmul.f32 0.080537446, %v6504_v9  ;;  %v3640_v30 = vpop.eup %3639  ;;  %v2169_v49 = vmul.f32 1.442695, %v2167_v14  ;;  %v2253_v53 = vmul.f32 %v6346_v48, %v6346_v48  ;;  %v6573_v4 = vsel %vm6543_vm8, %v2187_v33, %v2183_v31  ;;  %v8689_v14 = vld [vmem:[#allocation63_spill] sm:$0xff] }
 0x1e2   :  { %8687 = vst [vmem:[#allocation62_spill] sm:$0xff] %v6573_v4  ;;  %v6579_v11 = vadd.f32 %v8689_v14, %v8688_v12  ;;  %vm2209_vm9 = vweird.f32 %v6511_v20  ;;  %v2212_v33 = vand.u32 2147483647, %v6414_v22  ;;  %v8327_v31 = vstv %s6554_s20 }
 0x1e3   :  { %2084 = vadd.xlane.f32.xlu1 %v2021_v28  ;;  %v2025_v28 = vmul.f32 %v2023_v13, %v5901_v2  ;;  %v3384_v34 = vadd.f32 -0.13877685, %v2319_v40  ;;  %v2031_v2 = vmul.f32 %v6444_v37, %v6375_v32  ;;  %v2263_v37 = vsub.f32 %v6414_v22, %v2261_v0  ;;  %vm6607_vm11 = vmor %vm2208_vm10, %vm2209_vm9 }
 0x1e4   :  { %v2205_v40 = vsub.f32 1.0, %v2204_v24  ;;  %3645 = vpow2.f32 %v2169_v49  ;;  %v2214_v32 = vand.u32 2147483648, %v6414_v22  ;;  %v2255_v49 = vmul.f32 %v2253_v53, %v6346_v48 }
 0x1e5   :  { %v2029_v21 = vsub.f32 %v2025_v28, %v2027_v55  ;;  %v2323_v47 = vmul.f32 %v3384_v34, %v6504_v9  ;;  %v6563_v55 = vstv %s2526_s1  ;;  %v2257_v34 = vmul.f32 %v6329_v61, %v6005_v63 }
 0x1e6   :  { %v2206_v61 = vmul.f32 %v6511_v20, %v2205_v40  ;;  %v6624_v12 = vadd.f32 %v6563_v55, %v8641_v5  ;;  %vm2213_vm12 = vcmp.eq.f32.partialorder %v2212_v33, 8.507059e+37  ;;  %v2200_v62 = vand.u32 2147483648, %v6268_v17 }
 0x1e7   :  { %v2033_v45 = vsub.f32 %v2029_v21, %v2031_v2  ;;  %v2325_v13 = vadd.f32 0.19977711, %v2323_v47  ;;  %v2267_v21 = vadd.f32 %v6408_v41, %v2263_v37  ;;  %v6575_v2 = vmul.f32 %v3640_v30, %v2282_v51  ;;  %v8690_v41 = vld [vmem:[#allocation24_spill] sm:$0xff] }
 0x1e8   :  { %v2157_v47 = vmul.f32 %v2155_v52, %v8661_v57  ;;  %v2313_v37 = vsel %vm6481_vm4, 0.7853982, %v8664_v18  ;;  %v2271_v52 = vmul.f32 %v2253_v53, %v6573_v4  ;;  %v2207_v46 = vadd.f32 %v6511_v20, %v2206_v61  ;;  %8695 = vst [vmem:[#allocation28_spill] sm:$0xff] %v6624_v12 }
 0x1e9   :  { %v2037_v0 = vsub.f32 %v2033_v45, %v2035_v36  ;;  %v2327_v28 = vmul.f32 %v2325_v13, %v6504_v9  ;;  %v2269_v30 = vmul.f32 %v2267_v21, %v2257_v34  ;;  %v508_v21 = vpop.xlane.xlu1 %507  ;;  %vm2635_vm7 = vweird.f32 %v6624_v12 }
 0x1ea   :  { %vm2222_vm10 = vweird.f32 %v6474_v8 }
 0x1eb   :  { %2106 = vadd.xlane.f32.xlu1 %v2044_v43  ;;  %v3642_v43 = vpop.eup %3641  ;;  %v2039_v26 = vmul.f32 %v2037_v0, %v6395_v50  ;;  %v3386_v16 = vadd.f32 -0.3333295, %v2327_v28  ;;  %v6585_v50 = vadd.f32 %v6563_v55, %v8690_v41  ;;  %v2215_v0 = vor.u32 1.1754944e-38, %v2214_v32 }
 0x1ec   :  { %v2166_v24 = vmul.f32 0.6931472, %v3642_v43  ;;  %v6592_v36 = vpop.eup %3643  ;;  %v6600_v43 = vand.u32 2147483647, %v6575_v2  ;;  %v6615_v39 = vmul.f32 %v2271_v52, %v2269_v30  ;;  %v1279_v32 = vrot.slane %v6579_v11, 4 }
 0x1ed   :  { %2096 = vadd.xlane.f32.xlu0 %v2039_v26  ;;  %8691 = vst [vmem:[#allocation72_spill] sm:$0xff] %v6585_v50  ;;  %v2331_v45 = vmul.f32 %v3386_v16, %v6504_v9  ;;  %v2315_v9 = vsel %vm2289_vm15, 1.5707964, %v2313_v37  ;;  %3647 = vlog2.f32 %v6585_v50  ;;  %v2190_v34 = vmul.f32 %v6592_v36, %v6268_v17  ;;  %v510_v26 = vpop.xlane.xlu2 %509  ;;  %v6617_v16 = vld [vmem:[#allocation10] sm:$0xff]  ;;  %v3646_v48 = vpop.eup %3645 }
 0x1ee   :  { %v2168_v51 = vmul.f32 -2.8333333, %v2166_v24  ;;  %8694 = vst [vmem:[#allocation58_spill] sm:$0xff] %v6617_v16  ;;  %v2275_v24 = vmul.f32 %v6617_v16, %v6414_v22  ;;  %3649 = vrcp.f32 %v6600_v43  ;;  %v6629_v53 = vmul.f32 %v6617_v16, %v8327_v31 }
 0x1ef   :  { %v2333_v13 = vmul.f32 %v2331_v45, %v6498_v1  ;;  %v2300_v61 = vadd.f32 1.0, %v6600_v43  ;;  %v2211_v37 = vsel %vm6607_vm11, %v6511_v20, %v2207_v46  ;;  %v2191_v30 = vsub.f32 1.0, %v2190_v34  ;;  %v6647_v46 = vpop.xlane.xlu0 %483 }
 0x1f0   :  { %v2171_v14 = vmul.f32 1.442695, %v2168_v51  ;;  %vm2290_vm15 = vcmp.gt.f32.partialorder %v6600_v43, 2.4142137  ;;  %v6640_v51 = vmul.f32 %v6617_v16, %v6363_v54  ;;  %v2356_v10 = vmul.f32 %v6629_v53, %v6615_v39  ;;  %8697 = vst [vmem:[#allocation37_spill] sm:$0xff] %v6647_v46 }
 0x1f1   :  { %v2335_v28 = vadd.f32 %v2333_v13, %v6498_v1  ;;  %3651 = vrcp.f32 %v2300_v61  ;;  %v2173_v13 = vmul.f32 %v3646_v48, %v2157_v47  ;;  %v2156_v47 = vmul.f32 %v6474_v8, %v6474_v8  ;;  %vm2294_vm0 = vmxor %vm2290_vm15, %vm3908_vm2 }
 0x1f2   :  { %3653 = vrsqrt.f32 %v6624_v12  ;;  %vm2292_vm14 = vcmp.gt.f32.partialorder %v6600_v43, 0.41421357  ;;  %v1280_v34 = vadd.f32 %v1279_v32, %v6579_v11  ;;  %v2392_v31 = vsub.f32 %v6414_v22, %v8641_v5 }
 0x1f3   :  { %v2337_v1 = vadd.f32 %v2335_v28, %v2315_v9  ;;  %v3648_v52 = vpop.eup %3647  ;;  %v2277_v9 = vmul.f32 %v2275_v24, %v2255_v49  ;;  %v6643_v28 = vsel %vm2213_vm12, %v2215_v0, %v2211_v37  ;;  %3655 = vpow2.f32 %v2171_v14  ;;  %vm6670_vm3 = vmand %vm2292_vm14, %vm2294_vm0 }
 0x1f4   :  { %8696 = vst [vmem:[#allocation57_spill] sm:$0xff] %v6643_v28  ;;  %v3650_v33 = vpop.eup %3649  ;;  %v3383_v0 = vadd.f32 -1.0, %v6600_v43  ;;  %v883_v49 = vrot.slane %v6530_v7, 2  ;;  %v2192_v24 = vmul.f32 %v6592_v36, %v2191_v30  ;;  %v2533_v48 = vmul.f32 0.6931472, %v3648_v52 }
 0x1f5   :  { %v2341_v45 = vsub.f32 0.0, %v2337_v1  ;;  %v6660_v61 = vmul.f32 %v6235_v56, %v2173_v13  ;;  %v2396_v37 = vmul.f32 2.0, %v6640_v51  ;;  %v915_v32 = vpop.xlane.xlu2 %914  ;;  %v2158_v52 = vmul.f32 %v2156_v47, %v8661_v57 }
 0x1f6   :  { %vm2195_vm4 = vweird.f32 %v6592_v36  ;;  %3657 = vrcp.f32 %v6474_v8  ;;  %v2536_v5 = vmul.f32 -0.33333334, %v2533_v48 }
 0x1f7   :  { %v2343_v20 = vsel %vm2339_vm13, %v2341_v45, %v2337_v1  ;;  %v511_v1 = vadd.f32 %v510_v26, %v508_v21  ;;  %8698 = vst [vmem:[#allocation53_spill] sm:$0xff] %v6660_v61  ;;  %v3652_v45 = vpop.eup %3651  ;;  %v2304_v21 = vsub.f32 0.0, %v3650_v33  ;;  %v913_v26 = vpop.xlane.xlu1 %912  ;;  %vm6696_vm5 = vmor %vm2194_vm1, %vm2195_vm4  ;;  %vm2340_vm13 = vcmp.lt.f32.partialorder %v6575_v2, 0.0 }
 0x1f8   :  { %v2345_v40 = vsub.f32 1.5707964, %v2343_v20  ;;  %v2362_v20 = vmul.f32 %v6643_v28, %v6643_v28  ;;  %v6674_v56 = vpop.eup %3653  ;;  %v2308_v13 = vmul.f32 %v3652_v45, %v3383_v0  ;;  %v1281_v0 = vrot.slane %v1280_v34, 2  ;;  %v6711_v4 = vpop.xlane.xlu0 %866 }
 0x1f9   :  { %v1677_v45 = vrot.slane %v6090_v38, 4  ;;  %v2538_v28 = vmul.f32 1.442695, %v2536_v5  ;;  %vm2636_vm8 = vweird.f32 %v6674_v56 }
 0x1fa   :  { %v2347_v14 = vmul.f32 %v2345_v40, %v2277_v9  ;;  %v3656_v9 = vpop.eup %3655  ;;  %v2193_v40 = vadd.f32 %v6592_v36, %v2192_v24  ;;  %v2310_v47 = vsel %vm6670_vm3, %v2308_v13, %v6600_v43  ;;  %v6692_v24 = vmul.f32 %v2362_v20, %v6660_v61  ;;  %vm6825_vm11 = vmor %vm2635_vm7, %vm2636_vm8 }
 0x1fb   :  { %v2174_v13 = vmul.f32 %v3656_v9, %v2158_v52  ;;  %v512_v20 = vrot.slane %v511_v1, 4  ;;  %v2201_v61 = vor.u32 1.1754944e-38, %v2200_v62  ;;  %v6720_v52 = vadd.f32 %v883_v49, %v6530_v7 }
 0x1fc   :  { %v6676_v30 = vadd.f32 %v2356_v10, %v2347_v14  ;;  %v2198_v10 = vand.u32 2147483647, %v6268_v17  ;;  %v2630_v17 = vmul.f32 %v6674_v56, %v6624_v12  ;;  %v6722_v5 = vadd.f32 %v1281_v0, %v1280_v34 }
 0x1fd   :  { %v6724_v62 = vadd.f32 %v915_v32, %v913_v26  ;;  %v2260_v9 = vmul.f32 2.0, %v6454_v27  ;;  %3659 = vpow2.f32 %v2538_v28  ;;  %v6739_v49 = vadd.f32 %v512_v20, %v511_v1 }
 0x1fe   :  { %v2398_v33 = vmul.f32 %v2396_v37, %v6676_v30  ;;  %v2402_v41 = vmul.f32 %v6676_v30, %v6676_v30  ;;  %v6702_v37 = vsel %vm2290_vm15, %v2304_v21, %v2310_v47  ;;  %vm2199_vm6 = vcmp.eq.f32.partialorder %v2198_v10, 8.507059e+37  ;;  %v6717_v21 = vpop.eup %3657 }
 0x1ff   :  { %v6707_v46 = vmul.f32 %v6702_v37, %v6702_v37  ;;  %v2631_v7 = vmul.f32 %v6674_v56, %v2630_v17  ;;  %v1311_v34 = vpop.xlane.xlu1 %1310  ;;  %v2218_v28 = vmul.f32 %v6717_v21, %v6474_v8  ;;  %v2262_v1 = vmul.f32 %v2260_v9, %v6454_v27 }
 0x200   :  { %v2400_v57 = vsub.f32 %v2392_v31, %v2398_v33  ;;  %v2404_v50 = vmul.f32 %v2402_v41, %v6048_v44  ;;  %v2197_v31 = vsel %vm6696_vm5, %v6592_v36, %v2193_v40  ;;  %v6729_v33 = vmul.f32 %v6274_v59, %v2174_v13 }
 0x201   :  { %v2320_v41 = vmul.f32 0.080537446, %v6707_v46  ;;  %v2352_v36 = vmul.f32 %v6629_v53, %v2347_v14  ;;  %v6733_v40 = vadd.f32 %v1677_v45, %v6090_v38  ;;  %v6735_v10 = vsel %vm2199_vm6, %v2201_v61, %v2197_v31 }
 0x202   :  { %v2406_v60 = vadd.f32 %v2404_v50, %v2400_v57  ;;  %v2371_v53 = vmul.f32 %v6735_v10, %v6735_v10  ;;  %v917_v14 = vrot.slane %v6724_v62, 4  ;;  %v6761_v45 = vstv %s6493_s19 }
 0x203   :  { %v3385_v50 = vadd.f32 -0.13877685, %v2320_v41  ;;  %v6745_v38 = vsub.f32 %v6615_v39, %v2352_v36  ;;  %v6758_v39 = vstv %s2376_s2  ;;  %8703 = vst [vmem:[#allocation27_spill] sm:$0xff] %v6761_v45  ;;  %v2632_v48 = vmul.f32 0.5, %v2631_v7  ;;  %v3660_v41 = vpop.eup %3659  ;;  %v6779_v7 = vpop.xlane.xlu0 %888 }
 0x204   :  { %v2408_v57 = vmul.f32 %v2406_v60, %v6692_v24  ;;  %v1313_v60 = vpop.xlane.xlu2 %1312  ;;  %v2373_v32 = vmul.f32 %v2371_v53, %v6729_v33  ;;  %v2374_v17 = vsub.f32 %v6414_v22, %v6005_v63  ;;  %v2264_v9 = vsub.f32 %v6474_v8, %v2262_v1 }
 0x205   :  { %v2324_v59 = vmul.f32 %v3385_v50, %v6707_v46  ;;  %v6748_v61 = vadd.f32 %v1313_v60, %v1311_v34  ;;  %v2377_v47 = vmul.f32 %v6745_v38, %v6363_v54  ;;  %v2420_v0 = vmul.f32 %v6676_v30, %v6745_v38 }
 0x206   :  { %2456 = vadd.xlane.f32.xlu2 %v2408_v57  ;;  %v2411_v20 = vmul.f32 %v2373_v32, %v6108_v42  ;;  %v2384_v57 = vmul.f32 %v6745_v38, %v6745_v38  ;;  %v6776_v50 = vmul.f32 %v6363_v54, %v6339_v29  ;;  %v2219_v34 = vsub.f32 1.0, %v2218_v28 }
 0x207   :  { %v2326_v26 = vadd.f32 0.19977711, %v2324_v59  ;;  %v2380_v31 = vmul.f32 %v6758_v39, %v2377_v47  ;;  %v2422_v36 = vmul.f32 %v2420_v0, %v6048_v44  ;;  %v2424_v22 = vmul.f32 %v6617_v16, %v6339_v29 }
 0x208   :  { %v2254_v53 = vmul.f32 %v6463_v3, %v6463_v3  ;;  %v2314_v1 = vsel %vm6670_vm3, 0.7853982, %v8664_v18  ;;  %v2386_v54 = vmul.f32 %v2384_v57, %v6048_v44  ;;  %v2432_v47 = vmul.f32 %v6640_v51, %v6745_v38 }
 0x209   :  { %v2328_v13 = vmul.f32 %v2326_v26, %v6707_v46  ;;  %v2382_v59 = vsub.f32 %v2374_v17, %v2380_v31  ;;  %v2428_v26 = vmul.f32 %v6776_v50, %v6676_v30  ;;  %v2426_v28 = vsub.f32 %v2422_v36, %v2424_v22  ;;  %v460_v22 = vpop.xlane.xlu1 %459 }
 0x20a   :  { %v6795_v0 = vmul.f32 %v3660_v41, %v8649_v19  ;;  %v2268_v11 = vadd.f32 %v6522_v25, %v2264_v9  ;;  %v2633_v31 = vsub.f32 1.5, %v2632_v48  ;;  %v2220_v57 = vmul.f32 %v6717_v21, %v2219_v34 }
 0x20b   :  { %v3387_v60 = vadd.f32 -0.3333295, %v2328_v13  ;;  %v2258_v13 = vmul.f32 %v6427_v15, %v6005_v63  ;;  %v2388_v17 = vadd.f32 %v2386_v54, %v2382_v59  ;;  %vm2223_vm9 = vweird.f32 %v6717_v21 }
 0x20c   :  { %v2228_v36 = vand.u32 2147483648, %v6474_v8  ;;  %v2316_v41 = vsel %vm2290_vm15, 1.5707964, %v2314_v1  ;;  %v2276_v25 = vmul.f32 %v6323_v58, %v6474_v8  ;;  %v6813_v34 = vmul.f32 %v6761_v45, %v6795_v0  ;;  %vm6840_vm12 = vmor %vm2222_vm10, %vm2223_vm9 }
 0x20d   :  { %v2332_v32 = vmul.f32 %v3387_v60, %v6707_v46  ;;  %v2256_v60 = vmul.f32 %v2254_v53, %v6463_v3  ;;  %v2390_v15 = vmul.f32 %v2388_v17, %v6692_v24  ;;  %v1679_v59 = vrot.slane %v6733_v40, 2 }
 0x20e   :  { %2470 = vadd.xlane.f32.xlu2 %v2411_v20  ;;  %v2430_v20 = vsub.f32 %v2426_v28, %v2428_v26  ;;  %v2270_v54 = vmul.f32 %v2268_v11, %v2258_v13  ;;  %v2272_v3 = vmul.f32 %v2254_v53, %v6735_v10  ;;  %v2634_v43 = vmul.f32 %v6674_v56, %v2633_v31  ;;  %v6845_v11 = vpop.xlane.xlu0 %1264 }
 0x20f   :  { %v2334_v46 = vmul.f32 %v2332_v32, %v6702_v37  ;;  %2444 = vadd.xlane.f32.xlu0 %v2390_v15  ;;  %v2221_v1 = vadd.f32 %v6717_v21, %v2220_v57  ;;  %v2226_v26 = vand.u32 2147483647, %v6474_v8  ;;  %v514_v53 = vrot.slane %v6739_v49, 2 }
 0x210   :  { %v2434_v9 = vsub.f32 %v2430_v20, %v2432_v47  ;;  %v6833_v47 = vadd.f32 %v917_v14, %v6724_v62  ;;  %v1315_v13 = vrot.slane %v6748_v61, 4  ;;  %v2229_v17 = vor.u32 1.1754944e-38, %v2228_v36  ;;  %v3748_v62 = vld [vmem:[#allocation11] sm:$0xff] }
 0x211   :  { %v2336_v48 = vadd.f32 %v2334_v46, %v6702_v37  ;;  %v2278_v31 = vmul.f32 %v2276_v25, %v2256_v60  ;;  %v6848_v14 = vadd.f32 %v3748_v62, %v6813_v34  ;;  %v865_v46 = vpop.xlane.xlu2 %864  ;;  %v2274_v20 = vmul.f32 %v2272_v3, %v2270_v54 }
 0x212   :  { %v2436_v37 = vmul.f32 %v2434_v9, %v6692_v24  ;;  %v6860_v2 = vsel %vm6825_vm11, %v6674_v56, %v2634_v43  ;;  %v2225_v36 = vsel %vm6840_vm12, %v6717_v21, %v2221_v1  ;;  %vm2227_vm15 = vcmp.eq.f32.partialorder %v2226_v26, 8.507059e+37  ;;  %v8711_v9 = vld [vmem:[#allocation32_spill] sm:$0xff] }
 0x213   :  { %v2338_v32 = vadd.f32 %v2336_v48, %v2316_v41  ;;  %8708 = vst [vmem:[#allocation77_spill] sm:$0xff] %v6848_v14  ;;  %v8709_v41 = vstv %s6554_s20  ;;  %v6855_v48 = vmul.f32 %v6323_v58, %v6454_v27  ;;  %v6867_v25 = vadd.f32 %v6563_v55, %v8643_v23 }
 0x214   :  { %v2351_v15 = vmul.f32 %v6323_v58, %v8709_v41  ;;  %v6871_v54 = vmul.f32 %v6560_v35, %v8711_v9  ;;  %v6876_v43 = vadd.f32 %v1679_v59, %v6733_v40  ;;  %v2549_v21 = vmul.f32 %v6848_v14, %v6848_v14  ;;  %v462_v40 = vpop.xlane.xlu1 %461 }
 0x215   :  { %v2342_v57 = vsub.f32 0.0, %v2338_v32  ;;  %8710 = vst [vmem:[#allocation39_spill] sm:$0xff] %v6867_v25  ;;  %v2649_v1 = vmul.f32 %v6860_v2, %v6624_v12  ;;  %v6883_v26 = vadd.f32 %v514_v53, %v6739_v49  ;;  %v2230_v35 = vsel %vm2227_vm15, %v2229_v17, %v2225_v36 }
 0x216   :  { %2492 = vadd.xlane.f32.xlu2 %v2436_v37  ;;  %8712 = vst [vmem:[#allocation64_spill] sm:$0xff] %v6871_v54  ;;  %v2357_v37 = vmul.f32 %v2351_v15, %v2274_v20  ;;  %v2397_v28 = vmul.f32 2.0, %v6855_v48  ;;  %v919_v24 = vrot.slane %v6833_v47, 2  ;;  %v868_v59 = vadd.f32 %v6711_v4, %v865_v46 }
 0x217   :  { %v2344_v60 = vsel %vm2340_vm13, %v2342_v57, %v2338_v32  ;;  %v6888_v57 = vadd.f32 %v1315_v13, %v6748_v61  ;;  %3661 = vlog2.f32 %v6867_v25  ;;  %v2393_v49 = vsub.f32 %v6474_v8, %v8647_v6 }
 0x218   :  { %v2346_v3 = vsub.f32 1.5707964, %v2344_v60  ;;  %v2367_v53 = vmul.f32 %v2230_v35, %v6735_v10  ;;  %v463_v17 = vadd.f32 %v462_v40, %v460_v22  ;;  %v6898_v36 = vadd.f32 %v2549_v21, %v6624_v12  ;;  %v6910_v60 = vpop.xlane.xlu0 %1286 }
 0x219   :  { %v2677_v61 = vmul.f32 %v2649_v1, %v6813_v34  ;;  %v869_v10 = vrot.slane %v868_v59, 4  ;;  %v2375_v22 = vsub.f32 %v6474_v8, %v6005_v63  ;;  %v2412_v18 = vmul.f32 %v6745_v38, %v6048_v44 }
 0x21a   :  { %v2348_v32 = vmul.f32 %v2346_v3, %v2278_v31  ;;  %v2363_v31 = vmul.f32 %v2230_v35, %v2230_v35  ;;  %v1263_v35 = vpop.xlane.xlu2 %1262  ;;  %v464_v12 = vrot.slane %v463_v17, 4  ;;  %vm2606_vm11 = vweird.f32 %v6898_v36 }
 0x21b   :  { %3663 = vrcp.f32 %v2677_v61 }
 0x21c   :  { %v2353_v62 = vmul.f32 %v2351_v15, %v2348_v32  ;;  %v6892_v41 = vadd.f32 %v2357_v37, %v2348_v32  ;;  %v6908_v15 = vadd.f32 %v6563_v55, %v8647_v6  ;;  %v6926_v63 = vmul.f32 %v2363_v31, %v6729_v33  ;;  %v8716_v31 = vld [vmem:[#allocation57_spill] sm:$0xff] }
 0x21d   :  { %v3662_v40 = vpop.eup %3661 }
 0x21e   :  { %v6901_v13 = vsub.f32 %v2274_v20, %v2353_v62  ;;  %v2399_v4 = vmul.f32 %v2397_v28, %v6892_v41  ;;  %v2403_v46 = vmul.f32 %v6892_v41, %v6892_v41  ;;  %8713 = vst [vmem:[#allocation76_spill] sm:$0xff] %v6908_v15  ;;  %v2439_v3 = vmul.f32 %v6892_v41, %v6108_v42  ;;  %v8714_v20 = vld [vmem:[#allocation35_spill] sm:$0xff] }
 0x21f   :  { %v2557_v37 = vmul.f32 %v6898_v36, %v8714_v20  ;;  %v6923_v28 = vmul.f32 %v2367_v53, %v6729_v33  ;;  %v6931_v62 = vmul.f32 %v6848_v14, %v6813_v34  ;;  %3665 = vrsqrt.f32 %v6908_v15  ;;  %v8715_v33 = vld [vmem:[#allocation62_spill] sm:$0xff] }
 0x220   :  { %v2378_v21 = vmul.f32 %v6901_v13, %v6454_v27  ;;  %v2385_v1 = vmul.f32 %v6901_v13, %v6901_v13  ;;  %v2401_v32 = vsub.f32 %v2393_v49, %v2399_v4  ;;  %v2405_v8 = vmul.f32 %v2403_v46, %v6108_v42 }
 0x221   :  { %v2441_v49 = vsub.f32 %v2439_v3, %v6855_v48  ;;  %v1266_v53 = vadd.f32 %v6845_v11, %v1263_v35  ;;  %v2366_v54 = vmul.f32 %v8716_v31, %v8715_v33  ;;  %v2559_v46 = vadd.f32 1.0, %v2557_v37 }
 0x222   :  { %v2381_v56 = vmul.f32 %v6758_v39, %v2378_v21  ;;  %v2387_v58 = vmul.f32 %v2385_v1, %v6108_v42  ;;  %v2407_v4 = vadd.f32 %v2405_v8, %v2401_v32  ;;  %v2535_v61 = vmul.f32 0.6931472, %v3662_v40  ;;  %v486_v1 = vpop.xlane.xlu1 %485 }
 0x223   :  { %v2443_v34 = vmul.f32 %v2441_v49, %v6923_v28  ;;  %v920_v39 = vadd.f32 %v919_v24, %v6833_v47  ;;  %v870_v21 = vadd.f32 %v869_v10, %v868_v59  ;;  %v1317_v11 = vrot.slane %v6888_v57, 2  ;;  %v8717_v47 = vld [vmem:[#allocation53_spill] sm:$0xff] }
 0x224   :  { %v2383_v16 = vsub.f32 %v2375_v22, %v2381_v56  ;;  %v2409_v3 = vmul.f32 %v2407_v4, %v6926_v63  ;;  %v2370_v37 = vmul.f32 %v8715_v33, %v8715_v33  ;;  %v2679_v56 = vsub.f32 %v6898_v36, %v6931_v62  ;;  %v3664_v22 = vpop.eup %3663 }
 0x225   :  { %2506 = vadd.xlane.f32.xlu2 %v2443_v34  ;;  %v1267_v32 = vrot.slane %v1266_v53, 4  ;;  %v6951_v24 = vmul.f32 %v2366_v54, %v8717_v47  ;;  %v2416_v59 = vsub.f32 %v2412_v18, %v6776_v50  ;;  %3667 = vlog2.f32 %v2559_v46  ;;  %v6954_v38 = vpop.eup %3665  ;;  %v8719_v54 = vld [vmem:[#allocation37_spill] sm:$0xff]  ;;  %v1663_v34 = vpop.xlane.xlu0 %1662 }
 0x226   :  { %v2389_v35 = vadd.f32 %v2387_v58, %v2383_v16  ;;  %2458 = vadd.xlane.f32.xlu0 %v2409_v3  ;;  %v8718_v16 = vrot.slane %v6720_v52, 1  ;;  %v465_v10 = vadd.f32 %v464_v12, %v463_v17  ;;  %v2537_v8 = vmul.f32 -0.33333334, %v2535_v61  ;;  %v8721_v12 = vld [vmem:[#allocation72_spill] sm:$0xff] }
 0x227   :  { %v1681_v49 = vrot.slane %v6876_v43, 1  ;;  %v516_v4 = vrot.slane %v6883_v26, 1  ;;  %v871_v33 = vrot.slane %v870_v21, 2  ;;  %v487_v31 = vadd.f32 %v486_v1, %v8719_v54 }
 0x228   :  { %v886_v58 = vadd.f32 %v8718_v16, %v6720_v52  ;;  %v2391_v40 = vmul.f32 %v2389_v35, %v6926_v63  ;;  %v8720_v18 = vrot.slane %v6722_v5, 1  ;;  %v921_v46 = vrot.slane %v920_v39, 1  ;;  %v8722_v16 = vld [vmem:[#allocation33_spill] sm:$0xff] }
 0x229   :  { %v2372_v52 = vmul.f32 %v2370_v37, %v8717_v47  ;;  %3669 = vrcp.f32 %v8721_v12  ;;  %v1318_v17 = vadd.f32 %v1317_v11, %v6888_v57  ;;  %v1268_v61 = vadd.f32 %v1267_v32, %v1266_v53  ;;  %v8723_v32 = vld [vmem:[#allocation44_spill] sm:$0xff] }
 0x22a   :  { %v1284_v50 = vadd.f32 %v8720_v18, %v6722_v5  ;;  %2446 = vadd.xlane.f32.xlu1 %v2391_v40  ;;  %v2418_v3 = vmul.f32 %v2416_v59, %v6951_v24  ;;  %v6970_v35 = vmul.f32 %v3664_v22, %v2679_v56  ;;  %v6973_v1 = vmul.f32 %v886_v58, %v8722_v16 }
 0x22b   :  { %v466_v54 = vrot.slane %v465_v10, 2  ;;  %v2540_v25 = vmul.f32 1.442695, %v2537_v8  ;;  %v2640_v5 = vmul.f32 %v6954_v38, %v6908_v15  ;;  %v3668_v40 = vpop.eup %3667  ;;  %v1682_v37 = vadd.f32 %v1681_v49, %v6876_v43  ;;  %v891_v43 = vpop.xlane.xlu1 %890 }
 0x22c   :  { %v517_v47 = vadd.f32 %v516_v4, %v6883_v26  ;;  %v872_v18 = vadd.f32 %v871_v33, %v870_v21  ;;  %v488_v57 = vrot.slane %v487_v31, 4  ;;  %v922_v53 = vadd.f32 %v921_v46, %v920_v39  ;;  %v8725_v33 = vld [vmem:[#allocation61_spill] sm:$0xff] }
 0x22d   :  { %v2410_v11 = vmul.f32 %v2372_v52, %v6048_v44  ;;  %v2413_v56 = vmul.f32 %v6901_v13, %v6108_v42  ;;  %v6984_v22 = vmul.f32 %v6454_v27, %v6339_v29  ;;  %v6987_v59 = vmul.f32 %v1284_v50, %v8723_v32 }
 0x22e   :  { %v1319_v58 = vrot.slane %v1318_v17, 1  ;;  %v1269_v8 = vrot.slane %v1268_v61, 2  ;;  %2480 = vadd.xlane.f32.xlu0 %v2418_v3  ;;  %v6990_v26 = vand.u32 2147483647, %v6970_v35  ;;  %v467_v21 = vadd.f32 %v466_v54, %v465_v10 }
 0x22f   :  { %8724 = vst [vmem:[#allocation38_spill] sm:$0xff] %v6987_v59  ;;  %v6992_v39 = vpop.eup %3669  ;;  %v2562_v49 = vmul.f32 0.6931472, %v3668_v40  ;;  %3671 = vpow2.f32 %v2540_v25  ;;  %v2641_v4 = vmul.f32 %v6954_v38, %v2640_v5  ;;  %v6996_v27 = vmul.f32 %v1682_v37, %v8725_v33  ;;  %v1661_v59 = vpop.xlane.xlu2 %1660 }
 0x230   :  { %v6999_v50 = vmul.f32 %v517_v47, %v8711_v9  ;;  %v873_v46 = vrot.slane %v872_v18, 1  ;;  %v489_v52 = vadd.f32 %v488_v57, %v487_v31  ;;  %v7004_v3 = vmul.f32 %v922_v53, %v8722_v16  ;;  %v7011_v40 = vpop.xlane.xlu0 %447  ;;  %v7133_v9 = vld [vmem:[#allocation10 + $0x8] sm:$0xff] }
 0x231   :  { %8726 = vst [vmem:[#allocation30_spill] sm:$0xff] %v6996_v27  ;;  %v892_v10 = vadd.f32 %v891_v43, %v6779_v7  ;;  %v2417_v25 = vsub.f32 %v2413_v56, %v6984_v22  ;;  %3673 = vrcp.f32 %v6990_v26  ;;  %v7009_v54 = vadd.f32 %v1319_v58, %v1318_v17 }
 0x232   :  { %8727 = vst [vmem:[#allocation67_spill] sm:$0xff] %v6999_v50  ;;  %2468 = vadd.xlane.f32.xlu1 %v2410_v11  ;;  %v1270_v5 = vadd.f32 %v1269_v8, %v1268_v61  ;;  %v2574_v31 = vmul.f32 %v6992_v39, %v8721_v12  ;;  %v2697_v37 = vadd.f32 1.0, %v6990_v26  ;;  %v468_v47 = vrot.slane %v467_v21, 1 }
 0x233   :  { %8728 = vst [vmem:[#allocation68_spill] sm:$0xff] %v7004_v3  ;;  %v1664_v57 = vadd.f32 %v1663_v34, %v1661_v59  ;;  %v2565_v53 = vmul.f32 -2.8333333, %v2562_v49  ;;  %v2642_v11 = vmul.f32 0.5, %v2641_v4  ;;  %v874_v3 = vadd.f32 %v873_v46, %v872_v18 }
 0x234   :  { %8729 = vst [vmem:[#allocation52_spill] sm:$0xff] %v7009_v54  ;;  %v490_v7 = vrot.slane %v489_v52, 2  ;;  %vm2687_vm14 = vcmp.gt.f32.partialorder %v6990_v26, 2.4142137  ;;  %3675 = vrcp.f32 %v2697_v37  ;;  %v893_v17 = vrot.slane %v892_v10, 4 }
 0x235   :  { %v3672_v56 = vpop.eup %3671  ;;  %v2419_v61 = vmul.f32 %v2417_v25, %v6923_v28  ;;  %v2438_v58 = vmul.f32 %v6676_v30, %v6048_v44  ;;  %v2643_v8 = vsub.f32 1.5, %v2642_v11  ;;  %v1271_v43 = vrot.slane %v1270_v5, 1  ;;  %vm7026_vm4 = vmxor %vm2687_vm14, %vm3908_vm2 }
 0x236   :  { %v2575_v50 = vsub.f32 1.0, %v2574_v31  ;;  %vm2645_vm0 = vweird.f32 %v6908_v15  ;;  %vm2646_vm1 = vweird.f32 %v6954_v38  ;;  %v1665_v18 = vrot.slane %v1664_v57, 4 }
 0x237   :  { %v3674_v34 = vpop.eup %3673  ;;  %v2567_v59 = vmul.f32 1.442695, %v2565_v53  ;;  %vm2689_vm3 = vcmp.gt.f32.partialorder %v6990_v26, 0.41421357  ;;  %v3390_v44 = vadd.f32 -1.0, %v6990_v26  ;;  %v7031_v30 = vadd.f32 %v468_v47, %v467_v21  ;;  %vm2647_vm5 = vmor %vm2645_vm0, %vm2646_vm1 }
 0x238   :  { %3677 = vrcp.f32 %v6898_v36  ;;  %v7035_v49 = vmul.f32 %v3672_v56, %v8649_v19  ;;  %v2644_v4 = vmul.f32 %v6954_v38, %v2643_v8  ;;  %v7041_v46 = vmul.f32 %v874_v3, %v8722_v16  ;;  %vm7058_vm7 = vmand %vm2689_vm3, %vm7026_vm4 }
 0x239   :  { %8732 = vst [vmem:[#allocation46_spill] sm:$0xff] %v7031_v30  ;;  %v7043_v25 = vadd.f32 %v490_v7, %v489_v52  ;;  %v2440_v31 = vsub.f32 %v2438_v58, %v6640_v51  ;;  %v2553_v21 = vmul.f32 %v6898_v36, %v6898_v36  ;;  %v1272_v47 = vadd.f32 %v1271_v43, %v1270_v5  ;;  %v7066_v5 = vpop.xlane.xlu0 %449 }
 0x23a   :  { %2482 = vadd.xlane.f32.xlu1 %v2419_v61  ;;  %v3676_v37 = vpop.eup %3675  ;;  %v2576_v53 = vmul.f32 %v6992_v39, %v2575_v50  ;;  %vm2578_vm6 = vweird.f32 %v8721_v12  ;;  %v2701_v52 = vsub.f32 0.0, %v3674_v34  ;;  %v7062_v3 = vadd.f32 %v893_v17, %v892_v10  ;;  %v8737_v17 = vld [vmem:[#allocation34_spill] sm:$0xff] }
 0x23b   :  { %v7064_v11 = vadd.f32 %v1665_v18, %v1664_v57  ;;  %3679 = vpow2.f32 %v2567_v59  ;;  %v2705_v7 = vmul.f32 %v3676_v37, %v3390_v44  ;;  %vm2579_vm8 = vweird.f32 %v6992_v39  ;;  %v1289_v18 = vpop.xlane.xlu1 %1288 }
 0x23c   :  { %v2546_v50 = vmul.f32 %v6761_v45, %v7035_v49  ;;  %v7072_v56 = vsel %vm2647_vm5, %v6954_v38, %v2644_v4  ;;  %v7074_v61 = vstv %s2924_s3  ;;  %v124_v58 = vlaneseq  ;;  %vm7096_vm10 = vmor %vm2578_vm6, %vm2579_vm8 }
 0x23d   :  { %8735 = vst [vmem:[#allocation80_spill] sm:$0xff] %v7064_v11  ;;  %v2442_v10 = vmul.f32 %v2440_v31, %v6951_v24  ;;  %v7078_v57 = vmul.f32 %v2553_v21, %v8737_v17  ;;  %v2707_v8 = vsel %vm7058_vm7, %v2705_v7, %v6990_v26  ;;  %v7086_v34 = vmul.f32 %v1272_v47, %v8723_v32 }
 0x23e   :  { %8736 = vst [vmem:[#allocation54_spill] sm:$0xff] %v7074_v61  ;;  %v7083_v43 = vpop.eup %3677  ;;  %v2577_v38 = vadd.f32 %v6992_v39, %v2576_v53  ;;  %v2657_v59 = vmul.f32 2.0, %v6848_v14  ;;  %v7092_v24 = vsel %vm2687_vm14, %v2701_v52, %v2707_v8  ;;  %v2582_v44 = vand.u32 2147483647, %v8721_v12  ;;  %v7115_v52 = vld [vmem:[#allocation11 + $0x8] sm:$0xff] }
 0x23f   :  { %v7103_v4 = vmul.f32 %v7092_v24, %v7092_v24  ;;  %v2650_v31 = vmul.f32 %v7072_v56, %v6908_v15  ;;  %v7109_v21 = vadd.f32 %v7074_v61, %v8643_v23  ;;  %v2584_v47 = vand.u32 2147483648, %v8721_v12 }
 0x240   :  { %v2421_v53 = vmul.f32 %v6892_v41, %v6901_v13  ;;  %v7118_v7 = vadd.f32 %v7115_v52, %v2546_v50  ;;  %v7121_v45 = vadd.f32 %v1289_v18, %v6910_v60  ;;  %v7123_v27 = vand.u32 127, %v124_v58  ;;  %v8744_v58 = vld [vmem:[#allocation39_spill] sm:$0xff] }
 0x241   :  { %v3680_v8 = vpop.eup %3679  ;;  %v2602_v23 = vmul.f32 %v7083_v43, %v6898_v36  ;;  %v2717_v12 = vmul.f32 0.080537446, %v7103_v4  ;;  %v2581_v37 = vsel %vm7096_vm10, %v6992_v39, %v2577_v38  ;;  %v2659_v33 = vmul.f32 %v2657_v59, %v6848_v14 }
 0x242   :  { %8740 = vst [vmem:[#allocation74_spill] sm:$0xff] %v7118_v7  ;;  %2504 = vadd.xlane.f32.xlu1 %v2442_v10  ;;  %v2423_v30 = vmul.f32 %v2421_v53, %v6108_v42  ;;  %v2425_v60 = vmul.f32 %v7133_v9, %v6339_v29  ;;  %vm7137_vm9 = vcmp.eq.f32.partialorder %v2582_v44, 8.507059e+37  ;;  %v2678_v18 = vmul.f32 %v2650_v31, %v2546_v50  ;;  %v853_v53 = vpop.xlane.xlu0 %852 }
 0x243   :  { %v3392_v10 = vadd.f32 -0.13877685, %v2717_v12  ;;  %3681 = vlog2.f32 %v7109_v21  ;;  %v2585_v54 = vor.u32 1.1754944e-38, %v2584_v47  ;;  %v2429_v39 = vmul.f32 %v6984_v22, %v6892_v41 }
 0x244   :  { %v2427_v28 = vsub.f32 %v2423_v30, %v2425_v60  ;;  %v2550_v42 = vmul.f32 %v7118_v7, %v7118_v7  ;;  %v2603_v38 = vsub.f32 1.0, %v2602_v23  ;;  %v7150_v44 = vadd.f32 %v7074_v61, %v8647_v6  ;;  %v855_v30 = vpop.xlane.xlu1 %854 }
 0x245   :  { %v2721_v59 = vmul.f32 %v3392_v10, %v7103_v4  ;;  %v2610_v31 = vand.u32 2147483647, %v6898_v36  ;;  %v2661_v47 = vsub.f32 %v6898_v36, %v2659_v33  ;;  %v2433_v41 = vmul.f32 %v6855_v48, %v6901_v13 }
 0x246   :  { %v2431_v12 = vsub.f32 %v2427_v28, %v2429_v39  ;;  %v2612_v22 = vand.u32 2147483648, %v6898_v36  ;;  %v856_v60 = vadd.f32 %v855_v30, %v853_v53  ;;  %3683 = vrcp.f32 %v2678_v18 }
 0x247   :  { %v2723_v23 = vadd.f32 0.19977711, %v2721_v59  ;;  %v2651_v10 = vmul.f32 %v6860_v2, %v6860_v2  ;;  %v7162_v11 = vadd.f32 %v2550_v42, %v6908_v15  ;;  %v7165_v33 = vmul.f32 %v7118_v7, %v2546_v50 }
 0x248   :  { %v2435_v29 = vsub.f32 %v2431_v12, %v2433_v41  ;;  %v2604_v48 = vmul.f32 %v7083_v43, %v2603_v38  ;;  %v857_v39 = vrot.slane %v856_v60, 4  ;;  %3685 = vrsqrt.f32 %v7150_v44 }
 0x249   :  { %v3682_v28 = vpop.eup %3681  ;;  %v2725_v13 = vmul.f32 %v2723_v23, %v7103_v4  ;;  %v7172_v18 = vsel %vm7137_vm9, %v2585_v54, %v2581_v37  ;;  %v2655_v59 = vmul.f32 %v6795_v0, %v6563_v55  ;;  %v2665_v42 = vadd.f32 %v6931_v62, %v2661_v47 }
 0x24a   :  { %8743 = vst [vmem:[#allocation73_spill] sm:$0xff] %v7172_v18  ;;  %v2437_v50 = vmul.f32 %v2435_v29, %v6926_v63  ;;  %vm2607_vm12 = vweird.f32 %v7083_v43  ;;  %v858_v38 = vadd.f32 %v857_v39, %v856_v60  ;;  %v2558_v53 = vmul.f32 %v7162_v11, %v8714_v20 }
 0x24b   :  { %v3394_v30 = vadd.f32 -0.3333295, %v2725_v13  ;;  %v2571_v12 = vmul.f32 %v3680_v8, %v7078_v57  ;;  %3687 = vrcp.f32 %v8744_v58  ;;  %v2680_v54 = vsub.f32 %v7162_v11, %v7165_v33  ;;  %vm7195_vm15 = vmor %vm2606_vm11, %vm2607_vm12 }
 0x24c   :  { %2494 = vadd.xlane.f32.xlu0 %v2437_v50  ;;  %v2933_v0 = vmul.f32 0.6931472, %v3682_v28  ;;  %v3684_v62 = vpop.eup %3683  ;;  %v2605_v29 = vadd.f32 %v7083_v43, %v2604_v48  ;;  %v8745_v63 = vmov 0.0   ;;  %v859_v41 = vrot.slane %v858_v38, 2 }
 0x24d   :  { %v2711_v37 = vsel %vm7058_vm7, 0.7853982, %v8745_v63  ;;  %v2729_v47 = vmul.f32 %v3394_v30, %v7103_v4  ;;  %vm519_vm13 = vcmp.eq.s32.totalorder %v7123_v27, 0  ;;  %vm7199_vm0 = vcmp.eq.f32.partialorder %v2610_v31, 8.507059e+37  ;;  %v8750_v31 = vld [vmem:[#allocation58_spill] sm:$0xff] }
 0x24e   :  { %v2613_v23 = vor.u32 1.1754944e-38, %v2612_v22  ;;  %v2667_v51 = vmul.f32 %v2665_v42, %v2655_v59  ;;  %v2669_v60 = vmul.f32 %v2651_v10, %v7172_v18  ;;  %v7204_v4 = vpop.eup %3685  ;;  %vm521_vm1 = vcmp.eq.s32.totalorder %v7123_v27, 1 }
 0x24f   :  { %v2731_v28 = vmul.f32 %v2729_v47, %v7092_v24  ;;  %v860_v13 = vadd.f32 %v859_v41, %v858_v38  ;;  %v2560_v39 = vadd.f32 1.0, %v2558_v53  ;;  %vm523_vm3 = vcmp.eq.s32.totalorder %v7123_v27, 2 }
 0x250   :  { %v2673_v50 = vmul.f32 %v8750_v31, %v6898_v36  ;;  %v2713_v22 = vsel %vm2687_vm14, 1.5707964, %v2711_v37  ;;  %v7214_v59 = vmul.f32 %v3684_v62, %v2680_v54  ;;  %v2935_v42 = vmul.f32 -0.33333334, %v2933_v0 }
 0x251   :  { %v2609_v30 = vsel %vm7195_vm15, %v7083_v43, %v2605_v29  ;;  %v2653_v47 = vmul.f32 %v2651_v10, %v6860_v2  ;;  %v2733_v38 = vadd.f32 %v2731_v28, %v7092_v24  ;;  %v861_v53 = vrot.slane %v860_v13, 1  ;;  %v7221_v41 = vpop.eup %3687 }
 0x252   :  { %v7223_v48 = vmul.f32 %v2669_v60, %v2667_v51  ;;  %v8751_v18 = vstv %s7156_s5  ;;  %v7231_v54 = vand.u32 2147483647, %v7214_v59  ;;  %v3038_v0 = vmul.f32 %v7204_v4, %v7150_v44 }
 0x253   :  { %v7228_v26 = vmul.f32 %v8750_v31, %v8751_v18  ;;  %v2735_v43 = vadd.f32 %v2733_v38, %v2713_v22  ;;  %vm2737_vm14 = vcmp.lt.f32.partialorder %v6970_v35, 0.0  ;;  %v862_v2 = vadd.f32 %v861_v53, %v860_v13 }
 0x254   :  { %3689 = vlog2.f32 %v2560_v39  ;;  %v7238_v24 = vsel %vm7199_vm0, %v2613_v23, %v2609_v30  ;;  %v7242_v10 = vmul.f32 %v8750_v31, %v6848_v14  ;;  %v2938_v18 = vmul.f32 1.442695, %v2935_v42  ;;  %v7251_v23 = vld [vmem:[#allocation13] sm:$0xff] }
 0x255   :  { %8752 = vst [vmem:[#allocation47_spill] sm:$0xff] %v7238_v24  ;;  %3691 = vrcp.f32 %v7231_v54  ;;  %v2739_v62 = vsub.f32 0.0, %v2735_v43  ;;  %v863_v29 = vmul.f32 %v862_v2, %v8722_v16  ;;  %v2588_v37 = vmul.f32 %v7221_v41, %v8744_v58 }
 0x256   :  { %8753 = vst [vmem:[#allocation50_spill] sm:$0xff] %v7242_v10  ;;  %v2698_v57 = vadd.f32 1.0, %v7231_v54  ;;  %v2675_v51 = vmul.f32 %v2673_v50, %v2653_v47  ;;  %v2754_v8 = vmul.f32 %v7228_v26, %v7223_v48  ;;  %v7254_v60 = vmul.f32 %v7251_v23, %v2571_v12 }
 0x257   :  { %8754 = vst [vmem:[#allocation65_spill] sm:$0xff] %v7251_v23  ;;  %v3039_v28 = vmul.f32 %v7204_v4, %v3038_v0  ;;  %v2741_v13 = vsel %vm2737_vm14, %v2739_v62, %v2735_v43  ;;  %v924_v39 = vsel %vm519_vm13, %v863_v29, 0.0  ;;  %vm2688_vm4 = vcmp.gt.f32.partialorder %v7231_v54, 2.4142137  ;;  %v8757_v43 = vld [vmem:[#allocation24_spill] sm:$0xff] }
 0x258   :  { %8755 = vst [vmem:[#allocation59_spill] sm:$0xff] %v7254_v60  ;;  %3693 = vrcp.f32 %v2698_v57  ;;  %v2743_v31 = vsub.f32 1.5707964, %v2741_v13  ;;  %v2760_v50 = vmul.f32 %v7238_v24, %v7238_v24  ;;  %v925_v12 = vsel %vm521_vm1, %v7041_v46, %v924_v39  ;;  %vm2692_vm6 = vmxor %vm2688_vm4, %vm3908_vm2 }
 0x259   :  { %3695 = vpow2.f32 %v2938_v18  ;;  %v2794_v42 = vmul.f32 2.0, %v7242_v10  ;;  %v7271_v35 = vsel %vm523_vm3, %v6973_v1, %v925_v12  ;;  %v2589_v30 = vsub.f32 1.0, %v2588_v37  ;;  %v8758_v18 = vld [vmem:[#allocation22_spill] sm:$0xff] }
 0x25a   :  { %v3690_v22 = vpop.eup %3689  ;;  %8756 = vst [vmem:[#allocation55_spill] sm:$0xff] %v7271_v35  ;;  %v3040_v47 = vmul.f32 0.5, %v3039_v28  ;;  %v2745_v53 = vmul.f32 %v2743_v31, %v2675_v51  ;;  %3697 = vrcp.f32 %v7162_v11  ;;  %vm2690_vm5 = vcmp.gt.f32.partialorder %v7231_v54, 0.41421357 }
 0x25b   :  { %v3692_v38 = vpop.eup %3691  ;;  %v3391_v46 = vadd.f32 -1.0, %v7231_v54  ;;  %v1291_v0 = vrot.slane %v7121_v45, 4  ;;  %v451_v1 = vadd.f32 %v7066_v5, %v7011_v40  ;;  %v7284_v2 = vadd.f32 %v7074_v61, %v8757_v43  ;;  %vm7298_vm7 = vmand %vm2690_vm5, %vm2692_vm6 }
 0x25c   :  { %v7288_v62 = vadd.f32 %v7074_v61, %v8758_v18  ;;  %v7290_v29 = vadd.f32 %v2754_v8, %v2745_v53  ;;  %v7293_v37 = vmul.f32 %v2760_v50, %v7254_v60  ;;  %v2790_v57 = vsub.f32 %v6898_v36, %v8758_v18 }
 0x25d   :  { %v3041_v51 = vsub.f32 1.5, %v3040_v47  ;;  %v2564_v13 = vmul.f32 0.6931472, %v3690_v22  ;;  %v2590_v40 = vmul.f32 %v7221_v41, %v2589_v30  ;;  %v2702_v39 = vsub.f32 0.0, %v3692_v38  ;;  %v8763_v38 = vld [vmem:[#allocation28_spill] sm:$0xff] }
 0x25e   :  { %8759 = vst [vmem:[#allocation48_spill] sm:$0xff] %v7290_v29  ;;  %v3694_v28 = vpop.eup %3693  ;;  %vm3043_vm8 = vweird.f32 %v7150_v44  ;;  %v2796_v31 = vmul.f32 %v2794_v42, %v7290_v29  ;;  %v2800_v50 = vmul.f32 %v7290_v29, %v7290_v29  ;;  %vm3044_vm10 = vweird.f32 %v7204_v4 }
 0x25f   :  { %8760 = vst [vmem:[#allocation45_spill] sm:$0xff] %v7293_v37  ;;  %v3696_v8 = vpop.eup %3695  ;;  %v2706_v12 = vmul.f32 %v3694_v28, %v3391_v46  ;;  %vm2592_vm9 = vweird.f32 %v8744_v58  ;;  %vm2593_vm11 = vweird.f32 %v7221_v41  ;;  %v2598_v22 = vand.u32 2147483648, %v8744_v58  ;;  %vm3045_vm12 = vmor %vm3043_vm8, %vm3044_vm10 }
 0x260   :  { %3699 = vlog2.f32 %v7284_v2  ;;  %v7311_v30 = vpop.eup %3697  ;;  %v2798_v47 = vsub.f32 %v2790_v57, %v2796_v31  ;;  %v2802_v42 = vmul.f32 %v2800_v50, %v8763_v38  ;;  %v3042_v43 = vmul.f32 %v7204_v4, %v3041_v51  ;;  %vm7333_vm15 = vmor %vm2592_vm9, %vm2593_vm11 }
 0x261   :  { %v2708_v46 = vsel %vm7298_vm7, %v2706_v12, %v7231_v54  ;;  %v2591_v28 = vadd.f32 %v7221_v41, %v2590_v40  ;;  %v2596_v24 = vand.u32 2147483647, %v8744_v58  ;;  %v7325_v29 = vmul.f32 %v3696_v8, %v8649_v19 }
 0x262   :  { %v7322_v10 = vsel %vm2688_vm4, %v2702_v39, %v2708_v46  ;;  %v2804_v57 = vadd.f32 %v2802_v42, %v2798_v47  ;;  %v2566_v31 = vmul.f32 -2.8333333, %v2564_v13  ;;  %v7340_v39 = vstv %s7001_s21 }
 0x263   :  { %8764 = vst [vmem:[#allocation49_spill] sm:$0xff] %v7325_v29  ;;  %v2716_v40 = vmul.f32 %v7322_v10, %v7322_v10  ;;  %v452_v8 = vrot.slane %v451_v1, 4  ;;  %v2554_v50 = vmul.f32 %v7162_v11, %v7162_v11  ;;  %v2616_v13 = vmul.f32 %v7311_v30, %v7162_v11 }
 0x264   :  { %8767 = vst [vmem:[#allocation71_spill] sm:$0xff] %v7340_v39  ;;  %v2658_v12 = vmul.f32 2.0, %v7118_v7  ;;  %v2806_v58 = vmul.f32 %v2804_v57, %v7293_v37  ;;  %v2599_v47 = vor.u32 1.1754944e-38, %v2598_v22  ;;  %v7349_v46 = vsel %vm3045_vm12, %v7204_v4, %v3042_v43 }
 0x265   :  { %v2718_v42 = vmul.f32 0.080537446, %v2716_v40  ;;  %v7352_v35 = vadd.f32 %v1291_v0, %v7121_v45  ;;  %v2595_v23 = vsel %vm7333_vm15, %v7221_v41, %v2591_v28  ;;  %vm2597_vm0 = vcmp.eq.f32.partialorder %v2596_v24, 8.507059e+37 }
 0x266   :  { %v3700_v18 = vpop.eup %3699  ;;  %v2944_v16 = vmul.f32 %v7340_v39, %v7325_v29  ;;  %2854 = vadd.xlane.f32.xlu2 %v2806_v58  ;;  %v2569_v57 = vmul.f32 1.442695, %v2566_v31  ;;  %v2750_v60 = vmul.f32 %v7228_v26, %v2745_v53  ;;  %3701 = vrsqrt.f32 %v7288_v62 }
 0x267   :  { %v3393_v22 = vadd.f32 -0.13877685, %v2718_v42  ;;  %v7361_v4 = vadd.f32 %v452_v8, %v451_v1  ;;  %v2617_v43 = vsub.f32 1.0, %v2616_v13  ;;  %v2660_v45 = vmul.f32 %v2658_v12, %v7118_v7 }
 0x268   :  { %v3048_v41 = vmul.f32 %v7349_v46, %v7150_v44  ;;  %v7368_v24 = vmul.f32 %v2554_v50, %v8737_v17  ;;  %v7370_v0 = vsel %vm2597_vm0, %v2599_v47, %v2595_v23  ;;  %v7373_v31 = vsub.f32 %v7223_v48, %v2750_v60 }
 0x269   :  { %v2722_v28 = vmul.f32 %v3393_v22, %v2716_v40  ;;  %vm2620_vm14 = vweird.f32 %v7162_v11  ;;  %vm2621_vm5 = vweird.f32 %v7311_v30  ;;  %v7378_v26 = vadd.f32 %v7115_v52, %v2944_v16  ;;  %v1251_v22 = vpop.xlane.xlu0 %1250 }
 0x26a   :  { %8768 = vst [vmem:[#allocation43_spill] sm:$0xff] %v7373_v31  ;;  %v2931_v53 = vmul.f32 0.6931472, %v3700_v18  ;;  %3703 = vpow2.f32 %v2569_v57  ;;  %v2624_v1 = vand.u32 2147483647, %v7162_v11  ;;  %v2775_v23 = vmul.f32 %v7373_v31, %v6848_v14  ;;  %v1253_v57 = vpop.xlane.xlu1 %1252  ;;  %vm7411_vm6 = vmor %vm2620_vm14, %vm2621_vm5 }
 0x26b   :  { %v2724_v51 = vadd.f32 0.19977711, %v2722_v28  ;;  %v2618_v8 = vmul.f32 %v7311_v30, %v2617_v43  ;;  %v2662_v48 = vsub.f32 %v7162_v11, %v2660_v45  ;;  %v7385_v60 = vstv %s2774_s22 }
 0x26c   :  { %v3076_v50 = vmul.f32 %v3048_v41, %v2944_v16  ;;  %v7387_v13 = vpop.eup %3701  ;;  %v2772_v52 = vsub.f32 %v6898_v36, %v6563_v55  ;;  %v2778_v18 = vmul.f32 %v7385_v60, %v2775_v23  ;;  %v2782_v58 = vmul.f32 %v7373_v31, %v7373_v31 }
 0x26d   :  { %v2726_v12 = vmul.f32 %v2724_v51, %v2716_v40  ;;  %v2626_v47 = vand.u32 2147483648, %v7162_v11  ;;  %v2656_v42 = vmul.f32 %v7035_v49, %v6563_v55  ;;  %v2948_v43 = vmul.f32 %v7378_v26, %v7378_v26 }
 0x26e   :  { %v2934_v45 = vmul.f32 -0.33333334, %v2931_v53  ;;  %v1254_v28 = vadd.f32 %v1253_v57, %v1251_v22  ;;  %v2780_v51 = vsub.f32 %v2772_v52, %v2778_v18  ;;  %v2784_v36 = vmul.f32 %v2782_v58, %v8763_v38 }
 0x26f   :  { %v3395_v41 = vadd.f32 -0.3333295, %v2726_v12  ;;  %v2619_v23 = vadd.f32 %v7311_v30, %v2618_v8  ;;  %v2666_v31 = vadd.f32 %v7165_v33, %v2662_v48  ;;  %v2712_v14 = vsel %vm7298_vm7, 0.7853982, %v8745_v63 }
 0x270   :  { %v3028_v49 = vmul.f32 %v7387_v13, %v7288_v62  ;;  %v3704_v29 = vpop.eup %3703  ;;  %v1255_v17 = vrot.slane %v1254_v28, 4  ;;  %v2786_v53 = vadd.f32 %v2784_v36, %v2780_v51  ;;  %3705 = vrcp.f32 %v3076_v50 }
 0x271   :  { %v2730_v61 = vmul.f32 %v3395_v41, %v2716_v40  ;;  %v2652_v33 = vmul.f32 %v7072_v56, %v7072_v56  ;;  %v7418_v5 = vadd.f32 %v2948_v43, %v7150_v44  ;;  %v7421_v48 = vmul.f32 %v7378_v26, %v2944_v16 }
 0x272   :  { %v2936_v40 = vmul.f32 1.442695, %v2934_v45  ;;  %vm7423_vm7 = vcmp.eq.f32.partialorder %v2624_v1, 8.507059e+37  ;;  %v1256_v52 = vadd.f32 %v1255_v17, %v1254_v28  ;;  %v2788_v18 = vmul.f32 %v2786_v53, %v7293_v37 }
 0x273   :  { %v2732_v12 = vmul.f32 %v2730_v61, %v7322_v10  ;;  %v2627_v58 = vor.u32 1.1754944e-38, %v2626_v47  ;;  %v2668_v57 = vmul.f32 %v2666_v31, %v2656_v42  ;;  %v2670_v22 = vmul.f32 %v2652_v33, %v7370_v0 }
 0x274   :  { %v2714_v43 = vsel %vm2688_vm4, 1.5707964, %v2712_v14  ;;  %v2623_v16 = vsel %vm7411_vm6, %v7311_v30, %v2619_v23  ;;  %v1257_v45 = vrot.slane %v1256_v52, 2  ;;  %2842 = vadd.xlane.f32.xlu0 %v2788_v18  ;;  %v3029_v61 = vmul.f32 %v7387_v13, %v3028_v49 }
 0x275   :  { %v2734_v1 = vadd.f32 %v2732_v12, %v7322_v10  ;;  %v2654_v17 = vmul.f32 %v2652_v33, %v7072_v56  ;;  %v2674_v31 = vmul.f32 %v7133_v9, %v7162_v11  ;;  %v3078_v47 = vsub.f32 %v7418_v5, %v7421_v48 }
 0x276   :  { %3707 = vpow2.f32 %v2936_v40  ;;  %v3706_v14 = vpop.eup %3705  ;;  %v454_v54 = vrot.slane %v7361_v4, 2  ;;  %v2572_v30 = vmul.f32 %v3704_v29, %v7368_v24  ;;  %v1258_v42 = vadd.f32 %v1257_v45, %v1256_v52 }
 0x277   :  { %v2736_v10 = vadd.f32 %v2734_v1, %v2714_v43  ;;  %v7446_v41 = vsel %vm7423_vm7, %v2627_v58, %v2623_v16  ;;  %v2672_v56 = vmul.f32 %v2670_v22, %v2668_v57  ;;  %vm2738_vm4 = vcmp.lt.f32.partialorder %v7214_v59, 0.0  ;;  %v7461_v59 = vld [vmem:[#allocation13 + $0x8] sm:$0xff] }
 0x278   :  { %v2956_v28 = vmul.f32 %v7418_v5, %v8714_v20  ;;  %v7453_v36 = vmul.f32 %v7133_v9, %v7118_v7  ;;  %v1259_v23 = vrot.slane %v1258_v42, 1  ;;  %v3030_v49 = vmul.f32 0.5, %v3029_v61 }
 0x279   :  { %v2740_v51 = vsub.f32 0.0, %v2736_v10  ;;  %v2676_v29 = vmul.f32 %v2674_v31, %v2654_v17  ;;  %v8774_v24 = vstv %s7156_s5  ;;  %v7458_v8 = vmul.f32 %v3706_v14, %v3078_v47 }
 0x27a   :  { %8773 = vst [vmem:[#allocation41_spill] sm:$0xff] %v7453_v36  ;;  %v2749_v53 = vmul.f32 %v7133_v9, %v8774_v24  ;;  %vm3033_vm8 = vweird.f32 %v7288_v62  ;;  %v7464_v40 = vmul.f32 %v7461_v59, %v2572_v30  ;;  %v2761_v50 = vmul.f32 %v7446_v41, %v7446_v41 }
 0x27b   :  { %v2742_v33 = vsel %vm2738_vm4, %v2740_v51, %v2736_v10  ;;  %v1260_v12 = vadd.f32 %v1259_v23, %v1258_v42  ;;  %v2958_v57 = vadd.f32 1.0, %v2956_v28  ;;  %v7469_v22 = vand.u32 2147483647, %v7458_v8  ;;  %v8777_v10 = vld [vmem:[#allocation38_spill] sm:$0xff] }
 0x27c   :  { %8775 = vst [vmem:[#allocation69_spill] sm:$0xff] %v7464_v40  ;;  %v3708_v52 = vpop.eup %3707  ;;  %v2744_v18 = vsub.f32 1.5707964, %v2742_v33  ;;  %v2755_v58 = vmul.f32 %v2749_v53, %v2672_v56  ;;  %v2773_v43 = vsub.f32 %v7162_v11, %v6563_v55  ;;  %v2795_v16 = vmul.f32 2.0, %v7453_v36 }
 0x27d   :  { %v1261_v1 = vmul.f32 %v1260_v12, %v8723_v32  ;;  %v3031_v45 = vsub.f32 1.5, %v3030_v49  ;;  %v2791_v17 = vsub.f32 %v7162_v11, %v8647_v6  ;;  %3709 = vrcp.f32 %v7109_v21 }
 0x27e   :  { %v2746_v61 = vmul.f32 %v2744_v18, %v2676_v29  ;;  %vm3034_vm10 = vweird.f32 %v7387_v13  ;;  %3711 = vrcp.f32 %v7469_v22  ;;  %v3096_v55 = vadd.f32 1.0, %v7469_v22 }
 0x27f   :  { %v1322_v31 = vsel %vm519_vm13, %v1261_v1, 0.0  ;;  %v7484_v47 = vmul.f32 %v3708_v52, %v8649_v19  ;;  %3713 = vlog2.f32 %v2958_v57  ;;  %vm3086_vm9 = vcmp.gt.f32.partialorder %v7469_v22, 2.4142137  ;;  %vm3035_vm11 = vmor %vm3033_vm8, %vm3034_vm10 }
 0x280   :  { %v2751_v14 = vmul.f32 %v2749_v53, %v2746_v61  ;;  %v7486_v30 = vadd.f32 %v2755_v58, %v2746_v61  ;;  %v1323_v11 = vsel %vm521_vm1, %v7086_v34, %v1322_v31  ;;  %3715 = vrcp.f32 %v3096_v55  ;;  %vm3090_vm15 = vmxor %vm3086_vm9, %vm3908_vm2  ;;  %v8780_v58 = vld [vmem:[#allocation80_spill] sm:$0xff] }
 0x281   :  { %v7494_v42 = vsel %vm523_vm3, %v8777_v10, %v1323_v11  ;;  %v3032_v28 = vmul.f32 %v7387_v13, %v3031_v45  ;;  %v7501_v51 = vmul.f32 %v2761_v50, %v7464_v40  ;;  %3717 = vrcp.f32 %v7418_v5 }
 0x282   :  { %8776 = vst [vmem:[#allocation42_spill] sm:$0xff] %v7486_v30  ;;  %v7498_v19 = vsub.f32 %v2672_v56, %v2751_v14  ;;  %v2797_v23 = vmul.f32 %v2795_v16, %v7486_v30  ;;  %v2801_v34 = vmul.f32 %v7486_v30, %v7486_v30  ;;  %vm3088_vm12 = vcmp.gt.f32.partialorder %v7469_v22, 0.41421357  ;;  %v8794_v30 = vld [vmem:[#allocation54_spill] sm:$0xff] }
 0x283   :  { %8779 = vst [vmem:[#allocation66_spill] sm:$0xff] %v7501_v51  ;;  %v3399_v56 = vadd.f32 -1.0, %v7469_v22  ;;  %v2943_v49 = vmul.f32 %v7340_v39, %v7484_v47  ;;  %v7515_v29 = vpop.eup %3709  ;;  %v492_v52 = vrot.slane %v7043_v25, 1  ;;  %v895_v18 = vrot.slane %v7062_v3, 2  ;;  %vm7541_vm0 = vmand %vm3088_vm12, %vm3090_vm15  ;;  %v1649_v39 = vpop.xlane.xlu0 %1648 }
 0x284   :  { %8778 = vst [vmem:[#allocation79_spill] sm:$0xff] %v7498_v19  ;;  %v2776_v24 = vmul.f32 %v7498_v19, %v7118_v7  ;;  %v2783_v53 = vmul.f32 %v7498_v19, %v7498_v19  ;;  %v2799_v33 = vsub.f32 %v2791_v17, %v2797_v23  ;;  %v2803_v50 = vmul.f32 %v2801_v34, %v6908_v15  ;;  %v3712_v12 = vpop.eup %3711  ;;  %v8795_v7 = vld [vmem:[#allocation49_spill] sm:$0xff] }
 0x285   :  { %v8781_v57 = vrot.slane %v8780_v58, 2  ;;  %v7531_v1 = vsel %vm3035_vm11, %v7387_v13, %v3032_v28  ;;  %v3714_v45 = vpop.eup %3713  ;;  %v1293_v61 = vrot.slane %v7352_v35, 2  ;;  %v455_v11 = vadd.f32 %v454_v54, %v7361_v4  ;;  %v3753_v28 = vld [vmem:[#allocation11] sm:$0xff] }
 0x286   :  { %v2779_v17 = vmul.f32 %v7385_v60, %v2776_v24  ;;  %v2785_v31 = vmul.f32 %v2783_v53, %v6908_v15  ;;  %v2805_v55 = vadd.f32 %v2803_v50, %v2799_v33  ;;  %v3716_v14 = vpop.eup %3715  ;;  %v3100_v13 = vsub.f32 0.0, %v3712_v12  ;;  %v8784_v33 = vld [vmem:[#allocation52_spill] sm:$0xff] }
 0x287   :  { %v1668_v16 = vadd.f32 %v8781_v57, %v8780_v58  ;;  %v7545_v23 = vadd.f32 %v3753_v28, %v2943_v49  ;;  %v3047_v60 = vmul.f32 %v7531_v1, %v7288_v62  ;;  %v2986_v53 = vmul.f32 %v7515_v29, %v7109_v21  ;;  %v7552_v54 = vpop.eup %3717 }
 0x288   :  { %v2781_v34 = vsub.f32 %v2773_v43, %v2779_v17  ;;  %v2807_v24 = vmul.f32 %v2805_v55, %v7501_v51  ;;  %v3104_v4 = vmul.f32 %v3716_v14, %v3399_v56  ;;  %v7556_v50 = vmul.f32 %v8784_v33, %v8723_v32 }
 0x289   :  { %v493_v12 = vadd.f32 %v492_v52, %v7043_v25  ;;  %v896_v58 = vadd.f32 %v895_v18, %v7062_v3  ;;  %v1669_v57 = vrot.slane %v1668_v16, 1  ;;  %v2962_v43 = vmul.f32 0.6931472, %v3714_v45  ;;  %v8786_v3 = vld [vmem:[#allocation32_spill] sm:$0xff]  ;;  %v8787_v52 = vld [vmem:[#allocation46_spill] sm:$0xff] }
 0x28a   :  { %8785 = vst [vmem:[#allocation70_spill] sm:$0xff] %v7556_v50  ;;  %v2787_v28 = vadd.f32 %v2785_v31, %v2781_v34  ;;  %2856 = vadd.xlane.f32.xlu2 %v2807_v24  ;;  %v3106_v17 = vsel %vm7541_vm0, %v3104_v4, %v7469_v22  ;;  %v3075_v55 = vmul.f32 %v3047_v60, %v2943_v49  ;;  %v456_v14 = vrot.slane %v455_v11, 1 }
 0x28b   :  { %v1294_v56 = vadd.f32 %v1293_v61, %v7352_v35  ;;  %v7566_v33 = vsel %vm3086_vm9, %v3100_v13, %v3106_v17  ;;  %v2947_v25 = vmul.f32 %v7545_v23, %v7545_v23  ;;  %v7572_v18 = vmul.f32 %v8787_v52, %v8786_v3 }
 0x28c   :  { %v2789_v45 = vmul.f32 %v2787_v28, %v7501_v51  ;;  %v2987_v31 = vsub.f32 1.0, %v2986_v53  ;;  %v3114_v60 = vmul.f32 %v7566_v33, %v7566_v33  ;;  %v7578_v35 = vmul.f32 %v493_v12, %v8786_v3 }
 0x28d   :  { %v897_v61 = vrot.slane %v896_v58, 1  ;;  %v3014_v13 = vmul.f32 %v7552_v54, %v7418_v5  ;;  %v3056_v34 = vmul.f32 2.0, %v7378_v26  ;;  %v1670_v24 = vadd.f32 %v1669_v57, %v1668_v16 }
 0x28e   :  { %2844 = vadd.xlane.f32.xlu1 %v2789_v45  ;;  %v2964_v4 = vmul.f32 -2.8333333, %v2962_v43  ;;  %v3116_v17 = vmul.f32 0.080537446, %v3114_v60  ;;  %3719 = vrcp.f32 %v3075_v55  ;;  %v1295_v52 = vrot.slane %v1294_v56, 1  ;;  %v8788_v45 = vld [vmem:[#allocation61_spill] sm:$0xff] }
 0x28f   :  { %v457_v28 = vadd.f32 %v456_v14, %v455_v11  ;;  %v7584_v53 = vadd.f32 %v2947_v25, %v7288_v62  ;;  %v7587_v37 = vmul.f32 %v7545_v23, %v2943_v49  ;;  %3721 = vrcp.f32 %v7284_v2 }
 0x290   :  { %v2988_v12 = vmul.f32 %v7515_v29, %v2987_v31  ;;  %vm2990_vm14 = vweird.f32 %v7109_v21  ;;  %v3401_v50 = vadd.f32 -0.13877685, %v3116_v17  ;;  %vm2991_vm5 = vweird.f32 %v7515_v29 }
 0x291   :  { %v2994_v16 = vand.u32 2147483647, %v7109_v21  ;;  %v3015_v57 = vsub.f32 1.0, %v3014_v13  ;;  %v3058_v11 = vmul.f32 %v3056_v34, %v7378_v26  ;;  %v2967_v43 = vmul.f32 1.442695, %v2964_v4  ;;  %vm7615_vm6 = vmor %vm2990_vm14, %vm2991_vm5 }
 0x292   :  { %v2996_v55 = vand.u32 2147483648, %v7109_v21  ;;  %v3120_v14 = vmul.f32 %v3401_v50, %v3114_v60  ;;  %v2955_v49 = vmul.f32 %v7584_v53, %v8714_v20  ;;  %v7598_v25 = vadd.f32 %v897_v61, %v896_v58 }
 0x293   :  { %v7601_v31 = vmul.f32 %v1670_v24, %v8788_v45  ;;  %v7603_v17 = vadd.f32 %v1295_v52, %v1294_v56  ;;  %v3077_v51 = vsub.f32 %v7584_v53, %v7587_v37  ;;  %v458_v34 = vmul.f32 %v457_v28, %v8786_v3 }
 0x294   :  { %v3720_v13 = vpop.eup %3719  ;;  %v2952_v4 = vmul.f32 %v7418_v5, %v7418_v5  ;;  %v2989_v50 = vadd.f32 %v7515_v29, %v2988_v12  ;;  %v3122_v36 = vadd.f32 0.19977711, %v3120_v14  ;;  %vm7619_vm7 = vcmp.eq.f32.partialorder %v2994_v16, 8.507059e+37  ;;  %v1651_v14 = vpop.xlane.xlu1 %1650 }
 0x295   :  { %v3016_v56 = vmul.f32 %v7552_v54, %v3015_v57  ;;  %vm3018_vm4 = vweird.f32 %v7418_v5  ;;  %v3060_v61 = vsub.f32 %v7418_v5, %v3058_v11  ;;  %v7626_v24 = vpop.eup %3721  ;;  %3723 = vpow2.f32 %v2967_v43 }
 0x296   :  { %v2997_v52 = vor.u32 1.1754944e-38, %v2996_v55  ;;  %v3124_v28 = vmul.f32 %v3122_v36, %v3114_v60  ;;  %v2957_v21 = vadd.f32 1.0, %v2955_v49  ;;  %vm3019_vm8 = vweird.f32 %v7552_v54  ;;  %v8793_v55 = vld [vmem:[#allocation34_spill] sm:$0xff] }
 0x297   :  { %v3022_v12 = vand.u32 2147483647, %v7418_v5  ;;  %v3024_v16 = vand.u32 2147483648, %v7418_v5  ;;  %v7631_v40 = vmul.f32 %v3720_v13, %v3077_v51  ;;  %v2993_v57 = vsel %vm7615_vm6, %v7515_v29, %v2989_v50  ;;  %vm7649_vm10 = vmor %vm3018_vm4, %vm3019_vm8 }
 0x298   :  { %v3050_v11 = vmul.f32 %v7349_v46, %v7349_v46  ;;  %v3403_v43 = vadd.f32 -0.3333295, %v3124_v28  ;;  %v1652_v36 = vadd.f32 %v1651_v14, %v1649_v39  ;;  %v2954_v49 = vmul.f32 %v2952_v4, %v8793_v55 }
 0x299   :  { %v3017_v3 = vadd.f32 %v7552_v54, %v3016_v56  ;;  %v3054_v19 = vmul.f32 %v8795_v7, %v8794_v30  ;;  %v3064_v15 = vadd.f32 %v7421_v48, %v3060_v61  ;;  %v3110_v39 = vsel %vm7541_vm0, 0.7853982, %v8745_v63 }
 0x29a   :  { %v3128_v29 = vmul.f32 %v3403_v43, %v3114_v60  ;;  %v1653_v13 = vrot.slane %v1652_v36, 4  ;;  %3725 = vlog2.f32 %v2957_v21  ;;  %v7658_v7 = vsel %vm7619_vm7, %v2997_v52, %v2993_v57 }
 0x29b   :  { %vm7660_vm11 = vcmp.eq.f32.partialorder %v3022_v12, 8.507059e+37  ;;  %v2972_v4 = vmul.f32 %v7626_v24, %v7284_v2  ;;  %v7667_v50 = vand.u32 2147483647, %v7631_v40  ;;  %v3724_v20 = vpop.eup %3723  ;;  %v3025_v10 = vor.u32 1.1754944e-38, %v3024_v16 }
 0x29c   :  { %v3052_v60 = vmul.f32 %v3050_v11, %v7349_v46  ;;  %v3130_v56 = vmul.f32 %v3128_v29, %v7566_v33  ;;  %v1654_v61 = vadd.f32 %v1653_v13, %v1652_v36  ;;  %v3021_v58 = vsel %vm7649_vm10, %v7552_v54, %v3017_v3 }
 0x29d   :  { %v3072_v52 = vmul.f32 %v7133_v9, %v7418_v5  ;;  %v3112_v28 = vsel %vm3086_vm9, 1.5707964, %v3110_v39  ;;  %3727 = vrcp.f32 %v7584_v53  ;;  %v3066_v21 = vmul.f32 %v3064_v15, %v3054_v19  ;;  %v7696_v39 = vpop.xlane.xlu2 %495 }
 0x29e   :  { %v3068_v12 = vmul.f32 %v3050_v11, %v7658_v7  ;;  %v3132_v46 = vadd.f32 %v3130_v56, %v7566_v33  ;;  %v1655_v16 = vrot.slane %v1654_v61, 2  ;;  %v2970_v14 = vmul.f32 %v3724_v20, %v2954_v49 }
 0x29f   :  { %v2973_v57 = vsub.f32 1.0, %v2972_v4  ;;  %3729 = vrcp.f32 %v7667_v50  ;;  %v3095_v54 = vadd.f32 1.0, %v7667_v50  ;;  %v7685_v22 = vsel %vm519_vm13, %v458_v34, 0.0 }
 0x2a0   :  { %v3726_v3 = vpop.eup %3725  ;;  %v7689_v15 = vsel %vm7660_vm11, %v3025_v10, %v3021_v58  ;;  %v3134_v19 = vadd.f32 %v3132_v46, %v3112_v28  ;;  %v1656_v11 = vadd.f32 %v1655_v16, %v1654_v61  ;;  %v3074_v33 = vmul.f32 %v3072_v52, %v3052_v60 }
 0x2a1   :  { %vm3136_vm9 = vcmp.lt.f32.partialorder %v7458_v8, 0.0  ;;  %vm3085_vm12 = vcmp.gt.f32.partialorder %v7667_v50, 2.4142137  ;;  %3731 = vrcp.f32 %v3095_v54  ;;  %v3070_v43 = vmul.f32 %v3068_v12, %v3066_v21 }
 0x2a2   :  { %v3138_v36 = vsub.f32 0.0, %v3134_v19  ;;  %v8389_v49 = vstv %s7643_s23  ;;  %v1657_v51 = vrot.slane %v1656_v11, 1  ;;  %v7699_v29 = vmul.f32 %v7461_v59, %v2970_v14  ;;  %vm7708_vm0 = vmxor %vm3085_vm12, %vm3908_vm2 }
 0x2a3   :  { %v7694_v34 = vpop.eup %3727  ;;  %v3159_v13 = vmul.f32 %v7689_v15, %v7689_v15  ;;  %v2960_v8 = vmul.f32 0.6931472, %v3726_v3  ;;  %v2974_v48 = vmul.f32 %v7626_v24, %v2973_v57  ;;  %vm3087_vm15 = vcmp.gt.f32.partialorder %v7667_v50, 0.41421357 }
 0x2a4   :  { %v3140_v4 = vsel %vm3136_vm9, %v3138_v36, %v3134_v19  ;;  %v1658_v20 = vadd.f32 %v1657_v51, %v1656_v11  ;;  %v3398_v59 = vadd.f32 -1.0, %v7667_v50  ;;  %v3147_v61 = vmul.f32 %v7133_v9, %v8389_v49  ;;  %vm7730_vm2 = vmand %vm3087_vm15, %vm7708_vm0  ;;  %v8814_v49 = vld [vmem:[#allocation59_spill] sm:$0xff] }
 0x2a5   :  { %v3730_v60 = vpop.eup %3729  ;;  %v3142_v56 = vsub.f32 1.5707964, %v3140_v4  ;;  %vm2976_vm14 = vweird.f32 %v7284_v2  ;;  %v2982_v58 = vand.u32 2147483648, %v7284_v2  ;;  %vm2977_vm5 = vweird.f32 %v7626_v24 }
 0x2a6   :  { %v1659_v52 = vmul.f32 %v1658_v20, %v8788_v45  ;;  %v2980_v28 = vand.u32 2147483647, %v7284_v2  ;;  %v3000_v21 = vmul.f32 %v7694_v34, %v7584_v53  ;;  %v3171_v16 = vsub.f32 %v7418_v5, %v8794_v30  ;;  %vm7749_vm6 = vmor %vm2976_vm14, %vm2977_vm5  ;;  %v8806_v20 = vld [vmem:[#allocation30_spill] sm:$0xff] }
 0x2a7   :  { %v3732_v12 = vpop.eup %3731  ;;  %v3144_v46 = vmul.f32 %v3142_v56, %v3074_v33  ;;  %v2963_v14 = vmul.f32 -2.8333333, %v2960_v8  ;;  %v3099_v54 = vsub.f32 0.0, %v3730_v60  ;;  %v7735_v3 = vmul.f32 %v3159_v13, %v7699_v29 }
 0x2a8   :  { %v1720_v19 = vsel %vm519_vm13, %v1659_v52, 0.0  ;;  %v2975_v11 = vadd.f32 %v7626_v24, %v2974_v48  ;;  %v3103_v33 = vmul.f32 %v3732_v12, %v3398_v59  ;;  %v7740_v51 = vstv %s3172_s24 }
 0x2a9   :  { %v3149_v36 = vmul.f32 %v3147_v61, %v3144_v46  ;;  %v1721_v8 = vsel %vm521_vm1, %v7601_v31, %v1720_v19  ;;  %v2983_v4 = vor.u32 1.1754944e-38, %v2982_v58  ;;  %vm7758_vm7 = vcmp.eq.f32.partialorder %v2980_v28, 8.507059e+37  ;;  %v7787_v19 = vpop.xlane.xlu2 %900 }
 0x2aa   :  { %v7756_v48 = vsel %vm523_vm3, %v8806_v20, %v1721_v8  ;;  %v3001_v59 = vsub.f32 1.0, %v3000_v21  ;;  %v3105_v31 = vsel %vm7730_vm2, %v3103_v33, %v7667_v50  ;;  %v2965_v60 = vmul.f32 1.442695, %v2963_v14 }
 0x2ab   :  { %8807 = vst [vmem:[#allocation25_spill] sm:$0xff] %v7756_v48  ;;  %v7765_v2 = vsub.f32 %v3070_v43, %v3149_v36  ;;  %v3055_v56 = vmul.f32 2.0, %v7545_v23  ;;  %v7770_v58 = vsel %vm3085_vm12, %v3099_v54, %v3105_v31  ;;  %v2979_v52 = vsel %vm7749_vm6, %v7626_v24, %v2975_v11 }
 0x2ac   :  { %v7777_v28 = vmul.f32 %v7770_v58, %v7770_v58  ;;  %v3153_v21 = vmul.f32 %v3147_v61, %v3070_v43  ;;  %v7781_v12 = vmul.f32 %v7133_v9, %v7378_v26  ;;  %vm3004_vm4 = vweird.f32 %v7584_v53 }
 0x2ad   :  { %v3174_v14 = vmul.f32 %v7765_v2, %v7378_v26  ;;  %v3181_v54 = vmul.f32 %v7765_v2, %v7765_v2  ;;  %vm3005_vm8 = vweird.f32 %v7694_v34  ;;  %v3002_v24 = vmul.f32 %v7694_v34, %v3001_v59 }
 0x2ae   :  { %8810 = vst [vmem:[#allocation60_spill] sm:$0xff] %v7781_v12  ;;  %v3115_v43 = vmul.f32 0.080537446, %v7777_v28  ;;  %v7793_v61 = vadd.f32 %v3153_v21, %v3144_v46  ;;  %v3193_v9 = vmul.f32 2.0, %v7781_v12  ;;  %3733 = vpow2.f32 %v2965_v60  ;;  %vm7818_vm10 = vmor %vm3004_vm4, %vm3005_vm8 }
 0x2af   :  { %v3177_v11 = vmul.f32 %v7740_v51, %v3174_v14  ;;  %v3183_v33 = vmul.f32 %v3181_v54, %v7150_v44  ;;  %v3057_v36 = vmul.f32 %v3055_v56, %v7545_v23  ;;  %v3189_v13 = vsub.f32 %v7418_v5, %v8647_v6  ;;  %v8811_v5 = vld [vmem:[#allocation73_spill] sm:$0xff] }
 0x2b0   :  { %v3400_v8 = vadd.f32 -0.13877685, %v3115_v43  ;;  %v3195_v20 = vmul.f32 %v3193_v9, %v7793_v61  ;;  %v3199_v59 = vmul.f32 %v7793_v61, %v7793_v61  ;;  %v2951_v31 = vmul.f32 %v7584_v53, %v7584_v53 }
 0x2b1   :  { %v3179_v46 = vsub.f32 %v3171_v16, %v3177_v11  ;;  %v3008_v21 = vand.u32 2147483647, %v7584_v53  ;;  %v3010_v14 = vand.u32 2147483648, %v7584_v53  ;;  %v3003_v60 = vadd.f32 %v7694_v34, %v3002_v24 }
 0x2b2   :  { %v3049_v56 = vmul.f32 %v7531_v1, %v7531_v1  ;;  %v3119_v6 = vmul.f32 %v3400_v8, %v7777_v28  ;;  %v2768_v54 = vmul.f32 %v8811_v5, %v8811_v5  ;;  %v3059_v9 = vsub.f32 %v7584_v53, %v3057_v36 }
 0x2b3   :  { %v3185_v43 = vadd.f32 %v3183_v33, %v3179_v46  ;;  %v3197_v24 = vsub.f32 %v3189_v13, %v3195_v20  ;;  %v3201_v11 = vmul.f32 %v3199_v59, %v7150_v44  ;;  %v522_v8 = vsel %vm521_vm1, %v7572_v18, %v7685_v22  ;;  %v7848_v59 = vld [vmem:[#allocation10] sm:$0xff] }
 0x2b4   :  { %v7830_v33 = vsel %vm7758_vm7, %v2983_v4, %v2979_v52  ;;  %v3121_v46 = vadd.f32 0.19977711, %v3119_v6  ;;  %v2770_v48 = vmul.f32 %v2768_v54, %v8814_v49  ;;  %v3734_v45 = vpop.eup %3733  ;;  %v2953_v36 = vmul.f32 %v2951_v31, %v8793_v55 }
 0x2b5   :  { %v3187_v12 = vmul.f32 %v3185_v43, %v7735_v3  ;;  %vm7835_vm11 = vcmp.eq.f32.partialorder %v3008_v21, 8.507059e+37  ;;  %v3011_v20 = vor.u32 1.1754944e-38, %v3010_v14  ;;  %v3007_v18 = vsel %vm7818_vm10, %v7694_v34, %v3003_v60  ;;  %v498_v14 = vpop.xlane.xlu0 %497  ;;  %v7852_v34 = vpop.xlane.xlu2 %1298  ;;  %v8817_v60 = vld [vmem:[#allocation33_spill] sm:$0xff] }
 0x2b6   :  { %v3053_v22 = vmul.f32 %v7484_v47, %v8794_v30  ;;  %v3123_v4 = vmul.f32 %v3121_v46, %v7777_v28  ;;  %v2808_v10 = vmul.f32 %v2770_v48, %v8763_v38  ;;  %v3051_v52 = vmul.f32 %v3049_v56, %v7531_v1  ;;  %v8819_v46 = vld [vmem:[#allocation65_spill] sm:$0xff] }
 0x2b7   :  { %3242 = vadd.xlane.f32.xlu1 %v3187_v12  ;;  %v3063_v55 = vadd.f32 %v7587_v37, %v3059_v9  ;;  %v3071_v31 = vmul.f32 %v7848_v59, %v7584_v53  ;;  %v3203_v21 = vadd.f32 %v3201_v11, %v3197_v24  ;;  %v899_v47 = vmul.f32 %v7598_v25, %v8817_v60  ;;  %v8818_v37 = vld [vmem:[#allocation64_spill] sm:$0xff] }
 0x2b8   :  { %v1297_v48 = vmul.f32 %v7603_v17, %v8723_v32  ;;  %v3402_v12 = vadd.f32 -0.3333295, %v3123_v4  ;;  %2866 = vadd.xlane.f32.xlu2 %v2808_v10  ;;  %v499_v1 = vadd.f32 %v498_v14, %v7696_v39  ;;  %v524_v6 = vsel %vm523_vm3, %v8818_v37, %v522_v8 }
 0x2b9   :  { %v2969_v54 = vmul.f32 %v3734_v45, %v2953_v36  ;;  %v3012_v43 = vsel %vm7835_vm11, %v3011_v20, %v3007_v18  ;;  %v3067_v16 = vmul.f32 %v3049_v56, %v7830_v33  ;;  %v3109_v25 = vsel %vm7730_vm2, 0.7853982, %v8745_v63 }
 0x2ba   :  { %v3127_v17 = vmul.f32 %v3402_v12, %v7777_v28  ;;  %v500_v9 = vrot.slane %v499_v1, 4  ;;  %v3167_v39 = vmul.f32 %v7658_v7, %v7658_v7  ;;  %v3065_v24 = vmul.f32 %v3063_v55, %v3053_v22 }
 0x2bb   :  { %v3073_v11 = vmul.f32 %v3071_v31, %v3051_v52  ;;  %v3205_v45 = vmul.f32 %v3203_v21, %v7735_v3  ;;  %v3166_v8 = vmul.f32 %v7830_v33, %v7830_v33  ;;  %vm3135_vm9 = vcmp.lt.f32.partialorder %v7631_v40, 0.0  ;;  %v8829_v40 = vld [vmem:[#allocation69_spill] sm:$0xff] }
 0x2bc   :  { %v3129_v56 = vmul.f32 %v3127_v17, %v7770_v58  ;;  %v501_v57 = vadd.f32 %v500_v9, %v499_v1  ;;  %v3169_v63 = vmul.f32 %v3167_v39, %v7699_v29  ;;  %v3111_v28 = vsel %vm3085_vm12, 1.5707964, %v3109_v25  ;;  %v8821_v9 = vld [vmem:[#allocation55_spill] sm:$0xff] }
 0x2bd   :  { %v7880_v36 = vmul.f32 %v8819_v46, %v2969_v54  ;;  %v3158_v13 = vmul.f32 %v3012_v43, %v3012_v43  ;;  %v7884_v20 = vmul.f32 %v7848_v59, %v7545_v23  ;;  %vm525_vm15 = vcmp.eq.s32.totalorder %v7123_v27, 3  ;;  %v903_v31 = vpop.xlane.xlu0 %902  ;;  %v7893_v21 = vpop.xlane.xlu2 %1696  ;;  %v8825_v46 = vld [vmem:[#allocation74_spill] sm:$0xff] }
 0x2be   :  { %v3131_v18 = vadd.f32 %v3129_v56, %v7770_v58  ;;  %v502_v22 = vrot.slane %v501_v57, 2  ;;  %v3207_v4 = vmul.f32 %v3169_v63, %v7150_v44  ;;  %v3069_v10 = vmul.f32 %v3067_v16, %v3065_v24 }
 0x2bf   :  { %v8820_v52 = vstv %s7643_s23  ;;  %3254 = vadd.xlane.f32.xlu1 %v3205_v45  ;;  %v3168_v55 = vmul.f32 %v3166_v8, %v7880_v36  ;;  %v7898_v14 = vsel %vm525_vm15, %v1297_v48, %v7494_v42  ;;  %v3170_v12 = vsub.f32 %v7584_v53, %v8794_v30  ;;  %v8822_v8 = vld [vmem:[#allocation76_spill] sm:$0xff] }
 0x2c0   :  { %v3146_v50 = vmul.f32 %v7848_v59, %v8820_v52  ;;  %v3133_v58 = vadd.f32 %v3131_v18, %v3111_v28  ;;  %v503_v1 = vadd.f32 %v502_v22, %v501_v57  ;;  %3266 = vadd.xlane.f32.xlu2 %v3207_v4  ;;  %v904_v37 = vadd.f32 %v903_v31, %v7787_v19  ;;  %v8824_v28 = vld [vmem:[#allocation27_spill] sm:$0xff]  ;;  %v8826_v18 = vld [vmem:[#allocation42_spill] sm:$0xff]  ;;  %v8827_v4 = vld [vmem:[#allocation32_spill] sm:$0xff] }
 0x2c1   :  { %v7904_v54 = vmul.f32 %v3158_v13, %v7880_v36  ;;  %v526_v16 = vsel %vm525_vm15, %v7578_v35, %v524_v6  ;;  %v3192_v17 = vmul.f32 2.0, %v7884_v20  ;;  %v7913_v39 = vsel %vm525_vm15, %v899_v47, %v8821_v9  ;;  %v8823_v35 = vld [vmem:[#allocation79_spill] sm:$0xff]  ;;  %v8828_v52 = vld [vmem:[#allocation22_spill] sm:$0xff]  ;;  %v1687_v9 = vpop.xlane.xlu1 %1686 }
 0x2c2   :  { %v3152_v25 = vmul.f32 %v3146_v50, %v3069_v10  ;;  %v3137_v42 = vsub.f32 0.0, %v3133_v58  ;;  %v504_v48 = vrot.slane %v503_v1, 1  ;;  %v905_v24 = vrot.slane %v904_v37, 4 }
 0x2c3   :  { %vm527_vm12 = vcmp.eq.s32.totalorder %v7123_v27, 4  ;;  %v3206_v19 = vmul.f32 %v3168_v55, %v7288_v62  ;;  %v2765_v45 = vmul.f32 %v7446_v41, %v7370_v0  ;;  %v2811_v6 = vmul.f32 %v8823_v35, %v8822_v8 }
 0x2c4   :  { %v3139_v56 = vsel %vm3135_vm9, %v3137_v42, %v3133_v58  ;;  %vm529_vm0 = vcmp.eq.s32.totalorder %v7123_v27, 5  ;;  %v505_v57 = vadd.f32 %v504_v48, %v503_v1  ;;  %v906_v63 = vadd.f32 %v905_v24, %v904_v37  ;;  %v7935_v24 = vld [vmem:[#allocation10 + $0x8] sm:$0xff] }
 0x2c5   :  { %v3141_v47 = vsub.f32 1.5707964, %v3139_v56  ;;  %vm531_vm14 = vcmask 57344   ;;  %v2813_v13 = vmul.f32 %v8825_v46, %v8824_v28  ;;  %v2819_v22 = vmul.f32 %v8826_v18, %v8823_v35  ;;  %v1301_v48 = vpop.xlane.xlu0 %1300 }
 0x2c6   :  { %v506_v41 = vmul.f32 %v505_v57, %v8827_v4  ;;  %v3188_v55 = vsub.f32 %v7584_v53, %v8828_v52  ;;  %v907_v31 = vrot.slane %v906_v63, 2  ;;  %v7932_v58 = vmul.f32 %v2765_v45, %v8829_v40  ;;  %v1711_v45 = vpop.xlane.xlu2 %1710 }
 0x2c7   :  { %v3143_v42 = vmul.f32 %v3141_v47, %v3073_v11  ;;  %3264 = vadd.xlane.f32.xlu1 %v3206_v19  ;;  %v3162_v1 = vmul.f32 %v3012_v43, %v7830_v33  ;;  %v2815_v37 = vsub.f32 %v2811_v6, %v2813_v13  ;;  %v2823_v56 = vmul.f32 %v7935_v24, %v8824_v28  ;;  %v8830_v47 = vld [vmem:[#allocation67_spill] sm:$0xff] }
 0x2c8   :  { %v528_v57 = vsel %vm527_vm12, %v506_v41, %v526_v16  ;;  %v908_v46 = vadd.f32 %v907_v31, %v906_v63  ;;  %v1302_v4 = vadd.f32 %v1301_v48, %v7852_v34  ;;  %v2821_v11 = vmul.f32 %v2819_v22, %v8822_v8  ;;  %v8831_v63 = vld [vmem:[#allocation71_spill] sm:$0xff] }
 0x2c9   :  { %v3148_v19 = vmul.f32 %v3146_v50, %v3143_v42  ;;  %v530_v33 = vsel %vm529_vm0, %v8830_v47, %v528_v57  ;;  %v7946_v43 = vadd.f32 %v3152_v25, %v3143_v42  ;;  %v7950_v6 = vmul.f32 %v7370_v0, %v7370_v0 }
 0x2ca   :  { %532 = vst.msk [vmem:[#allocation14] sm:$0x1] %vm531_vm14, %v530_v33  ;;  %v909_v16 = vrot.slane %v908_v46, 1  ;;  %v7955_v34 = vmul.f32 %v7545_v23, %v8831_v63  ;;  %v2817_v22 = vmul.f32 %v2815_v37, %v7932_v58  ;;  %v1303_v50 = vrot.slane %v1302_v4, 4 }
 0x2cb   :  { %v7958_v41 = vsub.f32 %v3069_v10, %v3148_v19  ;;  %v3194_v52 = vmul.f32 %v3192_v17, %v7946_v43  ;;  %v3198_v25 = vmul.f32 %v7946_v43, %v7946_v43  ;;  %v2825_v31 = vsub.f32 %v2821_v11, %v2823_v56 }
 0x2cc   :  { %v910_v0 = vadd.f32 %v909_v16, %v908_v46  ;;  %v7964_v42 = vmul.f32 %v3162_v1, %v7880_v36  ;;  %v1304_v48 = vadd.f32 %v1303_v50, %v1302_v4  ;;  %v2827_v57 = vmul.f32 %v2813_v13, %v8826_v18  ;;  %v1709_v16 = vpop.xlane.xlu1 %1708 }
 0x2cd   :  { %v3173_v47 = vmul.f32 %v7958_v41, %v7545_v23  ;;  %v3180_v10 = vmul.f32 %v7958_v41, %v7958_v41  ;;  %v3196_v37 = vsub.f32 %v3188_v55, %v3194_v52  ;;  %v3200_v17 = vmul.f32 %v3198_v25, %v7288_v62  ;;  %v8832_v23 = vld [vmem:[#allocation77_spill] sm:$0xff]  ;;  %v1685_v33 = vpop.xlane.xlu0 %1684  ;;  %v8835_v25 = vld [vmem:[#allocation48_spill] sm:$0xff] }
 0x2ce   :  { %v911_v19 = vmul.f32 %v910_v0, %v8817_v60  ;;  %v3208_v56 = vmul.f32 %v7958_v41, %v7288_v62  ;;  %v1305_v46 = vrot.slane %v1304_v48, 2  ;;  %v2829_v36 = vsub.f32 %v2825_v31, %v2827_v57  ;;  %v8833_v55 = vld [vmem:[#allocation41_spill] sm:$0xff] }
 0x2cf   :  { %v3176_v1 = vmul.f32 %v7740_v51, %v3173_v47  ;;  %v3182_v13 = vmul.f32 %v3180_v10, %v7288_v62  ;;  %2880 = vadd.xlane.f32.xlu1 %v2817_v22  ;;  %v7979_v4 = vmul.f32 %v8832_v23, %v8824_v28  ;;  %v2831_v11 = vmul.f32 %v8833_v55, %v8823_v35  ;;  %v8834_v51 = vld [vmem:[#allocation43_spill] sm:$0xff]  ;;  %v7989_v22 = vpop.xlane.xlu2 %2058  ;;  %v8836_v35 = vld [vmem:[#allocation68_spill] sm:$0xff]  ;;  %v8837_v23 = vld [vmem:[#allocation66_spill] sm:$0xff] }
 0x2d0   :  { %v928_v60 = vsel %vm527_vm12, %v911_v19, %v7913_v39  ;;  %v3212_v50 = vsub.f32 %v3208_v56, %v7955_v34  ;;  %v1306_v52 = vadd.f32 %v1305_v46, %v1304_v48  ;;  %v2818_v31 = vmul.f32 %v8835_v25, %v8834_v51 }
 0x2d1   :  { %v3178_v0 = vsub.f32 %v3170_v12, %v3176_v1  ;;  %v3202_v57 = vadd.f32 %v3200_v17, %v3196_v37  ;;  %v929_v47 = vsel %vm529_vm0, %v8836_v35, %v928_v60  ;;  %v2833_v10 = vsub.f32 %v2829_v36, %v2831_v11  ;;  %v8838_v12 = vld [vmem:[#allocation50_spill] sm:$0xff] }
 0x2d2   :  { %930 = vst.msk [vmem:[#allocation14 + $0x1] sm:$0x1] %vm531_vm14, %v929_v47  ;;  %v3214_v39 = vmul.f32 %v3212_v50, %v7964_v42  ;;  %v1307_v48 = vrot.slane %v1306_v52, 1  ;;  %v2820_v19 = vmul.f32 %v2818_v31, %v8763_v38  ;;  %v2822_v56 = vmul.f32 %v7848_v59, %v8824_v28 }
 0x2d3   :  { %v3184_v46 = vadd.f32 %v3182_v13, %v3178_v0  ;;  %v2835_v30 = vmul.f32 %v2833_v10, %v8837_v23  ;;  %v2826_v53 = vmul.f32 %v7979_v4, %v8835_v25  ;;  %v2830_v37 = vmul.f32 %v8838_v12, %v8834_v51 }
 0x2d4   :  { %3276 = vadd.xlane.f32.xlu2 %v3214_v39  ;;  %v1308_v17 = vadd.f32 %v1307_v48, %v1306_v52  ;;  %v2824_v36 = vsub.f32 %v2820_v19, %v2822_v56  ;;  %v1688_v1 = vadd.f32 %v1687_v9, %v1685_v33  ;;  %v1712_v11 = vadd.f32 %v1711_v45, %v1709_v16  ;;  %v2049_v16 = vpop.xlane.xlu1 %2048  ;;  %v8839_v19 = vld [vmem:[#allocation70_spill] sm:$0xff]  ;;  %v8840_v56 = vld [vmem:[#allocation47_spill] sm:$0xff] }
 0x2d5   :  { %v3186_v60 = vmul.f32 %v3184_v46, %v7904_v54  ;;  %v3163_v50 = vmul.f32 %v7689_v15, %v7658_v7  ;;  %v3209_v13 = vmul.f32 %v7765_v2, %v7150_v44  ;;  %v3211_v31 = vmul.f32 %v7378_v26, %v8831_v63  ;;  %v1699_v15 = vpop.xlane.xlu0 %1698 }
 0x2d6   :  { %v1309_v0 = vmul.f32 %v1308_v17, %v8723_v32  ;;  %v2828_v35 = vsub.f32 %v2824_v36, %v2826_v53  ;;  %v1689_v47 = vrot.slane %v1688_v1, 4  ;;  %v1713_v10 = vrot.slane %v1712_v11, 4  ;;  %v8841_v53 = vld [vmem:[#allocation45_spill] sm:$0xff] }
 0x2d7   :  { %3240 = vadd.xlane.f32.xlu0 %v3186_v60  ;;  %v8016_v9 = vmul.f32 %v3163_v50, %v7699_v29  ;;  %v3213_v45 = vsub.f32 %v3209_v13, %v3211_v31  ;;  %v2836_v33 = vmul.f32 %v8835_v25, %v8763_v38  ;;  %v3217_v7 = vmul.f32 %v7793_v61, %v7765_v2  ;;  %v2073_v48 = vpop.xlane.xlu2 %2072 }
 0x2d8   :  { %v1326_v32 = vsel %vm527_vm12, %v1309_v0, %v7898_v14  ;;  %v2832_v26 = vsub.f32 %v2828_v35, %v2830_v37  ;;  %v1690_v52 = vadd.f32 %v1689_v47, %v1688_v1  ;;  %v1714_v39 = vadd.f32 %v1713_v10, %v1712_v11  ;;  %v8842_v0 = vld [vmem:[#allocation60_spill] sm:$0xff] }
 0x2d9   :  { %v1327_v29 = vsel %vm529_vm0, %v8839_v19, %v1326_v32  ;;  %v2764_v25 = vmul.f32 %v8840_v56, %v8811_v5  ;;  %v8031_v46 = vmul.f32 %v3213_v45, %v8016_v9  ;;  %v3219_v23 = vmul.f32 %v3217_v7, %v7150_v44 }
 0x2da   :  { %1328 = vst.msk [vmem:[#allocation14 + $0x2] sm:$0x1] %vm531_vm14, %v1327_v29  ;;  %v2834_v14 = vmul.f32 %v2832_v26, %v8841_v53  ;;  %v1691_v37 = vrot.slane %v1690_v52, 2  ;;  %v1715_v17 = vrot.slane %v1714_v39, 2  ;;  %v3221_v36 = vmul.f32 %v7935_v24, %v8831_v63 }
 0x2db   :  { %v3204_v1 = vmul.f32 %v3202_v57, %v7904_v54  ;;  %v2838_v11 = vsub.f32 %v2836_v33, %v8838_v12  ;;  %v3225_v5 = vmul.f32 %v3211_v31, %v7793_v61  ;;  %v1700_v60 = vadd.f32 %v1699_v15, %v7893_v21 }
 0x2dc   :  { %2892 = vadd.xlane.f32.xlu2 %v2835_v30  ;;  %2890 = vadd.xlane.f32.xlu1 %v2834_v14  ;;  %v1692_v50 = vadd.f32 %v1691_v37, %v1690_v52  ;;  %v3223_v13 = vsub.f32 %v3219_v23, %v3221_v36  ;;  %v3229_v35 = vmul.f32 %v8842_v0, %v7765_v2  ;;  %v2071_v21 = vpop.xlane.xlu1 %2070 }
 0x2dd   :  { %v1701_v47 = vrot.slane %v1700_v60, 4  ;;  %v2766_v10 = vmul.f32 %v2764_v25, %v8814_v49  ;;  %v1716_v24 = vadd.f32 %v1715_v17, %v1714_v39  ;;  %v2771_v57 = vmul.f32 %v7950_v6, %v8829_v40  ;;  %v2047_v31 = vpop.xlane.xlu0 %2046  ;;  %v8843_v25 = vld [vmem:[#allocation61_spill] sm:$0xff] }
 0x2de   :  { %v1693_v45 = vrot.slane %v1692_v50, 1  ;;  %v3227_v7 = vsub.f32 %v3223_v13, %v3225_v5  ;;  %v3235_v15 = vmul.f32 %v7793_v61, %v7150_v44  ;;  %v3234_v2 = vmul.f32 %v7946_v43, %v7288_v62 }
 0x2df   :  { %3252 = vadd.xlane.f32.xlu0 %v3204_v1  ;;  %v1702_v12 = vadd.f32 %v1701_v47, %v1700_v60  ;;  %v2840_v30 = vmul.f32 %v2838_v11, %v2766_v10  ;;  %v8051_v32 = vpop.xlane.xlu2 %2094  ;;  %v1717_v52 = vrot.slane %v1716_v24, 1  ;;  %v2050_v19 = vadd.f32 %v2049_v16, %v2047_v31 }
 0x2e0   :  { %v3231_v33 = vsub.f32 %v3227_v7, %v3229_v35  ;;  %v1694_v26 = vadd.f32 %v1693_v45, %v1692_v50  ;;  %v2809_v40 = vmul.f32 %v2771_v57, %v8822_v8  ;;  %v2810_v6 = vmul.f32 %v8834_v51, %v8763_v38  ;;  %v8844_v50 = vld [vmem:[#allocation25_spill] sm:$0xff] }
 0x2e1   :  { %v1703_v49 = vrot.slane %v1702_v12, 2  ;;  %v3237_v44 = vsub.f32 %v3235_v15, %v8842_v0  ;;  %v3236_v61 = vsub.f32 %v3234_v2, %v7884_v20  ;;  %v1718_v53 = vadd.f32 %v1717_v52, %v1716_v24 }
 0x2e2   :  { %v3233_v39 = vmul.f32 %v3231_v33, %v7735_v3  ;;  %v1695_v23 = vmul.f32 %v1694_v26, %v8843_v25  ;;  %v2051_v14 = vrot.slane %v2050_v19, 4  ;;  %v2814_v3 = vsub.f32 %v2810_v6, %v7979_v4 }
 0x2e3   :  { %v1704_v29 = vadd.f32 %v1703_v49, %v1702_v12  ;;  %v3216_v37 = vmul.f32 %v7946_v43, %v7958_v41  ;;  %v3239_v17 = vmul.f32 %v3237_v44, %v8016_v9  ;;  %v3238_v36 = vmul.f32 %v3236_v61, %v7964_v42 }
 0x2e4   :  { %2902 = vadd.xlane.f32.xlu2 %v2840_v30  ;;  %3290 = vadd.xlane.f32.xlu1 %v3233_v39  ;;  %v2085_v51 = vpop.xlane.xlu1 %2084  ;;  %v2074_v1 = vadd.f32 %v2073_v48, %v2071_v21  ;;  %v1723_v4 = vsel %vm525_vm15, %v1695_v23, %v8844_v50  ;;  %v1719_v13 = vmul.f32 %v1718_v53, %v8843_v25 }
 0x2e5   :  { %v1705_v56 = vrot.slane %v1704_v29, 1  ;;  %v2061_v38 = vpop.xlane.xlu0 %2060  ;;  %v2052_v0 = vadd.f32 %v2051_v14, %v2050_v19  ;;  %v2816_v47 = vmul.f32 %v2814_v3, %v2766_v10  ;;  %v3218_v42 = vmul.f32 %v3216_v37, %v7288_v62 }
 0x2e6   :  { %v2062_v11 = vadd.f32 %v2061_v38, %v7989_v22  ;;  %v3220_v22 = vmul.f32 %v7848_v59, %v8831_v63  ;;  %v2075_v45 = vrot.slane %v2074_v1, 4  ;;  %v3224_v57 = vmul.f32 %v7955_v34, %v7946_v43 }
 0x2e7   :  { %2868 = vadd.xlane.f32.xlu0 %v2809_v40  ;;  %v1706_v16 = vadd.f32 %v1705_v56, %v1704_v29  ;;  %v2109_v5 = vpop.xlane.xlu2 %2108  ;;  %v2053_v7 = vrot.slane %v2052_v0, 2  ;;  %v3228_v52 = vmul.f32 %v7884_v20, %v7958_v41  ;;  %v2837_v20 = vmul.f32 %v8826_v18, %v8822_v8 }
 0x2e8   :  { %v2063_v35 = vrot.slane %v2062_v11, 4  ;;  %v3222_v10 = vsub.f32 %v3218_v42, %v3220_v22  ;;  %v2076_v21 = vadd.f32 %v2075_v45, %v2074_v1  ;;  %v8845_v1 = vld [vmem:[#allocation36_spill] sm:$0xff] }
 0x2e9   :  { %v1707_v60 = vmul.f32 %v1706_v16, %v8843_v25  ;;  %v2054_v15 = vadd.f32 %v2053_v7, %v2052_v0 }
 0x2ea   :  { %v2064_v24 = vadd.f32 %v2063_v35, %v2062_v11  ;;  %v3226_v26 = vsub.f32 %v3222_v10, %v3224_v57  ;;  %v2077_v19 = vrot.slane %v2076_v21, 2 }
 0x2eb   :  { %v1724_v9 = vsel %vm527_vm12, %v1707_v60, %v1723_v4  ;;  %v2055_v29 = vrot.slane %v2054_v15, 1  ;;  %v2839_v60 = vsub.f32 %v2837_v20, %v8833_v55 }
 0x2ec   :  { %v1725_v48 = vsel %vm529_vm0, %v1719_v13, %v1724_v9  ;;  %3302 = vadd.xlane.f32.xlu2 %v3239_v17  ;;  %3300 = vadd.xlane.f32.xlu1 %v3238_v36  ;;  %v2065_v12 = vrot.slane %v2064_v24, 2  ;;  %v2107_v31 = vpop.xlane.xlu1 %2106  ;;  %v3230_v34 = vsub.f32 %v3226_v26, %v3228_v52  ;;  %v2078_v23 = vadd.f32 %v2077_v19, %v2076_v21 }
 0x2ed   :  { %1726 = vst.msk [vmem:[#allocation14 + $0x3] sm:$0x1] %vm531_vm14, %v1725_v48  ;;  %v2083_v62 = vpop.xlane.xlu0 %2082  ;;  %v2110_v30 = vadd.f32 %v2109_v5, %v2107_v31  ;;  %v2056_v3 = vadd.f32 %v2055_v29, %v2054_v15  ;;  %v2841_v9 = vmul.f32 %v2839_v60, %v7932_v58 }
 0x2ee   :  { %v2086_v59 = vadd.f32 %v2085_v51, %v2083_v62  ;;  %v2066_v39 = vadd.f32 %v2065_v12, %v2064_v24  ;;  %v3232_v37 = vmul.f32 %v3230_v34, %v7904_v54  ;;  %v2079_v17 = vrot.slane %v2078_v23, 1 }
 0x2ef   :  { %2878 = vadd.xlane.f32.xlu0 %v2816_v47  ;;  %v2457_v33 = vpop.xlane.xlu2 %2456  ;;  %v2111_v49 = vrot.slane %v2110_v30, 4  ;;  %v2057_v11 = vmul.f32 %v2056_v3, %v8845_v1 }
 0x2f0   :  { %v2087_v2 = vrot.slane %v2086_v59, 4  ;;  %v2067_v44 = vrot.slane %v2066_v39, 1  ;;  %v2080_v13 = vadd.f32 %v2079_v17, %v2078_v23 }
 0x2f1   :  { %v2112_v6 = vadd.f32 %v2111_v49, %v2110_v30  ;;  %v2118_v54 = vsel %vm519_vm13, %v2057_v11, 0.0 }
 0x2f2   :  { %v2088_v40 = vadd.f32 %v2087_v2, %v2086_v59  ;;  %v2068_v38 = vadd.f32 %v2067_v44, %v2066_v39  ;;  %v2081_v48 = vmul.f32 %v2080_v13, %v8845_v1 }
 0x2f3   :  { %v2113_v61 = vrot.slane %v2112_v6, 2 }
 0x2f4   :  { %v2089_v43 = vrot.slane %v2088_v40, 2  ;;  %v2447_v25 = vpop.xlane.xlu1 %2446 }
 0x2f5   :  { %v2097_v56 = vpop.xlane.xlu0 %2096 }
 0x2f6   :  { %v2090_v53 = vadd.f32 %v2089_v43, %v2088_v40  ;;  %v2098_v14 = vadd.f32 %v2097_v56, %v8051_v32  ;;  %v2069_v32 = vmul.f32 %v2068_v38, %v8845_v1 }
 0x2f7   :  { %3278 = vadd.xlane.f32.xlu0 %v8031_v46  ;;  %v2471_v16 = vpop.xlane.xlu2 %2470  ;;  %v2114_v46 = vadd.f32 %v2113_v61, %v2112_v6 }
 0x2f8   :  { %v2099_v41 = vrot.slane %v2098_v14, 4  ;;  %v2091_v51 = vrot.slane %v2090_v53, 1  ;;  %v2119_v42 = vsel %vm521_vm1, %v2069_v32, %v2118_v54 }
 0x2f9   :  { %v2115_v4 = vrot.slane %v2114_v46, 1  ;;  %v2120_v7 = vsel %vm523_vm3, %v2081_v48, %v2119_v42 }
 0x2fa   :  { %v2100_v36 = vadd.f32 %v2099_v41, %v2098_v14  ;;  %v2092_v50 = vadd.f32 %v2091_v51, %v2090_v53 }
 0x2fb   :  { %v2116_v22 = vadd.f32 %v2115_v4, %v2114_v46 }
 0x2fc   :  { %v2101_v5 = vrot.slane %v2100_v36, 2  ;;  %v2469_v18 = vpop.xlane.xlu1 %2468  ;;  %v2093_v55 = vmul.f32 %v2092_v50, %v8845_v1  ;;  %v8846_v50 = vld [vmem:[#allocation40_spill] sm:$0xff] }
 0x2fd   :  { %v2445_v8 = vpop.xlane.xlu0 %2444  ;;  %v2117_v12 = vmul.f32 %v2116_v22, %v8845_v1  ;;  %v2472_v59 = vadd.f32 %v2471_v16, %v2469_v18 }
 0x2fe   :  { %v2102_v0 = vadd.f32 %v2101_v5, %v2100_v36  ;;  %v2448_v47 = vadd.f32 %v2447_v25, %v2445_v8  ;;  %v2121_v58 = vsel %vm525_vm15, %v2093_v55, %v2120_v7 }
 0x2ff   :  { %3288 = vadd.xlane.f32.xlu0 %v3232_v37  ;;  %v2493_v24 = vpop.xlane.xlu2 %2492  ;;  %v2473_v26 = vrot.slane %v2472_v59, 4 }
 0x300   :  { %v2103_v35 = vrot.slane %v2102_v0, 1  ;;  %v2449_v57 = vrot.slane %v2448_v47, 4 }
 0x301   :  { %v2474_v43 = vadd.f32 %v2473_v26, %v2472_v59 }
 0x302   :  { %v2104_v45 = vadd.f32 %v2103_v35, %v2102_v0  ;;  %v2450_v2 = vadd.f32 %v2449_v57, %v2448_v47 }
 0x303   :  { %v2475_v23 = vrot.slane %v2474_v43, 2 }
 0x304   :  { %v2105_v10 = vmul.f32 %v2104_v45, %v8845_v1  ;;  %v2483_v31 = vpop.xlane.xlu1 %2482  ;;  %v2451_v39 = vrot.slane %v2450_v2, 2 }
 0x305   :  { %v2459_v62 = vpop.xlane.xlu0 %2458  ;;  %v2476_v38 = vadd.f32 %v2475_v23, %v2474_v43 }
 0x306   :  { %v2122_v21 = vsel %vm527_vm12, %v2105_v10, %v2121_v58  ;;  %v2460_v30 = vadd.f32 %v2459_v62, %v2457_v33  ;;  %v2452_v61 = vadd.f32 %v2451_v39, %v2450_v2 }
 0x307   :  { %2904 = vadd.xlane.f32.xlu0 %v2841_v9  ;;  %v2123_v15 = vsel %vm529_vm0, %v2117_v12, %v2122_v21  ;;  %v2507_v19 = vpop.xlane.xlu2 %2506  ;;  %v2477_v60 = vrot.slane %v2476_v38, 1 }
 0x308   :  { %2124 = vst.msk [vmem:[#allocation14 + $0x4] sm:$0x1] %vm531_vm14, %v2123_v15  ;;  %v2461_v49 = vrot.slane %v2460_v30, 4  ;;  %v2453_v3 = vrot.slane %v2452_v61, 1 }
 0x309   :  { %v2478_v54 = vadd.f32 %v2477_v60, %v2476_v38 }
 0x30a   :  { %v2462_v52 = vadd.f32 %v2461_v49, %v2460_v30  ;;  %v2454_v17 = vadd.f32 %v2453_v3, %v2452_v61 }
 0x30c   :  { %v2463_v40 = vrot.slane %v2462_v52, 2  ;;  %v2505_v29 = vpop.xlane.xlu1 %2504  ;;  %v2455_v4 = vmul.f32 %v2454_v17, %v8846_v50 }
 0x30d   :  { %v2481_v6 = vpop.xlane.xlu0 %2480  ;;  %v2508_v44 = vadd.f32 %v2507_v19, %v2505_v29 }
 0x30e   :  { %v2484_v34 = vadd.f32 %v2483_v31, %v2481_v6  ;;  %v2464_v25 = vadd.f32 %v2463_v40, %v2462_v52  ;;  %v2516_v42 = vsel %vm519_vm13, %v2455_v4, 0.0 }
 0x30f   :  { %v2509_v33 = vrot.slane %v2508_v44, 4  ;;  %v2855_v9 = vpop.xlane.xlu2 %2854 }
 0x310   :  { %v2485_v56 = vrot.slane %v2484_v34, 4  ;;  %v2465_v41 = vrot.slane %v2464_v25, 1 }
 0x311   :  { %v2510_v14 = vadd.f32 %v2509_v33, %v2508_v44 }
 0x312   :  { %v2486_v53 = vadd.f32 %v2485_v56, %v2484_v34  ;;  %v2466_v1 = vadd.f32 %v2465_v41, %v2464_v25 }
 0x313   :  { %v2511_v16 = vrot.slane %v2510_v14, 2 }
 0x314   :  { %v2487_v20 = vrot.slane %v2486_v53, 2  ;;  %v2467_v18 = vmul.f32 %v2466_v1, %v8846_v50  ;;  %v2845_v47 = vpop.xlane.xlu1 %2844 }
 0x315   :  { %v2495_v37 = vpop.xlane.xlu0 %2494  ;;  %v2512_v5 = vadd.f32 %v2511_v16, %v2510_v14 }
 0x316   :  { %v2488_v51 = vadd.f32 %v2487_v20, %v2486_v53  ;;  %v2496_v46 = vadd.f32 %v2495_v37, %v2493_v24  ;;  %v2517_v22 = vsel %vm521_vm1, %v2467_v18, %v2516_v42  ;;  %v2479_v24 = vmul.f32 %v2478_v54, %v8846_v50 }
 0x317   :  { %v2513_v0 = vrot.slane %v2512_v5, 1  ;;  %v2857_v59 = vpop.xlane.xlu2 %2856 }
 0x318   :  { %v2497_v36 = vrot.slane %v2496_v46, 4  ;;  %v2489_v11 = vrot.slane %v2488_v51, 1  ;;  %v2518_v10 = vsel %vm523_vm3, %v2479_v24, %v2517_v22  ;;  %v2858_v17 = vadd.f32 %v2857_v59, %v2855_v9 }
 0x319   :  { %v2514_v45 = vadd.f32 %v2513_v0, %v2512_v5 }
 0x31a   :  { %v2498_v32 = vadd.f32 %v2497_v36, %v2496_v46  ;;  %v2490_v13 = vadd.f32 %v2489_v11, %v2488_v51  ;;  %v2859_v18 = vrot.slane %v2858_v17, 4 }
 0x31b   :  { %v2515_v12 = vmul.f32 %v2514_v45, %v8846_v50 }
 0x31c   :  { %v2499_v8 = vrot.slane %v2498_v32, 2  ;;  %v2491_v48 = vmul.f32 %v2490_v13, %v8846_v50  ;;  %v2860_v45 = vadd.f32 %v2859_v18, %v2858_v17 }
 0x31d   :  { %v2843_v26 = vpop.xlane.xlu0 %2842 }
 0x31e   :  { %v2500_v35 = vadd.f32 %v2499_v8, %v2498_v32  ;;  %v2519_v58 = vsel %vm525_vm15, %v2491_v48, %v2518_v10  ;;  %v2846_v33 = vadd.f32 %v2845_v47, %v2843_v26 }
 0x320   :  { %v2501_v55 = vrot.slane %v2500_v35, 1  ;;  %v2847_v41 = vrot.slane %v2846_v33, 4 }
 0x322   :  { %v2502_v7 = vadd.f32 %v2501_v55, %v2500_v35  ;;  %v2848_v1 = vadd.f32 %v2847_v41, %v2846_v33 }
 0x324   :  { %v2503_v57 = vmul.f32 %v2502_v7, %v8846_v50  ;;  %v2849_v54 = vrot.slane %v2848_v1, 2 }
 0x326   :  { %v2520_v62 = vsel %vm527_vm12, %v2503_v57, %v2519_v58  ;;  %v2850_v10 = vadd.f32 %v2849_v54, %v2848_v1 }
 0x327   :  { %v2521_v31 = vsel %vm529_vm0, %v2515_v12, %v2520_v62 }
 0x328   :  { %2522 = vst.msk [vmem:[#allocation14 + $0x5] sm:$0x1] %vm531_vm14, %v2521_v31 }
 0x32a   :  { %v3243_v21 = vpop.xlane.xlu1 %3242 }
 0x32b   :  { %v2867_v15 = vpop.xlane.xlu2 %2866 }
 0x332   :  { %v3255_v30 = vpop.xlane.xlu1 %3254 }
 0x333   :  { %v3267_v49 = vpop.xlane.xlu2 %3266 }
 0x33a   :  { %v3265_v2 = vpop.xlane.xlu1 %3264 }
 0x33b   :  { %v3268_v23 = vadd.f32 %v3267_v49, %v3265_v2 }
 0x33d   :  { %v3269_v38 = vrot.slane %v3268_v23, 4 }
 0x33f   :  { %v3270_v60 = vadd.f32 %v3269_v38, %v3268_v23 }
 0x341   :  { %v3271_v42 = vrot.slane %v3270_v60, 2 }
 0x342   :  { %v2881_v52 = vpop.xlane.xlu1 %2880 }
 0x343   :  { %v3272_v12 = vadd.f32 %v3271_v42, %v3270_v60 }
 0x347   :  { %v3277_v39 = vpop.xlane.xlu2 %3276 }
 0x34a   :  { %v3241_v19 = vpop.xlane.xlu0 %3240 }
 0x34b   :  { %v3244_v61 = vadd.f32 %v3243_v21, %v3241_v19 }
 0x34d   :  { %v3245_v25 = vrot.slane %v3244_v61, 4 }
 0x34f   :  { %v2893_v40 = vpop.xlane.xlu2 %2892  ;;  %v2891_v6 = vpop.xlane.xlu1 %2890  ;;  %v3246_v37 = vadd.f32 %v3245_v25, %v3244_v61 }
 0x350   :  { %v2894_v4 = vadd.f32 %v2893_v40, %v2891_v6  ;;  %v3273_v40 = vrot.slane %v3272_v12, 1 }
 0x351   :  { %v3247_v5 = vrot.slane %v3246_v37, 2 }
 0x352   :  { %v3253_v29 = vpop.xlane.xlu0 %3252  ;;  %v2895_v9 = vrot.slane %v2894_v4, 4 }
 0x353   :  { %v3256_v56 = vadd.f32 %v3255_v30, %v3253_v29  ;;  %v3248_v47 = vadd.f32 %v3247_v5, %v3246_v37 }
 0x354   :  { %v2896_v59 = vadd.f32 %v2895_v9, %v2894_v4 }
 0x355   :  { %v3257_v3 = vrot.slane %v3256_v56, 4  ;;  %v3249_v58 = vrot.slane %v3248_v47, 1 }
 0x356   :  { %v2897_v61 = vrot.slane %v2896_v59, 2 }
 0x357   :  { %v8128_v43 = vpop.xlane.xlu2 %2902  ;;  %v3291_v34 = vpop.xlane.xlu1 %3290  ;;  %v3258_v51 = vadd.f32 %v3257_v3, %v3256_v56  ;;  %v3250_v19 = vadd.f32 %v3249_v58, %v3248_v47 }
 0x358   :  { %v2898_v37 = vadd.f32 %v2897_v61, %v2896_v59 }
 0x359   :  { %v3259_v32 = vrot.slane %v3258_v51, 2  ;;  %v3251_v3 = vmul.f32 %v3250_v19, %v8831_v63 }
 0x35a   :  { %v2869_v44 = vpop.xlane.xlu0 %2868 }
 0x35b   :  { %v2870_v46 = vadd.f32 %v2869_v44, %v2867_v15  ;;  %v3260_v22 = vadd.f32 %v3259_v32, %v3258_v51  ;;  %v2861_v15 = vrot.slane %v2860_v45, 2  ;;  %v3312_v60 = vsel %vm519_vm13, %v3251_v3, 0.0 }
 0x35d   :  { %v2871_v50 = vrot.slane %v2870_v46, 4  ;;  %v3261_v31 = vrot.slane %v3260_v22, 1  ;;  %v2862_v33 = vadd.f32 %v2861_v15, %v2860_v45 }
 0x35f   :  { %v3303_v53 = vpop.xlane.xlu2 %3302  ;;  %v3301_v14 = vpop.xlane.xlu1 %3300  ;;  %v2872_v48 = vadd.f32 %v2871_v50, %v2870_v46  ;;  %v3262_v29 = vadd.f32 %v3261_v31, %v3260_v22  ;;  %v2863_v46 = vrot.slane %v2862_v33, 1 }
 0x360   :  { %v3304_v16 = vadd.f32 %v3303_v53, %v3301_v14 }
 0x361   :  { %v2873_v21 = vrot.slane %v2872_v48, 2  ;;  %v2864_v54 = vadd.f32 %v2863_v46, %v2862_v33 }
 0x362   :  { %v2879_v20 = vpop.xlane.xlu0 %2878  ;;  %v3305_v11 = vrot.slane %v3304_v16, 4 }
 0x363   :  { %v2882_v36 = vadd.f32 %v2881_v52, %v2879_v20  ;;  %v2851_v52 = vrot.slane %v2850_v10, 1  ;;  %v2874_v44 = vadd.f32 %v2873_v21, %v2872_v48  ;;  %v3274_v20 = vadd.f32 %v3273_v40, %v3272_v12 }
 0x364   :  { %v3306_v35 = vadd.f32 %v3305_v11, %v3304_v16 }
 0x365   :  { %v2883_v13 = vrot.slane %v2882_v36, 4  ;;  %v2852_v53 = vadd.f32 %v2851_v52, %v2850_v10  ;;  %v2875_v16 = vrot.slane %v2874_v44, 1  ;;  %v3275_v32 = vmul.f32 %v3274_v20, %v8831_v63 }
 0x366   :  { %v3307_v57 = vrot.slane %v3306_v35, 2  ;;  %v2865_v10 = vmul.f32 %v2864_v54, %v8824_v28 }
 0x367   :  { %v2884_v24 = vadd.f32 %v2883_v13, %v2882_v36  ;;  %v2853_v11 = vmul.f32 %v2852_v53, %v8824_v28  ;;  %v2876_v18 = vadd.f32 %v2875_v16, %v2874_v44  ;;  %v2899_v13 = vrot.slane %v2898_v37, 1 }
 0x369   :  { %v2885_v2 = vrot.slane %v2884_v24, 2  ;;  %v2914_v9 = vsel %vm519_vm13, %v2853_v11, 0.0  ;;  %v2877_v45 = vmul.f32 %v2876_v18, %v8824_v28 }
 0x36a   :  { %v3279_v8 = vpop.xlane.xlu0 %3278 }
 0x36b   :  { %v3280_v0 = vadd.f32 %v3279_v8, %v3277_v39  ;;  %v3308_v39 = vadd.f32 %v3307_v57, %v3306_v35  ;;  %v2886_v25 = vadd.f32 %v2885_v2, %v2884_v24  ;;  %v2900_v24 = vadd.f32 %v2899_v13, %v2898_v37 }
 0x36d   :  { %v3281_v55 = vrot.slane %v3280_v0, 4  ;;  %v3309_v14 = vrot.slane %v3308_v39, 1  ;;  %v2887_v17 = vrot.slane %v2886_v25, 1  ;;  %v2901_v59 = vmul.f32 %v2900_v24, %v8824_v28 }
 0x36f   :  { %v3282_v7 = vadd.f32 %v3281_v55, %v3280_v0  ;;  %v3310_v5 = vadd.f32 %v3309_v14, %v3308_v39  ;;  %v2888_v35 = vadd.f32 %v2887_v17, %v2886_v25 }
 0x371   :  { %v3283_v62 = vrot.slane %v3282_v7, 2  ;;  %v3311_v42 = vmul.f32 %v3310_v5, %v8831_v63  ;;  %v2889_v57 = vmul.f32 %v2888_v35, %v8824_v28 }
 0x372   :  { %v3289_v30 = vpop.xlane.xlu0 %3288 }
 0x373   :  { %v3284_v49 = vadd.f32 %v3283_v62, %v3282_v7  ;;  %v3292_v26 = vadd.f32 %v3291_v34, %v3289_v30  ;;  %v3263_v34 = vmul.f32 %v3262_v29, %v8831_v63  ;;  %v2915_v62 = vsel %vm521_vm1, %v2865_v10, %v2914_v9 }
 0x374   :  { %v2916_v21 = vsel %vm523_vm3, %v2877_v45, %v2915_v62 }
 0x375   :  { %v3293_v6 = vrot.slane %v3292_v26, 4  ;;  %v3285_v56 = vrot.slane %v3284_v49, 1  ;;  %v3313_v8 = vsel %vm521_vm1, %v3263_v34, %v3312_v60  ;;  %v2917_v30 = vsel %vm525_vm15, %v2889_v57, %v2916_v21 }
 0x376   :  { %v3314_v55 = vsel %vm523_vm3, %v3275_v32, %v3313_v8 }
 0x377   :  { %v3294_v23 = vadd.f32 %v3293_v6, %v3292_v26  ;;  %v3286_v38 = vadd.f32 %v3285_v56, %v3284_v49  ;;  %v2918_v49 = vsel %vm527_vm12, %v2901_v59, %v2917_v30 }
 0x379   :  { %v3295_v41 = vrot.slane %v3294_v23, 2  ;;  %v3287_v0 = vmul.f32 %v3286_v38, %v8831_v63 }
 0x37a   :  { %v2905_v51 = vpop.xlane.xlu0 %2904 }
 0x37b   :  { %v3296_v36 = vadd.f32 %v3295_v41, %v3294_v23  ;;  %v2906_v1 = vadd.f32 %v2905_v51, %v8128_v43  ;;  %v3315_v7 = vsel %vm525_vm15, %v3287_v0, %v3314_v55 }
 0x37d   :  { %v3297_v50 = vrot.slane %v3296_v36, 1  ;;  %v2907_v4 = vrot.slane %v2906_v1, 4 }
 0x37f   :  { %v3298_v43 = vadd.f32 %v3297_v50, %v3296_v36  ;;  %v2908_v47 = vadd.f32 %v2907_v4, %v2906_v1 }
 0x381   :  { %v3299_v22 = vmul.f32 %v3298_v43, %v8831_v63  ;;  %v2909_v48 = vrot.slane %v2908_v47, 2 }
 0x383   :  { %v3316_v58 = vsel %vm527_vm12, %v3299_v22, %v3315_v7  ;;  %v2910_v12 = vadd.f32 %v2909_v48, %v2908_v47 }
 0x384   :  { %v3317_v63 = vsel %vm529_vm0, %v3311_v42, %v3316_v58 }
 0x385   :  { %3318 = vst.msk [vmem:[#allocation14 + $0x7] sm:$0x1] %vm531_vm14, %v3317_v63  ;;  %v2911_v31 = vrot.slane %v2910_v12, 1 }
 0x387   :  { %v2912_v15 = vadd.f32 %v2911_v31, %v2910_v12 }
 0x389   :  { %v2913_v2 = vmul.f32 %v2912_v15, %v8824_v28 }
 0x38b   :  { %v2919_v26 = vsel %vm529_vm0, %v2913_v2, %v2918_v49 }
 0x38c   :  { %2920 = vst.msk [vmem:[#allocation14 + $0x6] sm:$0x1] %vm531_vm14, %v2919_v26 }
 0x38d   :  { %3329 = dma.vmem_to_hbm [thread:$0]  %s3325_s26, 128, %s3327_s29, [#allocation4]  }
 0x38e   :  { %3898 = dma.done.wait [#allocation4], 128  }
 0x38f   :  { %3899 = vsyncadd [#allocation4], 4294967168 }
 0x390   :  { %3334 = vsyncpa [#allocation3], 1 }
 0x391   :  { %3335 = vsyncpa [#allocation12], 1 }
 0x392   :  { %3336 = vsyncpa [#allocation4], 1 }
 0x393   :  { %3337 = vsyncpa [#allocation5], 1 }
 0x394   :  { %3338 = vsyncpa [#allocation8], 1 }
 0x395   :  { %3339 = vsyncpa [#allocation6], 1 }

</bundles_post_ra>
